<compile_context>
chip_gen: v7x
topology: tpu7x:2x2x1
jax: 0.10.0
libtpu: 0.0.40
codegen_flags: <defaults>
</compile_context>

<pallas_src>
import jax
import jax.numpy as jnp
from jax.experimental import pallas as pl
from jax.experimental.pallas import tpu as pltpu

BN_EPS = 1e-5


# ----------------------------------------------------------------------------
# In-kernel building blocks (values + VMEM scratch refs inside the fused kernel)
# ----------------------------------------------------------------------------
def _conv3x3_bn_relu(x, pad_ref, w_ref, scale_ref, shift_ref):
    """x: (B, H, W, Cin) value. pad_ref: (B, H+2, W+2, Cin) VMEM scratch.
    w_ref: (9*Cin, Cout) im2col weights. scale/shift: (1, Cout) folded conv-bias + BN.
    Returns (B, H, W, Cout) value."""
    B, Hp, Wp, Cin = pad_ref.shape
    H, W = Hp - 2, Wp - 2
    Cout = w_ref.shape[1]

    # In-kernel zero padding (halo) held in VMEM.
    pad_ref[...] = jnp.zeros(pad_ref.shape, jnp.float32)
    pad_ref[:, 1:H + 1, 1:W + 1, :] = x

    # im2col: 9 shifted views concatenated along the channel (lane) axis -> one GEMM.
    taps = [pad_ref[:, dy:dy + H, dx:dx + W, :]
            for dy in range(3) for dx in range(3)]
    patches = jnp.concatenate(taps, axis=-1).reshape(B * H * W, 9 * Cin)

    y = jnp.dot(patches, w_ref[...], preferred_element_type=jnp.float32)
    y = y * scale_ref[...] + shift_ref[...]   # folded conv bias + eval-mode BatchNorm
    y = jnp.maximum(y, 0.0)                   # ReLU
    return y.reshape(B, H, W, Cout)


def _maxpool2x2(x, mp_ref):
    """x: (B, H, W, C) value. mp_ref: (B, H, W, C) VMEM scratch. Returns (B, H/2, W/2, C)."""
    B, H, W, C = mp_ref.shape
    Ho, Wo = H // 2, W // 2
    mp_ref[...] = x
    # Pool along W via sublane-strided ref loads.
    even = mp_ref[:, :, pl.ds(0, Wo, 2), :]
    odd = mp_ref[:, :, pl.ds(1, Wo, 2), :]
    wp = jnp.maximum(even, odd)               # (B, H, Wo, C)
    # Pool along H via a leading-dims-only reshape (last two dims unchanged).
    wp = wp.reshape(B, Ho, 2, Wo, C)
    return jnp.maximum(wp[:, :, 0], wp[:, :, 1])   # (B, Ho, Wo, C)


def _classifier(feat, w1_ref, s1_ref, t1_ref, w2_ref, b2_ref):
    """Linear(feat_dim->512) + folded eval-mode BatchNorm1d + Linear(512->num_class)."""
    h = jnp.dot(feat, w1_ref[...], preferred_element_type=jnp.float32)
    h = h * s1_ref[...] + t1_ref[...]
    return jnp.dot(h, w2_ref[...], preferred_element_type=jnp.float32) + b2_ref[...]


# ----------------------------------------------------------------------------
# Fused forward builder (static plan derived from cfg; params are arrays only)
# ----------------------------------------------------------------------------
def build_vgg_forward(batch, in_ch, height, width, cfg, num_class):
    # Derive the static per-layer plan and scratch shapes.
    plan = []            # sequence of "conv" / "pool"
    pad_shapes = []      # one per conv: (B, H+2, W+2, Cin)
    mp_shapes = []       # one per pool: (B, H, W, C)
    h, w, c = height, width, in_ch
    for v in cfg:
        if v == "M":
            plan.append("pool")
            mp_shapes.append((batch, h, w, c))
            h //= 2
            w //= 2
        else:
            cout = int(v)
            plan.append("conv")
            pad_shapes.append((batch, h + 2, w + 2, c))
            c = cout
    # torch.flatten(x, 1) == plain reshape only because spatial collapses to 1x1 here.
    assert h == 1 and w == 1, "classifier Linear(cfg[-2], 512) requires spatial to collapse to 1x1"
    n_conv = len(pad_shapes)
    n_pool = len(mp_shapes)
    n_inputs = 1 + 3 * n_conv + 5

    def kernel(*refs):
        idx = 0
        x_ref = refs[idx]; idx += 1
        conv_refs = []
        for _ in range(n_conv):
            conv_refs.append((refs[idx], refs[idx + 1], refs[idx + 2]))
            idx += 3
        cw1, cs1, ct1, cw2, cb2 = refs[idx:idx + 5]; idx += 5
        o_ref = refs[idx]; idx += 1
        pad_refs = refs[idx:idx + n_conv]; idx += n_conv
        mp_refs = refs[idx:idx + n_pool]; idx += n_pool

        x = x_ref[...]
        ci = pi = 0
        for kind in plan:
            if kind == "conv":
                w_r, s_r, t_r = conv_refs[ci]
                x = _conv3x3_bn_relu(x, pad_refs[ci], w_r, s_r, t_r)
                ci += 1
            else:
                x = _maxpool2x2(x, mp_refs[pi])
                pi += 1
        # Final spatial is 1x1 -> NHWC flatten == torch.flatten(NCHW, 1).
        feat = x.reshape(x.shape[0], x.shape[1] * x.shape[2] * x.shape[3])
        o_ref[...] = _classifier(feat, cw1, cs1, ct1, cw2, cb2)

    vmem_spec = pl.BlockSpec(memory_space=pltpu.MemorySpace.VMEM)
    fused = pl.pallas_call(
        kernel,
        out_shape=jax.ShapeDtypeStruct((batch, num_class), jnp.float32),
        in_specs=[vmem_spec] * n_inputs,
        out_specs=vmem_spec,
        scratch_shapes=(
            [pltpu.VMEM(s, jnp.float32) for s in pad_shapes]
            + [pltpu.VMEM(s, jnp.float32) for s in mp_shapes]
        ),
    )

    def forward(x_nchw, params):
        # Single layout op outside the kernel: NCHW -> NHWC (channels on the lane axis).
        x = jnp.transpose(x_nchw, (0, 2, 3, 1)).astype(jnp.float32)
        args = [x]
        for layer in params["conv"]:
            args += [layer["w"], layer["scale"], layer["shift"]]
        cls = params["cls"]
        args += [cls["w1"], cls["s1"], cls["t1"], cls["w2"], cls["b2"]]
        return fused(*args)

    return jax.jit(forward)


# ----------------------------------------------------------------------------
# Parameter construction (arrays only; mirrors _initialize_weights distributions)
# ----------------------------------------------------------------------------
def init_params(key, in_ch, cfg, num_class):
    bn_scale = 1.0 / (1.0 + BN_EPS) ** 0.5   # folded eval-mode BN (gamma=1, beta=0, mean=0, var=1)
    conv_layers = []
    c_in = in_ch
    for v in cfg:
        if v == "M":
            continue
        c_out = int(v)
        key, kw = jax.random.split(key)
        fan_out = c_out * 3 * 3
        std = (2.0 / fan_out) ** 0.5          # kaiming_normal_, mode='fan_out', relu
        w_oihw = jax.random.normal(kw, (c_out, c_in, 3, 3), jnp.float32) * std
        # im2col layout: row index = (dy*3 + dx)*Cin + cin, matching the tap concat order.
        w_flat = jnp.transpose(w_oihw, (2, 3, 1, 0)).reshape(9 * c_in, c_out)
        conv_layers.append({
            "w": w_flat,
            "scale": jnp.full((1, c_out), bn_scale, jnp.float32),
            "shift": jnp.zeros((1, c_out), jnp.float32),   # conv bias=0, BN beta=0, mean=0
        })
        c_in = c_out

    feat_dim = c_in   # == cfg[-2]; spatial collapses to 1x1 -> flatten size == last conv channels
    key, k1, k2 = jax.random.split(key, 3)
    w1 = jax.random.normal(k1, (512, feat_dim), jnp.float32) * 0.01   # Linear init N(0, 0.01)
    w2 = jax.random.normal(k2, (num_class, 512), jnp.float32) * 0.01
    cls = {
        "w1": jnp.transpose(w1),                                  # (feat_dim, 512)
        "s1": jnp.full((1, 512), bn_scale, jnp.float32),          # folded bias1(=0) + BN1d
        "t1": jnp.zeros((1, 512), jnp.float32),
        "w2": jnp.transpose(w2),                                  # (512, num_class)
        "b2": jnp.zeros((1, num_class), jnp.float32),
    }
    return {"conv": conv_layers, "cls": cls}


if __name__ == "__main__":
    key = jax.random.PRNGKey(0)
    kx, kp = jax.random.split(key)

    B, C, H, W = 2, 4, 16, 16
    cfg = [8, "M", 16, "M", 16, "M", 16, "M"]
    num_class = 10

    x = jax.random.normal(kx, (B, C, H, W), jnp.float32)
    params = init_params(kp, in_ch=C, cfg=cfg, num_class=num_class)

    forward = build_vgg_forward(B, C, H, W, cfg, num_class)
    out = jax.block_until_ready(forward(x, params))

    assert out.shape == (B, num_class), out.shape
    assert bool(jnp.all(jnp.isfinite(out)))
    print("KERNEL_OK")
</pallas_src>

<mosaic_0001>
module attributes {stable_mosaic.version = 11 : i64} {
  func.func @kernel(%arg0: memref<2x16x16x4xf32, #tpu.memory_space<vmem>>, %arg1: memref<36x8xf32, #tpu.memory_space<vmem>>, %arg2: memref<1x8xf32, #tpu.memory_space<vmem>>, %arg3: memref<1x8xf32, #tpu.memory_space<vmem>>, %arg4: memref<72x16xf32, #tpu.memory_space<vmem>>, %arg5: memref<1x16xf32, #tpu.memory_space<vmem>>, %arg6: memref<1x16xf32, #tpu.memory_space<vmem>>, %arg7: memref<144x16xf32, #tpu.memory_space<vmem>>, %arg8: memref<1x16xf32, #tpu.memory_space<vmem>>, %arg9: memref<1x16xf32, #tpu.memory_space<vmem>>, %arg10: memref<144x16xf32, #tpu.memory_space<vmem>>, %arg11: memref<1x16xf32, #tpu.memory_space<vmem>>, %arg12: memref<1x16xf32, #tpu.memory_space<vmem>>, %arg13: memref<16x512xf32, #tpu.memory_space<vmem>>, %arg14: memref<1x512xf32, #tpu.memory_space<vmem>>, %arg15: memref<1x512xf32, #tpu.memory_space<vmem>>, %arg16: memref<512x10xf32, #tpu.memory_space<vmem>>, %arg17: memref<1x10xf32, #tpu.memory_space<vmem>>, %arg18: memref<2x10xf32, #tpu.memory_space<vmem>>, %arg19: memref<2x18x18x4xf32, #tpu.memory_space<vmem>>, %arg20: memref<2x10x10x8xf32, #tpu.memory_space<vmem>>, %arg21: memref<2x6x6x16xf32, #tpu.memory_space<vmem>>, %arg22: memref<2x4x4x16xf32, #tpu.memory_space<vmem>>, %arg23: memref<2x16x16x8xf32, #tpu.memory_space<vmem>>, %arg24: memref<2x8x8x16xf32, #tpu.memory_space<vmem>>, %arg25: memref<2x4x4x16xf32, #tpu.memory_space<vmem>>, %arg26: memref<2x2x2x16xf32, #tpu.memory_space<vmem>>) attributes {dimension_semantics = [], scalar_prefetch = 0 : i64, scratch_operands = 8 : i64, tpu.core_type = #tpu.core_type<tc>} {
    %c0 = arith.constant 0 : index
    %c0_0 = arith.constant 0 : index
    %c0_1 = arith.constant 0 : index
    %c0_2 = arith.constant 0 : index
    %0 = vector.load %arg0[%c0, %c0_0, %c0_1, %c0_2] : memref<2x16x16x4xf32, #tpu.memory_space<vmem>>, vector<2x16x16x4xf32>
    %cst = arith.constant 0.000000e+00 : f32
    %1 = vector.broadcast %cst : f32 to vector<2x18x18x4xf32>
    %c0_3 = arith.constant 0 : index
    %c0_4 = arith.constant 0 : index
    %c0_5 = arith.constant 0 : index
    %c0_6 = arith.constant 0 : index
    %2 = vector.load %arg19[%c0_3, %c0_4, %c0_5, %c0_6] : memref<2x18x18x4xf32, #tpu.memory_space<vmem>>, vector<2x18x18x4xf32>
    tpu.vector_store %arg19[%c0_3, %c0_4, %c0_5, %c0_6], %1 {strides = array<i32>} : memref<2x18x18x4xf32, #tpu.memory_space<vmem>>, vector<2x18x18x4xf32>,
    %c0_7 = arith.constant 0 : index
    %c1 = arith.constant 1 : index
    %c1_8 = arith.constant 1 : index
    %c0_9 = arith.constant 0 : index
    %3 = vector.load %arg19[%c0_7, %c1, %c1_8, %c0_9] : memref<2x18x18x4xf32, #tpu.memory_space<vmem>>, vector<2x16x16x4xf32>
    tpu.vector_store %arg19[%c0_7, %c1, %c1_8, %c0_9], %0 {strides = array<i32>} : memref<2x18x18x4xf32, #tpu.memory_space<vmem>>, vector<2x16x16x4xf32>,
    %c0_10 = arith.constant 0 : index
    %c0_11 = arith.constant 0 : index
    %c0_12 = arith.constant 0 : index
    %c0_13 = arith.constant 0 : index
    %4 = vector.load %arg19[%c0_10, %c0_11, %c0_12, %c0_13] : memref<2x18x18x4xf32, #tpu.memory_space<vmem>>, vector<2x16x16x4xf32>
    %c0_14 = arith.constant 0 : index
    %c0_15 = arith.constant 0 : index
    %c1_16 = arith.constant 1 : index
    %c0_17 = arith.constant 0 : index
    %5 = vector.load %arg19[%c0_14, %c0_15, %c1_16, %c0_17] : memref<2x18x18x4xf32, #tpu.memory_space<vmem>>, vector<2x16x16x4xf32>
    %c0_18 = arith.constant 0 : index
    %c0_19 = arith.constant 0 : index
    %c2 = arith.constant 2 : index
    %c0_20 = arith.constant 0 : index
    %6 = vector.load %arg19[%c0_18, %c0_19, %c2, %c0_20] : memref<2x18x18x4xf32, #tpu.memory_space<vmem>>, vector<2x16x16x4xf32>
    %c0_21 = arith.constant 0 : index
    %c1_22 = arith.constant 1 : index
    %c0_23 = arith.constant 0 : index
    %c0_24 = arith.constant 0 : index
    %7 = vector.load %arg19[%c0_21, %c1_22, %c0_23, %c0_24] : memref<2x18x18x4xf32, #tpu.memory_space<vmem>>, vector<2x16x16x4xf32>
    %c0_25 = arith.constant 0 : index
    %c1_26 = arith.constant 1 : index
    %c1_27 = arith.constant 1 : index
    %c0_28 = arith.constant 0 : index
    %8 = vector.load %arg19[%c0_25, %c1_26, %c1_27, %c0_28] : memref<2x18x18x4xf32, #tpu.memory_space<vmem>>, vector<2x16x16x4xf32>
    %c0_29 = arith.constant 0 : index
    %c1_30 = arith.constant 1 : index
    %c2_31 = arith.constant 2 : index
    %c0_32 = arith.constant 0 : index
    %9 = vector.load %arg19[%c0_29, %c1_30, %c2_31, %c0_32] : memref<2x18x18x4xf32, #tpu.memory_space<vmem>>, vector<2x16x16x4xf32>
    %c0_33 = arith.constant 0 : index
    %c2_34 = arith.constant 2 : index
    %c0_35 = arith.constant 0 : index
    %c0_36 = arith.constant 0 : index
    %10 = vector.load %arg19[%c0_33, %c2_34, %c0_35, %c0_36] : memref<2x18x18x4xf32, #tpu.memory_space<vmem>>, vector<2x16x16x4xf32>
    %c0_37 = arith.constant 0 : index
    %c2_38 = arith.constant 2 : index
    %c1_39 = arith.constant 1 : index
    %c0_40 = arith.constant 0 : index
    %11 = vector.load %arg19[%c0_37, %c2_38, %c1_39, %c0_40] : memref<2x18x18x4xf32, #tpu.memory_space<vmem>>, vector<2x16x16x4xf32>
    %c0_41 = arith.constant 0 : index
    %c2_42 = arith.constant 2 : index
    %c2_43 = arith.constant 2 : index
    %c0_44 = arith.constant 0 : index
    %12 = vector.load %arg19[%c0_41, %c2_42, %c2_43, %c0_44] : memref<2x18x18x4xf32, #tpu.memory_space<vmem>>, vector<2x16x16x4xf32>
    %13 = tpu.concatenate %4, %5, %6, %7, %8, %9, %10, %11, %12 in 3 : vector<2x16x16x4xf32>, vector<2x16x16x4xf32>, vector<2x16x16x4xf32>, vector<2x16x16x4xf32>, vector<2x16x16x4xf32>, vector<2x16x16x4xf32>, vector<2x16x16x4xf32>, vector<2x16x16x4xf32>, vector<2x16x16x4xf32> -> vector<2x16x16x36xf32>
    %14 = vector.shape_cast %13 : vector<2x16x16x36xf32> to vector<512x36xf32>
    %c0_45 = arith.constant 0 : index
    %c0_46 = arith.constant 0 : index
    %15 = vector.load %arg1[%c0_45, %c0_46] : memref<36x8xf32, #tpu.memory_space<vmem>>, vector<36x8xf32>
    %cst_47 = arith.constant dense<0.000000e+00> : vector<512x8xf32>
    %16 = tpu.matmul %14, %15, %cst_47 {dimension_numbers = #tpu.dot_dimension_numbers<[1], [0], [0], [1], [0, 0, 1, 1], [], []>} : vector<512x36xf32>, vector<36x8xf32>, vector<512x8xf32> -> vector<512x8xf32>
    %c0_48 = arith.constant 0 : index
    %c0_49 = arith.constant 0 : index
    %17 = vector.load %arg2[%c0_48, %c0_49] : memref<1x8xf32, #tpu.memory_space<vmem>>, vector<1x8xf32>
    %18 = vector.broadcast %17 : vector<1x8xf32> to vector<512x8xf32>
    %19 = arith.mulf %16, %18 : vector<512x8xf32>
    %c0_50 = arith.constant 0 : index
    %c0_51 = arith.constant 0 : index
    %20 = vector.load %arg3[%c0_50, %c0_51] : memref<1x8xf32, #tpu.memory_space<vmem>>, vector<1x8xf32>
    %21 = vector.broadcast %20 : vector<1x8xf32> to vector<512x8xf32>
    %22 = arith.addf %19, %21 : vector<512x8xf32>
    %cst_52 = arith.constant 0.000000e+00 : f32
    %23 = vector.broadcast %cst_52 : f32 to vector<512x8xf32>
    %24 = arith.maximumf %22, %23 : vector<512x8xf32>
    %25 = vector.shape_cast %24 : vector<512x8xf32> to vector<2x16x16x8xf32>
    %c0_53 = arith.constant 0 : index
    %c0_54 = arith.constant 0 : index
    %c0_55 = arith.constant 0 : index
    %c0_56 = arith.constant 0 : index
    %26 = vector.load %arg23[%c0_53, %c0_54, %c0_55, %c0_56] : memref<2x16x16x8xf32, #tpu.memory_space<vmem>>, vector<2x16x16x8xf32>
    tpu.vector_store %arg23[%c0_53, %c0_54, %c0_55, %c0_56], %25 {strides = array<i32>} : memref<2x16x16x8xf32, #tpu.memory_space<vmem>>, vector<2x16x16x8xf32>,
    %c0_57 = arith.constant 0 : index
    %c0_58 = arith.constant 0 : index
    %c0_59 = arith.constant 0 : index
    %c0_60 = arith.constant 0 : index
    %27 = tpu.strided_load %arg23[%c0_57, %c0_58, %c0_59, %c0_60] {strides = array<i32: 1, 1, 2, 1>} : memref<2x16x16x8xf32, #tpu.memory_space<vmem>>, vector<2x16x8x8xf32>
    %c0_61 = arith.constant 0 : index
    %c0_62 = arith.constant 0 : index
    %c1_63 = arith.constant 1 : index
    %c0_64 = arith.constant 0 : index
    %28 = tpu.strided_load %arg23[%c0_61, %c0_62, %c1_63, %c0_64] {strides = array<i32: 1, 1, 2, 1>} : memref<2x16x16x8xf32, #tpu.memory_space<vmem>>, vector<2x16x8x8xf32>
    %29 = arith.maximumf %27, %28 : vector<2x16x8x8xf32>
    %30 = vector.shape_cast %29 : vector<2x16x8x8xf32> to vector<2x8x2x8x8xf32>
    %31 = vector.extract_strided_slice %30 {offsets = [0, 0, 0, 0, 0], sizes = [2, 8, 1, 8, 8], strides = [1, 1, 1, 1, 1]} : vector<2x8x2x8x8xf32> to vector<2x8x1x8x8xf32>
    %32 = vector.shape_cast %31 : vector<2x8x1x8x8xf32> to vector<2x8x8x8xf32>
    %33 = vector.extract_strided_slice %30 {offsets = [0, 0, 1, 0, 0], sizes = [2, 8, 1, 8, 8], strides = [1, 1, 1, 1, 1]} : vector<2x8x2x8x8xf32> to vector<2x8x1x8x8xf32>
    %34 = vector.shape_cast %33 : vector<2x8x1x8x8xf32> to vector<2x8x8x8xf32>
    %35 = arith.maximumf %32, %34 : vector<2x8x8x8xf32>
    %cst_65 = arith.constant 0.000000e+00 : f32
    %36 = vector.broadcast %cst_65 : f32 to vector<2x10x10x8xf32>
    %c0_66 = arith.constant 0 : index
    %c0_67 = arith.constant 0 : index
    %c0_68 = arith.constant 0 : index
    %c0_69 = arith.constant 0 : index
    %37 = vector.load %arg20[%c0_66, %c0_67, %c0_68, %c0_69] : memref<2x10x10x8xf32, #tpu.memory_space<vmem>>, vector<2x10x10x8xf32>
    tpu.vector_store %arg20[%c0_66, %c0_67, %c0_68, %c0_69], %36 {strides = array<i32>} : memref<2x10x10x8xf32, #tpu.memory_space<vmem>>, vector<2x10x10x8xf32>,
    %c0_70 = arith.constant 0 : index
    %c1_71 = arith.constant 1 : index
    %c1_72 = arith.constant 1 : index
    %c0_73 = arith.constant 0 : index
    %38 = vector.load %arg20[%c0_70, %c1_71, %c1_72, %c0_73] : memref<2x10x10x8xf32, #tpu.memory_space<vmem>>, vector<2x8x8x8xf32>
    tpu.vector_store %arg20[%c0_70, %c1_71, %c1_72, %c0_73], %35 {strides = array<i32>} : memref<2x10x10x8xf32, #tpu.memory_space<vmem>>, vector<2x8x8x8xf32>,
    %c0_74 = arith.constant 0 : index
    %c0_75 = arith.constant 0 : index
    %c0_76 = arith.constant 0 : index
    %c0_77 = arith.constant 0 : index
    %39 = vector.load %arg20[%c0_74, %c0_75, %c0_76, %c0_77] : memref<2x10x10x8xf32, #tpu.memory_space<vmem>>, vector<2x8x8x8xf32>
    %c0_78 = arith.constant 0 : index
    %c0_79 = arith.constant 0 : index
    %c1_80 = arith.constant 1 : index
    %c0_81 = arith.constant 0 : index
    %40 = vector.load %arg20[%c0_78, %c0_79, %c1_80, %c0_81] : memref<2x10x10x8xf32, #tpu.memory_space<vmem>>, vector<2x8x8x8xf32>
    %c0_82 = arith.constant 0 : index
    %c0_83 = arith.constant 0 : index
    %c2_84 = arith.constant 2 : index
    %c0_85 = arith.constant 0 : index
    %41 = vector.load %arg20[%c0_82, %c0_83, %c2_84, %c0_85] : memref<2x10x10x8xf32, #tpu.memory_space<vmem>>, vector<2x8x8x8xf32>
    %c0_86 = arith.constant 0 : index
    %c1_87 = arith.constant 1 : index
    %c0_88 = arith.constant 0 : index
    %c0_89 = arith.constant 0 : index
    %42 = vector.load %arg20[%c0_86, %c1_87, %c0_88, %c0_89] : memref<2x10x10x8xf32, #tpu.memory_space<vmem>>, vector<2x8x8x8xf32>
    %c0_90 = arith.constant 0 : index
    %c1_91 = arith.constant 1 : index
    %c1_92 = arith.constant 1 : index
    %c0_93 = arith.constant 0 : index
    %43 = vector.load %arg20[%c0_90, %c1_91, %c1_92, %c0_93] : memref<2x10x10x8xf32, #tpu.memory_space<vmem>>, vector<2x8x8x8xf32>
    %c0_94 = arith.constant 0 : index
    %c1_95 = arith.constant 1 : index
    %c2_96 = arith.constant 2 : index
    %c0_97 = arith.constant 0 : index
    %44 = vector.load %arg20[%c0_94, %c1_95, %c2_96, %c0_97] : memref<2x10x10x8xf32, #tpu.memory_space<vmem>>, vector<2x8x8x8xf32>
    %c0_98 = arith.constant 0 : index
    %c2_99 = arith.constant 2 : index
    %c0_100 = arith.constant 0 : index
    %c0_101 = arith.constant 0 : index
    %45 = vector.load %arg20[%c0_98, %c2_99, %c0_100, %c0_101] : memref<2x10x10x8xf32, #tpu.memory_space<vmem>>, vector<2x8x8x8xf32>
    %c0_102 = arith.constant 0 : index
    %c2_103 = arith.constant 2 : index
    %c1_104 = arith.constant 1 : index
    %c0_105 = arith.constant 0 : index
    %46 = vector.load %arg20[%c0_102, %c2_103, %c1_104, %c0_105] : memref<2x10x10x8xf32, #tpu.memory_space<vmem>>, vector<2x8x8x8xf32>
    %c0_106 = arith.constant 0 : index
    %c2_107 = arith.constant 2 : index
    %c2_108 = arith.constant 2 : index
    %c0_109 = arith.constant 0 : index
    %47 = vector.load %arg20[%c0_106, %c2_107, %c2_108, %c0_109] : memref<2x10x10x8xf32, #tpu.memory_space<vmem>>, vector<2x8x8x8xf32>
    %48 = tpu.concatenate %39, %40, %41, %42, %43, %44, %45, %46, %47 in 3 : vector<2x8x8x8xf32>, vector<2x8x8x8xf32>, vector<2x8x8x8xf32>, vector<2x8x8x8xf32>, vector<2x8x8x8xf32>, vector<2x8x8x8xf32>, vector<2x8x8x8xf32>, vector<2x8x8x8xf32>, vector<2x8x8x8xf32> -> vector<2x8x8x72xf32>
    %49 = vector.shape_cast %48 : vector<2x8x8x72xf32> to vector<128x72xf32>
    %c0_110 = arith.constant 0 : index
    %c0_111 = arith.constant 0 : index
    %50 = vector.load %arg4[%c0_110, %c0_111] : memref<72x16xf32, #tpu.memory_space<vmem>>, vector<72x16xf32>
    %cst_112 = arith.constant dense<0.000000e+00> : vector<128x16xf32>
    %51 = tpu.matmul %49, %50, %cst_112 {dimension_numbers = #tpu.dot_dimension_numbers<[1], [0], [0], [1], [0, 0, 1, 1], [], []>} : vector<128x72xf32>, vector<72x16xf32>, vector<128x16xf32> -> vector<128x16xf32>
    %c0_113 = arith.constant 0 : index
    %c0_114 = arith.constant 0 : index
    %52 = vector.load %arg5[%c0_113, %c0_114] : memref<1x16xf32, #tpu.memory_space<vmem>>, vector<1x16xf32>
    %53 = vector.broadcast %52 : vector<1x16xf32> to vector<128x16xf32>
    %54 = arith.mulf %51, %53 : vector<128x16xf32>
    %c0_115 = arith.constant 0 : index
    %c0_116 = arith.constant 0 : index
    %55 = vector.load %arg6[%c0_115, %c0_116] : memref<1x16xf32, #tpu.memory_space<vmem>>, vector<1x16xf32>
    %56 = vector.broadcast %55 : vector<1x16xf32> to vector<128x16xf32>
    %57 = arith.addf %54, %56 : vector<128x16xf32>
    %cst_117 = arith.constant 0.000000e+00 : f32
    %58 = vector.broadcast %cst_117 : f32 to vector<128x16xf32>
    %59 = arith.maximumf %57, %58 : vector<128x16xf32>
    %60 = vector.shape_cast %59 : vector<128x16xf32> to vector<2x8x8x16xf32>
    %c0_118 = arith.constant 0 : index
    %c0_119 = arith.constant 0 : index
    %c0_120 = arith.constant 0 : index
    %c0_121 = arith.constant 0 : index
    %61 = vector.load %arg24[%c0_118, %c0_119, %c0_120, %c0_121] : memref<2x8x8x16xf32, #tpu.memory_space<vmem>>, vector<2x8x8x16xf32>
    tpu.vector_store %arg24[%c0_118, %c0_119, %c0_120, %c0_121], %60 {strides = array<i32>} : memref<2x8x8x16xf32, #tpu.memory_space<vmem>>, vector<2x8x8x16xf32>,
    %c0_122 = arith.constant 0 : index
    %c0_123 = arith.constant 0 : index
    %c0_124 = arith.constant 0 : index
    %c0_125 = arith.constant 0 : index
    %62 = tpu.strided_load %arg24[%c0_122, %c0_123, %c0_124, %c0_125] {strides = array<i32: 1, 1, 2, 1>} : memref<2x8x8x16xf32, #tpu.memory_space<vmem>>, vector<2x8x4x16xf32>
    %c0_126 = arith.constant 0 : index
    %c0_127 = arith.constant 0 : index
    %c1_128 = arith.constant 1 : index
    %c0_129 = arith.constant 0 : index
    %63 = tpu.strided_load %arg24[%c0_126, %c0_127, %c1_128, %c0_129] {strides = array<i32: 1, 1, 2, 1>} : memref<2x8x8x16xf32, #tpu.memory_space<vmem>>, vector<2x8x4x16xf32>
    %64 = arith.maximumf %62, %63 : vector<2x8x4x16xf32>
    %65 = vector.shape_cast %64 : vector<2x8x4x16xf32> to vector<2x4x2x4x16xf32>
    %66 = vector.extract_strided_slice %65 {offsets = [0, 0, 0, 0, 0], sizes = [2, 4, 1, 4, 16], strides = [1, 1, 1, 1, 1]} : vector<2x4x2x4x16xf32> to vector<2x4x1x4x16xf32>
    %67 = vector.shape_cast %66 : vector<2x4x1x4x16xf32> to vector<2x4x4x16xf32>
    %68 = vector.extract_strided_slice %65 {offsets = [0, 0, 1, 0, 0], sizes = [2, 4, 1, 4, 16], strides = [1, 1, 1, 1, 1]} : vector<2x4x2x4x16xf32> to vector<2x4x1x4x16xf32>
    %69 = vector.shape_cast %68 : vector<2x4x1x4x16xf32> to vector<2x4x4x16xf32>
    %70 = arith.maximumf %67, %69 : vector<2x4x4x16xf32>
    %cst_130 = arith.constant 0.000000e+00 : f32
    %71 = vector.broadcast %cst_130 : f32 to vector<2x6x6x16xf32>
    %c0_131 = arith.constant 0 : index
    %c0_132 = arith.constant 0 : index
    %c0_133 = arith.constant 0 : index
    %c0_134 = arith.constant 0 : index
    %72 = vector.load %arg21[%c0_131, %c0_132, %c0_133, %c0_134] : memref<2x6x6x16xf32, #tpu.memory_space<vmem>>, vector<2x6x6x16xf32>
    tpu.vector_store %arg21[%c0_131, %c0_132, %c0_133, %c0_134], %71 {strides = array<i32>} : memref<2x6x6x16xf32, #tpu.memory_space<vmem>>, vector<2x6x6x16xf32>,
    %c0_135 = arith.constant 0 : index
    %c1_136 = arith.constant 1 : index
    %c1_137 = arith.constant 1 : index
    %c0_138 = arith.constant 0 : index
    %73 = vector.load %arg21[%c0_135, %c1_136, %c1_137, %c0_138] : memref<2x6x6x16xf32, #tpu.memory_space<vmem>>, vector<2x4x4x16xf32>
    tpu.vector_store %arg21[%c0_135, %c1_136, %c1_137, %c0_138], %70 {strides = array<i32>} : memref<2x6x6x16xf32, #tpu.memory_space<vmem>>, vector<2x4x4x16xf32>,
    %c0_139 = arith.constant 0 : index
    %c0_140 = arith.constant 0 : index
    %c0_141 = arith.constant 0 : index
    %c0_142 = arith.constant 0 : index
    %74 = vector.load %arg21[%c0_139, %c0_140, %c0_141, %c0_142] : memref<2x6x6x16xf32, #tpu.memory_space<vmem>>, vector<2x4x4x16xf32>
    %c0_143 = arith.constant 0 : index
    %c0_144 = arith.constant 0 : index
    %c1_145 = arith.constant 1 : index
    %c0_146 = arith.constant 0 : index
    %75 = vector.load %arg21[%c0_143, %c0_144, %c1_145, %c0_146] : memref<2x6x6x16xf32, #tpu.memory_space<vmem>>, vector<2x4x4x16xf32>
    %c0_147 = arith.constant 0 : index
    %c0_148 = arith.constant 0 : index
    %c2_149 = arith.constant 2 : index
    %c0_150 = arith.constant 0 : index
    %76 = vector.load %arg21[%c0_147, %c0_148, %c2_149, %c0_150] : memref<2x6x6x16xf32, #tpu.memory_space<vmem>>, vector<2x4x4x16xf32>
    %c0_151 = arith.constant 0 : index
    %c1_152 = arith.constant 1 : index
    %c0_153 = arith.constant 0 : index
    %c0_154 = arith.constant 0 : index
    %77 = vector.load %arg21[%c0_151, %c1_152, %c0_153, %c0_154] : memref<2x6x6x16xf32, #tpu.memory_space<vmem>>, vector<2x4x4x16xf32>
    %c0_155 = arith.constant 0 : index
    %c1_156 = arith.constant 1 : index
    %c1_157 = arith.constant 1 : index
    %c0_158 = arith.constant 0 : index
    %78 = vector.load %arg21[%c0_155, %c1_156, %c1_157, %c0_158] : memref<2x6x6x16xf32, #tpu.memory_space<vmem>>, vector<2x4x4x16xf32>
    %c0_159 = arith.constant 0 : index
    %c1_160 = arith.constant 1 : index
    %c2_161 = arith.constant 2 : index
    %c0_162 = arith.constant 0 : index
    %79 = vector.load %arg21[%c0_159, %c1_160, %c2_161, %c0_162] : memref<2x6x6x16xf32, #tpu.memory_space<vmem>>, vector<2x4x4x16xf32>
    %c0_163 = arith.constant 0 : index
    %c2_164 = arith.constant 2 : index
    %c0_165 = arith.constant 0 : index
    %c0_166 = arith.constant 0 : index
    %80 = vector.load %arg21[%c0_163, %c2_164, %c0_165, %c0_166] : memref<2x6x6x16xf32, #tpu.memory_space<vmem>>, vector<2x4x4x16xf32>
    %c0_167 = arith.constant 0 : index
    %c2_168 = arith.constant 2 : index
    %c1_169 = arith.constant 1 : index
    %c0_170 = arith.constant 0 : index
    %81 = vector.load %arg21[%c0_167, %c2_168, %c1_169, %c0_170] : memref<2x6x6x16xf32, #tpu.memory_space<vmem>>, vector<2x4x4x16xf32>
    %c0_171 = arith.constant 0 : index
    %c2_172 = arith.constant 2 : index
    %c2_173 = arith.constant 2 : index
    %c0_174 = arith.constant 0 : index
    %82 = vector.load %arg21[%c0_171, %c2_172, %c2_173, %c0_174] : memref<2x6x6x16xf32, #tpu.memory_space<vmem>>, vector<2x4x4x16xf32>
    %83 = tpu.concatenate %74, %75, %76, %77, %78, %79, %80, %81, %82 in 3 : vector<2x4x4x16xf32>, vector<2x4x4x16xf32>, vector<2x4x4x16xf32>, vector<2x4x4x16xf32>, vector<2x4x4x16xf32>, vector<2x4x4x16xf32>, vector<2x4x4x16xf32>, vector<2x4x4x16xf32>, vector<2x4x4x16xf32> -> vector<2x4x4x144xf32>
    %84 = vector.shape_cast %83 : vector<2x4x4x144xf32> to vector<32x144xf32>
    %c0_175 = arith.constant 0 : index
    %c0_176 = arith.constant 0 : index
    %85 = vector.load %arg7[%c0_175, %c0_176] : memref<144x16xf32, #tpu.memory_space<vmem>>, vector<144x16xf32>
    %cst_177 = arith.constant dense<0.000000e+00> : vector<32x16xf32>
    %86 = tpu.matmul %84, %85, %cst_177 {dimension_numbers = #tpu.dot_dimension_numbers<[1], [0], [0], [1], [0, 0, 1, 1], [], []>} : vector<32x144xf32>, vector<144x16xf32>, vector<32x16xf32> -> vector<32x16xf32>
    %c0_178 = arith.constant 0 : index
    %c0_179 = arith.constant 0 : index
    %87 = vector.load %arg8[%c0_178, %c0_179] : memref<1x16xf32, #tpu.memory_space<vmem>>, vector<1x16xf32>
    %88 = vector.broadcast %87 : vector<1x16xf32> to vector<32x16xf32>
    %89 = arith.mulf %86, %88 : vector<32x16xf32>
    %c0_180 = arith.constant 0 : index
    %c0_181 = arith.constant 0 : index
    %90 = vector.load %arg9[%c0_180, %c0_181] : memref<1x16xf32, #tpu.memory_space<vmem>>, vector<1x16xf32>
    %91 = vector.broadcast %90 : vector<1x16xf32> to vector<32x16xf32>
    %92 = arith.addf %89, %91 : vector<32x16xf32>
    %cst_182 = arith.constant 0.000000e+00 : f32
    %93 = vector.broadcast %cst_182 : f32 to vector<32x16xf32>
    %94 = arith.maximumf %92, %93 : vector<32x16xf32>
    %95 = vector.shape_cast %94 : vector<32x16xf32> to vector<2x4x4x16xf32>
    %c0_183 = arith.constant 0 : index
    %c0_184 = arith.constant 0 : index
    %c0_185 = arith.constant 0 : index
    %c0_186 = arith.constant 0 : index
    %96 = vector.load %arg25[%c0_183, %c0_184, %c0_185, %c0_186] : memref<2x4x4x16xf32, #tpu.memory_space<vmem>>, vector<2x4x4x16xf32>
    tpu.vector_store %arg25[%c0_183, %c0_184, %c0_185, %c0_186], %95 {strides = array<i32>} : memref<2x4x4x16xf32, #tpu.memory_space<vmem>>, vector<2x4x4x16xf32>,
    %c0_187 = arith.constant 0 : index
    %c0_188 = arith.constant 0 : index
    %c0_189 = arith.constant 0 : index
    %c0_190 = arith.constant 0 : index
    %97 = tpu.strided_load %arg25[%c0_187, %c0_188, %c0_189, %c0_190] {strides = array<i32: 1, 1, 2, 1>} : memref<2x4x4x16xf32, #tpu.memory_space<vmem>>, vector<2x4x2x16xf32>
    %c0_191 = arith.constant 0 : index
    %c0_192 = arith.constant 0 : index
    %c1_193 = arith.constant 1 : index
    %c0_194 = arith.constant 0 : index
    %98 = tpu.strided_load %arg25[%c0_191, %c0_192, %c1_193, %c0_194] {strides = array<i32: 1, 1, 2, 1>} : memref<2x4x4x16xf32, #tpu.memory_space<vmem>>, vector<2x4x2x16xf32>
    %99 = arith.maximumf %97, %98 : vector<2x4x2x16xf32>
    %100 = vector.shape_cast %99 : vector<2x4x2x16xf32> to vector<2x2x2x2x16xf32>
    %101 = vector.extract_strided_slice %100 {offsets = [0, 0, 0, 0, 0], sizes = [2, 2, 1, 2, 16], strides = [1, 1, 1, 1, 1]} : vector<2x2x2x2x16xf32> to vector<2x2x1x2x16xf32>
    %102 = vector.shape_cast %101 : vector<2x2x1x2x16xf32> to vector<2x2x2x16xf32>
    %103 = vector.extract_strided_slice %100 {offsets = [0, 0, 1, 0, 0], sizes = [2, 2, 1, 2, 16], strides = [1, 1, 1, 1, 1]} : vector<2x2x2x2x16xf32> to vector<2x2x1x2x16xf32>
    %104 = vector.shape_cast %103 : vector<2x2x1x2x16xf32> to vector<2x2x2x16xf32>
    %105 = arith.maximumf %102, %104 : vector<2x2x2x16xf32>
    %cst_195 = arith.constant 0.000000e+00 : f32
    %106 = vector.broadcast %cst_195 : f32 to vector<2x4x4x16xf32>
    %c0_196 = arith.constant 0 : index
    %c0_197 = arith.constant 0 : index
    %c0_198 = arith.constant 0 : index
    %c0_199 = arith.constant 0 : index
    %107 = vector.load %arg22[%c0_196, %c0_197, %c0_198, %c0_199] : memref<2x4x4x16xf32, #tpu.memory_space<vmem>>, vector<2x4x4x16xf32>
    tpu.vector_store %arg22[%c0_196, %c0_197, %c0_198, %c0_199], %106 {strides = array<i32>} : memref<2x4x4x16xf32, #tpu.memory_space<vmem>>, vector<2x4x4x16xf32>,
    %c0_200 = arith.constant 0 : index
    %c1_201 = arith.constant 1 : index
    %c1_202 = arith.constant 1 : index
    %c0_203 = arith.constant 0 : index
    %108 = vector.load %arg22[%c0_200, %c1_201, %c1_202, %c0_203] : memref<2x4x4x16xf32, #tpu.memory_space<vmem>>, vector<2x2x2x16xf32>
    tpu.vector_store %arg22[%c0_200, %c1_201, %c1_202, %c0_203], %105 {strides = array<i32>} : memref<2x4x4x16xf32, #tpu.memory_space<vmem>>, vector<2x2x2x16xf32>,
    %c0_204 = arith.constant 0 : index
    %c0_205 = arith.constant 0 : index
    %c0_206 = arith.constant 0 : index
    %c0_207 = arith.constant 0 : index
    %109 = vector.load %arg22[%c0_204, %c0_205, %c0_206, %c0_207] : memref<2x4x4x16xf32, #tpu.memory_space<vmem>>, vector<2x2x2x16xf32>
    %c0_208 = arith.constant 0 : index
    %c0_209 = arith.constant 0 : index
    %c1_210 = arith.constant 1 : index
    %c0_211 = arith.constant 0 : index
    %110 = vector.load %arg22[%c0_208, %c0_209, %c1_210, %c0_211] : memref<2x4x4x16xf32, #tpu.memory_space<vmem>>, vector<2x2x2x16xf32>
    %c0_212 = arith.constant 0 : index
    %c0_213 = arith.constant 0 : index
    %c2_214 = arith.constant 2 : index
    %c0_215 = arith.constant 0 : index
    %111 = vector.load %arg22[%c0_212, %c0_213, %c2_214, %c0_215] : memref<2x4x4x16xf32, #tpu.memory_space<vmem>>, vector<2x2x2x16xf32>
    %c0_216 = arith.constant 0 : index
    %c1_217 = arith.constant 1 : index
    %c0_218 = arith.constant 0 : index
    %c0_219 = arith.constant 0 : index
    %112 = vector.load %arg22[%c0_216, %c1_217, %c0_218, %c0_219] : memref<2x4x4x16xf32, #tpu.memory_space<vmem>>, vector<2x2x2x16xf32>
    %c0_220 = arith.constant 0 : index
    %c1_221 = arith.constant 1 : index
    %c1_222 = arith.constant 1 : index
    %c0_223 = arith.constant 0 : index
    %113 = vector.load %arg22[%c0_220, %c1_221, %c1_222, %c0_223] : memref<2x4x4x16xf32, #tpu.memory_space<vmem>>, vector<2x2x2x16xf32>
    %c0_224 = arith.constant 0 : index
    %c1_225 = arith.constant 1 : index
    %c2_226 = arith.constant 2 : index
    %c0_227 = arith.constant 0 : index
    %114 = vector.load %arg22[%c0_224, %c1_225, %c2_226, %c0_227] : memref<2x4x4x16xf32, #tpu.memory_space<vmem>>, vector<2x2x2x16xf32>
    %c0_228 = arith.constant 0 : index
    %c2_229 = arith.constant 2 : index
    %c0_230 = arith.constant 0 : index
    %c0_231 = arith.constant 0 : index
    %115 = vector.load %arg22[%c0_228, %c2_229, %c0_230, %c0_231] : memref<2x4x4x16xf32, #tpu.memory_space<vmem>>, vector<2x2x2x16xf32>
    %c0_232 = arith.constant 0 : index
    %c2_233 = arith.constant 2 : index
    %c1_234 = arith.constant 1 : index
    %c0_235 = arith.constant 0 : index
    %116 = vector.load %arg22[%c0_232, %c2_233, %c1_234, %c0_235] : memref<2x4x4x16xf32, #tpu.memory_space<vmem>>, vector<2x2x2x16xf32>
    %c0_236 = arith.constant 0 : index
    %c2_237 = arith.constant 2 : index
    %c2_238 = arith.constant 2 : index
    %c0_239 = arith.constant 0 : index
    %117 = vector.load %arg22[%c0_236, %c2_237, %c2_238, %c0_239] : memref<2x4x4x16xf32, #tpu.memory_space<vmem>>, vector<2x2x2x16xf32>
    %118 = tpu.concatenate %109, %110, %111, %112, %113, %114, %115, %116, %117 in 3 : vector<2x2x2x16xf32>, vector<2x2x2x16xf32>, vector<2x2x2x16xf32>, vector<2x2x2x16xf32>, vector<2x2x2x16xf32>, vector<2x2x2x16xf32>, vector<2x2x2x16xf32>, vector<2x2x2x16xf32>, vector<2x2x2x16xf32> -> vector<2x2x2x144xf32>
    %119 = vector.shape_cast %118 : vector<2x2x2x144xf32> to vector<8x144xf32>
    %c0_240 = arith.constant 0 : index
    %c0_241 = arith.constant 0 : index
    %120 = vector.load %arg10[%c0_240, %c0_241] : memref<144x16xf32, #tpu.memory_space<vmem>>, vector<144x16xf32>
    %cst_242 = arith.constant dense<0.000000e+00> : vector<8x16xf32>
    %121 = tpu.matmul %119, %120, %cst_242 {dimension_numbers = #tpu.dot_dimension_numbers<[1], [0], [0], [1], [0, 0, 1, 1], [], []>} : vector<8x144xf32>, vector<144x16xf32>, vector<8x16xf32> -> vector<8x16xf32>
    %c0_243 = arith.constant 0 : index
    %c0_244 = arith.constant 0 : index
    %122 = vector.load %arg11[%c0_243, %c0_244] : memref<1x16xf32, #tpu.memory_space<vmem>>, vector<1x16xf32>
    %123 = vector.broadcast %122 : vector<1x16xf32> to vector<8x16xf32>
    %124 = arith.mulf %121, %123 : vector<8x16xf32>
    %c0_245 = arith.constant 0 : index
    %c0_246 = arith.constant 0 : index
    %125 = vector.load %arg12[%c0_245, %c0_246] : memref<1x16xf32, #tpu.memory_space<vmem>>, vector<1x16xf32>
    %126 = vector.broadcast %125 : vector<1x16xf32> to vector<8x16xf32>
    %127 = arith.addf %124, %126 : vector<8x16xf32>
    %cst_247 = arith.constant 0.000000e+00 : f32
    %128 = vector.broadcast %cst_247 : f32 to vector<8x16xf32>
    %129 = arith.maximumf %127, %128 : vector<8x16xf32>
    %130 = vector.shape_cast %129 : vector<8x16xf32> to vector<2x2x2x16xf32>
    %c0_248 = arith.constant 0 : index
    %c0_249 = arith.constant 0 : index
    %c0_250 = arith.constant 0 : index
    %c0_251 = arith.constant 0 : index
    %131 = vector.load %arg26[%c0_248, %c0_249, %c0_250, %c0_251] : memref<2x2x2x16xf32, #tpu.memory_space<vmem>>, vector<2x2x2x16xf32>
    tpu.vector_store %arg26[%c0_248, %c0_249, %c0_250, %c0_251], %130 {strides = array<i32>} : memref<2x2x2x16xf32, #tpu.memory_space<vmem>>, vector<2x2x2x16xf32>,
    %c0_252 = arith.constant 0 : index
    %c0_253 = arith.constant 0 : index
    %c0_254 = arith.constant 0 : index
    %c0_255 = arith.constant 0 : index
    %132 = tpu.strided_load %arg26[%c0_252, %c0_253, %c0_254, %c0_255] {strides = array<i32: 1, 1, 2, 1>} : memref<2x2x2x16xf32, #tpu.memory_space<vmem>>, vector<2x2x1x16xf32>
    %c0_256 = arith.constant 0 : index
    %c0_257 = arith.constant 0 : index
    %c1_258 = arith.constant 1 : index
    %c0_259 = arith.constant 0 : index
    %133 = tpu.strided_load %arg26[%c0_256, %c0_257, %c1_258, %c0_259] {strides = array<i32: 1, 1, 2, 1>} : memref<2x2x2x16xf32, #tpu.memory_space<vmem>>, vector<2x2x1x16xf32>
    %134 = arith.maximumf %132, %133 : vector<2x2x1x16xf32>
    %135 = vector.shape_cast %134 : vector<2x2x1x16xf32> to vector<2x1x2x1x16xf32>
    %136 = vector.extract_strided_slice %135 {offsets = [0, 0, 0, 0, 0], sizes = [2, 1, 1, 1, 16], strides = [1, 1, 1, 1, 1]} : vector<2x1x2x1x16xf32> to vector<2x1x1x1x16xf32>
    %137 = vector.shape_cast %136 : vector<2x1x1x1x16xf32> to vector<2x1x1x16xf32>
    %138 = vector.extract_strided_slice %135 {offsets = [0, 0, 1, 0, 0], sizes = [2, 1, 1, 1, 16], strides = [1, 1, 1, 1, 1]} : vector<2x1x2x1x16xf32> to vector<2x1x1x1x16xf32>
    %139 = vector.shape_cast %138 : vector<2x1x1x1x16xf32> to vector<2x1x1x16xf32>
    %140 = arith.maximumf %137, %139 : vector<2x1x1x16xf32>
    %141 = vector.shape_cast %140 : vector<2x1x1x16xf32> to vector<2x16xf32>
    %c0_260 = arith.constant 0 : index
    %c0_261 = arith.constant 0 : index
    %142 = vector.load %arg13[%c0_260, %c0_261] : memref<16x512xf32, #tpu.memory_space<vmem>>, vector<16x512xf32>
    %cst_262 = arith.constant dense<0.000000e+00> : vector<2x512xf32>
    %143 = tpu.matmul %141, %142, %cst_262 {dimension_numbers = #tpu.dot_dimension_numbers<[1], [0], [0], [1], [0, 0, 1, 1], [], []>} : vector<2x16xf32>, vector<16x512xf32>, vector<2x512xf32> -> vector<2x512xf32>
    %c0_263 = arith.constant 0 : index
    %c0_264 = arith.constant 0 : index
    %144 = vector.load %arg14[%c0_263, %c0_264] : memref<1x512xf32, #tpu.memory_space<vmem>>, vector<1x512xf32>
    %145 = vector.broadcast %144 : vector<1x512xf32> to vector<2x512xf32>
    %146 = arith.mulf %143, %145 : vector<2x512xf32>
    %c0_265 = arith.constant 0 : index
    %c0_266 = arith.constant 0 : index
    %147 = vector.load %arg15[%c0_265, %c0_266] : memref<1x512xf32, #tpu.memory_space<vmem>>, vector<1x512xf32>
    %148 = vector.broadcast %147 : vector<1x512xf32> to vector<2x512xf32>
    %149 = arith.addf %146, %148 : vector<2x512xf32>
    %c0_267 = arith.constant 0 : index
    %c0_268 = arith.constant 0 : index
    %150 = vector.load %arg16[%c0_267, %c0_268] : memref<512x10xf32, #tpu.memory_space<vmem>>, vector<512x10xf32>
    %cst_269 = arith.constant dense<0.000000e+00> : vector<2x10xf32>
    %151 = tpu.matmul %149, %150, %cst_269 {dimension_numbers = #tpu.dot_dimension_numbers<[1], [0], [0], [1], [0, 0, 1, 1], [], []>} : vector<2x512xf32>, vector<512x10xf32>, vector<2x10xf32> -> vector<2x10xf32>
    %c0_270 = arith.constant 0 : index
    %c0_271 = arith.constant 0 : index
    %152 = vector.load %arg17[%c0_270, %c0_271] : memref<1x10xf32, #tpu.memory_space<vmem>>, vector<1x10xf32>
    %153 = vector.broadcast %152 : vector<1x10xf32> to vector<2x10xf32>
    %154 = arith.addf %151, %153 : vector<2x10xf32>
    %c0_272 = arith.constant 0 : index
    %c0_273 = arith.constant 0 : index
    %155 = vector.load %arg18[%c0_272, %c0_273] : memref<2x10xf32, #tpu.memory_space<vmem>>, vector<2x10xf32>
    tpu.vector_store %arg18[%c0_272, %c0_273], %154 {strides = array<i32>} : memref<2x10xf32, #tpu.memory_space<vmem>>, vector<2x10xf32>,
    return
  }
}

</mosaic_0001>

<bundles_post_ra>
// kernel: forward.1
= control target key start
LH: loop header
LB: loop body
LE: loop exit
PB: predicated region body
PF: predicated region fallthrough
CT: control target
= control target key end

     0   :  { %s12127_s0 = inlined_call_operand.vmem [shape: f32[2,16,16,4], index: 0, kind: input, shape index: {}]   ;;  %s12128_s1 = inlined_call_operand.vmem [shape: f32[36,8], index: 1, kind: input, shape index: {}]   ;;  %s12129_s2 = inlined_call_operand.vmem [shape: f32[1,8], index: 2, kind: input, shape index: {}]   ;;  %s12130_s3 = inlined_call_operand.vmem [shape: f32[1,8], index: 3, kind: input, shape index: {}]   ;;  %s12131_s4 = inlined_call_operand.vmem [shape: f32[72,16], index: 4, kind: input, shape index: {}]   ;;  %s12132_s5 = inlined_call_operand.vmem [shape: f32[1,16], index: 5, kind: input, shape index: {}]   ;;  %s12133_s6 = inlined_call_operand.vmem [shape: f32[1,16], index: 6, kind: input, shape index: {}]   ;;  %s12134_s7 = inlined_call_operand.vmem [shape: f32[144,16], index: 7, kind: input, shape index: {}]   ;;  %s12135_s8 = inlined_call_operand.vmem [shape: f32[1,16], index: 8, kind: input, shape index: {}]   ;;  %s12136_s9 = inlined_call_operand.vmem [shape: f32[1,16], index: 9, kind: input, shape index: {}]   ;;  %s12137_s10 = inlined_call_operand.vmem [shape: f32[144,16], index: 10, kind: input, shape index: {}]   ;;  %s12138_s11 = inlined_call_operand.vmem [shape: f32[1,16], index: 11, kind: input, shape index: {}]   ;;  %s12139_s12 = inlined_call_operand.vmem [shape: f32[1,16], index: 12, kind: input, shape index: {}]   ;;  %s12140_s13 = inlined_call_operand.vmem [shape: f32[16,512], index: 13, kind: input, shape index: {}]   ;;  %s12141_s14 = inlined_call_operand.vmem [shape: f32[1,512], index: 14, kind: input, shape index: {}]   ;;  %s12142_s15 = inlined_call_operand.vmem [shape: f32[1,512], index: 15, kind: input, shape index: {}]   ;;  %s12143_s16 = inlined_call_operand.vmem [shape: f32[512,10], index: 16, kind: input, shape index: {}]   ;;  %s12144_s17 = inlined_call_operand.vmem [shape: f32[1,10], index: 17, kind: input, shape index: {}]   ;;  %s12145_s18 = inlined_call_operand.hbm [shape: f32[2,10], index: 18, kind: output, shape index: {}]  }
   0x1   :  { %12149 = sst [smem:[#allocation13_spill]] %s12127_s0 }
   0x2   :  { %12150 = sst [smem:[#allocation14_spill]] %s12128_s1 }
   0x3   :  { %12151 = sst [smem:[#allocation15_spill]] %s12129_s2 }
   0x4   :  { %vm124_vm0 = vcmask 31744   ;;  %vm127_vm1 = vcmask 25600   ;;  %s12152_s29 = sld [smem:[#allocation13_spill]]  ;;  %v7767_v1 = vmov 0.0   ;;  %vm2988_vm2 = vcmask 64512  }
   0x5   :  { %125 = vst.msk [vmem:[#allocation2] sm:$0xff] %vm124_vm0, %v7767_v1  ;;  %126 = vst.msk [vmem:[#allocation2 + $0x8] sm:$0xff] %vm124_vm0, %v7767_v1 }
   0x6   :  { %129 = vst.msk [vmem:[#allocation2 + $0x18] sm:$0xff] %vm124_vm0, %v7767_v1  ;;  %130 = vst.msk [vmem:[#allocation2 + $0x20] sm:$0xff] %vm124_vm0, %v7767_v1 }
   0x7   :  { %132 = vst.msk [vmem:[#allocation2 + $0x30] sm:$0xff] %vm124_vm0, %v7767_v1  ;;  %133 = vst.msk [vmem:[#allocation2 + $0x38] sm:$0xff] %vm124_vm0, %v7767_v1 }
   0x8   :  { %135 = vst.msk [vmem:[#allocation2 + $0x48] sm:$0xff] %vm124_vm0, %v7767_v1  ;;  %136 = vst.msk [vmem:[#allocation2 + $0x50] sm:$0xff] %vm124_vm0, %v7767_v1 }
   0x9   :  { %138 = vst.msk [vmem:[#allocation2 + $0x60] sm:$0xff] %vm124_vm0, %v7767_v1  ;;  %139 = vst.msk [vmem:[#allocation2 + $0x68] sm:$0xff] %vm124_vm0, %v7767_v1 }
   0xa   :  { %v7884_v0 = vld [vmem:[%s12152_s29] sm:$0xff]  ;;  %141 = vst.msk [vmem:[#allocation2 + $0x78] sm:$0xff] %vm124_vm0, %v7767_v1  ;;  %142 = vst.msk [vmem:[#allocation2 + $0x80] sm:$0xff] %vm124_vm0, %v7767_v1  ;;  %v61_v2 = vld [vmem:[%s12152_s29 + $0x8] sm:$0xff] }
   0xb   :  { %144 = vst.msk [vmem:[#allocation2 + $0x90] sm:$0xff] %vm124_vm0, %v7767_v1  ;;  %145 = vst.msk [vmem:[#allocation2 + $0x98] sm:$0xff] %vm124_vm0, %v7767_v1  ;;  %v62_v3 = vld [vmem:[%s12152_s29 + $0x10] sm:$0xff]  ;;  %v63_v4 = vld [vmem:[%s12152_s29 + $0x18] sm:$0xff] }
   0xc   :  { %147 = vst.msk [vmem:[#allocation2 + $0xa8] sm:$0xff] %vm124_vm0, %v7767_v1  ;;  %148 = vst.msk [vmem:[#allocation2 + $0xb0] sm:$0xff] %vm124_vm0, %v7767_v1  ;;  %v64_v5 = vld [vmem:[%s12152_s29 + $0x20] sm:$0xff]  ;;  %v65_v6 = vld [vmem:[%s12152_s29 + $0x28] sm:$0xff] }
   0xd   :  { %150 = vst.msk [vmem:[#allocation2 + $0xc0] sm:$0xff] %vm124_vm0, %v7767_v1  ;;  %151 = vst.msk [vmem:[#allocation2 + $0xc8] sm:$0xff] %vm124_vm0, %v7767_v1  ;;  %v66_v7 = vld [vmem:[%s12152_s29 + $0x30] sm:$0xff]  ;;  %v67_v8 = vld [vmem:[%s12152_s29 + $0x38] sm:$0xff] }
   0xe   :  { %153 = vst.msk [vmem:[#allocation2 + $0xd8] sm:$0xff] %vm124_vm0, %v7767_v1  ;;  %154 = vst.msk [vmem:[#allocation2 + $0xe0] sm:$0xff] %vm124_vm0, %v7767_v1  ;;  %v68_v9 = vld [vmem:[%s12152_s29 + $0x40] sm:$0xff]  ;;  %v69_v10 = vld [vmem:[%s12152_s29 + $0x48] sm:$0xff] }
   0xf   :  { %156 = vst.msk [vmem:[#allocation2 + $0xf0] sm:$0xff] %vm124_vm0, %v7767_v1  ;;  %157 = vst.msk [vmem:[#allocation2 + $0xf8] sm:$0xff] %vm124_vm0, %v7767_v1 }
  0x10   :  { %159 = vst.msk [vmem:[#allocation2 + $0x108] sm:$0xff] %vm124_vm0, %v7767_v1  ;;  %160 = vst.msk [vmem:[#allocation2 + $0x110] sm:$0xff] %vm124_vm0, %v7767_v1 }
  0x11   :  { %162 = vst.msk [vmem:[#allocation2 + $0x120] sm:$0xff] %vm124_vm0, %v7767_v1  ;;  %163 = vst.msk [vmem:[#allocation2 + $0x128] sm:$0xff] %vm124_vm0, %v7767_v1 }
  0x12   :  { %165 = vst.msk [vmem:[#allocation2 + $0x138] sm:$0xff] %vm124_vm0, %v7767_v1  ;;  %166 = vst.msk [vmem:[#allocation2 + $0x140] sm:$0xff] %vm124_vm0, %v7767_v1 }
  0x13   :  { %168 = vst.msk [vmem:[#allocation2 + $0x150] sm:$0xff] %vm124_vm0, %v7767_v1  ;;  %169 = vst.msk [vmem:[#allocation2 + $0x158] sm:$0xff] %vm124_vm0, %v7767_v1 }
  0x14   :  { %171 = vst.msk [vmem:[#allocation2 + $0x168] sm:$0xff] %vm124_vm0, %v7767_v1  ;;  %172 = vst.msk [vmem:[#allocation2 + $0x170] sm:$0xff] %vm124_vm0, %v7767_v1 }
  0x15   :  { %174 = vst.msk [vmem:[#allocation2 + $0x180] sm:$0xff] %vm124_vm0, %v7767_v1  ;;  %175 = vst.msk [vmem:[#allocation2 + $0x188] sm:$0xff] %vm124_vm0, %v7767_v1 }
  0x16   :  { %177 = vst.msk [vmem:[#allocation2 + $0x198] sm:$0xff] %vm124_vm0, %v7767_v1  ;;  %178 = vst.msk [vmem:[#allocation2 + $0x1a0] sm:$0xff] %vm124_vm0, %v7767_v1 }
  0x17   :  { %180 = vst.msk [vmem:[#allocation2 + $0x1b0] sm:$0xff] %vm124_vm0, %v7767_v1  ;;  %181 = vst.msk [vmem:[#allocation2 + $0x1b8] sm:$0xff] %vm124_vm0, %v7767_v1 }
  0x18   :  { %183 = vst.msk [vmem:[#allocation2 + $0x1c8] sm:$0xff] %vm124_vm0, %v7767_v1  ;;  %184 = vst.msk [vmem:[#allocation2 + $0x1d0] sm:$0xff] %vm124_vm0, %v7767_v1 }
  0x19   :  { %186 = vst.msk [vmem:[#allocation2 + $0x1e0] sm:$0xff] %vm124_vm0, %v7767_v1  ;;  %187 = vst.msk [vmem:[#allocation2 + $0x1e8] sm:$0xff] %vm124_vm0, %v7767_v1 }
  0x1a   :  { %189 = vst.msk [vmem:[#allocation2 + $0x1f8] sm:$0xff] %vm124_vm0, %v7767_v1  ;;  %190 = vst.msk [vmem:[#allocation2 + $0x200] sm:$0xff] %vm124_vm0, %v7767_v1 }
  0x1b   :  { %192 = vst.msk [vmem:[#allocation2 + $0x210] sm:$0xff] %vm124_vm0, %v7767_v1  ;;  %193 = vst.msk [vmem:[#allocation2 + $0x218] sm:$0xff] %vm124_vm0, %v7767_v1 }
  0x1c   :  { %195 = vst.msk [vmem:[#allocation2 + $0x228] sm:$0xff] %vm124_vm0, %v7767_v1  ;;  %196 = vst.msk [vmem:[#allocation2 + $0x230] sm:$0xff] %vm124_vm0, %v7767_v1 }
  0x1d   :  { %198 = vst.msk [vmem:[#allocation2 + $0x240] sm:$0xff] %vm124_vm0, %v7767_v1  ;;  %199 = vst.msk [vmem:[#allocation2 + $0x248] sm:$0xff] %vm124_vm0, %v7767_v1 }
  0x1e   :  { %201 = vst.msk [vmem:[#allocation2 + $0x258] sm:$0xff] %vm124_vm0, %v7767_v1  ;;  %202 = vst.msk [vmem:[#allocation2 + $0x260] sm:$0xff] %vm124_vm0, %v7767_v1 }
  0x1f   :  { %204 = vst.msk [vmem:[#allocation2 + $0x270] sm:$0xff] %vm124_vm0, %v7767_v1  ;;  %205 = vst.msk [vmem:[#allocation2 + $0x278] sm:$0xff] %vm124_vm0, %v7767_v1 }
  0x20   :  { %207 = vst.msk [vmem:[#allocation2 + $0x288] sm:$0xff] %vm124_vm0, %v7767_v1  ;;  %208 = vst.msk [vmem:[#allocation2 + $0x290] sm:$0xff] %vm124_vm0, %v7767_v1 }
  0x21   :  { %210 = vst.msk [vmem:[#allocation2 + $0x2a0] sm:$0xff] %vm124_vm0, %v7767_v1  ;;  %211 = vst.msk [vmem:[#allocation2 + $0x2a8] sm:$0xff] %vm124_vm0, %v7767_v1 }
  0x22   :  { %213 = vst.msk [vmem:[#allocation2 + $0x2b8] sm:$0xff] %vm124_vm0, %v7767_v1  ;;  %214 = vst.msk [vmem:[#allocation2 + $0x2c0] sm:$0xff] %vm124_vm0, %v7767_v1 }
  0x23   :  { %216 = vst.msk [vmem:[#allocation2 + $0x2d0] sm:$0xff] %vm124_vm0, %v7767_v1  ;;  %217 = vst.msk [vmem:[#allocation2 + $0x2d8] sm:$0xff] %vm124_vm0, %v7767_v1 }
  0x24   :  { %219 = vst.msk [vmem:[#allocation2 + $0x2e8] sm:$0xff] %vm124_vm0, %v7767_v1  ;;  %220 = vst.msk [vmem:[#allocation2 + $0x2f0] sm:$0xff] %vm124_vm0, %v7767_v1 }
  0x25   :  { %222 = vst.msk [vmem:[#allocation2 + $0x300] sm:$0xff] %vm124_vm0, %v7767_v1  ;;  %223 = vst.msk [vmem:[#allocation2 + $0x308] sm:$0xff] %vm124_vm0, %v7767_v1 }
  0x26   :  { %225 = vst.msk [vmem:[#allocation2 + $0x318] sm:$0xff] %vm124_vm0, %v7767_v1  ;;  %226 = vst.msk [vmem:[#allocation2 + $0x320] sm:$0xff] %vm124_vm0, %v7767_v1 }
  0x27   :  { %228 = vst.msk [vmem:[#allocation2 + $0x330] sm:$0xff] %vm124_vm0, %v7767_v1  ;;  %229 = vst.msk [vmem:[#allocation2 + $0x338] sm:$0xff] %vm124_vm0, %v7767_v1 }
  0x28   :  { %231 = vst.msk [vmem:[#allocation2 + $0x348] sm:$0xff] %vm124_vm0, %v7767_v1  ;;  %232 = vst.msk [vmem:[#allocation2 + $0x350] sm:$0xff] %vm124_vm0, %v7767_v1 }
  0x29   :  { %128 = vst.msk [vmem:[#allocation2 + $0x10] sm:$0x3] %vm127_vm1, %v7767_v1  ;;  %131 = vst.msk [vmem:[#allocation2 + $0x28] sm:$0x3] %vm127_vm1, %v7767_v1 }
  0x2a   :  { %134 = vst.msk [vmem:[#allocation2 + $0x40] sm:$0x3] %vm127_vm1, %v7767_v1  ;;  %137 = vst.msk [vmem:[#allocation2 + $0x58] sm:$0x3] %vm127_vm1, %v7767_v1 }
  0x2b   :  { %140 = vst.msk [vmem:[#allocation2 + $0x70] sm:$0x3] %vm127_vm1, %v7767_v1  ;;  %143 = vst.msk [vmem:[#allocation2 + $0x88] sm:$0x3] %vm127_vm1, %v7767_v1 }
  0x2c   :  { %146 = vst.msk [vmem:[#allocation2 + $0xa0] sm:$0x3] %vm127_vm1, %v7767_v1  ;;  %149 = vst.msk [vmem:[#allocation2 + $0xb8] sm:$0x3] %vm127_vm1, %v7767_v1 }
  0x2d   :  { %152 = vst.msk [vmem:[#allocation2 + $0xd0] sm:$0x3] %vm127_vm1, %v7767_v1  ;;  %155 = vst.msk [vmem:[#allocation2 + $0xe8] sm:$0x3] %vm127_vm1, %v7767_v1 }
  0x2e   :  { %158 = vst.msk [vmem:[#allocation2 + $0x100] sm:$0x3] %vm127_vm1, %v7767_v1  ;;  %161 = vst.msk [vmem:[#allocation2 + $0x118] sm:$0x3] %vm127_vm1, %v7767_v1 }
  0x2f   :  { %164 = vst.msk [vmem:[#allocation2 + $0x130] sm:$0x3] %vm127_vm1, %v7767_v1  ;;  %167 = vst.msk [vmem:[#allocation2 + $0x148] sm:$0x3] %vm127_vm1, %v7767_v1 }
  0x30   :  { %170 = vst.msk [vmem:[#allocation2 + $0x160] sm:$0x3] %vm127_vm1, %v7767_v1  ;;  %173 = vst.msk [vmem:[#allocation2 + $0x178] sm:$0x3] %vm127_vm1, %v7767_v1 }
  0x31   :  { %176 = vst.msk [vmem:[#allocation2 + $0x190] sm:$0x3] %vm127_vm1, %v7767_v1  ;;  %179 = vst.msk [vmem:[#allocation2 + $0x1a8] sm:$0x3] %vm127_vm1, %v7767_v1 }
  0x32   :  { %182 = vst.msk [vmem:[#allocation2 + $0x1c0] sm:$0x3] %vm127_vm1, %v7767_v1  ;;  %185 = vst.msk [vmem:[#allocation2 + $0x1d8] sm:$0x3] %vm127_vm1, %v7767_v1 }
  0x33   :  { %188 = vst.msk [vmem:[#allocation2 + $0x1f0] sm:$0x3] %vm127_vm1, %v7767_v1  ;;  %191 = vst.msk [vmem:[#allocation2 + $0x208] sm:$0x3] %vm127_vm1, %v7767_v1 }
  0x34   :  { %194 = vst.msk [vmem:[#allocation2 + $0x220] sm:$0x3] %vm127_vm1, %v7767_v1  ;;  %197 = vst.msk [vmem:[#allocation2 + $0x238] sm:$0x3] %vm127_vm1, %v7767_v1 }
  0x35   :  { %200 = vst.msk [vmem:[#allocation2 + $0x250] sm:$0x3] %vm127_vm1, %v7767_v1  ;;  %203 = vst.msk [vmem:[#allocation2 + $0x268] sm:$0x3] %vm127_vm1, %v7767_v1 }
  0x36   :  { %206 = vst.msk [vmem:[#allocation2 + $0x280] sm:$0x3] %vm127_vm1, %v7767_v1  ;;  %209 = vst.msk [vmem:[#allocation2 + $0x298] sm:$0x3] %vm127_vm1, %v7767_v1 }
  0x37   :  { %212 = vst.msk [vmem:[#allocation2 + $0x2b0] sm:$0x3] %vm127_vm1, %v7767_v1  ;;  %215 = vst.msk [vmem:[#allocation2 + $0x2c8] sm:$0x3] %vm127_vm1, %v7767_v1 }
  0x38   :  { %218 = vst.msk [vmem:[#allocation2 + $0x2e0] sm:$0x3] %vm127_vm1, %v7767_v1  ;;  %221 = vst.msk [vmem:[#allocation2 + $0x2f8] sm:$0x3] %vm127_vm1, %v7767_v1 }
  0x39   :  { %224 = vst.msk [vmem:[#allocation2 + $0x310] sm:$0x3] %vm127_vm1, %v7767_v1  ;;  %227 = vst.msk [vmem:[#allocation2 + $0x328] sm:$0x3] %vm127_vm1, %v7767_v1 }
  0x3a   :  { %230 = vst.msk [vmem:[#allocation2 + $0x340] sm:$0x3] %vm127_vm1, %v7767_v1  ;;  %233 = vst.msk [vmem:[#allocation2 + $0x358] sm:$0x3] %vm127_vm1, %v7767_v1 }
  0x3b   :  { %235 = vst.msk [vmem:[#allocation2 + $0x19] sm:$0xff] %vm124_vm0, %v7884_v0  ;;  %236 = vst.msk [vmem:[#allocation2 + $0x21] sm:$0xff] %vm124_vm0, %v61_v2 }
  0x3c   :  { %237 = vst.msk [vmem:[#allocation2 + $0x31] sm:$0xff] %vm124_vm0, %v62_v3  ;;  %238 = vst.msk [vmem:[#allocation2 + $0x39] sm:$0xff] %vm124_vm0, %v63_v4 }
  0x3d   :  { %4475 = vst.msk [vmem:[#allocation3] sm:$0xff] %vm2988_vm2, %v7767_v1  ;;  %4478 = vst.msk [vmem:[#allocation3 + $0x10] sm:$0xff] %vm2988_vm2, %v7767_v1 }
  0x3e   :  { %4480 = vst.msk [vmem:[#allocation3 + $0x20] sm:$0xff] %vm2988_vm2, %v7767_v1  ;;  %4482 = vst.msk [vmem:[#allocation3 + $0x30] sm:$0xff] %vm2988_vm2, %v7767_v1 }
  0x3f   :  { %4484 = vst.msk [vmem:[#allocation3 + $0x40] sm:$0xff] %vm2988_vm2, %v7767_v1  ;;  %4486 = vst.msk [vmem:[#allocation3 + $0x50] sm:$0xff] %vm2988_vm2, %v7767_v1 }
  0x40   :  { %4488 = vst.msk [vmem:[#allocation3 + $0x60] sm:$0xff] %vm2988_vm2, %v7767_v1  ;;  %4490 = vst.msk [vmem:[#allocation3 + $0x70] sm:$0xff] %vm2988_vm2, %v7767_v1 }
  0x41   :  { %4492 = vst.msk [vmem:[#allocation3 + $0x80] sm:$0xff] %vm2988_vm2, %v7767_v1  ;;  %4494 = vst.msk [vmem:[#allocation3 + $0x90] sm:$0xff] %vm2988_vm2, %v7767_v1 }
  0x42   :  { %4496 = vst.msk [vmem:[#allocation3 + $0xa0] sm:$0xff] %vm2988_vm2, %v7767_v1  ;;  %4498 = vst.msk [vmem:[#allocation3 + $0xb0] sm:$0xff] %vm2988_vm2, %v7767_v1 }
  0x43   :  { %4500 = vst.msk [vmem:[#allocation3 + $0xc0] sm:$0xff] %vm2988_vm2, %v7767_v1  ;;  %4502 = vst.msk [vmem:[#allocation3 + $0xd0] sm:$0xff] %vm2988_vm2, %v7767_v1 }
  0x44   :  { %4504 = vst.msk [vmem:[#allocation3 + $0xe0] sm:$0xff] %vm2988_vm2, %v7767_v1  ;;  %4506 = vst.msk [vmem:[#allocation3 + $0xf0] sm:$0xff] %vm2988_vm2, %v7767_v1 }
  0x45   :  { %4508 = vst.msk [vmem:[#allocation3 + $0x100] sm:$0xff] %vm2988_vm2, %v7767_v1  ;;  %4510 = vst.msk [vmem:[#allocation3 + $0x110] sm:$0xff] %vm2988_vm2, %v7767_v1 }
  0x46   :  { %4512 = vst.msk [vmem:[#allocation3 + $0x120] sm:$0xff] %vm2988_vm2, %v7767_v1  ;;  %4514 = vst.msk [vmem:[#allocation3 + $0x130] sm:$0xff] %vm2988_vm2, %v7767_v1 }
  0x47   :  { %239 = vst.msk [vmem:[#allocation2 + $0x49] sm:$0xff] %vm124_vm0, %v64_v5  ;;  %240 = vst.msk [vmem:[#allocation2 + $0x51] sm:$0xff] %vm124_vm0, %v65_v6 }
  0x48   :  { %241 = vst.msk [vmem:[#allocation2 + $0x61] sm:$0xff] %vm124_vm0, %v66_v7  ;;  %242 = vst.msk [vmem:[#allocation2 + $0x69] sm:$0xff] %vm124_vm0, %v67_v8 }
  0x49   :  { %243 = vst.msk [vmem:[#allocation2 + $0x79] sm:$0xff] %vm124_vm0, %v68_v9  ;;  %244 = vst.msk [vmem:[#allocation2 + $0x81] sm:$0xff] %vm124_vm0, %v69_v10 }
  0x4a   :  { %23 = vsyncpa [#allocation11], 0  ;;  %v427_v11 = vld [vmem:[#allocation2 + $0x2] sm:$0xff]  ;;  %s7768_s20 = smov 8   ;;  %s7769_s21 = smov 4   ;;  %v428_v13 = vld [vmem:[#allocation2 + $0xa] sm:$0xff] }
  0x4b   :  { %v363_v12 = vld [vmem:[#allocation2 + $0x1] sm:$0xff]  ;;  %1196 = vrot.lane.b32.xlu1 %v427_v11, %s7768_s20  ;;  %v364_v14 = vld [vmem:[#allocation2 + $0x9] sm:$0xff]  ;;  %v8186_v16 = vld [vmem:[#allocation2 + $0x18] sm:$0xff]  ;;  %s7770_s22 = smov 12   ;;  %s7771_s2 = smov 16   ;;  %vm3641_vm3 = vcmask 1043456  }
  0x4c   :  { %940 = vrot.lane.b32.xlu0 %v363_v12, %s7769_s21  ;;  %v8184_v15 = vld [vmem:[#allocation2 + $0x20] sm:$0xff]  ;;  %v70_v20 = vld [vmem:[%s12152_s29 + $0x50] sm:$0xff]  ;;  %s7772_s25 = smov 20   ;;  %s12153_s28 = sld [smem:[#allocation14_spill]]  ;;  %v71_v26 = vld [vmem:[%s12152_s29 + $0x58] sm:$0xff]  ;;  %vm3053_vm4 = vcmask 97280  }
  0x4d   :  { %v555_v17 = vld [vmem:[#allocation2 + $0x19] sm:$0xff]  ;;  %v556_v18 = vld [vmem:[#allocation2 + $0x21] sm:$0xff]  ;;  %245 = vst.msk [vmem:[#allocation2 + $0x91] sm:$0xff] %vm124_vm0, %v70_v20  ;;  %v8202_v22 = vld [vmem:[#allocation2 + $0x30] sm:$0xff]  ;;  %s7773_s19 = smov 24   ;;  %s7774_s0 = smov 28  }
  0x4e   :  { %v619_v19 = vld [vmem:[#allocation2 + $0x1a] sm:$0xff]  ;;  %v620_v21 = vld [vmem:[#allocation2 + $0x22] sm:$0xff]  ;;  %246 = vst.msk [vmem:[#allocation2 + $0x99] sm:$0xff] %vm124_vm0, %v71_v26  ;;  %v748_v30 = vld [vmem:[#allocation2 + $0x31] sm:$0xff]  ;;  %s7775_s24 = smov 32   ;;  %vm3118_vm5 = vcmask 130048  }
  0x4f   :  { %1198 = vrot.lane.b32.xlu1 %v428_v13, %s7768_s20  ;;  %v8226_v29 = vld [vmem:[#allocation2 + $0x38] sm:$0xff]  ;;  %v72_v36 = vld [vmem:[%s12152_s29 + $0x60] sm:$0xff]  ;;  %v8249_v37 = vld [vmem:[#allocation2 + $0x48] sm:$0xff]  ;;  %vm3183_vm6 = vcmask 162816   ;;  %vm3248_vm7 = vcmask 195584   ;;  %vm3313_vm8 = vcmask 228352  }
  0x50   :  { %942 = vrot.lane.b32.xlu0 %v364_v14, %s7769_s21  ;;  %v749_v33 = vld [vmem:[#allocation2 + $0x39] sm:$0xff]  ;;  %247 = vst.msk [vmem:[#allocation2 + $0xa9] sm:$0xff] %vm124_vm0, %v72_v36  ;;  %v73_v38 = vld [vmem:[%s12152_s29 + $0x68] sm:$0xff]  ;;  %v8261_v39 = vld [vmem:[#allocation2 + $0x50] sm:$0xff]  ;;  %vm3378_vm9 = vcmask 261120   ;;  %vm3448_vm10 = vcmask 293888  }
  0x51   :  { %v812_v34 = vld [vmem:[#allocation2 + $0x32] sm:$0xff]  ;;  %v813_v35 = vld [vmem:[#allocation2 + $0x3a] sm:$0xff]  ;;  %248 = vst.msk [vmem:[#allocation2 + $0xb1] sm:$0xff] %vm124_vm0, %v73_v38  ;;  %v750_v40 = vld [vmem:[#allocation2 + $0x49] sm:$0xff]  ;;  %vm4476_vm11 = vcmask 58368   ;;  %s12154_s27 = sld [smem:[#allocation15_spill]] }
  0x52   :  { %v3443_v23 = vld [vmem:[%s12153_s28] sm:$0xff]  ;;  %v3444_v24 = vld [vmem:[%s12153_s28 + $0x8] sm:$0xff]  ;;  %v3445_v27 = vld [vmem:[%s12153_s28 + $0x10] sm:$0xff]  ;;  %4477 = vst.msk [vmem:[#allocation3 + $0x8] sm:$0x3] %vm4476_vm11, %v7767_v1  ;;  %s7777_s1 = smov 48  }
  0x53   :  { %1454 = vrot.lane.b32.xlu1 %v8184_v15, %s7770_s22  ;;  %v7562_v25 = vpack.c.bf16 %v3444_v24, %v3443_v23  ;;  %v3446_v28 = vld [vmem:[%s12153_s28 + $0x18] sm:$0xff]  ;;  %v3447_v32 = vld [vmem:[%s12153_s28 + $0x20] sm:$0xf]  ;;  %v814_v42 = vld [vmem:[#allocation2 + $0x4a] sm:$0xff]  ;;  %4479 = vst.msk [vmem:[#allocation3 + $0x18] sm:$0x3] %vm4476_vm11, %v7767_v1 }
  0x54   :  { %1452 = vrot.lane.b32.xlu0 %v8186_v16, %s7770_s22  ;;  %v7566_v31 = vpack.c.bf16 %v3446_v28, %v3445_v27  ;;  %v751_v41 = vld [vmem:[#allocation2 + $0x51] sm:$0xff]  ;;  %v8281_v45 = vld [vmem:[#allocation2 + $0x60] sm:$0xff]  ;;  %v8293_v47 = vld [vmem:[#allocation2 + $0x68] sm:$0xff]  ;;  %4481 = vst.msk [vmem:[#allocation3 + $0x28] sm:$0x3] %vm4476_vm11, %v7767_v1  ;;  %s7778_s23 = smov 56  }
  0x55   :  { %7563 = vmatprep.subr.bf16.mxu0 %v7562_v25  ;;  %v815_v43 = vld [vmem:[#allocation2 + $0x52] sm:$0xff]  ;;  %v752_v48 = vld [vmem:[#allocation2 + $0x61] sm:$0xff]  ;;  %v753_v49 = vld [vmem:[#allocation2 + $0x69] sm:$0xff]  ;;  %4483 = vst.msk [vmem:[#allocation3 + $0x38] sm:$0x3] %vm4476_vm11, %v7767_v1  ;;  %vm5254_vm12 = vcmask 326656  }
  0x56   :  { %7565 = vmatpush3.bf16.msra.mxu0 %v7562_v25  ;;  %v74_v44 = vld [vmem:[%s12152_s29 + $0x70] sm:$0xff]  ;;  %v75_v46 = vld [vmem:[%s12152_s29 + $0x78] sm:$0xff]  ;;  %v816_v50 = vld [vmem:[#allocation2 + $0x62] sm:$0xff]  ;;  %4485 = vst.msk [vmem:[#allocation3 + $0x48] sm:$0x3] %vm4476_vm11, %v7767_v1  ;;  %vm5271_vm13 = vcmask 392192  }
  0x57   :  { %944 = vrot.lane.b32.xlu1 %v555_v17, %s7769_s21  ;;  %7567 = vmatprep.subr.bf16.mxu0 %v7566_v31  ;;  %249 = vst.msk [vmem:[#allocation2 + $0xc1] sm:$0xff] %vm124_vm0, %v74_v44  ;;  %250 = vst.msk [vmem:[#allocation2 + $0xc9] sm:$0xff] %vm124_vm0, %v75_v46  ;;  %v817_v51 = vld [vmem:[#allocation2 + $0x6a] sm:$0xff]  ;;  %v76_v52 = vld [vmem:[%s12152_s29 + $0x80] sm:$0xff]  ;;  %vm5288_vm14 = vcmask 457728   ;;  %vm5305_vm15 = vcmask 523264  }
  0x58   :  { %1708 = vrot.lane.b32.xlu0 %v555_v17, %s7771_s2  ;;  %251 = vst.msk [vmem:[#allocation2 + $0xd9] sm:$0xff] %vm124_vm0, %v76_v52  ;;  %v8313_v55 = vld [vmem:[#allocation2 + $0x78] sm:$0xff]  ;;  %v77_v58 = vld [vmem:[%s12152_s29 + $0x88] sm:$0xff]  ;;  %v8329_v61 = vld [vmem:[#allocation2 + $0x80] sm:$0xff]  ;;  %vm5690_vm1 = vcmask 128000   ;;  %s7783_s28 = smov 112  }
  0x59   :  { %252 = vst.msk [vmem:[#allocation2 + $0xe1] sm:$0xff] %vm124_vm0, %v77_v58  ;;  %v754_v62 = vld [vmem:[#allocation2 + $0x79] sm:$0xff]  ;;  %v755_v4 = vld [vmem:[#allocation2 + $0x81] sm:$0xff]  ;;  %v78_v14 = vld [vmem:[%s12152_s29 + $0x90] sm:$0xff] }
  0x5a   :  { %7569 = vmatpush3.bf16.msra.mxu0 %v7566_v31  ;;  %v818_v5 = vld [vmem:[#allocation2 + $0x7a] sm:$0xff]  ;;  %v819_v10 = vld [vmem:[#allocation2 + $0x82] sm:$0xff]  ;;  %253 = vst.msk [vmem:[#allocation2 + $0xf1] sm:$0xff] %vm124_vm0, %v78_v14 }
  0x5b   :  { %1964 = vrot.lane.b32.xlu1 %v619_v19, %s7772_s25  ;;  %7422 = vmatprep.subr.msk.mxu0 %vm3641_vm3, %v3447_v32  ;;  %v299_v13 = vld [vmem:[#allocation2] sm:$0xff]  ;;  %v300_v26 = vld [vmem:[#allocation2 + $0x8] sm:$0xff]  ;;  %4487 = vst.msk [vmem:[#allocation3 + $0x58] sm:$0x3] %vm4476_vm11, %v7767_v1  ;;  %4489 = vst.msk [vmem:[#allocation3 + $0x68] sm:$0x3] %vm4476_vm11, %v7767_v1 }
  0x5c   :  { %1710 = vrot.lane.b32.xlu0 %v556_v18, %s7771_s2  ;;  %4491 = vst.msk [vmem:[#allocation3 + $0x78] sm:$0x3] %vm4476_vm11, %v7767_v1  ;;  %4493 = vst.msk [vmem:[#allocation3 + $0x88] sm:$0x3] %vm4476_vm11, %v7767_v1 }
  0x5d   :  { %4495 = vst.msk [vmem:[#allocation3 + $0x98] sm:$0x3] %vm4476_vm11, %v7767_v1  ;;  %4497 = vst.msk [vmem:[#allocation3 + $0xa8] sm:$0x3] %vm4476_vm11, %v7767_v1 }
  0x5e   :  { %7423 = vmatpush3.msk.msra.mxu0 %vm3641_vm3, %v3447_v32  ;;  %4499 = vst.msk [vmem:[#allocation3 + $0xb8] sm:$0x3] %vm4476_vm11, %v7767_v1  ;;  %4501 = vst.msk [vmem:[#allocation3 + $0xc8] sm:$0x3] %vm4476_vm11, %v7767_v1  ;;  %vm5704_vm3 = vcmask 125952  }
  0x5f   :  { %1200 = vrot.lane.b32.xlu1 %v619_v19, %s7768_s20  ;;  %4503 = vst.msk [vmem:[#allocation3 + $0xd8] sm:$0x3] %vm4476_vm11, %v7767_v1  ;;  %4505 = vst.msk [vmem:[#allocation3 + $0xe8] sm:$0x3] %vm4476_vm11, %v7767_v1 }
  0x60   :  { %946 = vrot.lane.b32.xlu0 %v556_v18, %s7769_s21  ;;  %4507 = vst.msk [vmem:[#allocation3 + $0xf8] sm:$0x3] %vm4476_vm11, %v7767_v1  ;;  %4509 = vst.msk [vmem:[#allocation3 + $0x108] sm:$0x3] %vm4476_vm11, %v7767_v1 }
  0x61   :  { %4511 = vst.msk [vmem:[#allocation3 + $0x118] sm:$0x3] %vm4476_vm11, %v7767_v1  ;;  %4513 = vst.msk [vmem:[#allocation3 + $0x128] sm:$0x3] %vm4476_vm11, %v7767_v1 }
  0x62   :  { %4515 = vst.msk [vmem:[#allocation3 + $0x138] sm:$0x3] %vm4476_vm11, %v7767_v1 }
  0x63   :  { %2220 = vrot.lane.b32.xlu1 %v8202_v22, %s7773_s19  ;;  %5691 = vst.msk [vmem:[#allocation4] sm:$0x3f] %vm5690_vm1, %v7767_v1  ;;  %5692 = vst.msk [vmem:[#allocation4 + $0x8] sm:$0x3f] %vm5690_vm1, %v7767_v1 }
  0x64   :  { %1966 = vrot.lane.b32.xlu0 %v620_v21, %s7772_s25  ;;  %5693 = vst.msk [vmem:[#allocation4 + $0x10] sm:$0x3f] %vm5690_vm1, %v7767_v1  ;;  %5694 = vst.msk [vmem:[#allocation4 + $0x18] sm:$0x3f] %vm5690_vm1, %v7767_v1 }
  0x65   :  { %5695 = vst.msk [vmem:[#allocation4 + $0x20] sm:$0x3f] %vm5690_vm1, %v7767_v1  ;;  %5696 = vst.msk [vmem:[#allocation4 + $0x28] sm:$0x3f] %vm5690_vm1, %v7767_v1 }
  0x66   :  { %5697 = vst.msk [vmem:[#allocation4 + $0x30] sm:$0x3f] %vm5690_vm1, %v7767_v1  ;;  %5698 = vst.msk [vmem:[#allocation4 + $0x38] sm:$0x3f] %vm5690_vm1, %v7767_v1 }
  0x67   :  { %1456 = vrot.lane.b32.xlu1 %v8202_v22, %s7770_s22  ;;  %5699 = vst.msk [vmem:[#allocation4 + $0x40] sm:$0x3f] %vm5690_vm1, %v7767_v1  ;;  %5700 = vst.msk [vmem:[#allocation4 + $0x48] sm:$0x3f] %vm5690_vm1, %v7767_v1 }
  0x68   :  { %1202 = vrot.lane.b32.xlu0 %v620_v21, %s7768_s20  ;;  %v8361_v21 = vld [vmem:[#allocation2 + $0x90] sm:$0xff]  ;;  %5701 = vst.msk [vmem:[#allocation4 + $0x50] sm:$0x3f] %vm5690_vm1, %v7767_v1  ;;  %5702 = vst.msk [vmem:[#allocation4 + $0x58] sm:$0x3f] %vm5690_vm1, %v7767_v1 }
  0x69   :  { %6305 = vst.msk [vmem:[#allocation5] sm:$0xf] %vm5704_vm3, %v7767_v1  ;;  %6306 = vst.msk [vmem:[#allocation5 + $0x4] sm:$0xf] %vm5704_vm3, %v7767_v1 }
  0x6a   :  { %6307 = vst.msk [vmem:[#allocation5 + $0x8] sm:$0xf] %vm5704_vm3, %v7767_v1  ;;  %6308 = vst.msk [vmem:[#allocation5 + $0xc] sm:$0xf] %vm5704_vm3, %v7767_v1 }
  0x6b   :  { %2476 = vrot.lane.b32.xlu1 %v748_v30, %s7774_s0  ;;  %6309 = vst.msk [vmem:[#allocation5 + $0x10] sm:$0xf] %vm5704_vm3, %v7767_v1  ;;  %6310 = vst.msk [vmem:[#allocation5 + $0x14] sm:$0xf] %vm5704_vm3, %v7767_v1 }
  0x6c   :  { %2222 = vrot.lane.b32.xlu0 %v8226_v29, %s7773_s19  ;;  %6311 = vst.msk [vmem:[#allocation5 + $0x18] sm:$0xf] %vm5704_vm3, %v7767_v1  ;;  %6312 = vst.msk [vmem:[#allocation5 + $0x1c] sm:$0xf] %vm5704_vm3, %v7767_v1 }
  0x6f   :  { %1712 = vrot.lane.b32.xlu1 %v748_v30, %s7771_s2 }
  0x70   :  { %1458 = vrot.lane.b32.xlu0 %v8226_v29, %s7770_s22 }
  0x73   :  { %2732 = vrot.lane.b32.xlu1 %v812_v34, %s7775_s24 }
  0x74   :  { %2478 = vrot.lane.b32.xlu0 %v749_v33, %s7774_s0 }
  0x77   :  { %1714 = vrot.lane.b32.xlu1 %v749_v33, %s7771_s2 }
  0x78   :  { %948 = vrot.lane.b32.xlu0 %v748_v30, %s7769_s21  ;;  %v79_v30 = vld [vmem:[%s12152_s29 + $0x98] sm:$0xff] }
  0x79   :  { %254 = vst.msk [vmem:[#allocation2 + $0xf9] sm:$0xff] %vm124_vm0, %v79_v30 }
  0x7b   :  { %2734 = vrot.lane.b32.xlu1 %v813_v35, %s7775_s24 }
  0x7c   :  { %1968 = vrot.lane.b32.xlu0 %v812_v34, %s7772_s25 }
  0x7f   :  { %1204 = vrot.lane.b32.xlu1 %v812_v34, %s7768_s20 }
  0x80   :  { %950 = vrot.lane.b32.xlu0 %v749_v33, %s7769_s21 }
  0x83   :  { %2224 = vrot.lane.b32.xlu1 %v8249_v37, %s7773_s19 }
  0x84   :  { %1970 = vrot.lane.b32.xlu0 %v813_v35, %s7772_s25 }
  0x87   :  { %1460 = vrot.lane.b32.xlu1 %v8249_v37, %s7770_s22 }
  0x88   :  { %1206 = vrot.lane.b32.xlu0 %v813_v35, %s7768_s20 }
  0x8b   :  { %2480 = vrot.lane.b32.xlu1 %v750_v40, %s7774_s0 }
  0x8c   :  { %2226 = vrot.lane.b32.xlu0 %v8261_v39, %s7773_s19 }
  0x8f   :  { %1716 = vrot.lane.b32.xlu1 %v750_v40, %s7771_s2 }
  0x90   :  { %1462 = vrot.lane.b32.xlu0 %v8261_v39, %s7770_s22 }
  0x93   :  { %2736 = vrot.lane.b32.xlu1 %v814_v42, %s7775_s24 }
  0x94   :  { %2482 = vrot.lane.b32.xlu0 %v751_v41, %s7774_s0 }
  0x97   :  { %1718 = vrot.lane.b32.xlu1 %v751_v41, %s7771_s2 }
  0x98   :  { %952 = vrot.lane.b32.xlu0 %v750_v40, %s7769_s21  ;;  %v8387_v40 = vld [vmem:[#allocation2 + $0x98] sm:$0xff] }
  0x9b   :  { %2738 = vrot.lane.b32.xlu1 %v815_v43, %s7775_s24 }
  0x9c   :  { %1972 = vrot.lane.b32.xlu0 %v814_v42, %s7772_s25 }
  0x9f   :  { %1208 = vrot.lane.b32.xlu1 %v814_v42, %s7768_s20 }
  0xa0   :  { %954 = vrot.lane.b32.xlu0 %v751_v41, %s7769_s21  ;;  %v756_v41 = vld [vmem:[#allocation2 + $0x91] sm:$0xff] }
  0xa3   :  { %2228 = vrot.lane.b32.xlu1 %v8281_v45, %s7773_s19 }
  0xa4   :  { %1974 = vrot.lane.b32.xlu0 %v815_v43, %s7772_s25 }
  0xa7   :  { %1464 = vrot.lane.b32.xlu1 %v8281_v45, %s7770_s22 }
  0xa8   :  { %1210 = vrot.lane.b32.xlu0 %v815_v43, %s7768_s20 }
  0xab   :  { %2484 = vrot.lane.b32.xlu1 %v752_v48, %s7774_s0 }
  0xac   :  { %2230 = vrot.lane.b32.xlu0 %v8293_v47, %s7773_s19 }
  0xaf   :  { %1720 = vrot.lane.b32.xlu1 %v752_v48, %s7771_s2 }
  0xb0   :  { %1466 = vrot.lane.b32.xlu0 %v8293_v47, %s7770_s22 }
  0xb3   :  { %2740 = vrot.lane.b32.xlu1 %v816_v50, %s7775_s24 }
  0xb4   :  { %2486 = vrot.lane.b32.xlu0 %v753_v49, %s7774_s0 }
  0xb7   :  { %1722 = vrot.lane.b32.xlu1 %v753_v49, %s7771_s2 }
  0xb8   :  { %956 = vrot.lane.b32.xlu0 %v752_v48, %s7769_s21 }
  0xbb   :  { %2742 = vrot.lane.b32.xlu1 %v817_v51, %s7775_s24 }
  0xbc   :  { %1976 = vrot.lane.b32.xlu0 %v816_v50, %s7772_s25 }
  0xbd   :  { %v1197_v53 = vpop.permute.xlu1 %1196 }
  0xbe   :  { %v941_v54 = vpop.permute.xlu0 %940 }
  0xbf   :  { %1212 = vrot.lane.b32.xlu1 %v816_v50, %s7768_s20  ;;  %v2924_v17 = vsel %vm124_vm0, %v299_v13, %v941_v54  ;;  %v757_v54 = vld [vmem:[#allocation2 + $0x99] sm:$0xff] }
  0xc0   :  { %958 = vrot.lane.b32.xlu0 %v753_v49, %s7769_s21  ;;  %v2989_v20 = vsel %vm2988_vm2, %v2924_v17, %v1197_v53 }
  0xc1   :  { %v8315_v56 = vpop.permute.xlu1 %1198 }
  0xc2   :  { %v943_v57 = vpop.permute.xlu0 %942 }
  0xc3   :  { %2232 = vrot.lane.b32.xlu1 %v8313_v55, %s7773_s19  ;;  %v2925_v32 = vsel %vm124_vm0, %v300_v26, %v943_v57 }
  0xc4   :  { %1978 = vrot.lane.b32.xlu0 %v817_v51, %s7772_s25  ;;  %v2990_v38 = vsel %vm2988_vm2, %v2925_v32, %v8315_v56  ;;  %v820_v56 = vld [vmem:[#allocation2 + $0x92] sm:$0xff] }
  0xc5   :  { %v8324_v59 = vpop.permute.xlu1 %1454 }
  0xc6   :  { %v1453_v60 = vpop.permute.xlu0 %1452  ;;  %v3055_v42 = vsel %vm3053_vm4, %v2990_v38, %v8324_v59  ;;  %v822_v38 = vld [vmem:[#allocation2 + $0xaa] sm:$0xff] }
  0xc7   :  { %1468 = vrot.lane.b32.xlu1 %v8313_v55, %s7770_s22  ;;  %v3054_v23 = vsel %vm3053_vm4, %v2989_v20, %v1453_v60 }
  0xc8   :  { %1214 = vrot.lane.b32.xlu0 %v817_v51, %s7768_s20 }
  0xc9   :  { %v8331_v0 = vpop.permute.xlu1 %944 }
  0xca   :  { %v1709_v63 = vpop.permute.xlu0 %1708 }
  0xcb   :  { %2488 = vrot.lane.b32.xlu1 %v754_v62, %s7774_s0  ;;  %v3119_v27 = vsel %vm3118_vm5, %v3054_v23, %v1709_v63 }
  0xcc   :  { %2234 = vrot.lane.b32.xlu0 %v8329_v61, %s7773_s19 }
  0xcd   :  { %v1965_v3 = vpop.permute.xlu1 %1964 }
  0xce   :  { %v1711_v2 = vpop.permute.xlu0 %1710  ;;  %v3184_v28 = vsel %vm3183_vm6, %v3119_v27, %v1965_v3  ;;  %v80_v3 = vld [vmem:[%s12152_s29 + $0xa0] sm:$0xff]  ;;  %v8458_v27 = vld [vmem:[#allocation2 + $0xb0] sm:$0xff] }
  0xcf   :  { %1724 = vrot.lane.b32.xlu1 %v754_v62, %s7771_s2  ;;  %v3120_v46 = vsel %vm3118_vm5, %v3055_v42, %v1711_v2  ;;  %255 = vst.msk [vmem:[#allocation2 + $0x109] sm:$0xff] %vm124_vm0, %v80_v3 }
  0xd0   :  { %1470 = vrot.lane.b32.xlu0 %v8329_v61, %s7770_s22 }
  0xd1   :  { %v8341_v7 = vpop.permute.xlu1 %1200 }
  0xd2   :  { %v8339_v6 = vpop.permute.xlu0 %946 }
  0xd3   :  { %2744 = vrot.lane.b32.xlu1 %v818_v5, %s7775_s24 }
  0xd4   :  { %2490 = vrot.lane.b32.xlu0 %v755_v4, %s7774_s0 }
  0xd5   :  { %v2221_v9 = vpop.permute.xlu1 %2220 }
  0xd6   :  { %v1967_v8 = vpop.permute.xlu0 %1966  ;;  %v3249_v31 = vsel %vm3248_vm7, %v3184_v28, %v2221_v9  ;;  %v758_v28 = vld [vmem:[#allocation2 + $0xa9] sm:$0xff] }
  0xd7   :  { %1726 = vrot.lane.b32.xlu1 %v755_v4, %s7771_s2  ;;  %v3185_v48 = vsel %vm3183_vm6, %v3120_v46, %v1967_v8  ;;  %v2926_v8 = vsel %vm124_vm0, %v8186_v16, %v8331_v0  ;;  %v81_v0 = vld [vmem:[%s12152_s29 + $0xa8] sm:$0xff] }
  0xd8   :  { %960 = vrot.lane.b32.xlu0 %v754_v62, %s7769_s21  ;;  %v821_v62 = vld [vmem:[#allocation2 + $0x9a] sm:$0xff]  ;;  %v2991_v9 = vsel %vm2988_vm2, %v2926_v8, %v8341_v7  ;;  %256 = vst.msk [vmem:[#allocation2 + $0x111] sm:$0xff] %vm124_vm0, %v81_v0 }
  0xd9   :  { %v8349_v12 = vpop.permute.xlu1 %1456 }
  0xda   :  { %v8347_v11 = vpop.permute.xlu0 %1202  ;;  %v3056_v13 = vsel %vm3053_vm4, %v2991_v9, %v8349_v12 }
  0xdb   :  { %2746 = vrot.lane.b32.xlu1 %v819_v10, %s7775_s24 }
  0xdc   :  { %1980 = vrot.lane.b32.xlu0 %v818_v5, %s7772_s25 }
  0xdd   :  { %v2477_v19 = vpop.permute.xlu1 %2476 }
  0xde   :  { %v2223_v18 = vpop.permute.xlu0 %2222  ;;  %v3314_v33 = vsel %vm3313_vm8, %v3249_v31, %v2477_v19 }
  0xdf   :  { %1216 = vrot.lane.b32.xlu1 %v818_v5, %s7768_s20  ;;  %v3250_v49 = vsel %vm3248_vm7, %v3185_v48, %v2223_v18  ;;  %v823_v48 = vld [vmem:[#allocation2 + $0xb2] sm:$0xff] }
  0xe0   :  { %962 = vrot.lane.b32.xlu0 %v755_v4, %s7769_s21 }
  0xe1   :  { %v8366_v25 = vpop.permute.xlu1 %1712 }
  0xe2   :  { %v8364_v24 = vpop.permute.xlu0 %1458  ;;  %v3121_v18 = vsel %vm3118_vm5, %v3056_v13, %v8366_v25  ;;  %v2927_v25 = vsel %vm124_vm0, %v8184_v15, %v8339_v6 }
  0xe3   :  { %2236 = vrot.lane.b32.xlu1 %v8361_v21, %s7773_s19  ;;  %v2992_v26 = vsel %vm2988_vm2, %v2927_v25, %v8347_v11  ;;  %v761_v25 = vld [vmem:[#allocation2 + $0xc9] sm:$0xff] }
  0xe4   :  { %1982 = vrot.lane.b32.xlu0 %v819_v10, %s7772_s25  ;;  %v3057_v30 = vsel %vm3053_vm4, %v2992_v26, %v8364_v24  ;;  %v824_v26 = vld [vmem:[#allocation2 + $0xc2] sm:$0xff] }
  0xe5   :  { %v2733_v35 = vpop.permute.xlu1 %2732 }
  0xe6   :  { %v2479_v34 = vpop.permute.xlu0 %2478  ;;  %v3379_v36 = vsel %vm3378_vm9, %v3314_v33, %v2733_v35 }
  0xe7   :  { %1472 = vrot.lane.b32.xlu1 %v8361_v21, %s7770_s22  ;;  %7424 = vmatprep.mubr.msk.f32.mxu0 %vm3448_vm10, %v3379_v36  ;;  %v3315_v50 = vsel %vm3313_vm8, %v3250_v49, %v2479_v34  ;;  %v759_v36 = vld [vmem:[#allocation2 + $0xb1] sm:$0xff] }
  0xe8   :  { %1218 = vrot.lane.b32.xlu0 %v819_v10, %s7768_s20  ;;  %v8430_v10 = vld [vmem:[#allocation2 + $0xa8] sm:$0xff] }
  0xe9   :  { %v1715_v44 = vpop.permute.xlu1 %1714 }
  0xea   :  { %v8391_v43 = vpop.permute.xlu0 %948  ;;  %v3122_v15 = vsel %vm3118_vm5, %v3057_v30, %v1715_v44 }
  0xeb   :  { %2492 = vrot.lane.b32.xlu1 %v756_v41, %s7774_s0 }
  0xec   :  { %2238 = vrot.lane.b32.xlu0 %v8387_v40, %s7773_s19 }
  0xed   :  { %v2735_v52 = vpop.permute.xlu1 %2734 }
  0xee   :  { %v1969_v51 = vpop.permute.xlu0 %1968  ;;  %v3380_v53 = vsel %vm3378_vm9, %v3315_v50, %v2735_v52 }
  0xef   :  { %1728 = vrot.lane.b32.xlu1 %v756_v41, %s7771_s2  ;;  %7425 = vmatmul.mubr.msk.f32.vlgmr.msra.gmra.mrb[0].mxu0 %vm3448_vm10, %v3380_v53  ;;  %v3186_v16 = vsel %vm3183_vm6, %v3121_v18, %v1969_v51  ;;  %v82_v51 = vld [vmem:[%s12152_s29 + $0xb0] sm:$0xff]  ;;  %v8528_v18 = vld [vmem:[#allocation2 + $0xc8] sm:$0xff] }
  0xf0   :  { %1474 = vrot.lane.b32.xlu0 %v8387_v40, %s7770_s22  ;;  %257 = vst.msk [vmem:[#allocation2 + $0x121] sm:$0xff] %vm124_vm0, %v82_v51 }
  0xf1   :  { %v8407_v58 = vpop.permute.xlu1 %1204 }
  0xf2   :  { %v8405_v57 = vpop.permute.xlu0 %950 }
  0xf3   :  { %2748 = vrot.lane.b32.xlu1 %v820_v56, %s7775_s24  ;;  %v2929_v13 = vsel %vm124_vm0, %v8226_v29, %v8405_v57 }
  0xf4   :  { %2494 = vrot.lane.b32.xlu0 %v757_v54, %s7774_s0 }
  0xf5   :  { %v2225_v60 = vpop.permute.xlu1 %2224 }
  0xf6   :  { %v1971_v59 = vpop.permute.xlu0 %1970  ;;  %v3251_v7 = vsel %vm3248_vm7, %v3186_v16, %v2225_v60  ;;  %v760_v16 = vld [vmem:[#allocation2 + $0xc1] sm:$0xff] }
  0xf7   :  { %1730 = vrot.lane.b32.xlu1 %v757_v54, %s7771_s2  ;;  %v3187_v6 = vsel %vm3183_vm6, %v3122_v15, %v1971_v59  ;;  %v8501_v59 = vld [vmem:[#allocation2 + $0xc0] sm:$0xff] }
  0xf8   :  { %964 = vrot.lane.b32.xlu0 %v756_v41, %s7769_s21 }
  0xf9   :  { %v8415_v2 = vpop.permute.xlu1 %1460 }
  0xfa   :  { %v8413_v63 = vpop.permute.xlu0 %1206 }
  0xfb   :  { %2750 = vrot.lane.b32.xlu1 %v821_v62, %s7775_s24 }
  0xfc   :  { %1984 = vrot.lane.b32.xlu0 %v820_v56, %s7772_s25 }
  0xfd   :  { %v2481_v5 = vpop.permute.xlu1 %2480 }
  0xfe   :  { %v2227_v4 = vpop.permute.xlu0 %2226  ;;  %v3316_v12 = vsel %vm3313_vm8, %v3251_v7, %v2481_v5 }
  0xff   :  { %1220 = vrot.lane.b32.xlu1 %v820_v56, %s7768_s20  ;;  %v3252_v11 = vsel %vm3248_vm7, %v3187_v6, %v2227_v4  ;;  %v825_v6 = vld [vmem:[#allocation2 + $0xca] sm:$0xff] }
 0x100   :  { %966 = vrot.lane.b32.xlu0 %v757_v54, %s7769_s21  ;;  %v2928_v54 = vsel %vm124_vm0, %v8202_v22, %v8391_v43  ;;  %v83_v22 = vld [vmem:[%s12152_s29 + $0xb8] sm:$0xff] }
 0x101   :  { %v1717_v17 = vpop.permute.xlu1 %1716  ;;  %v2993_v56 = vsel %vm2988_vm2, %v2928_v54, %v8407_v58  ;;  %258 = vst.msk [vmem:[#allocation2 + $0x129] sm:$0xff] %vm124_vm0, %v83_v22 }
 0x102   :  { %v8434_v14 = vpop.permute.xlu0 %1462  ;;  %v3058_v60 = vsel %vm3053_vm4, %v2993_v56, %v8415_v2 }
 0x103   :  { %2240 = vrot.lane.b32.xlu1 %v8430_v10, %s7773_s19  ;;  %v3123_v4 = vsel %vm3118_vm5, %v3058_v60, %v1717_v17  ;;  %v2994_v17 = vsel %vm2988_vm2, %v2929_v13, %v8413_v63  ;;  %v763_v13 = vld [vmem:[#allocation2 + $0xe1] sm:$0xff] }
 0x104   :  { %1986 = vrot.lane.b32.xlu0 %v821_v62, %s7772_s25  ;;  %v3059_v0 = vsel %vm3053_vm4, %v2994_v17, %v8434_v14  ;;  %v826_v17 = vld [vmem:[#allocation2 + $0xda] sm:$0xff] }
 0x105   :  { %v2737_v20 = vpop.permute.xlu1 %2736 }
 0x106   :  { %v2483_v19 = vpop.permute.xlu0 %2482  ;;  %v3381_v23 = vsel %vm3378_vm9, %v3316_v12, %v2737_v20 }
 0x107   :  { %1476 = vrot.lane.b32.xlu1 %v8430_v10, %s7770_s22  ;;  %7427 = vmatprep.mubr.msk.f32.mxu0 %vm3448_vm10, %v3381_v23  ;;  %v3317_v33 = vsel %vm3313_vm8, %v3252_v11, %v2483_v19 }
 0x108   :  { %1222 = vrot.lane.b32.xlu0 %v821_v62, %s7768_s20 }
 0x109   :  { %v1719_v32 = vpop.permute.xlu1 %1718 }
 0x10a   :  { %v8462_v31 = vpop.permute.xlu0 %952  ;;  %v3124_v29 = vsel %vm3118_vm5, %v3059_v0, %v1719_v32 }
 0x10b   :  { %2496 = vrot.lane.b32.xlu1 %v758_v28, %s7774_s0 }
 0x10c   :  { %2242 = vrot.lane.b32.xlu0 %v8458_v27, %s7773_s19 }
 0x10d   :  { %v2739_v35 = vpop.permute.xlu1 %2738 }
 0x10e   :  { %v1973_v34 = vpop.permute.xlu0 %1972  ;;  %v3382_v24 = vsel %vm3378_vm9, %v3317_v33, %v2739_v35 }
 0x10f   :  { %1732 = vrot.lane.b32.xlu1 %v758_v28, %s7771_s2  ;;  %7428 = vmatmul.mubr.msk.f32.gmra.mrb[2].mxu0 %vm3448_vm10, %v3382_v24  ;;  %v3188_v5 = vsel %vm3183_vm6, %v3123_v4, %v1973_v34  ;;  %v84_v34 = vld [vmem:[%s12152_s29 + $0xc0] sm:$0xff] }
 0x110   :  { %1478 = vrot.lane.b32.xlu0 %v8458_v27, %s7770_s22  ;;  %259 = vst.msk [vmem:[#allocation2 + $0x139] sm:$0xff] %vm124_vm0, %v84_v34  ;;  %v8598_v4 = vld [vmem:[#allocation2 + $0xe0] sm:$0xff] }
 0x111   :  { %v8478_v42 = vpop.permute.xlu1 %1208 }
 0x112   :  { %v8476_v41 = vpop.permute.xlu0 %954 }
 0x113   :  { %2752 = vrot.lane.b32.xlu1 %v822_v38, %s7775_s24  ;;  %v2931_v60 = vsel %vm124_vm0, %v8261_v39, %v8476_v41 }
 0x114   :  { %2498 = vrot.lane.b32.xlu0 %v759_v36, %s7774_s0 }
 0x115   :  { %v2229_v46 = vpop.permute.xlu1 %2228 }
 0x116   :  { %v1975_v44 = vpop.permute.xlu0 %1974  ;;  %v3253_v43 = vsel %vm3248_vm7, %v3188_v5, %v2229_v46  ;;  %v762_v5 = vld [vmem:[#allocation2 + $0xd9] sm:$0xff] }
 0x117   :  { %1734 = vrot.lane.b32.xlu1 %v759_v36, %s7771_s2  ;;  %v3189_v57 = vsel %vm3183_vm6, %v3124_v29, %v1975_v44  ;;  %v8571_v44 = vld [vmem:[#allocation2 + $0xd8] sm:$0xff] }
 0x118   :  { %968 = vrot.lane.b32.xlu0 %v758_v28, %s7769_s21 }
 0x119   :  { %v8486_v50 = vpop.permute.xlu1 %1464 }
 0x11a   :  { %v8484_v49 = vpop.permute.xlu0 %1210 }
 0x11b   :  { %2754 = vrot.lane.b32.xlu1 %v823_v48, %s7775_s24 }
 0x11c   :  { %1988 = vrot.lane.b32.xlu0 %v822_v38, %s7772_s25 }
 0x11d   :  { %v2485_v53 = vpop.permute.xlu1 %2484 }
 0x11e   :  { %v2231_v52 = vpop.permute.xlu0 %2230  ;;  %v3318_v58 = vsel %vm3313_vm8, %v3253_v43, %v2485_v53 }
 0x11f   :  { %1224 = vrot.lane.b32.xlu1 %v822_v38, %s7768_s20  ;;  %v3254_v63 = vsel %vm3248_vm7, %v3189_v57, %v2231_v52  ;;  %v827_v57 = vld [vmem:[#allocation2 + $0xe2] sm:$0xff] }
 0x120   :  { %970 = vrot.lane.b32.xlu0 %v759_v36, %s7769_s21  ;;  %v2930_v36 = vsel %vm124_vm0, %v8249_v37, %v8462_v31  ;;  %v85_v37 = vld [vmem:[%s12152_s29 + $0xc8] sm:$0xff] }
 0x121   :  { %v1721_v3 = vpop.permute.xlu1 %1720  ;;  %v2995_v38 = vsel %vm2988_vm2, %v2930_v36, %v8478_v42  ;;  %260 = vst.msk [vmem:[#allocation2 + $0x141] sm:$0xff] %vm124_vm0, %v85_v37 }
 0x122   :  { %v8505_v62 = vpop.permute.xlu0 %1466  ;;  %v3060_v46 = vsel %vm3053_vm4, %v2995_v38, %v8486_v50 }
 0x123   :  { %2244 = vrot.lane.b32.xlu1 %v8501_v59, %s7773_s19  ;;  %v3125_v52 = vsel %vm3118_vm5, %v3060_v46, %v1721_v3  ;;  %v2996_v3 = vsel %vm2988_vm2, %v2931_v60, %v8484_v49  ;;  %v765_v60 = vld [vmem:[#allocation2 + $0xf9] sm:$0xff] }
 0x124   :  { %1990 = vrot.lane.b32.xlu0 %v823_v48, %s7772_s25  ;;  %v3061_v22 = vsel %vm3053_vm4, %v2996_v3, %v8505_v62  ;;  %v828_v3 = vld [vmem:[#allocation2 + $0xf2] sm:$0xff] }
 0x125   :  { %v2741_v8 = vpop.permute.xlu1 %2740 }
 0x126   :  { %v2487_v2 = vpop.permute.xlu0 %2486  ;;  %v3383_v9 = vsel %vm3378_vm9, %v3318_v58, %v2741_v8 }
 0x127   :  { %1480 = vrot.lane.b32.xlu1 %v8501_v59, %s7770_s22  ;;  %7430 = vmatprep.mubr.msk.f32.mxu0 %vm3448_vm10, %v3383_v9  ;;  %v3319_v19 = vsel %vm3313_vm8, %v3254_v63, %v2487_v2 }
 0x128   :  { %1226 = vrot.lane.b32.xlu0 %v823_v48, %s7768_s20 }
 0x129   :  { %v1723_v12 = vpop.permute.xlu1 %1722 }
 0x12a   :  { %v8532_v7 = vpop.permute.xlu0 %956  ;;  %v3126_v39 = vsel %vm3118_vm5, %v3061_v22, %v1723_v12 }
 0x12b   :  { %2500 = vrot.lane.b32.xlu1 %v760_v16, %s7774_s0 }
 0x12c   :  { %2246 = vrot.lane.b32.xlu0 %v8528_v18, %s7773_s19 }
 0x12d   :  { %v2743_v23 = vpop.permute.xlu1 %2742 }
 0x12e   :  { %v1977_v20 = vpop.permute.xlu0 %1976  ;;  %v3384_v14 = vsel %vm3378_vm9, %v3319_v19, %v2743_v23 }
 0x12f   :  { %1736 = vrot.lane.b32.xlu1 %v760_v16, %s7771_s2  ;;  %7431 = vmatmul.mubr.msk.f32.gmra.mrb[4].mxu0 %vm3448_vm10, %v3384_v14  ;;  %v3190_v53 = vsel %vm3183_vm6, %v3125_v52, %v1977_v20  ;;  %v86_v20 = vld [vmem:[%s12152_s29 + $0xd0] sm:$0xff]  ;;  %v8670_v52 = vld [vmem:[#allocation2 + $0xf8] sm:$0xff] }
 0x130   :  { %1482 = vrot.lane.b32.xlu0 %v8528_v18, %s7770_s22  ;;  %261 = vst.msk [vmem:[#allocation2 + $0x151] sm:$0xff] %vm124_vm0, %v86_v20 }
 0x131   :  { %v8548_v30 = vpop.permute.xlu1 %1212 }
 0x132   :  { %v8546_v28 = vpop.permute.xlu0 %958 }
 0x133   :  { %2756 = vrot.lane.b32.xlu1 %v824_v26, %s7775_s24  ;;  %v2933_v46 = vsel %vm124_vm0, %v8293_v47, %v8546_v28 }
 0x134   :  { %2502 = vrot.lane.b32.xlu0 %v761_v25, %s7774_s0 }
 0x135   :  { %v2233_v15 = vpop.permute.xlu1 %2232 }
 0x136   :  { %v1979_v32 = vpop.permute.xlu0 %1978  ;;  %v3255_v31 = vsel %vm3248_vm7, %v3190_v53, %v2233_v15  ;;  %v764_v53 = vld [vmem:[#allocation2 + $0xf1] sm:$0xff] }
 0x137   :  { %1738 = vrot.lane.b32.xlu1 %v761_v25, %s7771_s2  ;;  %v3191_v41 = vsel %vm3183_vm6, %v3126_v39, %v1979_v32  ;;  %v8641_v32 = vld [vmem:[#allocation2 + $0xf0] sm:$0xff] }
 0x138   :  { %972 = vrot.lane.b32.xlu0 %v760_v16, %s7769_s21 }
 0x139   :  { %v8556_v33 = vpop.permute.xlu1 %1468 }
 0x13a   :  { %v8554_v11 = vpop.permute.xlu0 %1214 }
 0x13b   :  { %2758 = vrot.lane.b32.xlu1 %v825_v6, %s7775_s24 }
 0x13c   :  { %1992 = vrot.lane.b32.xlu0 %v824_v26, %s7772_s25 }
 0x13d   :  { %v2489_v24 = vpop.permute.xlu1 %2488 }
 0x13e   :  { %v2235_v35 = vpop.permute.xlu0 %2234  ;;  %v3320_v42 = vsel %vm3313_vm8, %v3255_v31, %v2489_v24 }
 0x13f   :  { %1228 = vrot.lane.b32.xlu1 %v824_v26, %s7768_s20  ;;  %v3256_v49 = vsel %vm3248_vm7, %v3191_v41, %v2235_v35  ;;  %v829_v41 = vld [vmem:[#allocation2 + $0xfa] sm:$0xff] }
 0x140   :  { %974 = vrot.lane.b32.xlu0 %v761_v25, %s7769_s21  ;;  %v2932_v25 = vsel %vm124_vm0, %v8281_v45, %v8532_v7  ;;  %v87_v7 = vld [vmem:[%s12152_s29 + $0xd8] sm:$0xff] }
 0x141   :  { %v1725_v51 = vpop.permute.xlu1 %1724  ;;  %v2997_v26 = vsel %vm2988_vm2, %v2932_v25, %v8548_v30  ;;  %262 = vst.msk [vmem:[#allocation2 + $0x159] sm:$0xff] %vm124_vm0, %v87_v7 }
 0x142   :  { %v8575_v48 = vpop.permute.xlu0 %1470  ;;  %v3062_v15 = vsel %vm3053_vm4, %v2997_v26, %v8556_v33 }
 0x143   :  { %2248 = vrot.lane.b32.xlu1 %v8571_v44, %s7773_s19  ;;  %v3127_v35 = vsel %vm3118_vm5, %v3062_v15, %v1725_v51  ;;  %v2998_v51 = vsel %vm2988_vm2, %v2933_v46, %v8554_v11  ;;  %v767_v46 = vld [vmem:[#allocation2 + $0x111] sm:$0xff] }
 0x144   :  { %1994 = vrot.lane.b32.xlu0 %v825_v6, %s7772_s25  ;;  %v3063_v37 = vsel %vm3053_vm4, %v2998_v51, %v8575_v48  ;;  %v830_v51 = vld [vmem:[#allocation2 + $0x10a] sm:$0xff] }
 0x145   :  { %v2745_v54 = vpop.permute.xlu1 %2744 }
 0x146   :  { %v2491_v50 = vpop.permute.xlu0 %2490  ;;  %v3385_v56 = vsel %vm3378_vm9, %v3320_v42, %v2745_v54 }
 0x147   :  { %1484 = vrot.lane.b32.xlu1 %v8571_v44, %s7770_s22  ;;  %7433 = vmatprep.mubr.msk.f32.mxu0 %vm3448_vm10, %v3385_v56  ;;  %v3321_v2 = vsel %vm3313_vm8, %v3256_v49, %v2491_v50 }
 0x148   :  { %1230 = vrot.lane.b32.xlu0 %v825_v6, %s7768_s20 }
 0x149   :  { %v1727_v58 = vpop.permute.xlu1 %1726 }
 0x14a   :  { %v8602_v43 = vpop.permute.xlu0 %960  ;;  %v3128_v47 = vsel %vm3118_vm5, %v3063_v37, %v1727_v58 }
 0x14b   :  { %2504 = vrot.lane.b32.xlu1 %v762_v5, %s7774_s0 }
 0x14c   :  { %2250 = vrot.lane.b32.xlu0 %v8598_v4, %s7773_s19 }
 0x14d   :  { %v2747_v9 = vpop.permute.xlu1 %2746 }
 0x14e   :  { %v1981_v8 = vpop.permute.xlu0 %1980  ;;  %v3386_v62 = vsel %vm3378_vm9, %v3321_v2, %v2747_v9 }
 0x14f   :  { %1740 = vrot.lane.b32.xlu1 %v762_v5, %s7771_s2  ;;  %7434 = vmatmul.mubr.msk.f32.gmra.mrb[6].mxu0 %vm3448_vm10, %v3386_v62  ;;  %v3192_v45 = vsel %vm3183_vm6, %v3127_v35, %v1981_v8  ;;  %v88_v8 = vld [vmem:[%s12152_s29 + $0xe0] sm:$0xff]  ;;  %v8785_v35 = vld [vmem:[#allocation2 + $0x110] sm:$0xff] }
 0x150   :  { %1486 = vrot.lane.b32.xlu0 %v8598_v4, %s7770_s22  ;;  %263 = vst.msk [vmem:[#allocation2 + $0x169] sm:$0xff] %vm124_vm0, %v88_v8 }
 0x151   :  { %v8618_v0 = vpop.permute.xlu1 %1216 }
 0x152   :  { %v8616_v16 = vpop.permute.xlu0 %962 }
 0x153   :  { %2760 = vrot.lane.b32.xlu1 %v826_v17, %s7775_s24  ;;  %v2935_v15 = vsel %vm124_vm0, %v8329_v61, %v8616_v16 }
 0x154   :  { %2506 = vrot.lane.b32.xlu0 %v763_v13, %s7774_s0 }
 0x155   :  { %v2237_v29 = vpop.permute.xlu1 %2236 }
 0x156   :  { %v1983_v12 = vpop.permute.xlu0 %1982  ;;  %v3257_v30 = vsel %vm3248_vm7, %v3192_v45, %v2237_v29  ;;  %v766_v45 = vld [vmem:[#allocation2 + $0x109] sm:$0xff] }
 0x157   :  { %1742 = vrot.lane.b32.xlu1 %v763_v13, %s7771_s2  ;;  %v3193_v28 = vsel %vm3183_vm6, %v3128_v47, %v1983_v12  ;;  %v8757_v12 = vld [vmem:[#allocation2 + $0x108] sm:$0xff] }
 0x158   :  { %976 = vrot.lane.b32.xlu0 %v762_v5, %s7769_s21 }
 0x159   :  { %v8626_v19 = vpop.permute.xlu1 %1472 }
 0x15a   :  { %v8624_v63 = vpop.permute.xlu0 %1218 }
 0x15b   :  { %2762 = vrot.lane.b32.xlu1 %v827_v57, %s7775_s24 }
 0x15c   :  { %1996 = vrot.lane.b32.xlu0 %v826_v17, %s7772_s25 }
 0x15d   :  { %v2493_v14 = vpop.permute.xlu1 %2492 }
 0x15e   :  { %v2239_v23 = vpop.permute.xlu0 %2238  ;;  %v3322_v33 = vsel %vm3313_vm8, %v3257_v30, %v2493_v14 }
 0x15f   :  { %1232 = vrot.lane.b32.xlu1 %v826_v17, %s7768_s20  ;;  %v3258_v11 = vsel %vm3248_vm7, %v3193_v28, %v2239_v23  ;;  %v831_v28 = vld [vmem:[#allocation2 + $0x112] sm:$0xff] }
 0x160   :  { %978 = vrot.lane.b32.xlu0 %v763_v13, %s7769_s21  ;;  %v2934_v13 = vsel %vm124_vm0, %v8313_v55, %v8602_v43  ;;  %v89_v43 = vld [vmem:[%s12152_s29 + $0xe8] sm:$0xff] }
 0x161   :  { %v8647_v34 = vpop.permute.xlu1 %1728  ;;  %v2999_v17 = vsel %vm2988_vm2, %v2934_v13, %v8618_v0  ;;  %264 = vst.msk [vmem:[#allocation2 + $0x171] sm:$0xff] %vm124_vm0, %v89_v43 }
 0x162   :  { %v8645_v6 = vpop.permute.xlu0 %1474  ;;  %v3064_v29 = vsel %vm3053_vm4, %v2999_v17, %v8626_v19 }
 0x163   :  { %2252 = vrot.lane.b32.xlu1 %v8641_v32, %s7773_s19  ;;  %v3129_v23 = vsel %vm3118_vm5, %v3064_v29, %v8647_v34  ;;  %v3000_v34 = vsel %vm2988_vm2, %v2935_v15, %v8624_v63  ;;  %v769_v15 = vld [vmem:[#allocation2 + $0x129] sm:$0xff] }
 0x164   :  { %1998 = vrot.lane.b32.xlu0 %v827_v57, %s7772_s25  ;;  %v3065_v7 = vsel %vm3053_vm4, %v3000_v34, %v8645_v6  ;;  %v832_v34 = vld [vmem:[#allocation2 + $0x122] sm:$0xff] }
 0x165   :  { %v2749_v36 = vpop.permute.xlu1 %2748 }
 0x166   :  { %v2495_v24 = vpop.permute.xlu0 %2494  ;;  %v3387_v38 = vsel %vm3378_vm9, %v3322_v33, %v2749_v36 }
 0x167   :  { %1488 = vrot.lane.b32.xlu1 %v8641_v32, %s7770_s22  ;;  %7436 = vmatprep.mubr.msk.f32.mxu0 %vm3448_vm10, %v3387_v38  ;;  %v3323_v50 = vsel %vm3313_vm8, %v3258_v11, %v2495_v24 }
 0x168   :  { %1234 = vrot.lane.b32.xlu0 %v827_v57, %s7768_s20 }
 0x169   :  { %v8676_v42 = vpop.permute.xlu1 %1730 }
 0x16a   :  { %v8674_v31 = vpop.permute.xlu0 %964  ;;  %v3130_v61 = vsel %vm3118_vm5, %v3065_v7, %v8676_v42 }
 0x16b   :  { %2508 = vrot.lane.b32.xlu1 %v764_v53, %s7774_s0 }
 0x16c   :  { %2254 = vrot.lane.b32.xlu0 %v8670_v52, %s7773_s19 }
 0x16d   :  { %v2751_v56 = vpop.permute.xlu1 %2750 }
 0x16e   :  { %v1985_v54 = vpop.permute.xlu0 %1984  ;;  %v3388_v48 = vsel %vm3378_vm9, %v3323_v50, %v2751_v56 }
 0x16f   :  { %1744 = vrot.lane.b32.xlu1 %v764_v53, %s7771_s2  ;;  %7437 = vmatmul.mubr.msk.f32.gmra.mrb[8].mxu0 %vm3448_vm10, %v3388_v48  ;;  %v3194_v55 = vsel %vm3183_vm6, %v3129_v23, %v1985_v54  ;;  %v90_v54 = vld [vmem:[%s12152_s29 + $0xf0] sm:$0xff]  ;;  %v8859_v23 = vld [vmem:[#allocation2 + $0x128] sm:$0xff] }
 0x170   :  { %1490 = vrot.lane.b32.xlu0 %v8670_v52, %s7770_s22  ;;  %265 = vst.msk [vmem:[#allocation2 + $0x181] sm:$0xff] %vm124_vm0, %v90_v54 }
 0x171   :  { %v8692_v22 = vpop.permute.xlu1 %1220 }
 0x172   :  { %v8690_v5 = vpop.permute.xlu0 %966 }
 0x173   :  { %2764 = vrot.lane.b32.xlu1 %v828_v3, %s7775_s24  ;;  %v2937_v29 = vsel %vm124_vm0, %v8387_v40, %v8690_v5 }
 0x174   :  { %2510 = vrot.lane.b32.xlu0 %v765_v60, %s7774_s0 }
 0x175   :  { %v2241_v39 = vpop.permute.xlu1 %2240 }
 0x176   :  { %v8696_v58 = vpop.permute.xlu0 %1986  ;;  %v3259_v0 = vsel %vm3248_vm7, %v3194_v55, %v2241_v39  ;;  %v768_v55 = vld [vmem:[#allocation2 + $0x121] sm:$0xff] }
 0x177   :  { %1746 = vrot.lane.b32.xlu1 %v765_v60, %s7771_s2  ;;  %v3195_v16 = vsel %vm3183_vm6, %v3130_v61, %v8696_v58  ;;  %v8830_v58 = vld [vmem:[#allocation2 + $0x120] sm:$0xff] }
 0x178   :  { %980 = vrot.lane.b32.xlu0 %v764_v53, %s7769_s21 }
 0x179   :  { %v8742_v2 = vpop.permute.xlu1 %1476 }
 0x17a   :  { %v8740_v49 = vpop.permute.xlu0 %1222 }
 0x17b   :  { %2766 = vrot.lane.b32.xlu1 %v829_v41, %s7775_s24 }
 0x17c   :  { %2000 = vrot.lane.b32.xlu0 %v828_v3, %s7772_s25 }
 0x17d   :  { %v2497_v62 = vpop.permute.xlu1 %2496 }
 0x17e   :  { %v2243_v9 = vpop.permute.xlu0 %2242  ;;  %v3324_v19 = vsel %vm3313_vm8, %v3259_v0, %v2497_v62 }
 0x17f   :  { %1236 = vrot.lane.b32.xlu1 %v828_v3, %s7768_s20  ;;  %v3260_v63 = vsel %vm3248_vm7, %v3195_v16, %v2243_v9  ;;  %v833_v16 = vld [vmem:[#allocation2 + $0x12a] sm:$0xff] }
 0x180   :  { %982 = vrot.lane.b32.xlu0 %v765_v60, %s7769_s21  ;;  %v2936_v60 = vsel %vm124_vm0, %v8361_v21, %v8674_v31  ;;  %v91_v31 = vld [vmem:[%s12152_s29 + $0xf8] sm:$0xff] }
 0x181   :  { %v1733_v20 = vpop.permute.xlu1 %1732  ;;  %v3001_v3 = vsel %vm2988_vm2, %v2936_v60, %v8692_v22  ;;  %266 = vst.msk [vmem:[#allocation2 + $0x189] sm:$0xff] %vm124_vm0, %v91_v31 }
 0x182   :  { %v8761_v57 = vpop.permute.xlu0 %1478  ;;  %v3066_v39 = vsel %vm3053_vm4, %v3001_v3, %v8742_v2 }
 0x183   :  { %2256 = vrot.lane.b32.xlu1 %v8757_v12, %s7773_s19  ;;  %v3131_v9 = vsel %vm3118_vm5, %v3066_v39, %v1733_v20  ;;  %v3002_v20 = vsel %vm2988_vm2, %v2937_v29, %v8740_v49 }
 0x184   :  { %2002 = vrot.lane.b32.xlu0 %v829_v41, %s7772_s25  ;;  %v3067_v43 = vsel %vm3053_vm4, %v3002_v20, %v8761_v57  ;;  %v8947_v20 = vld [vmem:[#allocation2 + $0x140] sm:$0xff] }
 0x185   :  { %v2753_v25 = vpop.permute.xlu1 %2752 }
 0x186   :  { %v2499_v14 = vpop.permute.xlu0 %2498  ;;  %v3389_v26 = vsel %vm3378_vm9, %v3324_v19, %v2753_v25 }
 0x187   :  { %1492 = vrot.lane.b32.xlu1 %v8757_v12, %s7770_s22  ;;  %7439 = vmatprep.mubr.msk.f32.mxu0 %vm3448_vm10, %v3389_v26  ;;  %v3325_v24 = vsel %vm3313_vm8, %v3260_v63, %v2499_v14 }
 0x188   :  { %1238 = vrot.lane.b32.xlu0 %v829_v41, %s7768_s20 }
 0x189   :  { %v1735_v33 = vpop.permute.xlu1 %1734 }
 0x18a   :  { %v8789_v30 = vpop.permute.xlu0 %968  ;;  %v3132_v40 = vsel %vm3118_vm5, %v3067_v43, %v1735_v33 }
 0x18b   :  { %2512 = vrot.lane.b32.xlu1 %v766_v45, %s7774_s0 }
 0x18c   :  { %2258 = vrot.lane.b32.xlu0 %v8785_v35, %s7773_s19 }
 0x18d   :  { %v2755_v6 = vpop.permute.xlu1 %2754 }
 0x18e   :  { %v1989_v36 = vpop.permute.xlu0 %1988  ;;  %v3390_v38 = vsel %vm3378_vm9, %v3325_v24, %v2755_v6 }
 0x18f   :  { %1748 = vrot.lane.b32.xlu1 %v766_v45, %s7771_s2  ;;  %7440 = vmatmul.mubr.msk.f32.gmra.mrb[10].mxu0 %vm3448_vm10, %v3390_v38  ;;  %v3196_v21 = vsel %vm3183_vm6, %v3131_v9, %v1989_v36  ;;  %v2938_v38 = vsel %vm124_vm0, %v8430_v10, %v8789_v30  ;;  %v8915_v30 = vld [vmem:[%s12154_s27] ss:$0 sm:$0xff] }
 0x190   :  { %1494 = vrot.lane.b32.xlu0 %v8785_v35, %s7770_s22 }
 0x191   :  { %v8807_v37 = vpop.permute.xlu1 %1224 }
 0x192   :  { %v8805_v53 = vpop.permute.xlu0 %970 }
 0x193   :  { %2768 = vrot.lane.b32.xlu1 %v830_v51, %s7775_s24 }
 0x194   :  { %2514 = vrot.lane.b32.xlu0 %v767_v46, %s7774_s0 }
 0x195   :  { %v2245_v47 = vpop.permute.xlu1 %2244 }
 0x196   :  { %v1991_v42 = vpop.permute.xlu0 %1990  ;;  %v3261_v22 = vsel %vm3248_vm7, %v3196_v21, %v2245_v47 }
 0x197   :  { %1750 = vrot.lane.b32.xlu1 %v767_v46, %s7771_s2  ;;  %v3197_v5 = vsel %vm3183_vm6, %v3132_v40, %v1991_v42  ;;  %v8903_v42 = vld [vmem:[#allocation2 + $0x138] sm:$0xff] }
 0x198   :  { %984 = vrot.lane.b32.xlu0 %v766_v45, %s7769_s21 }
 0x199   :  { %v8815_v50 = vpop.permute.xlu1 %1480 }
 0x19a   :  { %v8813_v11 = vpop.permute.xlu0 %1226 }
 0x19b   :  { %2770 = vrot.lane.b32.xlu1 %v831_v28, %s7775_s24 }
 0x19c   :  { %2004 = vrot.lane.b32.xlu0 %v830_v51, %s7772_s25 }
 0x19d   :  { %v2501_v48 = vpop.permute.xlu1 %2500 }
 0x19e   :  { %v2247_v56 = vpop.permute.xlu0 %2246  ;;  %v3326_v2 = vsel %vm3313_vm8, %v3261_v22, %v2501_v48  ;;  %v8923_v48 = vld [vmem:[%s12130_s3] ss:$0 sm:$0xff] }
 0x19f   :  { %1240 = vrot.lane.b32.xlu1 %v830_v51, %s7768_s20  ;;  %v3262_v49 = vsel %vm3248_vm7, %v3197_v5, %v2247_v56  ;;  %v3003_v51 = vsel %vm2988_vm2, %v2938_v38, %v8807_v37  ;;  %v94_v38 = vld [vmem:[%s12152_s29 + $0x110] sm:$0xff] }
 0x1a0   :  { %986 = vrot.lane.b32.xlu0 %v767_v46, %s7769_s21  ;;  %v92_v46 = vld [vmem:[%s12152_s29 + $0x100] sm:$0xff]  ;;  %v3068_v47 = vsel %vm3053_vm4, %v3003_v51, %v8815_v50  ;;  %269 = vst.msk [vmem:[#allocation2 + $0x1e1] sm:$0xff] %vm124_vm0, %v94_v38 }
 0x1a1   :  { %v8836_v8 = vpop.permute.xlu1 %1736  ;;  %267 = vst.msk [vmem:[#allocation2 + $0x1c9] sm:$0xff] %vm124_vm0, %v92_v46 }
 0x1a2   :  { %v8834_v41 = vpop.permute.xlu0 %1482  ;;  %v3133_v54 = vsel %vm3118_vm5, %v3068_v47, %v8836_v8 }
 0x1a3   :  { %2260 = vrot.lane.b32.xlu1 %v8830_v58, %s7773_s19 }
 0x1a4   :  { %2006 = vrot.lane.b32.xlu0 %v831_v28, %s7772_s25 }
 0x1a5   :  { %v2757_v13 = vpop.permute.xlu1 %2756 }
 0x1a6   :  { %v2503_v62 = vpop.permute.xlu0 %2502  ;;  %v3391_v17 = vsel %vm3378_vm9, %v3326_v2, %v2757_v13  ;;  %v2939_v2 = vsel %vm124_vm0, %v8458_v27, %v8805_v53  ;;  %v93_v13 = vld [vmem:[%s12152_s29 + $0x108] sm:$0xff]  ;;  %v770_v27 = vld [vmem:[#allocation2 + $0x139] sm:$0xff] }
 0x1a7   :  { %1496 = vrot.lane.b32.xlu1 %v8830_v58, %s7770_s22  ;;  %7442 = vmatprep.mubr.msk.f32.mxu0 %vm3448_vm10, %v3391_v17  ;;  %v3327_v14 = vsel %vm3313_vm8, %v3262_v49, %v2503_v62  ;;  %v3004_v17 = vsel %vm2988_vm2, %v2939_v2, %v8813_v11  ;;  %268 = vst.msk [vmem:[#allocation2 + $0x1d1] sm:$0xff] %vm124_vm0, %v93_v13 }
 0x1a8   :  { %1242 = vrot.lane.b32.xlu0 %v831_v28, %s7768_s20  ;;  %v3069_v53 = vsel %vm3053_vm4, %v3004_v17, %v8834_v41 }
 0x1a9   :  { %v8865_v19 = vpop.permute.xlu1 %1738 }
 0x1aa   :  { %v8863_v0 = vpop.permute.xlu0 %972  ;;  %v3134_v5 = vsel %vm3118_vm5, %v3069_v53, %v8865_v19  ;;  %v771_v19 = vld [vmem:[#allocation2 + $0x141] sm:$0xff]  ;;  %v772_v53 = vld [vmem:[#allocation2 + $0x151] sm:$0xff] }
 0x1ab   :  { %2516 = vrot.lane.b32.xlu1 %v768_v55, %s7774_s0  ;;  %v2940_v47 = vsel %vm124_vm0, %v8501_v59, %v8863_v0 }
 0x1ac   :  { %2262 = vrot.lane.b32.xlu0 %v8859_v23, %s7773_s19 }
 0x1ad   :  { %v2759_v26 = vpop.permute.xlu1 %2758 }
 0x1ae   :  { %v1993_v25 = vpop.permute.xlu0 %1992  ;;  %v3392_v57 = vsel %vm3378_vm9, %v3327_v14, %v2759_v26 }
 0x1af   :  { %1752 = vrot.lane.b32.xlu1 %v768_v55, %s7771_s2  ;;  %7443 = vmatmul.mubr.msk.f32.gmra.mrb[12].mxu0 %vm3448_vm10, %v3392_v57  ;;  %v3198_v37 = vsel %vm3183_vm6, %v3133_v54, %v1993_v25  ;;  %v834_v57 = vld [vmem:[#allocation2 + $0x13a] sm:$0xff] }
 0x1b0   :  { %1498 = vrot.lane.b32.xlu0 %v8859_v23, %s7770_s22 }
 0x1b1   :  { %v8881_v7 = vpop.permute.xlu1 %1228 }
 0x1b2   :  { %v8879_v45 = vpop.permute.xlu0 %974  ;;  %v3005_v54 = vsel %vm2988_vm2, %v2940_v47, %v8881_v7  ;;  %v95_v7 = vld [vmem:[%s12152_s29 + $0x118] sm:$0xff] }
 0x1b3   :  { %2772 = vrot.lane.b32.xlu1 %v832_v34, %s7775_s24  ;;  %270 = vst.msk [vmem:[#allocation2 + $0x1e9] sm:$0xff] %vm124_vm0, %v95_v7  ;;  %v96_v7 = vld [vmem:[%s12152_s29 + $0x120] sm:$0xff] }
 0x1b4   :  { %2518 = vrot.lane.b32.xlu0 %v769_v15, %s7774_s0  ;;  %271 = vst.msk [vmem:[#allocation2 + $0x1f9] sm:$0xff] %vm124_vm0, %v96_v7 }
 0x1b5   :  { %v2249_v61 = vpop.permute.xlu1 %2248 }
 0x1b6   :  { %v1995_v33 = vpop.permute.xlu0 %1994  ;;  %v3263_v50 = vsel %vm3248_vm7, %v3198_v37, %v2249_v61  ;;  %v8996_v37 = vld [vmem:[#allocation2 + $0x150] sm:$0xff] }
 0x1b7   :  { %1754 = vrot.lane.b32.xlu1 %v769_v15, %s7771_s2  ;;  %v3199_v11 = vsel %vm3183_vm6, %v3134_v5, %v1995_v33 }
 0x1b8   :  { %988 = vrot.lane.b32.xlu0 %v768_v55, %s7769_s21 }
 0x1b9   :  { %v8889_v24 = vpop.permute.xlu1 %1484 }
 0x1ba   :  { %v8887_v63 = vpop.permute.xlu0 %1230 }
 0x1bb   :  { %2774 = vrot.lane.b32.xlu1 %v833_v16, %s7775_s24 }
 0x1bc   :  { %2008 = vrot.lane.b32.xlu0 %v832_v34, %s7772_s25 }
 0x1bd   :  { %v2505_v6 = vpop.permute.xlu1 %2504 }
 0x1be   :  { %v2251_v36 = vpop.permute.xlu0 %2250  ;;  %v3328_v39 = vsel %vm3313_vm8, %v3263_v50, %v2505_v6 }
 0x1bf   :  { %1244 = vrot.lane.b32.xlu1 %v832_v34, %s7768_s20  ;;  %v3264_v41 = vsel %vm3248_vm7, %v3199_v11, %v2251_v36 }
 0x1c0   :  { %990 = vrot.lane.b32.xlu0 %v769_v15, %s7769_s21 }
 0x1c1   :  { %v8910_v10 = vpop.permute.xlu1 %1740 }
 0x1c2   :  { %v8908_v28 = vpop.permute.xlu0 %1486  ;;  %v7426_v56 = vpop.f32.mrb[0].mxu0 }
 0x1c3   :  { %2264 = vrot.lane.b32.xlu1 %v8903_v42, %s7773_s19  ;;  %v4038_v60 = vmul.f32 %v7426_v56, %v8915_v30  ;;  %v3711_v3 = vpop.f32.mrb[1].mxu0  ;;  %v3070_v56 = vsel %vm3053_vm4, %v3005_v54, %v8889_v24 }
 0x1c4   :  { %2010 = vrot.lane.b32.xlu0 %v833_v16, %s7772_s25  ;;  %v4037_v8 = vmul.f32 %v8915_v30, %v3711_v3  ;;  %v3135_v3 = vsel %vm3118_vm5, %v3070_v56, %v8910_v10 }
 0x1c5   :  { %v2761_v21 = vpop.permute.xlu1 %2760  ;;  %v4109_v31 = vadd.f32 %v8923_v48, %v4038_v60 }
 0x1c6   :  { %v2507_v9 = vpop.permute.xlu0 %2506  ;;  %v3393_v22 = vsel %vm3378_vm9, %v3328_v39, %v2761_v21  ;;  %v4108_v62 = vadd.f32 %v8923_v48, %v4037_v8 }
 0x1c7   :  { %1500 = vrot.lane.b32.xlu1 %v8903_v42, %s7770_s22  ;;  %v4173_v29 = vmax.f32 %v4109_v31, 0.0  ;;  %7445 = vmatprep.mubr.msk.f32.mxu0 %vm3448_vm10, %v3393_v22  ;;  %v3329_v49 = vsel %vm3313_vm8, %v3264_v41, %v2507_v9 }
 0x1c8   :  { %1246 = vrot.lane.b32.xlu0 %v833_v16, %s7768_s20  ;;  %v4172_v55 = vmax.f32 %v4108_v62, 0.0  ;;  %v835_v16 = vld [vmem:[#allocation2 + $0x142] sm:$0xff]  ;;  %v2941_v62 = vsel %vm124_vm0, %v8528_v18, %v8879_v45 }
 0x1c9   :  { %v8954_v40 = vpop.permute.xlu1 %1742  ;;  %4237 = vst.msk [vmem:[#allocation6 + $0x8] sm:$0xff] %vm2988_vm2, %v4173_v29  ;;  %v3006_v17 = vsel %vm2988_vm2, %v2941_v62, %v8887_v63 }
 0x1ca   :  { %v8952_v43 = vpop.permute.xlu0 %976  ;;  %4236 = vst.msk [vmem:[#allocation6] sm:$0xff] %vm2988_vm2, %v4172_v55  ;;  %v3071_v55 = vsel %vm3053_vm4, %v3006_v17, %v8908_v28 }
 0x1cb   :  { %2520 = vrot.lane.b32.xlu1 %v770_v27, %s7774_s0  ;;  %v3136_v11 = vsel %vm3118_vm5, %v3071_v55, %v8954_v40  ;;  %v773_v40 = vld [vmem:[#allocation2 + $0x159] sm:$0xff] }
 0x1cc   :  { %2266 = vrot.lane.b32.xlu0 %v8947_v20, %s7773_s19 }
 0x1cd   :  { %v2763_v25 = vpop.permute.xlu1 %2762 }
 0x1ce   :  { %v1997_v14 = vpop.permute.xlu0 %1996  ;;  %v3394_v26 = vsel %vm3378_vm9, %v3329_v49, %v2763_v25 }
 0x1cf   :  { %1756 = vrot.lane.b32.xlu1 %v770_v27, %s7771_s2  ;;  %7446 = vmatmul.mubr.msk.f32.gmra.mrb[14].mxu0 %vm3448_vm10, %v3394_v26  ;;  %v3200_v59 = vsel %vm3183_vm6, %v3135_v3, %v1997_v14  ;;  %v837_v3 = vld [vmem:[#allocation2 + $0x15a] sm:$0xff] }
 0x1d0   :  { %1502 = vrot.lane.b32.xlu0 %v8947_v20, %s7770_s22 }
 0x1d1   :  { %v8973_v34 = vpop.permute.xlu1 %1232  ;;  %v4300_v26 = vld [vmem:[#allocation6] ss:$2 sm:$0xff] }
 0x1d2   :  { %v8971_v15 = vpop.permute.xlu0 %978 }
 0x1d3   :  { %2776 = vrot.lane.b32.xlu1 %v834_v57, %s7775_s24 }
 0x1d4   :  { %2522 = vrot.lane.b32.xlu0 %v771_v19, %s7774_s0 }
 0x1d5   :  { %v2253_v61 = vpop.permute.xlu1 %2252 }
 0x1d6   :  { %v1999_v33 = vpop.permute.xlu0 %1998  ;;  %v3265_v24 = vsel %vm3248_vm7, %v3200_v59, %v2253_v61 }
 0x1d7   :  { %1758 = vrot.lane.b32.xlu1 %v771_v19, %s7771_s2  ;;  %v3201_v63 = vsel %vm3183_vm6, %v3136_v11, %v1999_v33  ;;  %v2943_v11 = vsel %vm124_vm0, %v8598_v4, %v8971_v15 }
 0x1d8   :  { %992 = vrot.lane.b32.xlu0 %v770_v27, %s7769_s21  ;;  %v9030_v27 = vld [vmem:[#allocation2 + $0x158] sm:$0xff] }
 0x1d9   :  { %v8981_v6 = vpop.permute.xlu1 %1488 }
 0x1da   :  { %v8979_v36 = vpop.permute.xlu0 %1234 }
 0x1db   :  { %2778 = vrot.lane.b32.xlu1 %v835_v16, %s7775_s24 }
 0x1dc   :  { %2012 = vrot.lane.b32.xlu0 %v834_v57, %s7772_s25 }
 0x1dd   :  { %v2509_v51 = vpop.permute.xlu1 %2508 }
 0x1de   :  { %v2255_v46 = vpop.permute.xlu0 %2254  ;;  %v3330_v10 = vsel %vm3313_vm8, %v3265_v24, %v2509_v51 }
 0x1df   :  { %1248 = vrot.lane.b32.xlu1 %v834_v57, %s7768_s20  ;;  %v3266_v28 = vsel %vm3248_vm7, %v3201_v63, %v2255_v46  ;;  %v836_v57 = vld [vmem:[#allocation2 + $0x152] sm:$0xff] }
 0x1e0   :  { %994 = vrot.lane.b32.xlu0 %v771_v19, %s7769_s21  ;;  %v4364_v19 = vld [vmem:[#allocation6 + $0x1] ss:$2 sm:$0xff] }
 0x1e1   :  { %v9002_v60 = vpop.permute.xlu1 %1744  ;;  %v4427_v46 = vmax.f32 %v4300_v26, %v4364_v19 }
 0x1e2   :  { %v9000_v50 = vpop.permute.xlu0 %1490  ;;  %v7429_v0 = vpop.f32.mrb[2].mxu0 }
 0x1e3   :  { %2268 = vrot.lane.b32.xlu1 %v8996_v37, %s7773_s19  ;;  %v4040_v39 = vmul.f32 %v7429_v0, %v8915_v30  ;;  %v3721_v8 = vpop.f32.mrb[3].mxu0 }
 0x1e4   :  { %2014 = vrot.lane.b32.xlu0 %v835_v16, %s7772_s25  ;;  %v4039_v9 = vmul.f32 %v8915_v30, %v3721_v8  ;;  %v2942_v8 = vsel %vm124_vm0, %v8571_v44, %v8952_v43 }
 0x1e5   :  { %v2765_v31 = vpop.permute.xlu1 %2764  ;;  %v4111_v22 = vadd.f32 %v8923_v48, %v4040_v39 }
 0x1e6   :  { %v2511_v21 = vpop.permute.xlu0 %2510  ;;  %v3395_v2 = vsel %vm3378_vm9, %v3330_v10, %v2765_v31  ;;  %v4110_v13 = vadd.f32 %v8923_v48, %v4039_v9  ;;  %v3007_v10 = vsel %vm2988_vm2, %v2942_v8, %v8973_v34  ;;  %v9079_v9 = vld [vmem:[#allocation2 + $0x168] sm:$0xff] }
 0x1e7   :  { %1504 = vrot.lane.b32.xlu1 %v8996_v37, %s7770_s22  ;;  %v4175_v29 = vmax.f32 %v4111_v22, 0.0  ;;  %7448 = vmatprep.mubr.msk.f32.mxu0 %vm3448_vm10, %v3395_v2  ;;  %v3331_v41 = vsel %vm3313_vm8, %v3266_v28, %v2511_v21  ;;  %v3072_v21 = vsel %vm3053_vm4, %v3007_v10, %v8981_v6  ;;  %v97_v34 = vld [vmem:[%s12152_s29 + $0x128] sm:$0xff]  ;;  %v3008_v28 = vsel %vm2988_vm2, %v2943_v11, %v8979_v36 }
 0x1e8   :  { %1250 = vrot.lane.b32.xlu0 %v835_v16, %s7768_s20  ;;  %v4174_v18 = vmax.f32 %v4110_v13, 0.0  ;;  %v3137_v2 = vsel %vm3118_vm5, %v3072_v21, %v9002_v60  ;;  %272 = vst.msk [vmem:[#allocation2 + $0x201] sm:$0xff] %vm124_vm0, %v97_v34 }
 0x1e9   :  { %v9036_v5 = vpop.permute.xlu1 %1746  ;;  %4239 = vst.msk [vmem:[#allocation6 + $0x18] sm:$0xff] %vm2988_vm2, %v4175_v29 }
 0x1ea   :  { %v9034_v45 = vpop.permute.xlu0 %980  ;;  %4238 = vst.msk [vmem:[#allocation6 + $0x10] sm:$0xff] %vm2988_vm2, %v4174_v18 }
 0x1eb   :  { %2524 = vrot.lane.b32.xlu1 %v772_v53, %s7774_s0  ;;  %v2944_v21 = vsel %vm124_vm0, %v8641_v32, %v9034_v45 }
 0x1ec   :  { %2270 = vrot.lane.b32.xlu0 %v9030_v27, %s7773_s19 }
 0x1ed   :  { %v2767_v14 = vpop.permute.xlu1 %2766 }
 0x1ee   :  { %v2001_v49 = vpop.permute.xlu0 %2000  ;;  %v3396_v25 = vsel %vm3378_vm9, %v3331_v41, %v2767_v14  ;;  %v774_v14 = vld [vmem:[#allocation2 + $0x169] sm:$0xff] }
 0x1ef   :  { %1760 = vrot.lane.b32.xlu1 %v772_v53, %s7771_s2  ;;  %7449 = vmatmul.mubr.msk.f32.gmra.mrb[16].mxu0 %vm3448_vm10, %v3396_v25  ;;  %v3202_v44 = vsel %vm3183_vm6, %v3137_v2, %v2001_v49  ;;  %v9113_v49 = vld [vmem:[#allocation2 + $0x170] sm:$0xff]  ;;  %v3073_v25 = vsel %vm3053_vm4, %v3008_v28, %v9000_v50 }
 0x1f0   :  { %1506 = vrot.lane.b32.xlu0 %v9030_v27, %s7770_s22  ;;  %v3138_v26 = vsel %vm3118_vm5, %v3073_v25, %v9036_v5  ;;  %v775_v5 = vld [vmem:[#allocation2 + $0x171] sm:$0xff]  ;;  %v776_v25 = vld [vmem:[#allocation2 + $0x181] sm:$0xff] }
 0x1f1   :  { %v9055_v61 = vpop.permute.xlu1 %1236  ;;  %v4302_v16 = vld [vmem:[#allocation6 + $0x10] ss:$2 sm:$0xff]  ;;  %v4366_v38 = vld [vmem:[#allocation6 + $0x11] ss:$2 sm:$0xff] }
 0x1f2   :  { %v9053_v33 = vpop.permute.xlu0 %982  ;;  %v4428_v51 = vmax.f32 %v4302_v16, %v4366_v38  ;;  %v3009_v2 = vsel %vm2988_vm2, %v2944_v21, %v9055_v61  ;;  %v99_v61 = vld [vmem:[%s12152_s29 + $0x138] sm:$0xff] }
 0x1f3   :  { %2780 = vrot.lane.b32.xlu1 %v836_v57, %s7775_s24  ;;  %274 = vst.msk [vmem:[#allocation2 + $0x219] sm:$0xff] %vm124_vm0, %v99_v61  ;;  %v2945_v11 = vsel %vm124_vm0, %v8670_v52, %v9053_v33  ;;  %v395_v21 = vld [vmem:[#allocation2 + $0x1b1] sm:$0xff]  ;;  %v100_v61 = vld [vmem:[%s12152_s29 + $0x140] sm:$0xff] }
 0x1f4   :  { %2526 = vrot.lane.b32.xlu0 %v773_v40, %s7774_s0  ;;  %v4459_v47 = vmax.f32 %v4427_v46, %v4428_v51  ;;  %v838_v46 = vld [vmem:[#allocation2 + $0x16a] sm:$0xff]  ;;  %275 = vst.msk [vmem:[#allocation2 + $0x229] sm:$0xff] %vm124_vm0, %v100_v61 }
 0x1f5   :  { %v2257_v56 = vpop.permute.xlu1 %2256 }
 0x1f6   :  { %v2003_v54 = vpop.permute.xlu0 %2002  ;;  %4517 = vst.msk [vmem:[#allocation3 + $0x11] sm:$0xff] %vm2988_vm2, %v4459_v47  ;;  %v3267_v6 = vsel %vm3248_vm7, %v3202_v44, %v2257_v56  ;;  %v712_v44 = vld [vmem:[#allocation2 + $0x180] sm:$0xff] }
 0x1f7   :  { %1762 = vrot.lane.b32.xlu1 %v773_v40, %s7771_s2  ;;  %v3203_v36 = vsel %vm3183_vm6, %v3138_v26, %v2003_v54 }
 0x1f8   :  { %996 = vrot.lane.b32.xlu0 %v772_v53, %s7769_s21 }
 0x1f9   :  { %v9064_v0 = vpop.permute.xlu1 %1492 }
 0x1fa   :  { %v9062_v59 = vpop.permute.xlu0 %1238 }
 0x1fb   :  { %2782 = vrot.lane.b32.xlu1 %v837_v3, %s7775_s24  ;;  %v3010_v28 = vsel %vm2988_vm2, %v2945_v11, %v9062_v59 }
 0x1fc   :  { %2016 = vrot.lane.b32.xlu0 %v836_v57, %s7772_s25 }
 0x1fd   :  { %v2513_v39 = vpop.permute.xlu1 %2512 }
 0x1fe   :  { %v2259_v24 = vpop.permute.xlu0 %2258  ;;  %v3332_v60 = vsel %vm3313_vm8, %v3267_v6, %v2513_v39  ;;  %v98_v39 = vld [vmem:[%s12152_s29 + $0x130] sm:$0xff] }
 0x1ff   :  { %1252 = vrot.lane.b32.xlu1 %v836_v57, %s7768_s20  ;;  %v3268_v50 = vsel %vm3248_vm7, %v3203_v36, %v2259_v24  ;;  %273 = vst.msk [vmem:[#allocation2 + $0x211] sm:$0xff] %vm124_vm0, %v98_v39 }
 0x200   :  { %998 = vrot.lane.b32.xlu0 %v773_v40, %s7769_s21 }
 0x201   :  { %v9085_v22 = vpop.permute.xlu1 %1748 }
 0x202   :  { %v9083_v31 = vpop.permute.xlu0 %1494  ;;  %v7432_v43 = vpop.f32.mrb[4].mxu0 }
 0x203   :  { %2272 = vrot.lane.b32.xlu1 %v9079_v9, %s7773_s19  ;;  %v4042_v62 = vmul.f32 %v7432_v43, %v8915_v30  ;;  %v3731_v13 = vpop.f32.mrb[5].mxu0  ;;  %v3074_v43 = vsel %vm3053_vm4, %v3009_v2, %v9064_v0 }
 0x204   :  { %2018 = vrot.lane.b32.xlu0 %v837_v3, %s7772_s25  ;;  %v4041_v17 = vmul.f32 %v8915_v30, %v3731_v13 }
 0x205   :  { %v2769_v53 = vpop.permute.xlu1 %2768  ;;  %v4113_v55 = vadd.f32 %v8923_v48, %v4042_v62  ;;  %v3139_v62 = vsel %vm3118_vm5, %v3074_v43, %v9085_v22 }
 0x206   :  { %v2515_v29 = vpop.permute.xlu0 %2514  ;;  %v3397_v18 = vsel %vm3378_vm9, %v3332_v60, %v2769_v53  ;;  %v4112_v63 = vadd.f32 %v8923_v48, %v4041_v17 }
 0x207   :  { %1508 = vrot.lane.b32.xlu1 %v9079_v9, %s7770_s22  ;;  %v4177_v41 = vmax.f32 %v4113_v55, 0.0  ;;  %7451 = vmatprep.mubr.msk.f32.mxu0 %vm3448_vm10, %v3397_v18  ;;  %v3333_v19 = vsel %vm3313_vm8, %v3268_v50, %v2515_v29 }
 0x208   :  { %1254 = vrot.lane.b32.xlu0 %v837_v3, %s7768_s20  ;;  %v4176_v4 = vmax.f32 %v4112_v63, 0.0  ;;  %v839_v3 = vld [vmem:[#allocation2 + $0x172] sm:$0xff] }
 0x209   :  { %v9119_v40 = vpop.permute.xlu1 %1750  ;;  %4241 = vst.msk [vmem:[#allocation6 + $0x28] sm:$0xff] %vm2988_vm2, %v4177_v41 }
 0x20a   :  { %v9117_v15 = vpop.permute.xlu0 %984  ;;  %4240 = vst.msk [vmem:[#allocation6 + $0x20] sm:$0xff] %vm2988_vm2, %v4176_v4  ;;  %v3075_v4 = vsel %vm3053_vm4, %v3010_v28, %v9083_v31 }
 0x20b   :  { %2528 = vrot.lane.b32.xlu1 %v774_v14, %s7774_s0  ;;  %v3140_v33 = vsel %vm3118_vm5, %v3075_v4, %v9119_v40  ;;  %v777_v40 = vld [vmem:[#allocation2 + $0x189] sm:$0xff] }
 0x20c   :  { %2274 = vrot.lane.b32.xlu0 %v9113_v49, %s7773_s19 }
 0x20d   :  { %v2771_v16 = vpop.permute.xlu1 %2770 }
 0x20e   :  { %v2005_v57 = vpop.permute.xlu0 %2004  ;;  %v3398_v38 = vsel %vm3378_vm9, %v3333_v19, %v2771_v16 }
 0x20f   :  { %1764 = vrot.lane.b32.xlu1 %v774_v14, %s7771_s2  ;;  %7452 = vmatmul.mubr.msk.f32.gmra.mrb[18].mxu0 %vm3448_vm10, %v3398_v38  ;;  %v3204_v32 = vsel %vm3183_vm6, %v3139_v62, %v2005_v57  ;;  %v841_v62 = vld [vmem:[#allocation2 + $0x18a] sm:$0xff] }
 0x210   :  { %1510 = vrot.lane.b32.xlu0 %v9113_v49, %s7770_s22 }
 0x211   :  { %v9138_v47 = vpop.permute.xlu1 %1240  ;;  %v4304_v38 = vld [vmem:[#allocation6 + $0x20] ss:$2 sm:$0xff] }
 0x212   :  { %v9136_v51 = vpop.permute.xlu0 %986 }
 0x213   :  { %2784 = vrot.lane.b32.xlu1 %v838_v46, %s7775_s24 }
 0x214   :  { %2530 = vrot.lane.b32.xlu0 %v775_v5, %s7774_s0 }
 0x215   :  { %v2261_v56 = vpop.permute.xlu1 %2260 }
 0x216   :  { %v2007_v54 = vpop.permute.xlu0 %2006  ;;  %v3269_v0 = vsel %vm3248_vm7, %v3204_v32, %v2261_v56 }
 0x217   :  { %1766 = vrot.lane.b32.xlu1 %v775_v5, %s7771_s2  ;;  %v3205_v59 = vsel %vm3183_vm6, %v3140_v33, %v2007_v54 }
 0x218   :  { %1000 = vrot.lane.b32.xlu0 %v774_v14, %s7769_s21  ;;  %v713_v14 = vld [vmem:[#allocation2 + $0x188] sm:$0xff] }
 0x219   :  { %v9146_v24 = vpop.permute.xlu1 %1496 }
 0x21a   :  { %v9144_v7 = vpop.permute.xlu0 %1242 }
 0x21b   :  { %2786 = vrot.lane.b32.xlu1 %v839_v3, %s7775_s24 }
 0x21c   :  { %2020 = vrot.lane.b32.xlu0 %v838_v46, %s7772_s25 }
 0x21d   :  { %v2517_v10 = vpop.permute.xlu1 %2516 }
 0x21e   :  { %v2263_v8 = vpop.permute.xlu0 %2262  ;;  %v3334_v22 = vsel %vm3313_vm8, %v3269_v0, %v2517_v10  ;;  %v396_v0 = vld [vmem:[#allocation2 + $0x1b9] sm:$0xff] }
 0x21f   :  { %1256 = vrot.lane.b32.xlu1 %v838_v46, %s7768_s20  ;;  %v3270_v31 = vsel %vm3248_vm7, %v3205_v59, %v2263_v8  ;;  %v840_v46 = vld [vmem:[#allocation2 + $0x182] sm:$0xff] }
 0x220   :  { %1002 = vrot.lane.b32.xlu0 %v775_v5, %s7769_s21  ;;  %v4368_v5 = vld [vmem:[#allocation6 + $0x21] ss:$2 sm:$0xff] }
 0x221   :  { %v9165_v6 = vpop.permute.xlu1 %1752  ;;  %v4429_v8 = vmax.f32 %v4304_v38, %v4368_v5  ;;  %v778_v38 = vld [vmem:[#allocation2 + $0x199] sm:$0xff] }
 0x222   :  { %v9163_v34 = vpop.permute.xlu0 %1498  ;;  %v7435_v45 = vpop.f32.mrb[6].mxu0 }
 0x223   :  { %2276 = vrot.lane.b32.xlu1 %v712_v44, %s7773_s19  ;;  %v4044_v13 = vmul.f32 %v7435_v45, %v8915_v30  ;;  %v3741_v60 = vpop.f32.mrb[7].mxu0 }
 0x224   :  { %2022 = vrot.lane.b32.xlu0 %v839_v3, %s7772_s25  ;;  %v4043_v17 = vmul.f32 %v8915_v30, %v3741_v60 }
 0x225   :  { %v2773_v53 = vpop.permute.xlu1 %2772  ;;  %v4115_v55 = vadd.f32 %v8923_v48, %v4044_v13  ;;  %v459_v13 = vld [vmem:[#allocation2 + $0x1b2] sm:$0xff] }
 0x226   :  { %v2519_v29 = vpop.permute.xlu0 %2518  ;;  %v3399_v18 = vsel %vm3378_vm9, %v3334_v22, %v2773_v53  ;;  %v4114_v63 = vadd.f32 %v8923_v48, %v4043_v17  ;;  %v2946_v17 = vsel %vm124_vm0, %v8757_v12, %v9117_v15  ;;  %v714_v53 = vld [vmem:[#allocation2 + $0x198] sm:$0xff] }
 0x227   :  { %1512 = vrot.lane.b32.xlu1 %v712_v44, %s7770_s22  ;;  %v4179_v41 = vmax.f32 %v4115_v55, 0.0  ;;  %7454 = vmatprep.mubr.msk.f32.mxu0 %vm3448_vm10, %v3399_v18  ;;  %v3335_v50 = vsel %vm3313_vm8, %v3270_v31, %v2519_v29  ;;  %v3011_v29 = vsel %vm2988_vm2, %v2946_v17, %v9138_v47  ;;  %v101_v47 = vld [vmem:[%s12152_s29 + $0x148] sm:$0xff] }
 0x228   :  { %1258 = vrot.lane.b32.xlu0 %v839_v3, %s7768_s20  ;;  %v4178_v26 = vmax.f32 %v4114_v63, 0.0  ;;  %v3076_v55 = vsel %vm3053_vm4, %v3011_v29, %v9146_v24  ;;  %276 = vst.msk [vmem:[#allocation2 + $0x231] sm:$0xff] %vm124_vm0, %v101_v47  ;;  %v843_v17 = vld [vmem:[#allocation2 + $0x1a2] sm:$0xff] }
 0x229   :  { %v9195_v52 = vpop.permute.xlu1 %1754  ;;  %4243 = vst.msk [vmem:[#allocation6 + $0x38] sm:$0xff] %vm2988_vm2, %v4179_v41  ;;  %v3141_v63 = vsel %vm3118_vm5, %v3076_v55, %v9165_v6  ;;  %v102_v55 = vld [vmem:[%s12152_s29 + $0x150] sm:$0xff] }
 0x22a   :  { %v9193_v36 = vpop.permute.xlu0 %988  ;;  %4242 = vst.msk [vmem:[#allocation6 + $0x30] sm:$0xff] %vm2988_vm2, %v4178_v26 }
 0x22b   :  { %2532 = vrot.lane.b32.xlu1 %v776_v25, %s7774_s0  ;;  %277 = vst.msk [vmem:[#allocation2 + $0x241] sm:$0xff] %vm124_vm0, %v102_v55 }
 0x22c   :  { %2278 = vrot.lane.b32.xlu0 %v713_v14, %s7773_s19 }
 0x22d   :  { %v2775_v57 = vpop.permute.xlu1 %2774 }
 0x22e   :  { %v2009_v19 = vpop.permute.xlu0 %2008  ;;  %v3400_v16 = vsel %vm3378_vm9, %v3335_v50, %v2775_v57  ;;  %v2947_v50 = vsel %vm124_vm0, %v8785_v35, %v9136_v51 }
 0x22f   :  { %1768 = vrot.lane.b32.xlu1 %v776_v25, %s7771_s2  ;;  %7455 = vmatmul.mubr.msk.f32.gmra.mrb[20].mxu0 %vm3448_vm10, %v3400_v16  ;;  %v3206_v12 = vsel %vm3183_vm6, %v3141_v63, %v2009_v19  ;;  %v9252_v25 = vld [vmem:[#allocation2 + $0x1c8] sm:$0xff]  ;;  %v3012_v57 = vsel %vm2988_vm2, %v2947_v50, %v9144_v7 }
 0x230   :  { %1514 = vrot.lane.b32.xlu0 %v713_v14, %s7770_s22  ;;  %v460_v14 = vld [vmem:[#allocation2 + $0x1ba] sm:$0xff]  ;;  %v3077_v5 = vsel %vm3053_vm4, %v3012_v57, %v9163_v34 }
 0x231   :  { %v9212_v56 = vpop.permute.xlu1 %1244  ;;  %v4306_v3 = vld [vmem:[#allocation6 + $0x30] ss:$2 sm:$0xff]  ;;  %v4370_v39 = vld [vmem:[#allocation6 + $0x31] ss:$2 sm:$0xff] }
 0x232   :  { %v9210_v54 = vpop.permute.xlu0 %990  ;;  %v4430_v10 = vmax.f32 %v4306_v3, %v4370_v39  ;;  %v3142_v3 = vsel %vm3118_vm5, %v3077_v5, %v9195_v52  ;;  %v9283_v39 = vld [vmem:[#allocation2 + $0x1d0] sm:$0xff] }
 0x233   :  { %2788 = vrot.lane.b32.xlu1 %v840_v46, %s7775_s24 }
 0x234   :  { %2534 = vrot.lane.b32.xlu0 %v777_v40, %s7774_s0  ;;  %v4460_v2 = vmax.f32 %v4429_v8, %v4430_v10  ;;  %v587_v8 = vld [vmem:[#allocation2 + $0x1c9] sm:$0xff] }
 0x235   :  { %v2265_v43 = vpop.permute.xlu1 %2264 }
 0x236   :  { %v2011_v44 = vpop.permute.xlu0 %2010  ;;  %4518 = vst.msk [vmem:[#allocation3 + $0x21] sm:$0xff] %vm2988_vm2, %v4460_v2  ;;  %v3271_v24 = vsel %vm3248_vm7, %v3206_v12, %v2265_v43  ;;  %v842_v43 = vld [vmem:[#allocation2 + $0x19a] sm:$0xff] }
 0x237   :  { %1770 = vrot.lane.b32.xlu1 %v777_v40, %s7771_s2  ;;  %v715_v40 = vld [vmem:[#allocation2 + $0x1a0] sm:$0xff]  ;;  %v3207_v7 = vsel %vm3183_vm6, %v3142_v3, %v2011_v44 }
 0x238   :  { %1004 = vrot.lane.b32.xlu0 %v395_v21, %s7769_s21  ;;  %v779_v44 = vld [vmem:[#allocation2 + $0x1a1] sm:$0xff] }
 0x239   :  { %v9221_v45 = vpop.permute.xlu1 %1500  ;;  %v780_v3 = vld [vmem:[#allocation2 + $0x1e1] sm:$0xff] }
 0x23a   :  { %v9219_v32 = vpop.permute.xlu0 %1246 }
 0x23b   :  { %2790 = vrot.lane.b32.xlu1 %v841_v62, %s7775_s24 }
 0x23c   :  { %2024 = vrot.lane.b32.xlu0 %v840_v46, %s7772_s25 }
 0x23d   :  { %v2521_v22 = vpop.permute.xlu1 %2520 }
 0x23e   :  { %v2267_v60 = vpop.permute.xlu0 %2266  ;;  %v3336_v6 = vsel %vm3313_vm8, %v3271_v24, %v2521_v22  ;;  %v651_v22 = vld [vmem:[#allocation2 + $0x1ca] sm:$0xff]  ;;  %v652_v24 = vld [vmem:[#allocation2 + $0x1d2] sm:$0xff] }
 0x23f   :  { %1260 = vrot.lane.b32.xlu1 %v459_v13, %s7768_s20  ;;  %v3272_v34 = vsel %vm3248_vm7, %v3207_v7, %v2267_v60 }
 0x240   :  { %1006 = vrot.lane.b32.xlu0 %v396_v0, %s7769_s21  ;;  %v588_v0 = vld [vmem:[#allocation2 + $0x1d1] sm:$0xff] }
 0x241   :  { %v9240_v11 = vpop.permute.xlu1 %1756 }
 0x242   :  { %v9238_v18 = vpop.permute.xlu0 %1502  ;;  %v7438_v15 = vpop.f32.mrb[8].mxu0 }
 0x243   :  { %2280 = vrot.lane.b32.xlu1 %v714_v53, %s7773_s19  ;;  %v4046_v28 = vmul.f32 %v7438_v15, %v8915_v30  ;;  %v3751_v41 = vpop.f32.mrb[9].mxu0  ;;  %v2948_v15 = vsel %vm124_vm0, %v8830_v58, %v9193_v36 }
 0x244   :  { %2026 = vrot.lane.b32.xlu0 %v841_v62, %s7772_s25  ;;  %v4045_v4 = vmul.f32 %v8915_v30, %v3751_v41  ;;  %v3013_v47 = vsel %vm2988_vm2, %v2948_v15, %v9212_v56  ;;  %v103_v56 = vld [vmem:[%s12152_s29 + $0x158] sm:$0xff] }
 0x245   :  { %v2777_v33 = vpop.permute.xlu1 %2776  ;;  %v4117_v59 = vadd.f32 %v8923_v48, %v4046_v28  ;;  %v9316_v28 = vld [vmem:[#allocation2 + $0x1e0] sm:$0xff]  ;;  %v3078_v41 = vsel %vm3053_vm4, %v3013_v47, %v9221_v45  ;;  %278 = vst.msk [vmem:[#allocation2 + $0x249] sm:$0xff] %vm124_vm0, %v103_v56 }
 0x246   :  { %v2523_v26 = vpop.permute.xlu0 %2522  ;;  %v3401_v31 = vsel %vm3378_vm9, %v3336_v6, %v2777_v33  ;;  %v4116_v19 = vadd.f32 %v8923_v48, %v4045_v4  ;;  %v3143_v58 = vsel %vm3118_vm5, %v3078_v41, %v9240_v11 }
 0x247   :  { %1516 = vrot.lane.b32.xlu1 %v9252_v25, %s7770_s22  ;;  %v4181_v16 = vmax.f32 %v4117_v59, 0.0  ;;  %7457 = vmatprep.mubr.msk.f32.mxu0 %vm3448_vm10, %v3401_v31  ;;  %v3337_v10 = vsel %vm3313_vm8, %v3272_v34, %v2523_v26 }
 0x248   :  { %1262 = vrot.lane.b32.xlu0 %v460_v14, %s7768_s20  ;;  %v4180_v46 = vmax.f32 %v4116_v19, 0.0 }
 0x249   :  { %v9273_v51 = vpop.permute.xlu1 %1758  ;;  %4245 = vst.msk [vmem:[#allocation6 + $0x48] sm:$0xff] %vm2988_vm2, %v4181_v16  ;;  %v2949_v16 = vsel %vm124_vm0, %v8859_v23, %v9210_v54 }
 0x24a   :  { %v9271_v35 = vpop.permute.xlu0 %992  ;;  %4244 = vst.msk [vmem:[#allocation6 + $0x40] sm:$0xff] %vm2988_vm2, %v4180_v46  ;;  %v9350_v46 = vld [vmem:[#allocation2 + $0x1e8] sm:$0xff] }
 0x24b   :  { %2536 = vrot.lane.b32.xlu1 %v778_v38, %s7774_s0  ;;  %v3014_v38 = vsel %vm2988_vm2, %v2949_v16, %v9219_v32 }
 0x24c   :  { %2282 = vrot.lane.b32.xlu0 %v715_v40, %s7773_s19  ;;  %v3079_v7 = vsel %vm3053_vm4, %v3014_v38, %v9238_v18 }
 0x24d   :  { %v2779_v2 = vpop.permute.xlu1 %2778 }
 0x24e   :  { %v2013_v21 = vpop.permute.xlu0 %2012  ;;  %v3402_v52 = vsel %vm3378_vm9, %v3337_v10, %v2779_v2 }
 0x24f   :  { %1772 = vrot.lane.b32.xlu1 %v587_v8, %s7771_s2  ;;  %7458 = vmatmul.mubr.msk.f32.gmra.mrb[22].mxu0 %vm3448_vm10, %v3402_v52  ;;  %v3208_v36 = vsel %vm3183_vm6, %v3143_v58, %v2013_v21 }
 0x250   :  { %1518 = vrot.lane.b32.xlu0 %v9283_v39, %s7770_s22 }
 0x251   :  { %v9293_v61 = vpop.permute.xlu1 %1248 }
 0x252   :  { %v9291_v62 = vpop.permute.xlu0 %994 }
 0x253   :  { %2792 = vrot.lane.b32.xlu1 %v842_v43, %s7775_s24  ;;  %v4372_v43 = vld [vmem:[#allocation6 + $0x41] ss:$2 sm:$0xff] }
 0x254   :  { %2538 = vrot.lane.b32.xlu0 %v779_v44, %s7774_s0  ;;  %v4308_v44 = vld [vmem:[#allocation6 + $0x40] ss:$2 sm:$0xff] }
 0x255   :  { %v2269_v60 = vpop.permute.xlu1 %2268  ;;  %v4431_v55 = vmax.f32 %v4308_v44, %v4372_v43  ;;  %v846_v43 = vld [vmem:[#allocation2 + $0x1fa] sm:$0xff] }
 0x256   :  { %v2015_v13 = vpop.permute.xlu0 %2014  ;;  %v3273_v45 = vsel %vm3248_vm7, %v3208_v36, %v2269_v60  ;;  %v104_v36 = vld [vmem:[%s12152_s29 + $0x160] sm:$0xff] }
 0x257   :  { %1774 = vrot.lane.b32.xlu1 %v588_v0, %s7771_s2  ;;  %279 = vst.msk [vmem:[#allocation2 + $0x259] sm:$0xff] %vm124_vm0, %v104_v36 }
 0x258   :  { %1008 = vrot.lane.b32.xlu0 %v587_v8, %s7769_s21  ;;  %v3144_v8 = vsel %vm3118_vm5, %v3079_v7, %v9273_v51  ;;  %v781_v51 = vld [vmem:[#allocation2 + $0x1e9] sm:$0xff]  ;;  %v2951_v7 = vsel %vm124_vm0, %v8947_v20, %v9291_v62 }
 0x259   :  { %v9301_v53 = vpop.permute.xlu1 %1504  ;;  %v3209_v32 = vsel %vm3183_vm6, %v3144_v8, %v2015_v13 }
 0x25a   :  { %v9299_v29 = vpop.permute.xlu0 %1250 }
 0x25b   :  { %2794 = vrot.lane.b32.xlu1 %v843_v17, %s7775_s24 }
 0x25c   :  { %2028 = vrot.lane.b32.xlu0 %v651_v22, %s7772_s25 }
 0x25d   :  { %v2525_v12 = vpop.permute.xlu1 %2524 }
 0x25e   :  { %v2271_v63 = vpop.permute.xlu0 %2270  ;;  %v3338_v11 = vsel %vm3313_vm8, %v3273_v45, %v2525_v12  ;;  %v2950_v45 = vsel %vm124_vm0, %v8903_v42, %v9271_v35 }
 0x25f   :  { %1264 = vrot.lane.b32.xlu1 %v651_v22, %s7768_s20  ;;  %v3274_v18 = vsel %vm3248_vm7, %v3209_v32, %v2271_v63  ;;  %v9433_v32 = vld [vmem:[#allocation2 + $0x200] sm:$0xff] }
 0x260   :  { %1010 = vrot.lane.b32.xlu0 %v588_v0, %s7769_s21  ;;  %v844_v0 = vld [vmem:[#allocation2 + $0x1e2] sm:$0xff] }
 0x261   :  { %v9322_v6 = vpop.permute.xlu1 %1760 }
 0x262   :  { %v9320_v14 = vpop.permute.xlu0 %1506  ;;  %v7441_v4 = vpop.f32.mrb[10].mxu0 }
 0x263   :  { %2284 = vrot.lane.b32.xlu1 %v9316_v28, %s7773_s19  ;;  %v4048_v26 = vmul.f32 %v7441_v4, %v8915_v30  ;;  %v3761_v33 = vpop.f32.mrb[11].mxu0 }
 0x264   :  { %2030 = vrot.lane.b32.xlu0 %v652_v24, %s7772_s25  ;;  %v4047_v59 = vmul.f32 %v8915_v30, %v3761_v33  ;;  %v9399_v33 = vld [vmem:[#allocation2 + $0x1f8] sm:$0xff] }
 0x265   :  { %v2781_v50 = vpop.permute.xlu1 %2780  ;;  %v4119_v19 = vadd.f32 %v8923_v48, %v4048_v26  ;;  %v3015_v26 = vsel %vm2988_vm2, %v2950_v45, %v9293_v61  ;;  %v105_v61 = vld [vmem:[%s12152_s29 + $0x168] sm:$0xff]  ;;  %v9481_v45 = vld [vmem:[#allocation2 + $0x210] sm:$0xff] }
 0x266   :  { %v2527_v31 = vpop.permute.xlu0 %2526  ;;  %v3403_v57 = vsel %vm3378_vm9, %v3338_v11, %v2781_v50  ;;  %v4118_v40 = vadd.f32 %v8923_v48, %v4047_v59  ;;  %v3080_v11 = vsel %vm3053_vm4, %v3015_v26, %v9301_v53  ;;  %280 = vst.msk [vmem:[#allocation2 + $0x261] sm:$0xff] %vm124_vm0, %v105_v61 }
 0x267   :  { %1520 = vrot.lane.b32.xlu1 %v9316_v28, %s7770_s22  ;;  %v4183_v5 = vmax.f32 %v4119_v19, 0.0  ;;  %7460 = vmatprep.mubr.msk.f32.mxu0 %vm3448_vm10, %v3403_v57  ;;  %v3339_v10 = vsel %vm3313_vm8, %v3274_v18, %v2527_v31  ;;  %v3145_v50 = vsel %vm3118_vm5, %v3080_v11, %v9322_v6  ;;  %v782_v18 = vld [vmem:[#allocation2 + $0x1f9] sm:$0xff] }
 0x268   :  { %1266 = vrot.lane.b32.xlu0 %v652_v24, %s7768_s20  ;;  %v4182_v23 = vmax.f32 %v4118_v40, 0.0  ;;  %v845_v24 = vld [vmem:[#allocation2 + $0x1ea] sm:$0xff] }
 0x269   :  { %v9356_v34 = vpop.permute.xlu1 %1762  ;;  %4247 = vst.msk [vmem:[#allocation6 + $0x58] sm:$0xff] %vm2988_vm2, %v4183_v5 }
 0x26a   :  { %v9354_v54 = vpop.permute.xlu0 %996  ;;  %4246 = vst.msk [vmem:[#allocation6 + $0x50] sm:$0xff] %vm2988_vm2, %v4182_v23 }
 0x26b   :  { %2540 = vrot.lane.b32.xlu1 %v780_v3, %s7774_s0 }
 0x26c   :  { %2286 = vrot.lane.b32.xlu0 %v9350_v46, %s7773_s19 }
 0x26d   :  { %v2783_v2 = vpop.permute.xlu1 %2782 }
 0x26e   :  { %v2017_v21 = vpop.permute.xlu0 %2016  ;;  %v3404_v52 = vsel %vm3378_vm9, %v3339_v10, %v2783_v2 }
 0x26f   :  { %1776 = vrot.lane.b32.xlu1 %v780_v3, %s7771_s2  ;;  %7461 = vmatmul.mubr.msk.f32.gmra.mrb[24].mxu0 %vm3448_vm10, %v3404_v52  ;;  %v3210_v42 = vsel %vm3183_vm6, %v3145_v50, %v2017_v21 }
 0x270   :  { %1522 = vrot.lane.b32.xlu0 %v9350_v46, %s7770_s22 }
 0x271   :  { %v9375_v60 = vpop.permute.xlu1 %1252  ;;  %v4310_v22 = vld [vmem:[#allocation6 + $0x50] ss:$2 sm:$0xff]  ;;  %v4374_v17 = vld [vmem:[#allocation6 + $0x51] ss:$2 sm:$0xff] }
 0x272   :  { %v9373_v13 = vpop.permute.xlu0 %998  ;;  %v4432_v63 = vmax.f32 %v4310_v22, %v4374_v17 }
 0x273   :  { %2796 = vrot.lane.b32.xlu1 %v844_v0, %s7775_s24 }
 0x274   :  { %2542 = vrot.lane.b32.xlu0 %v781_v51, %s7774_s0  ;;  %v4461_v12 = vmax.f32 %v4431_v55, %v4432_v63  ;;  %v847_v63 = vld [vmem:[#allocation2 + $0x202] sm:$0xff] }
 0x275   :  { %v2273_v47 = vpop.permute.xlu1 %2272 }
 0x276   :  { %v2019_v15 = vpop.permute.xlu0 %2018  ;;  %4519 = vst.msk [vmem:[#allocation3 + $0x31] sm:$0xff] %vm2988_vm2, %v4461_v12  ;;  %v3275_v53 = vsel %vm3248_vm7, %v3210_v42, %v2273_v47  ;;  %v106_v47 = vld [vmem:[%s12152_s29 + $0x170] sm:$0xff] }
 0x277   :  { %1778 = vrot.lane.b32.xlu1 %v781_v51, %s7771_s2  ;;  %281 = vst.msk [vmem:[#allocation2 + $0x271] sm:$0xff] %vm124_vm0, %v106_v47 }
 0x278   :  { %1012 = vrot.lane.b32.xlu0 %v780_v3, %s7769_s21 }
 0x279   :  { %v9384_v58 = vpop.permute.xlu1 %1508 }
 0x27a   :  { %v9382_v41 = vpop.permute.xlu0 %1254 }
 0x27b   :  { %2798 = vrot.lane.b32.xlu1 %v845_v24, %s7775_s24 }
 0x27c   :  { %2032 = vrot.lane.b32.xlu0 %v844_v0, %s7772_s25 }
 0x27d   :  { %v2529_v56 = vpop.permute.xlu1 %2528 }
 0x27e   :  { %v2275_v4 = vpop.permute.xlu0 %2274  ;;  %v3340_v6 = vsel %vm3313_vm8, %v3275_v53, %v2529_v56 }
 0x27f   :  { %1268 = vrot.lane.b32.xlu1 %v844_v0, %s7768_s20 }
 0x280   :  { %1014 = vrot.lane.b32.xlu0 %v781_v51, %s7769_s21 }
 0x281   :  { %v9405_v31 = vpop.permute.xlu1 %1764 }
 0x282   :  { %v9403_v59 = vpop.permute.xlu0 %1510  ;;  %v7444_v35 = vpop.f32.mrb[12].mxu0 }
 0x283   :  { %2288 = vrot.lane.b32.xlu1 %v9399_v33, %s7773_s19  ;;  %v4050_v19 = vmul.f32 %v7444_v35, %v8915_v30  ;;  %v3771_v57 = vpop.f32.mrb[13].mxu0  ;;  %v9502_v35 = vld [vmem:[%s12154_s27] ss:$0 sm:$0xff] }
 0x284   :  { %2034 = vrot.lane.b32.xlu0 %v845_v24, %s7772_s25  ;;  %v4049_v16 = vmul.f32 %v8915_v30, %v3771_v57  ;;  %v3016_v30 = vsel %vm2988_vm2, %v2951_v7, %v9299_v29 }
 0x285   :  { %v2785_v38 = vpop.permute.xlu1 %2784  ;;  %v4121_v5 = vadd.f32 %v8923_v48, %v4050_v19  ;;  %v3081_v10 = vsel %vm3053_vm4, %v3016_v30, %v9320_v14  ;;  %v9525_v30 = vld [vmem:[#allocation2 + $0x218] sm:$0xff] }
 0x286   :  { %v2531_v40 = vpop.permute.xlu0 %2530  ;;  %v3405_v3 = vsel %vm3378_vm9, %v3340_v6, %v2785_v38  ;;  %v4120_v23 = vadd.f32 %v8923_v48, %v4049_v16  ;;  %v3146_v21 = vsel %vm3118_vm5, %v3081_v10, %v9356_v34  ;;  %v783_v34 = vld [vmem:[#allocation2 + $0x201] sm:$0xff]  ;;  %v9511_v16 = vld [vmem:[%s12130_s3] ss:$0 sm:$0xff] }
 0x287   :  { %1524 = vrot.lane.b32.xlu1 %v9399_v33, %s7770_s22  ;;  %v4185_v8 = vmax.f32 %v4121_v5, 0.0  ;;  %7463 = vmatprep.mubr.msk.f32.mxu0 %vm3448_vm10, %v3405_v3  ;;  %v3211_v29 = vsel %vm3183_vm6, %v3146_v21, %v2019_v15  ;;  %v2953_v5 = vsel %vm124_vm0, %v9030_v27, %v9373_v13 }
 0x288   :  { %1270 = vrot.lane.b32.xlu0 %v845_v24, %s7768_s20  ;;  %v4184_v20 = vmax.f32 %v4120_v23, 0.0  ;;  %v3276_v14 = vsel %vm3248_vm7, %v3211_v29, %v2275_v4  ;;  %v2952_v4 = vsel %vm124_vm0, %v8996_v37, %v9354_v54  ;;  %v3018_v7 = vsel %vm2988_vm2, %v2953_v5, %v9382_v41 }
 0x289   :  { %v9439_v48 = vpop.permute.xlu1 %1766  ;;  %4249 = vst.msk [vmem:[#allocation6 + $0x68] sm:$0xff] %vm2988_vm2, %v4185_v8  ;;  %v3341_v2 = vsel %vm3313_vm8, %v3276_v14, %v2531_v40  ;;  %v3017_v56 = vsel %vm2988_vm2, %v2952_v4, %v9375_v60  ;;  %v107_v60 = vld [vmem:[%s12152_s29 + $0x178] sm:$0xff] }
 0x28a   :  { %v9437_v62 = vpop.permute.xlu0 %1000  ;;  %4248 = vst.msk [vmem:[#allocation6 + $0x60] sm:$0xff] %vm2988_vm2, %v4184_v20  ;;  %v3082_v26 = vsel %vm3053_vm4, %v3017_v56, %v9384_v58  ;;  %v784_v8 = vld [vmem:[#allocation2 + $0x211] sm:$0xff]  ;;  %v849_v56 = vld [vmem:[#allocation2 + $0x21a] sm:$0xff] }
 0x28b   :  { %2544 = vrot.lane.b32.xlu1 %v782_v18, %s7774_s0  ;;  %v3147_v42 = vsel %vm3118_vm5, %v3082_v26, %v9405_v31  ;;  %282 = vst.msk [vmem:[#allocation2 + $0x279] sm:$0xff] %vm124_vm0, %v107_v60 }
 0x28c   :  { %2290 = vrot.lane.b32.xlu0 %v9433_v32, %s7773_s19 }
 0x28d   :  { %v2787_v51 = vpop.permute.xlu1 %2786 }
 0x28e   :  { %v2021_v52 = vpop.permute.xlu0 %2020  ;;  %v3406_v44 = vsel %vm3378_vm9, %v3341_v2, %v2787_v51 }
 0x28f   :  { %1780 = vrot.lane.b32.xlu1 %v782_v18, %s7771_s2  ;;  %7464 = vmatmul.mubr.msk.f32.gmra.mrb[26].mxu0 %vm3448_vm10, %v3406_v44  ;;  %v3212_v37 = vsel %vm3183_vm6, %v3147_v42, %v2021_v52  ;;  %v848_v44 = vld [vmem:[#allocation2 + $0x212] sm:$0xff] }
 0x290   :  { %1526 = vrot.lane.b32.xlu0 %v9433_v32, %s7770_s22 }
 0x291   :  { %v9458_v22 = vpop.permute.xlu1 %1256  ;;  %v4312_v52 = vld [vmem:[#allocation6 + $0x60] ss:$2 sm:$0xff]  ;;  %v4376_v51 = vld [vmem:[#allocation6 + $0x61] ss:$2 sm:$0xff] }
 0x292   :  { %v9456_v0 = vpop.permute.xlu0 %1002 }
 0x293   :  { %2800 = vrot.lane.b32.xlu1 %v846_v43, %s7775_s24 }
 0x294   :  { %2546 = vrot.lane.b32.xlu0 %v783_v34, %s7774_s0 }
 0x295   :  { %v2277_v55 = vpop.permute.xlu1 %2276 }
 0x296   :  { %v2023_v17 = vpop.permute.xlu0 %2022  ;;  %v3277_v58 = vsel %vm3248_vm7, %v3212_v37, %v2277_v55  ;;  %v108_v37 = vld [vmem:[%s12152_s29 + $0x180] sm:$0xff] }
 0x297   :  { %1782 = vrot.lane.b32.xlu1 %v783_v34, %s7771_s2  ;;  %283 = vst.msk [vmem:[#allocation2 + $0x289] sm:$0xff] %vm124_vm0, %v108_v37  ;;  %v110_v37 = vld [vmem:[%s12152_s29 + $0x190] sm:$0xff] }
 0x298   :  { %1016 = vrot.lane.b32.xlu0 %v782_v18, %s7769_s21  ;;  %v3083_v18 = vsel %vm3053_vm4, %v3018_v7, %v9403_v59  ;;  %285 = vst.msk [vmem:[#allocation2 + $0x2a1] sm:$0xff] %vm124_vm0, %v110_v37 }
 0x299   :  { %v9466_v15 = vpop.permute.xlu1 %1512  ;;  %v3148_v20 = vsel %vm3118_vm5, %v3083_v18, %v9439_v48  ;;  %v785_v48 = vld [vmem:[#allocation2 + $0x219] sm:$0xff]  ;;  %v2955_v18 = vsel %vm124_vm0, %v9113_v49, %v9456_v0 }
 0x29a   :  { %v9464_v12 = vpop.permute.xlu0 %1258  ;;  %v3213_v41 = vsel %vm3183_vm6, %v3148_v20, %v2023_v17 }
 0x29b   :  { %2802 = vrot.lane.b32.xlu1 %v847_v63, %s7775_s24  ;;  %v3020_v20 = vsel %vm2988_vm2, %v2955_v18, %v9464_v12 }
 0x29c   :  { %2036 = vrot.lane.b32.xlu0 %v846_v43, %s7772_s25 }
 0x29d   :  { %v2533_v36 = vpop.permute.xlu1 %2532 }
 0x29e   :  { %v2279_v24 = vpop.permute.xlu0 %2278  ;;  %v3342_v53 = vsel %vm3313_vm8, %v3277_v58, %v2533_v36  ;;  %v2954_v58 = vsel %vm124_vm0, %v9079_v9, %v9437_v62 }
 0x29f   :  { %1272 = vrot.lane.b32.xlu1 %v846_v43, %s7768_s20  ;;  %v3278_v59 = vsel %vm3248_vm7, %v3213_v41, %v2279_v24 }
 0x2a0   :  { %1018 = vrot.lane.b32.xlu0 %v783_v34, %s7769_s21 }
 0x2a1   :  { %v9487_v50 = vpop.permute.xlu1 %1768 }
 0x2a2   :  { %v9485_v11 = vpop.permute.xlu0 %1514  ;;  %v7447_v54 = vpop.f32.mrb[14].mxu0 }
 0x2a3   :  { %2292 = vrot.lane.b32.xlu1 %v9481_v45, %s7773_s19  ;;  %v4052_v31 = vmul.f32 %v9502_v35, %v7447_v54  ;;  %v3781_v61 = vpop.f32.mrb[15].mxu0 }
 0x2a4   :  { %2038 = vrot.lane.b32.xlu0 %v847_v63, %s7772_s25  ;;  %v4051_v19 = vmul.f32 %v9502_v35, %v3781_v61  ;;  %v9574_v61 = vld [vmem:[#allocation2 + $0x228] sm:$0xff] }
 0x2a5   :  { %v2789_v6 = vpop.permute.xlu1 %2788  ;;  %v4123_v40 = vadd.f32 %v9511_v16, %v4052_v31  ;;  %v3019_v31 = vsel %vm2988_vm2, %v2954_v58, %v9458_v22  ;;  %v109_v22 = vld [vmem:[%s12152_s29 + $0x188] sm:$0xff] }
 0x2a6   :  { %v2535_v57 = vpop.permute.xlu0 %2534  ;;  %v3407_v38 = vsel %vm3378_vm9, %v3342_v53, %v2789_v6  ;;  %v4122_v3 = vadd.f32 %v9511_v16, %v4051_v19  ;;  %v3084_v53 = vsel %vm3053_vm4, %v3019_v31, %v9466_v15  ;;  %284 = vst.msk [vmem:[#allocation2 + $0x291] sm:$0xff] %vm124_vm0, %v109_v22 }
 0x2a7   :  { %1528 = vrot.lane.b32.xlu1 %v9481_v45, %s7770_s22  ;;  %v4187_v23 = vmax.f32 %v4123_v40, 0.0  ;;  %7466 = vmatprep.mubr.msk.f32.mxu0 %vm3448_vm10, %v3407_v38  ;;  %v3343_v21 = vsel %vm3313_vm8, %v3278_v59, %v2535_v57  ;;  %v3149_v6 = vsel %vm3118_vm5, %v3084_v53, %v9487_v50  ;;  %v9608_v59 = vld [vmem:[#allocation2 + $0x230] sm:$0xff] }
 0x2a8   :  { %1274 = vrot.lane.b32.xlu0 %v847_v63, %s7768_s20  ;;  %v4186_v27 = vmax.f32 %v4122_v3, 0.0  ;;  %v4433_v63 = vmax.f32 %v4312_v52, %v4376_v51 }
 0x2a9   :  { %v9531_v10 = vpop.permute.xlu1 %1770  ;;  %4251 = vst.msk [vmem:[#allocation6 + $0x78] sm:$0xff] %vm2988_vm2, %v4187_v23 }
 0x2aa   :  { %v9529_v13 = vpop.permute.xlu0 %1004  ;;  %4250 = vst.msk [vmem:[#allocation6 + $0x70] sm:$0xff] %vm2988_vm2, %v4186_v27 }
 0x2ab   :  { %2548 = vrot.lane.b32.xlu1 %v784_v8, %s7774_s0 }
 0x2ac   :  { %2294 = vrot.lane.b32.xlu0 %v9525_v30, %s7773_s19 }
 0x2ad   :  { %v2791_v14 = vpop.permute.xlu1 %2790 }
 0x2ae   :  { %v2025_v29 = vpop.permute.xlu0 %2024  ;;  %v3408_v2 = vsel %vm3378_vm9, %v3343_v21, %v2791_v14  ;;  %v786_v21 = vld [vmem:[#allocation2 + $0x229] sm:$0xff] }
 0x2af   :  { %1784 = vrot.lane.b32.xlu1 %v784_v8, %s7771_s2  ;;  %7467 = vmatmul.mubr.msk.f32.gmra.mrb[28].mxu0 %vm3448_vm10, %v3408_v2  ;;  %v3214_v9 = vsel %vm3183_vm6, %v3149_v6, %v2025_v29  ;;  %v3085_v29 = vsel %vm3053_vm4, %v3020_v20, %v9485_v11  ;;  %v9655_v6 = vld [vmem:[#allocation2 + $0x240] sm:$0xff] }
 0x2b0   :  { %1530 = vrot.lane.b32.xlu0 %v9525_v30, %s7770_s22  ;;  %v3150_v2 = vsel %vm3118_vm5, %v3085_v29, %v9531_v10  ;;  %v787_v10 = vld [vmem:[#allocation2 + $0x231] sm:$0xff]  ;;  %v9688_v29 = vld [vmem:[#allocation2 + $0x248] sm:$0xff] }
 0x2b1   :  { %v9550_v43 = vpop.permute.xlu1 %1260  ;;  %v4314_v17 = vld [vmem:[#allocation6 + $0x70] ss:$2 sm:$0xff]  ;;  %v4378_v55 = vld [vmem:[#allocation6 + $0x71] ss:$2 sm:$0xff] }
 0x2b2   :  { %v9548_v34 = vpop.permute.xlu0 %1006  ;;  %v4434_v47 = vmax.f32 %v4314_v17, %v4378_v55  ;;  %v850_v17 = vld [vmem:[#allocation2 + $0x22a] sm:$0xff] }
 0x2b3   :  { %2804 = vrot.lane.b32.xlu1 %v848_v44, %s7775_s24 }
 0x2b4   :  { %2550 = vrot.lane.b32.xlu0 %v785_v48, %s7774_s0  ;;  %v4462_v24 = vmax.f32 %v4433_v63, %v4434_v47 }
 0x2b5   :  { %v2281_v4 = vpop.permute.xlu1 %2280 }
 0x2b6   :  { %v2027_v36 = vpop.permute.xlu0 %2026  ;;  %4520 = vst.msk [vmem:[#allocation3 + $0x41] sm:$0xff] %vm2988_vm2, %v4462_v24  ;;  %v3279_v15 = vsel %vm3248_vm7, %v3214_v9, %v2281_v4 }
 0x2b7   :  { %1786 = vrot.lane.b32.xlu1 %v785_v48, %s7771_s2  ;;  %v3215_v12 = vsel %vm3183_vm6, %v3150_v2, %v2027_v36  ;;  %v851_v36 = vld [vmem:[#allocation2 + $0x232] sm:$0xff] }
 0x2b8   :  { %1020 = vrot.lane.b32.xlu0 %v784_v8, %s7769_s21 }
 0x2b9   :  { %v9559_v42 = vpop.permute.xlu1 %1516 }
 0x2ba   :  { %v9557_v26 = vpop.permute.xlu0 %1262 }
 0x2bb   :  { %2806 = vrot.lane.b32.xlu1 %v849_v56, %s7775_s24 }
 0x2bc   :  { %2040 = vrot.lane.b32.xlu0 %v848_v44, %s7772_s25 }
 0x2bd   :  { %v2537_v60 = vpop.permute.xlu1 %2536 }
 0x2be   :  { %v2283_v54 = vpop.permute.xlu0 %2282  ;;  %v3344_v50 = vsel %vm3313_vm8, %v3279_v15, %v2537_v60 }
 0x2bf   :  { %1276 = vrot.lane.b32.xlu1 %v848_v44, %s7768_s20  ;;  %v3280_v11 = vsel %vm3248_vm7, %v3215_v12, %v2283_v54  ;;  %v331_v54 = vld [vmem:[#allocation2 + $0x1b0] sm:$0xff] }
 0x2c0   :  { %1022 = vrot.lane.b32.xlu0 %v785_v48, %s7769_s21  ;;  %v2956_v31 = vsel %vm124_vm0, %v331_v54, %v9529_v13 }
 0x2c1   :  { %v9580_v57 = vpop.permute.xlu1 %1772  ;;  %v3021_v53 = vsel %vm2988_vm2, %v2956_v31, %v9550_v43  ;;  %v111_v43 = vld [vmem:[%s12152_s29 + $0x198] sm:$0xff] }
 0x2c2   :  { %v9578_v19 = vpop.permute.xlu0 %1518  ;;  %v7450_v62 = vpop.f32.mrb[16].mxu0  ;;  %v3086_v9 = vsel %vm3053_vm4, %v3021_v53, %v9559_v42  ;;  %v332_v42 = vld [vmem:[#allocation2 + $0x1b8] sm:$0xff]  ;;  %286 = vst.msk [vmem:[#allocation2 + $0x2a9] sm:$0xff] %vm124_vm0, %v111_v43 }
 0x2c3   :  { %2296 = vrot.lane.b32.xlu1 %v9574_v61, %s7773_s19  ;;  %v4054_v40 = vmul.f32 %v9502_v35, %v7450_v62  ;;  %v3791_v38 = vpop.f32.mrb[17].mxu0  ;;  %v3151_v15 = vsel %vm3118_vm5, %v3086_v9, %v9580_v57 }
 0x2c4   :  { %2042 = vrot.lane.b32.xlu0 %v849_v56, %s7772_s25  ;;  %v4053_v5 = vmul.f32 %v9502_v35, %v3791_v38 }
 0x2c5   :  { %v2793_v7 = vpop.permute.xlu1 %2792  ;;  %v4125_v23 = vadd.f32 %v9511_v16, %v4054_v40 }
 0x2c6   :  { %v2539_v3 = vpop.permute.xlu0 %2538  ;;  %v3409_v8 = vsel %vm3378_vm9, %v3344_v50, %v2793_v7  ;;  %v4124_v27 = vadd.f32 %v9511_v16, %v4053_v5 }
 0x2c7   :  { %1532 = vrot.lane.b32.xlu1 %v9574_v61, %s7770_s22  ;;  %v4189_v41 = vmax.f32 %v4125_v23, 0.0  ;;  %7469 = vmatprep.mubr.msk.f32.mxu0 %vm3448_vm10, %v3409_v8  ;;  %v3345_v48 = vsel %vm3313_vm8, %v3280_v11, %v2539_v3 }
 0x2c8   :  { %1278 = vrot.lane.b32.xlu0 %v849_v56, %s7768_s20  ;;  %v4188_v49 = vmax.f32 %v4124_v27, 0.0  ;;  %v2957_v27 = vsel %vm124_vm0, %v332_v42, %v9548_v34  ;;  %v112_v42 = vld [vmem:[%s12152_s29 + $0x1a0] sm:$0xff] }
 0x2c9   :  { %v9614_v14 = vpop.permute.xlu1 %1774  ;;  %4253 = vst.msk [vmem:[#allocation6 + $0x88] sm:$0xff] %vm2988_vm2, %v4189_v41  ;;  %v3022_v41 = vsel %vm2988_vm2, %v2957_v27, %v9557_v26 }
 0x2ca   :  { %v9612_v0 = vpop.permute.xlu0 %1008  ;;  %4252 = vst.msk [vmem:[#allocation6 + $0x80] sm:$0xff] %vm2988_vm2, %v4188_v49  ;;  %v788_v49 = vld [vmem:[#allocation2 + $0x241] sm:$0xff]  ;;  %v3087_v2 = vsel %vm3053_vm4, %v3022_v41, %v9578_v19 }
 0x2cb   :  { %2552 = vrot.lane.b32.xlu1 %v786_v21, %s7774_s0  ;;  %287 = vst.msk [vmem:[#allocation2 + $0x2b9] sm:$0xff] %vm124_vm0, %v112_v42 }
 0x2cc   :  { %2298 = vrot.lane.b32.xlu0 %v9608_v59, %s7773_s19 }
 0x2cd   :  { %v2795_v51 = vpop.permute.xlu1 %2794 }
 0x2ce   :  { %v2029_v52 = vpop.permute.xlu0 %2028  ;;  %v3410_v44 = vsel %vm3378_vm9, %v3345_v48, %v2795_v51  ;;  %v3152_v48 = vsel %vm3118_vm5, %v3087_v2, %v9614_v14  ;;  %v789_v14 = vld [vmem:[#allocation2 + $0x249] sm:$0xff] }
 0x2cf   :  { %1788 = vrot.lane.b32.xlu1 %v786_v21, %s7771_s2  ;;  %7470 = vmatmul.mubr.msk.f32.gmra.mrb[30].mxu0 %vm3448_vm10, %v3410_v44  ;;  %v3216_v13 = vsel %vm3183_vm6, %v3151_v15, %v2029_v52 }
 0x2d0   :  { %1534 = vrot.lane.b32.xlu0 %v9608_v59, %s7770_s22 }
 0x2d1   :  { %v9633_v63 = vpop.permute.xlu1 %1264 }
 0x2d2   :  { %v9631_v55 = vpop.permute.xlu0 %1010 }
 0x2d3   :  { %2808 = vrot.lane.b32.xlu1 %v850_v17, %s7775_s24 }
 0x2d4   :  { %2554 = vrot.lane.b32.xlu0 %v787_v10, %s7774_s0 }
 0x2d5   :  { %v2285_v24 = vpop.permute.xlu1 %2284 }
 0x2d6   :  { %v2031_v47 = vpop.permute.xlu0 %2030  ;;  %v3281_v38 = vsel %vm3248_vm7, %v3216_v13, %v2285_v24  ;;  %v852_v24 = vld [vmem:[#allocation2 + $0x242] sm:$0xff]  ;;  %v853_v13 = vld [vmem:[#allocation2 + $0x24a] sm:$0xff] }
 0x2d7   :  { %1790 = vrot.lane.b32.xlu1 %v787_v10, %s7771_s2  ;;  %v3217_v26 = vsel %vm3183_vm6, %v3152_v48, %v2031_v47  ;;  %v4380_v47 = vld [vmem:[#allocation6 + $0x81] ss:$2 sm:$0xff]  ;;  %v2959_v48 = vsel %vm124_vm0, %v9283_v39, %v9631_v55 }
 0x2d8   :  { %1024 = vrot.lane.b32.xlu0 %v786_v21, %s7769_s21 }
 0x2d9   :  { %v9641_v56 = vpop.permute.xlu1 %1520 }
 0x2da   :  { %v9639_v4 = vpop.permute.xlu0 %1266 }
 0x2db   :  { %2810 = vrot.lane.b32.xlu1 %v851_v36, %s7775_s24 }
 0x2dc   :  { %2044 = vrot.lane.b32.xlu0 %v850_v17, %s7772_s25 }
 0x2dd   :  { %v2541_v58 = vpop.permute.xlu1 %2540 }
 0x2de   :  { %v2287_v60 = vpop.permute.xlu0 %2286  ;;  %v3346_v57 = vsel %vm3313_vm8, %v3281_v38, %v2541_v58 }
 0x2df   :  { %1280 = vrot.lane.b32.xlu1 %v850_v17, %s7768_s20  ;;  %v3282_v19 = vsel %vm3248_vm7, %v3217_v26, %v2287_v60  ;;  %v4316_v17 = vld [vmem:[#allocation6 + $0x80] ss:$2 sm:$0xff] }
 0x2e0   :  { %1026 = vrot.lane.b32.xlu0 %v787_v10, %s7769_s21  ;;  %v4435_v58 = vmax.f32 %v4316_v17, %v4380_v47 }
 0x2e1   :  { %v9661_v22 = vpop.permute.xlu1 %1776 }
 0x2e2   :  { %v9659_v62 = vpop.permute.xlu0 %1522  ;;  %v7453_v40 = vpop.f32.mrb[18].mxu0 }
 0x2e3   :  { %2300 = vrot.lane.b32.xlu1 %v9655_v6, %s7773_s19  ;;  %v4056_v50 = vmul.f32 %v9502_v35, %v7453_v40  ;;  %v3801_v5 = vpop.f32.mrb[19].mxu0 }
 0x2e4   :  { %2046 = vrot.lane.b32.xlu0 %v851_v36, %s7772_s25  ;;  %v4055_v3 = vmul.f32 %v9502_v35, %v3801_v5  ;;  %v2958_v5 = vsel %vm124_vm0, %v9252_v25, %v9612_v0 }
 0x2e5   :  { %v2797_v23 = vpop.permute.xlu1 %2796  ;;  %v4127_v8 = vadd.f32 %v9511_v16, %v4056_v50 }
 0x2e6   :  { %v2543_v7 = vpop.permute.xlu0 %2542  ;;  %v3411_v18 = vsel %vm3378_vm9, %v3346_v57, %v2797_v23  ;;  %v4126_v20 = vadd.f32 %v9511_v16, %v4055_v3  ;;  %v3023_v57 = vsel %vm2988_vm2, %v2958_v5, %v9633_v63  ;;  %v9737_v3 = vld [vmem:[#allocation2 + $0x258] sm:$0xff]  ;;  %v113_v63 = vld [vmem:[%s12152_s29 + $0x1a8] sm:$0xff] }
 0x2e7   :  { %1536 = vrot.lane.b32.xlu1 %v9655_v6, %s7770_s22  ;;  %v4191_v21 = vmax.f32 %v4127_v8, 0.0  ;;  %7472 = vmatprep.mubr.msk.f32.mxu0 %vm3448_vm10, %v3411_v18  ;;  %v3347_v52 = vsel %vm3313_vm8, %v3282_v19, %v2543_v7  ;;  %v3088_v7 = vsel %vm3053_vm4, %v3023_v57, %v9641_v56  ;;  %288 = vst.msk [vmem:[#allocation2 + $0x2c1] sm:$0xff] %vm124_vm0, %v113_v63 }
 0x2e8   :  { %1282 = vrot.lane.b32.xlu0 %v851_v36, %s7768_s20  ;;  %v4190_v34 = vmax.f32 %v4126_v20, 0.0  ;;  %v3153_v18 = vsel %vm3118_vm5, %v3088_v7, %v9661_v22  ;;  %v3024_v19 = vsel %vm2988_vm2, %v2959_v48, %v9639_v4 }
 0x2e9   :  { %v9694_v11 = vpop.permute.xlu1 %1778  ;;  %4255 = vst.msk [vmem:[#allocation6 + $0x98] sm:$0xff] %vm2988_vm2, %v4191_v21 }
 0x2ea   :  { %v9692_v12 = vpop.permute.xlu0 %1012  ;;  %4254 = vst.msk [vmem:[#allocation6 + $0x90] sm:$0xff] %vm2988_vm2, %v4190_v34 }
 0x2eb   :  { %2556 = vrot.lane.b32.xlu1 %v788_v49, %s7774_s0  ;;  %v2960_v7 = vsel %vm124_vm0, %v9316_v28, %v9692_v12 }
 0x2ec   :  { %2302 = vrot.lane.b32.xlu0 %v9688_v29, %s7773_s19 }
 0x2ed   :  { %v2799_v44 = vpop.permute.xlu1 %2798 }
 0x2ee   :  { %v2033_v51 = vpop.permute.xlu0 %2032  ;;  %v3412_v10 = vsel %vm3378_vm9, %v3347_v52, %v2799_v44  ;;  %v790_v44 = vld [vmem:[#allocation2 + $0x259] sm:$0xff] }
 0x2ef   :  { %1792 = vrot.lane.b32.xlu1 %v788_v49, %s7771_s2  ;;  %7473 = vmatmul.mubr.msk.f32.gmra.mrb[32].mxu0 %vm3448_vm10, %v3412_v10  ;;  %v3218_v25 = vsel %vm3183_vm6, %v3153_v18, %v2033_v51  ;;  %v9771_v51 = vld [vmem:[#allocation2 + $0x260] sm:$0xff]  ;;  %v3089_v10 = vsel %vm3053_vm4, %v3024_v19, %v9659_v62 }
 0x2f0   :  { %1538 = vrot.lane.b32.xlu0 %v9688_v29, %s7770_s22  ;;  %v3154_v17 = vsel %vm3118_vm5, %v3089_v10, %v9694_v11  ;;  %v791_v11 = vld [vmem:[#allocation2 + $0x261] sm:$0xff]  ;;  %v792_v10 = vld [vmem:[#allocation2 + $0x271] sm:$0xff] }
 0x2f1   :  { %v9713_v37 = vpop.permute.xlu1 %1268  ;;  %v4318_v54 = vld [vmem:[#allocation6 + $0x90] ss:$2 sm:$0xff]  ;;  %v4382_v60 = vld [vmem:[#allocation6 + $0x91] ss:$2 sm:$0xff] }
 0x2f2   :  { %v9711_v36 = vpop.permute.xlu0 %1014  ;;  %v4436_v31 = vmax.f32 %v4318_v54, %v4382_v60  ;;  %v3025_v18 = vsel %vm2988_vm2, %v2960_v7, %v9713_v37  ;;  %v115_v37 = vld [vmem:[%s12152_s29 + $0x1b8] sm:$0xff] }
 0x2f3   :  { %2812 = vrot.lane.b32.xlu1 %v852_v24, %s7775_s24  ;;  %290 = vst.msk [vmem:[#allocation2 + $0x2d9] sm:$0xff] %vm124_vm0, %v115_v37  ;;  %v2961_v48 = vsel %vm124_vm0, %v9350_v46, %v9711_v36  ;;  %v116_v37 = vld [vmem:[%s12152_s29 + $0x1c0] sm:$0xff] }
 0x2f4   :  { %2558 = vrot.lane.b32.xlu0 %v789_v14, %s7774_s0  ;;  %v4463_v53 = vmax.f32 %v4435_v58, %v4436_v31  ;;  %v854_v58 = vld [vmem:[#allocation2 + $0x25a] sm:$0xff]  ;;  %291 = vst.msk [vmem:[#allocation2 + $0x2e9] sm:$0xff] %vm124_vm0, %v116_v37 }
 0x2f5   :  { %v2289_v15 = vpop.permute.xlu1 %2288 }
 0x2f6   :  { %v2035_v9 = vpop.permute.xlu0 %2034  ;;  %4521 = vst.msk [vmem:[#allocation3 + $0x51] sm:$0xff] %vm2988_vm2, %v4463_v53  ;;  %v3283_v56 = vsel %vm3248_vm7, %v3218_v25, %v2289_v15  ;;  %v9819_v25 = vld [vmem:[#allocation2 + $0x270] sm:$0xff] }
 0x2f7   :  { %1794 = vrot.lane.b32.xlu1 %v789_v14, %s7771_s2  ;;  %v3219_v4 = vsel %vm3183_vm6, %v3154_v17, %v2035_v9 }
 0x2f8   :  { %1028 = vrot.lane.b32.xlu0 %v788_v49, %s7769_s21 }
 0x2f9   :  { %v9722_v43 = vpop.permute.xlu1 %1524 }
 0x2fa   :  { %v9720_v40 = vpop.permute.xlu0 %1270 }
 0x2fb   :  { %2814 = vrot.lane.b32.xlu1 %v853_v13, %s7775_s24  ;;  %v3026_v19 = vsel %vm2988_vm2, %v2961_v48, %v9720_v40 }
 0x2fc   :  { %2048 = vrot.lane.b32.xlu0 %v852_v24, %s7772_s25 }
 0x2fd   :  { %v2545_v50 = vpop.permute.xlu1 %2544 }
 0x2fe   :  { %v2291_v38 = vpop.permute.xlu0 %2290  ;;  %v3348_v22 = vsel %vm3313_vm8, %v3283_v56, %v2545_v50  ;;  %v114_v50 = vld [vmem:[%s12152_s29 + $0x1b0] sm:$0xff] }
 0x2ff   :  { %1284 = vrot.lane.b32.xlu1 %v852_v24, %s7768_s20  ;;  %v3284_v62 = vsel %vm3248_vm7, %v3219_v4, %v2291_v38  ;;  %289 = vst.msk [vmem:[#allocation2 + $0x2d1] sm:$0xff] %vm124_vm0, %v114_v50 }
 0x300   :  { %1030 = vrot.lane.b32.xlu0 %v789_v14, %s7769_s21 }
 0x301   :  { %v9743_v8 = vpop.permute.xlu1 %1780 }
 0x302   :  { %v9741_v23 = vpop.permute.xlu0 %1526  ;;  %v7456_v0 = vpop.f32.mrb[20].mxu0 }
 0x303   :  { %2304 = vrot.lane.b32.xlu1 %v9737_v3, %s7773_s19  ;;  %v4058_v27 = vmul.f32 %v9502_v35, %v7456_v0  ;;  %v3811_v20 = vpop.f32.mrb[21].mxu0  ;;  %v3090_v0 = vsel %vm3053_vm4, %v3025_v18, %v9722_v43 }
 0x304   :  { %2050 = vrot.lane.b32.xlu0 %v853_v13, %s7772_s25  ;;  %v4057_v41 = vmul.f32 %v9502_v35, %v3811_v20 }
 0x305   :  { %v2801_v49 = vpop.permute.xlu1 %2800  ;;  %v4129_v2 = vadd.f32 %v9511_v16, %v4058_v27  ;;  %v3155_v27 = vsel %vm3118_vm5, %v3090_v0, %v9743_v8 }
 0x306   :  { %v2547_v21 = vpop.permute.xlu0 %2546  ;;  %v3413_v34 = vsel %vm3378_vm9, %v3348_v22, %v2801_v49  ;;  %v4128_v26 = vadd.f32 %v9511_v16, %v4057_v41 }
 0x307   :  { %1540 = vrot.lane.b32.xlu1 %v9737_v3, %s7770_s22  ;;  %v4193_v52 = vmax.f32 %v4129_v2, 0.0  ;;  %7475 = vmatprep.mubr.msk.f32.mxu0 %vm3448_vm10, %v3413_v34  ;;  %v3349_v47 = vsel %vm3313_vm8, %v3284_v62, %v2547_v21 }
 0x308   :  { %1286 = vrot.lane.b32.xlu0 %v853_v13, %s7768_s20  ;;  %v4192_v39 = vmax.f32 %v4128_v26, 0.0  ;;  %v855_v13 = vld [vmem:[#allocation2 + $0x262] sm:$0xff] }
 0x309   :  { %v9777_v14 = vpop.permute.xlu1 %1782  ;;  %4257 = vst.msk [vmem:[#allocation6 + $0xa8] sm:$0xff] %vm2988_vm2, %v4193_v52 }
 0x30a   :  { %v9775_v55 = vpop.permute.xlu0 %1016  ;;  %4256 = vst.msk [vmem:[#allocation6 + $0xa0] sm:$0xff] %vm2988_vm2, %v4192_v39  ;;  %v3091_v39 = vsel %vm3053_vm4, %v3026_v19, %v9741_v23 }
 0x30b   :  { %2560 = vrot.lane.b32.xlu1 %v790_v44, %s7774_s0  ;;  %v3156_v4 = vsel %vm3118_vm5, %v3091_v39, %v9777_v14  ;;  %v793_v14 = vld [vmem:[#allocation2 + $0x279] sm:$0xff] }
 0x30c   :  { %2306 = vrot.lane.b32.xlu0 %v9771_v51, %s7773_s19 }
 0x30d   :  { %v2803_v54 = vpop.permute.xlu1 %2802 }
 0x30e   :  { %v2037_v24 = vpop.permute.xlu0 %2036  ;;  %v3414_v60 = vsel %vm3378_vm9, %v3349_v47, %v2803_v54 }
 0x30f   :  { %1796 = vrot.lane.b32.xlu1 %v790_v44, %s7771_s2  ;;  %7476 = vmatmul.mubr.msk.f32.gmra.mrb[34].mxu0 %vm3448_vm10, %v3414_v60  ;;  %v3220_v28 = vsel %vm3183_vm6, %v3155_v27, %v2037_v24  ;;  %v857_v27 = vld [vmem:[#allocation2 + $0x27a] sm:$0xff] }
 0x310   :  { %1542 = vrot.lane.b32.xlu0 %v9771_v51, %s7770_s22 }
 0x311   :  { %v9796_v53 = vpop.permute.xlu1 %1272  ;;  %v4320_v60 = vld [vmem:[#allocation6 + $0xa0] ss:$2 sm:$0xff] }
 0x312   :  { %v9794_v31 = vpop.permute.xlu0 %1018 }
 0x313   :  { %2816 = vrot.lane.b32.xlu1 %v854_v58, %s7775_s24 }
 0x314   :  { %2562 = vrot.lane.b32.xlu0 %v791_v11, %s7774_s0 }
 0x315   :  { %v2293_v15 = vpop.permute.xlu1 %2292 }
 0x316   :  { %v2039_v9 = vpop.permute.xlu0 %2038  ;;  %v3285_v43 = vsel %vm3248_vm7, %v3220_v28, %v2293_v15 }
 0x317   :  { %1798 = vrot.lane.b32.xlu1 %v791_v11, %s7771_s2  ;;  %v3221_v40 = vsel %vm3183_vm6, %v3156_v4, %v2039_v9  ;;  %v2963_v4 = vsel %vm124_vm0, %v9433_v32, %v9794_v31 }
 0x318   :  { %1032 = vrot.lane.b32.xlu0 %v790_v44, %s7769_s21  ;;  %v9853_v44 = vld [vmem:[#allocation2 + $0x278] sm:$0xff] }
 0x319   :  { %v9804_v38 = vpop.permute.xlu1 %1528 }
 0x31a   :  { %v9802_v42 = vpop.permute.xlu0 %1274 }
 0x31b   :  { %2818 = vrot.lane.b32.xlu1 %v855_v13, %s7775_s24 }
 0x31c   :  { %2052 = vrot.lane.b32.xlu0 %v854_v58, %s7772_s25 }
 0x31d   :  { %v2549_v57 = vpop.permute.xlu1 %2548 }
 0x31e   :  { %v2295_v5 = vpop.permute.xlu0 %2294  ;;  %v3350_v8 = vsel %vm3313_vm8, %v3285_v43, %v2549_v57 }
 0x31f   :  { %1288 = vrot.lane.b32.xlu1 %v854_v58, %s7768_s20  ;;  %v3286_v23 = vsel %vm3248_vm7, %v3221_v40, %v2295_v5  ;;  %v856_v58 = vld [vmem:[#allocation2 + $0x272] sm:$0xff] }
 0x320   :  { %1034 = vrot.lane.b32.xlu0 %v791_v11, %s7769_s21  ;;  %v4384_v11 = vld [vmem:[#allocation6 + $0xa1] ss:$2 sm:$0xff] }
 0x321   :  { %v9825_v56 = vpop.permute.xlu1 %1784  ;;  %v4437_v5 = vmax.f32 %v4320_v60, %v4384_v11 }
 0x322   :  { %v9823_v63 = vpop.permute.xlu0 %1530  ;;  %v7459_v12 = vpop.f32.mrb[22].mxu0 }
 0x323   :  { %2308 = vrot.lane.b32.xlu1 %v9819_v25, %s7773_s19  ;;  %v4060_v20 = vmul.f32 %v9502_v35, %v7459_v12  ;;  %v3821_v22 = vpop.f32.mrb[23].mxu0 }
 0x324   :  { %2054 = vrot.lane.b32.xlu0 %v855_v13, %s7772_s25  ;;  %v4059_v41 = vmul.f32 %v9502_v35, %v3821_v22  ;;  %v2962_v22 = vsel %vm124_vm0, %v9399_v33, %v9775_v55 }
 0x325   :  { %v2805_v49 = vpop.permute.xlu1 %2804  ;;  %v4131_v2 = vadd.f32 %v9511_v16, %v4060_v20 }
 0x326   :  { %v2551_v21 = vpop.permute.xlu0 %2550  ;;  %v3415_v34 = vsel %vm3378_vm9, %v3350_v8, %v2805_v49  ;;  %v4130_v26 = vadd.f32 %v9511_v16, %v4059_v41  ;;  %v3027_v8 = vsel %vm2988_vm2, %v2962_v22, %v9796_v53  ;;  %v9902_v41 = vld [vmem:[#allocation2 + $0x288] sm:$0xff] }
 0x327   :  { %1544 = vrot.lane.b32.xlu1 %v9819_v25, %s7770_s22  ;;  %v4195_v52 = vmax.f32 %v4131_v2, 0.0  ;;  %7478 = vmatprep.mubr.msk.f32.mxu0 %vm3448_vm10, %v3415_v34  ;;  %v3351_v62 = vsel %vm3313_vm8, %v3286_v23, %v2551_v21  ;;  %v3092_v21 = vsel %vm3053_vm4, %v3027_v8, %v9804_v38  ;;  %v117_v53 = vld [vmem:[%s12152_s29 + $0x1c8] sm:$0xff]  ;;  %v3028_v23 = vsel %vm2988_vm2, %v2963_v4, %v9802_v42 }
 0x328   :  { %1290 = vrot.lane.b32.xlu0 %v855_v13, %s7768_s20  ;;  %v4194_v46 = vmax.f32 %v4130_v26, 0.0  ;;  %v3157_v34 = vsel %vm3118_vm5, %v3092_v21, %v9825_v56  ;;  %292 = vst.msk [vmem:[#allocation2 + $0x2f1] sm:$0xff] %vm124_vm0, %v117_v53 }
 0x329   :  { %v9859_v17 = vpop.permute.xlu1 %1786  ;;  %4259 = vst.msk [vmem:[#allocation6 + $0xb8] sm:$0xff] %vm2988_vm2, %v4195_v52 }
 0x32a   :  { %v9857_v36 = vpop.permute.xlu0 %1020  ;;  %4258 = vst.msk [vmem:[#allocation6 + $0xb0] sm:$0xff] %vm2988_vm2, %v4194_v46 }
 0x32b   :  { %2564 = vrot.lane.b32.xlu1 %v792_v10, %s7774_s0  ;;  %v2964_v21 = vsel %vm124_vm0, %v9481_v45, %v9857_v36 }
 0x32c   :  { %2310 = vrot.lane.b32.xlu0 %v9853_v44, %s7773_s19 }
 0x32d   :  { %v2807_v24 = vpop.permute.xlu1 %2806 }
 0x32e   :  { %v2041_v47 = vpop.permute.xlu0 %2040  ;;  %v3416_v54 = vsel %vm3378_vm9, %v3351_v62, %v2807_v24  ;;  %v794_v24 = vld [vmem:[#allocation2 + $0x289] sm:$0xff] }
 0x32f   :  { %1800 = vrot.lane.b32.xlu1 %v792_v10, %s7771_s2  ;;  %7479 = vmatmul.mubr.msk.f32.gmra.mrb[36].mxu0 %vm3448_vm10, %v3416_v54  ;;  %v3222_v33 = vsel %vm3183_vm6, %v3157_v34, %v2041_v47  ;;  %v9936_v47 = vld [vmem:[#allocation2 + $0x290] sm:$0xff]  ;;  %v3093_v54 = vsel %vm3053_vm4, %v3028_v23, %v9823_v63 }
 0x330   :  { %1546 = vrot.lane.b32.xlu0 %v9853_v44, %s7770_s22  ;;  %v3158_v60 = vsel %vm3118_vm5, %v3093_v54, %v9859_v17  ;;  %v795_v17 = vld [vmem:[#allocation2 + $0x291] sm:$0xff] }
 0x331   :  { %v9878_v15 = vpop.permute.xlu1 %1276  ;;  %v4322_v13 = vld [vmem:[#allocation6 + $0xb0] ss:$2 sm:$0xff]  ;;  %v4386_v50 = vld [vmem:[#allocation6 + $0xb1] ss:$2 sm:$0xff] }
 0x332   :  { %v9876_v9 = vpop.permute.xlu0 %1022  ;;  %v4438_v57 = vmax.f32 %v4322_v13, %v4386_v50  ;;  %v3029_v34 = vsel %vm2988_vm2, %v2964_v21, %v9878_v15  ;;  %v119_v15 = vld [vmem:[%s12152_s29 + $0x1d8] sm:$0xff] }
 0x333   :  { %2820 = vrot.lane.b32.xlu1 %v856_v58, %s7775_s24  ;;  %294 = vst.msk [vmem:[#allocation2 + $0x309] sm:$0xff] %vm124_vm0, %v119_v15  ;;  %v2965_v4 = vsel %vm124_vm0, %v9525_v30, %v9876_v9 }
 0x334   :  { %2566 = vrot.lane.b32.xlu0 %v793_v14, %s7774_s0  ;;  %v4464_v7 = vmax.f32 %v4437_v5, %v4438_v57  ;;  %v858_v5 = vld [vmem:[#allocation2 + $0x28a] sm:$0xff] }
 0x335   :  { %v2297_v0 = vpop.permute.xlu1 %2296 }
 0x336   :  { %v2043_v18 = vpop.permute.xlu0 %2042  ;;  %4522 = vst.msk [vmem:[#allocation3 + $0x61] sm:$0xff] %vm2988_vm2, %v4464_v7  ;;  %v3287_v38 = vsel %vm3248_vm7, %v3222_v33, %v2297_v0  ;;  %v9984_v33 = vld [vmem:[#allocation2 + $0x2a0] sm:$0xff] }
 0x337   :  { %1802 = vrot.lane.b32.xlu1 %v793_v14, %s7771_s2  ;;  %v3223_v42 = vsel %vm3183_vm6, %v3158_v60, %v2043_v18 }
 0x338   :  { %1036 = vrot.lane.b32.xlu0 %v792_v10, %s7769_s21 }
 0x339   :  { %v9887_v12 = vpop.permute.xlu1 %1532 }
 0x33a   :  { %v9885_v28 = vpop.permute.xlu0 %1278 }
 0x33b   :  { %2822 = vrot.lane.b32.xlu1 %v857_v27, %s7775_s24 }
 0x33c   :  { %2056 = vrot.lane.b32.xlu0 %v856_v58, %s7772_s25 }
 0x33d   :  { %v2553_v20 = vpop.permute.xlu1 %2552 }
 0x33e   :  { %v2299_v43 = vpop.permute.xlu0 %2298  ;;  %v3352_v56 = vsel %vm3313_vm8, %v3287_v38, %v2553_v20  ;;  %v118_v20 = vld [vmem:[%s12152_s29 + $0x1d0] sm:$0xff] }
 0x33f   :  { %1292 = vrot.lane.b32.xlu1 %v856_v58, %s7768_s20  ;;  %v3288_v63 = vsel %vm3248_vm7, %v3223_v42, %v2299_v43  ;;  %293 = vst.msk [vmem:[#allocation2 + $0x301] sm:$0xff] %vm124_vm0, %v118_v20 }
 0x340   :  { %1038 = vrot.lane.b32.xlu0 %v793_v14, %s7769_s21 }
 0x341   :  { %v9908_v2 = vpop.permute.xlu1 %1788 }
 0x342   :  { %v9906_v49 = vpop.permute.xlu0 %1534  ;;  %v7462_v55 = vpop.f32.mrb[24].mxu0 }
 0x343   :  { %2312 = vrot.lane.b32.xlu1 %v9902_v41, %s7773_s19  ;;  %v4062_v48 = vmul.f32 %v9502_v35, %v7462_v55  ;;  %v3831_v26 = vpop.f32.mrb[25].mxu0  ;;  %v3094_v55 = vsel %vm3053_vm4, %v3029_v34, %v9887_v12  ;;  %v861_v34 = vld [vmem:[#allocation2 + $0x2aa] sm:$0xff] }
 0x344   :  { %2058 = vrot.lane.b32.xlu0 %v857_v27, %s7772_s25  ;;  %v4061_v19 = vmul.f32 %v9502_v35, %v3831_v26 }
 0x345   :  { %v2809_v10 = vpop.permute.xlu1 %2808  ;;  %v4133_v39 = vadd.f32 %v9511_v16, %v4062_v48  ;;  %v3159_v48 = vsel %vm3118_vm5, %v3094_v55, %v9908_v2 }
 0x346   :  { %v2555_v52 = vpop.permute.xlu0 %2554  ;;  %v3417_v46 = vsel %vm3378_vm9, %v3352_v56, %v2809_v10  ;;  %v4132_v40 = vadd.f32 %v9511_v16, %v4061_v19 }
 0x347   :  { %1548 = vrot.lane.b32.xlu1 %v9902_v41, %s7770_s22  ;;  %v4197_v62 = vmax.f32 %v4133_v39, 0.0  ;;  %7481 = vmatprep.mubr.msk.f32.mxu0 %vm3448_vm10, %v3417_v46  ;;  %v3353_v11 = vsel %vm3313_vm8, %v3288_v63, %v2555_v52 }
 0x348   :  { %1294 = vrot.lane.b32.xlu0 %v857_v27, %s7768_s20  ;;  %v4196_v32 = vmax.f32 %v4132_v40, 0.0  ;;  %v859_v27 = vld [vmem:[#allocation2 + $0x292] sm:$0xff] }
 0x349   :  { %v9942_v14 = vpop.permute.xlu1 %1790  ;;  %4261 = vst.msk [vmem:[#allocation6 + $0xc8] sm:$0xff] %vm2988_vm2, %v4197_v62  ;;  %v10018_v62 = vld [vmem:[#allocation2 + $0x2a8] sm:$0xff] }
 0x34a   :  { %v9940_v31 = vpop.permute.xlu0 %1024  ;;  %4260 = vst.msk [vmem:[#allocation6 + $0xc0] sm:$0xff] %vm2988_vm2, %v4196_v32 }
 0x34b   :  { %2568 = vrot.lane.b32.xlu1 %v794_v24, %s7774_s0 }
 0x34c   :  { %2314 = vrot.lane.b32.xlu0 %v9936_v47, %s7773_s19 }
 0x34d   :  { %v2811_v13 = vpop.permute.xlu1 %2810 }
 0x34e   :  { %v2045_v58 = vpop.permute.xlu0 %2044  ;;  %v3418_v50 = vsel %vm3378_vm9, %v3353_v11, %v2811_v13 }
 0x34f   :  { %1804 = vrot.lane.b32.xlu1 %v794_v24, %s7771_s2  ;;  %7482 = vmatmul.mubr.msk.f32.gmra.mrb[38].mxu0 %vm3448_vm10, %v3418_v50  ;;  %v3224_v45 = vsel %vm3183_vm6, %v3159_v48, %v2045_v58  ;;  %v860_v50 = vld [vmem:[#allocation2 + $0x2a2] sm:$0xff] }
 0x350   :  { %1550 = vrot.lane.b32.xlu0 %v9936_v47, %s7770_s22 }
 0x351   :  { %v9961_v7 = vpop.permute.xlu1 %1280  ;;  %v4324_v58 = vld [vmem:[#allocation6 + $0xc0] ss:$2 sm:$0xff]  ;;  %v4388_v13 = vld [vmem:[#allocation6 + $0xc1] ss:$2 sm:$0xff] }
 0x352   :  { %v9959_v57 = vpop.permute.xlu0 %1026 }
 0x353   :  { %2824 = vrot.lane.b32.xlu1 %v858_v5, %s7775_s24 }
 0x354   :  { %2570 = vrot.lane.b32.xlu0 %v795_v17, %s7774_s0 }
 0x355   :  { %v2301_v0 = vpop.permute.xlu1 %2300 }
 0x356   :  { %v2047_v18 = vpop.permute.xlu0 %2046  ;;  %v3289_v12 = vsel %vm3248_vm7, %v3224_v45, %v2301_v0  ;;  %v120_v45 = vld [vmem:[%s12152_s29 + $0x1e0] sm:$0xff] }
 0x357   :  { %1806 = vrot.lane.b32.xlu1 %v795_v17, %s7771_s2  ;;  %295 = vst.msk [vmem:[#allocation2 + $0x319] sm:$0xff] %vm124_vm0, %v120_v45 }
 0x358   :  { %1040 = vrot.lane.b32.xlu0 %v794_v24, %s7769_s21  ;;  %v796_v24 = vld [vmem:[#allocation2 + $0x2a1] sm:$0xff] }
 0x359   :  { %v9969_v43 = vpop.permute.xlu1 %1536 }
 0x35a   :  { %v9967_v37 = vpop.permute.xlu0 %1282 }
 0x35b   :  { %2826 = vrot.lane.b32.xlu1 %v859_v27, %s7775_s24 }
 0x35c   :  { %2060 = vrot.lane.b32.xlu0 %v858_v5, %s7772_s25 }
 0x35d   :  { %v2557_v8 = vpop.permute.xlu1 %2556 }
 0x35e   :  { %v2303_v22 = vpop.permute.xlu0 %2302  ;;  %v3354_v2 = vsel %vm3313_vm8, %v3289_v12, %v2557_v8  ;;  %v2966_v12 = vsel %vm124_vm0, %v9574_v61, %v9940_v31 }
 0x35f   :  { %1296 = vrot.lane.b32.xlu1 %v858_v5, %s7768_s20 }
 0x360   :  { %1042 = vrot.lane.b32.xlu0 %v795_v17, %s7769_s21 }
 0x361   :  { %v9990_v38 = vpop.permute.xlu1 %1792 }
 0x362   :  { %v9988_v53 = vpop.permute.xlu0 %1538  ;;  %v7465_v36 = vpop.f32.mrb[26].mxu0 }
 0x363   :  { %2316 = vrot.lane.b32.xlu1 %v9984_v33, %s7773_s19  ;;  %v4064_v26 = vmul.f32 %v9502_v35, %v7465_v36  ;;  %v3841_v56 = vpop.f32.mrb[27].mxu0 }
 0x364   :  { %2062 = vrot.lane.b32.xlu0 %v859_v27, %s7772_s25  ;;  %v4063_v19 = vmul.f32 %v9502_v35, %v3841_v56  ;;  %v3030_v35 = vsel %vm2988_vm2, %v2965_v4, %v9885_v28  ;;  %v10067_v56 = vld [vmem:[#allocation2 + $0x2b8] sm:$0xff] }
 0x365   :  { %v2813_v10 = vpop.permute.xlu1 %2812  ;;  %v4135_v39 = vadd.f32 %v9511_v16, %v4064_v26  ;;  %v3095_v54 = vsel %vm3053_vm4, %v3030_v35, %v9906_v49  ;;  %v3031_v26 = vsel %vm2988_vm2, %v2966_v12, %v9961_v7  ;;  %v121_v7 = vld [vmem:[%s12152_s29 + $0x1e8] sm:$0xff] }
 0x366   :  { %v2559_v52 = vpop.permute.xlu0 %2558  ;;  %v3419_v46 = vsel %vm3378_vm9, %v3354_v2, %v2813_v10  ;;  %v4134_v40 = vadd.f32 %v9511_v16, %v4063_v19  ;;  %v3160_v32 = vsel %vm3118_vm5, %v3095_v54, %v9942_v14  ;;  %v797_v14 = vld [vmem:[#allocation2 + $0x2a9] sm:$0xff]  ;;  %v3096_v2 = vsel %vm3053_vm4, %v3031_v26, %v9969_v43  ;;  %296 = vst.msk [vmem:[#allocation2 + $0x321] sm:$0xff] %vm124_vm0, %v121_v7 }
 0x367   :  { %1552 = vrot.lane.b32.xlu1 %v9984_v33, %s7770_s22  ;;  %v4199_v23 = vmax.f32 %v4135_v39, 0.0  ;;  %7484 = vmatprep.mubr.msk.f32.mxu0 %vm3448_vm10, %v3419_v46  ;;  %v3225_v28 = vsel %vm3183_vm6, %v3160_v32, %v2047_v18  ;;  %v3161_v10 = vsel %vm3118_vm5, %v3096_v2, %v9990_v38  ;;  %v10088_v39 = vld [vmem:[%s12154_s27] ss:$0 sm:$0xff]  ;;  %v2967_v32 = vsel %vm124_vm0, %v9608_v59, %v9959_v57 }
 0x368   :  { %1298 = vrot.lane.b32.xlu0 %v859_v27, %s7768_s20  ;;  %v4198_v30 = vmax.f32 %v4134_v40, 0.0  ;;  %v3290_v49 = vsel %vm3248_vm7, %v3225_v28, %v2303_v22  ;;  %v4439_v27 = vmax.f32 %v4324_v58, %v4388_v13 }
 0x369   :  { %v10024_v16 = vpop.permute.xlu1 %1794  ;;  %4263 = vst.msk [vmem:[#allocation6 + $0xd8] sm:$0xff] %vm2988_vm2, %v4199_v23  ;;  %v3355_v60 = vsel %vm3313_vm8, %v3290_v49, %v2559_v52  ;;  %v3032_v49 = vsel %vm2988_vm2, %v2967_v32, %v9967_v37 }
 0x36a   :  { %v10022_v9 = vpop.permute.xlu0 %1028  ;;  %4262 = vst.msk [vmem:[#allocation6 + $0xd0] sm:$0xff] %vm2988_vm2, %v4198_v30 }
 0x36b   :  { %2572 = vrot.lane.b32.xlu1 %v796_v24, %s7774_s0  ;;  %v2968_v2 = vsel %vm124_vm0, %v9655_v6, %v10022_v9 }
 0x36c   :  { %2318 = vrot.lane.b32.xlu0 %v10018_v62, %s7773_s19 }
 0x36d   :  { %v2815_v63 = vpop.permute.xlu1 %2814 }
 0x36e   :  { %v2049_v42 = vpop.permute.xlu0 %2048  ;;  %v3420_v11 = vsel %vm3378_vm9, %v3355_v60, %v2815_v63  ;;  %v798_v63 = vld [vmem:[#allocation2 + $0x2b9] sm:$0xff] }
 0x36f   :  { %1808 = vrot.lane.b32.xlu1 %v796_v24, %s7771_s2  ;;  %7485 = vmatmul.mubr.msk.f32.gmra.mrb[40].mxu0 %vm3448_vm10, %v3420_v11  ;;  %v3226_v61 = vsel %vm3183_vm6, %v3161_v10, %v2049_v42  ;;  %v10111_v42 = vld [vmem:[#allocation2 + $0x2c0] sm:$0xff]  ;;  %v3097_v11 = vsel %vm3053_vm4, %v3032_v49, %v9988_v53 }
 0x370   :  { %1554 = vrot.lane.b32.xlu0 %v10018_v62, %s7770_s22  ;;  %v3162_v58 = vsel %vm3118_vm5, %v3097_v11, %v10024_v16  ;;  %v799_v16 = vld [vmem:[#allocation2 + $0x2c1] sm:$0xff]  ;;  %v800_v11 = vld [vmem:[#allocation2 + $0x2d1] sm:$0xff] }
 0x371   :  { %v10043_v5 = vpop.permute.xlu1 %1284  ;;  %v4326_v18 = vld [vmem:[#allocation6 + $0xd0] ss:$2 sm:$0xff]  ;;  %v4390_v0 = vld [vmem:[#allocation6 + $0xd1] ss:$2 sm:$0xff] }
 0x372   :  { %v10041_v17 = vpop.permute.xlu0 %1030  ;;  %v4440_v20 = vmax.f32 %v4326_v18, %v4390_v0  ;;  %v3033_v10 = vsel %vm2988_vm2, %v2968_v2, %v10043_v5  ;;  %v123_v5 = vld [vmem:[%s12152_s29 + $0x1f8] sm:$0xff] }
 0x373   :  { %2828 = vrot.lane.b32.xlu1 %v860_v50, %s7775_s24  ;;  %298 = vst.msk [vmem:[#allocation2 + $0x339] sm:$0xff] %vm124_vm0, %v123_v5  ;;  %v2969_v32 = vsel %vm124_vm0, %v9688_v29, %v10041_v17 }
 0x374   :  { %2574 = vrot.lane.b32.xlu0 %v797_v14, %s7774_s0  ;;  %v4465_v22 = vmax.f32 %v4439_v27, %v4440_v20  ;;  %v862_v27 = vld [vmem:[#allocation2 + $0x2ba] sm:$0xff] }
 0x375   :  { %v2305_v21 = vpop.permute.xlu1 %2304 }
 0x376   :  { %v2051_v8 = vpop.permute.xlu0 %2050  ;;  %4523 = vst.msk [vmem:[#allocation3 + $0x71] sm:$0xff] %vm2988_vm2, %v4465_v22  ;;  %v3291_v43 = vsel %vm3248_vm7, %v3226_v61, %v2305_v21  ;;  %v10159_v61 = vld [vmem:[#allocation2 + $0x2d0] sm:$0xff] }
 0x377   :  { %1810 = vrot.lane.b32.xlu1 %v797_v14, %s7771_s2  ;;  %v3227_v37 = vsel %vm3183_vm6, %v3162_v58, %v2051_v8 }
 0x378   :  { %1044 = vrot.lane.b32.xlu0 %v796_v24, %s7769_s21  ;;  %v10097_v24 = vld [vmem:[%s12130_s3] ss:$0 sm:$0xff] }
 0x379   :  { %v10052_v48 = vpop.permute.xlu1 %1540 }
 0x37a   :  { %v10050_v55 = vpop.permute.xlu0 %1286 }
 0x37b   :  { %2830 = vrot.lane.b32.xlu1 %v861_v34, %s7775_s24  ;;  %v3034_v49 = vsel %vm2988_vm2, %v2969_v32, %v10050_v55 }
 0x37c   :  { %2064 = vrot.lane.b32.xlu0 %v860_v50, %s7772_s25 }
 0x37d   :  { %v2561_v15 = vpop.permute.xlu1 %2560 }
 0x37e   :  { %v2307_v36 = vpop.permute.xlu0 %2306  ;;  %v3356_v4 = vsel %vm3313_vm8, %v3291_v43, %v2561_v15  ;;  %v122_v15 = vld [vmem:[%s12152_s29 + $0x1f0] sm:$0xff]  ;;  %s7776_s29 = smov 40  }
 0x37f   :  { %1300 = vrot.lane.b32.xlu1 %v860_v50, %s7768_s20  ;;  %v3292_v53 = vsel %vm3248_vm7, %v3227_v37, %v2307_v36  ;;  %297 = vst.msk [vmem:[#allocation2 + $0x331] sm:$0xff] %vm124_vm0, %v122_v15 }
 0x380   :  { %1046 = vrot.lane.b32.xlu0 %v797_v14, %s7769_s21 }
 0x381   :  { %v10073_v52 = vpop.permute.xlu1 %1796 }
 0x382   :  { %v10071_v19 = vpop.permute.xlu0 %1542  ;;  %v7468_v31 = vpop.f32.mrb[28].mxu0 }
 0x383   :  { %2320 = vrot.lane.b32.xlu1 %v10067_v56, %s7773_s19  ;;  %v4066_v38 = vmul.f32 %v10088_v39, %v7468_v31  ;;  %v3851_v46 = vpop.f32.mrb[29].mxu0  ;;  %v3098_v31 = vsel %vm3053_vm4, %v3033_v10, %v10052_v48 }
 0x384   :  { %2066 = vrot.lane.b32.xlu0 %v861_v34, %s7772_s25  ;;  %v4065_v40 = vmul.f32 %v10088_v39, %v3851_v46 }
 0x385   :  { %v2817_v23 = vpop.permute.xlu1 %2816  ;;  %v4137_v54 = vadd.f32 %v10097_v24, %v4066_v38  ;;  %v3163_v38 = vsel %vm3118_vm5, %v3098_v31, %v10073_v52 }
 0x386   :  { %v2563_v35 = vpop.permute.xlu0 %2562  ;;  %v3421_v30 = vsel %vm3378_vm9, %v3356_v4, %v2817_v23  ;;  %v4136_v28 = vadd.f32 %v10097_v24, %v4065_v40 }
 0x387   :  { %1556 = vrot.lane.b32.xlu1 %v10067_v56, %s7770_s22  ;;  %v4201_v60 = vmax.f32 %v4137_v54, 0.0  ;;  %7487 = vmatprep.mubr.msk.f32.mxu0 %vm3448_vm10, %v3421_v30  ;;  %v3357_v13 = vsel %vm3313_vm8, %v3292_v53, %v2563_v35 }
 0x388   :  { %1302 = vrot.lane.b32.xlu0 %v861_v34, %s7768_s20  ;;  %v4200_v59 = vmax.f32 %v4136_v28, 0.0  ;;  %v863_v34 = vld [vmem:[#allocation2 + $0x2c2] sm:$0xff] }
 0x389   :  { %v10117_v14 = vpop.permute.xlu1 %1798  ;;  %4265 = vst.msk [vmem:[#allocation6 + $0xe8] sm:$0xff] %vm2988_vm2, %v4201_v60 }
 0x38a   :  { %v10115_v57 = vpop.permute.xlu0 %1032  ;;  %4264 = vst.msk [vmem:[#allocation6 + $0xe0] sm:$0xff] %vm2988_vm2, %v4200_v59  ;;  %v3099_v59 = vsel %vm3053_vm4, %v3034_v49, %v10071_v19 }
 0x38b   :  { %2576 = vrot.lane.b32.xlu1 %v798_v63, %s7774_s0  ;;  %v3164_v37 = vsel %vm3118_vm5, %v3099_v59, %v10117_v14  ;;  %v801_v14 = vld [vmem:[#allocation2 + $0x2d9] sm:$0xff] }
 0x38c   :  { %2322 = vrot.lane.b32.xlu0 %v10111_v42, %s7773_s19 }
 0x38d   :  { %v2819_v18 = vpop.permute.xlu1 %2818 }
 0x38e   :  { %v2053_v50 = vpop.permute.xlu0 %2052  ;;  %v3422_v0 = vsel %vm3378_vm9, %v3357_v13, %v2819_v18 }
 0x38f   :  { %1812 = vrot.lane.b32.xlu1 %v798_v63, %s7771_s2  ;;  %7488 = vmatmul.mubr.msk.f32.gmra.mrb[42].mxu0 %vm3448_vm10, %v3422_v0  ;;  %v3228_v6 = vsel %vm3183_vm6, %v3163_v38, %v2053_v50  ;;  %v865_v38 = vld [vmem:[#allocation2 + $0x2da] sm:$0xff] }
 0x390   :  { %1558 = vrot.lane.b32.xlu0 %v10111_v42, %s7770_s22 }
 0x391   :  { %v10136_v22 = vpop.permute.xlu1 %1288  ;;  %v4328_v0 = vld [vmem:[#allocation6 + $0xe0] ss:$2 sm:$0xff] }
 0x392   :  { %v10134_v20 = vpop.permute.xlu0 %1034 }
 0x393   :  { %2832 = vrot.lane.b32.xlu1 %v862_v27, %s7775_s24  ;;  %v2971_v59 = vsel %vm124_vm0, %v9771_v51, %v10134_v20 }
 0x394   :  { %2578 = vrot.lane.b32.xlu0 %v799_v16, %s7774_s0 }
 0x395   :  { %v2309_v21 = vpop.permute.xlu1 %2308 }
 0x396   :  { %v2055_v8 = vpop.permute.xlu0 %2054  ;;  %v3293_v48 = vsel %vm3248_vm7, %v3228_v6, %v2309_v21 }
 0x397   :  { %1814 = vrot.lane.b32.xlu1 %v799_v16, %s7771_s2  ;;  %v3229_v55 = vsel %vm3183_vm6, %v3164_v37, %v2055_v8 }
 0x398   :  { %1048 = vrot.lane.b32.xlu0 %v798_v63, %s7769_s21  ;;  %v10193_v63 = vld [vmem:[#allocation2 + $0x2d8] sm:$0xff] }
 0x399   :  { %v10144_v36 = vpop.permute.xlu1 %1544 }
 0x39a   :  { %v10142_v45 = vpop.permute.xlu0 %1290 }
 0x39b   :  { %2834 = vrot.lane.b32.xlu1 %v863_v34, %s7775_s24  ;;  %v3036_v37 = vsel %vm2988_vm2, %v2971_v59, %v10142_v45 }
 0x39c   :  { %2068 = vrot.lane.b32.xlu0 %v862_v27, %s7772_s25 }
 0x39d   :  { %v2565_v26 = vpop.permute.xlu1 %2564 }
 0x39e   :  { %v2311_v12 = vpop.permute.xlu0 %2310  ;;  %v3358_v52 = vsel %vm3313_vm8, %v3293_v48, %v2565_v26 }
 0x39f   :  { %1304 = vrot.lane.b32.xlu1 %v862_v27, %s7768_s20  ;;  %v3294_v19 = vsel %vm3248_vm7, %v3229_v55, %v2311_v12  ;;  %v864_v27 = vld [vmem:[#allocation2 + $0x2d2] sm:$0xff] }
 0x3a0   :  { %1050 = vrot.lane.b32.xlu0 %v799_v16, %s7769_s21  ;;  %v4392_v16 = vld [vmem:[#allocation6 + $0xe1] ss:$2 sm:$0xff] }
 0x3a1   :  { %v10165_v43 = vpop.permute.xlu1 %1800  ;;  %v4441_v12 = vmax.f32 %v4328_v0, %v4392_v16 }
 0x3a2   :  { %v10163_v7 = vpop.permute.xlu0 %1546  ;;  %v7471_v9 = vpop.f32.mrb[30].mxu0 }
 0x3a3   :  { %2324 = vrot.lane.b32.xlu1 %v10159_v61, %s7773_s19  ;;  %v4068_v46 = vmul.f32 %v10088_v39, %v7471_v9  ;;  %v3861_v4 = vpop.f32.mrb[31].mxu0 }
 0x3a4   :  { %2070 = vrot.lane.b32.xlu0 %v863_v34, %s7772_s25  ;;  %v4067_v40 = vmul.f32 %v10088_v39, %v3861_v4 }
 0x3a5   :  { %v2821_v23 = vpop.permute.xlu1 %2820  ;;  %v4139_v54 = vadd.f32 %v10097_v24, %v4068_v46  ;;  %v2970_v46 = vsel %vm124_vm0, %v9737_v3, %v10115_v57 }
 0x3a6   :  { %v2567_v35 = vpop.permute.xlu0 %2566  ;;  %v3423_v30 = vsel %vm3378_vm9, %v3358_v52, %v2821_v23  ;;  %v4138_v28 = vadd.f32 %v10097_v24, %v4067_v40  ;;  %v3035_v4 = vsel %vm2988_vm2, %v2970_v46, %v10136_v22  ;;  %v10238_v52 = vld [vmem:[#allocation2 + $0x2e8] sm:$0xff] }
 0x3a7   :  { %1560 = vrot.lane.b32.xlu1 %v10159_v61, %s7770_s22  ;;  %v4203_v60 = vmax.f32 %v4139_v54, 0.0  ;;  %7490 = vmatprep.mubr.msk.f32.mxu0 %vm3448_vm10, %v3423_v30  ;;  %v3359_v53 = vsel %vm3313_vm8, %v3294_v19, %v2567_v35  ;;  %v3100_v40 = vsel %vm3053_vm4, %v3035_v4, %v10144_v36  ;;  %v10268_v19 = vld [vmem:[#allocation2 + $0x2f0] sm:$0xff] }
 0x3a8   :  { %1306 = vrot.lane.b32.xlu0 %v863_v34, %s7768_s20  ;;  %v4202_v29 = vmax.f32 %v4138_v28, 0.0  ;;  %v3165_v54 = vsel %vm3118_vm5, %v3100_v40, %v10165_v43  ;;  %v10312_v40 = vld [vmem:[#allocation2 + $0x300] sm:$0xff] }
 0x3a9   :  { %v10199_v58 = vpop.permute.xlu1 %1802  ;;  %4267 = vst.msk [vmem:[#allocation6 + $0xf8] sm:$0xff] %vm2988_vm2, %v4203_v60 }
 0x3aa   :  { %v10197_v17 = vpop.permute.xlu0 %1036  ;;  %4266 = vst.msk [vmem:[#allocation6 + $0xf0] sm:$0xff] %vm2988_vm2, %v4202_v29 }
 0x3ab   :  { %2580 = vrot.lane.b32.xlu1 %v800_v11, %s7774_s0  ;;  %v2972_v46 = vsel %vm124_vm0, %v9819_v25, %v10197_v17 }
 0x3ac   :  { %2326 = vrot.lane.b32.xlu0 %v10193_v63, %s7773_s19 }
 0x3ad   :  { %v2823_v50 = vpop.permute.xlu1 %2822 }
 0x3ae   :  { %v2057_v13 = vpop.permute.xlu0 %2056  ;;  %v3424_v18 = vsel %vm3378_vm9, %v3359_v53, %v2823_v50  ;;  %v802_v53 = vld [vmem:[#allocation2 + $0x2e9] sm:$0xff] }
 0x3af   :  { %1816 = vrot.lane.b32.xlu1 %v800_v11, %s7771_s2  ;;  %7491 = vmatmul.mubr.msk.f32.gmra.mrb[44].mxu0 %vm3448_vm10, %v3424_v18  ;;  %v3230_v3 = vsel %vm3183_vm6, %v3165_v54, %v2057_v13  ;;  %v3101_v13 = vsel %vm3053_vm4, %v3036_v37, %v10163_v7  ;;  %v10342_v37 = vld [vmem:[#allocation2 + $0x308] sm:$0xff] }
 0x3b0   :  { %1562 = vrot.lane.b32.xlu0 %v10193_v63, %s7770_s22  ;;  %v3166_v18 = vsel %vm3118_vm5, %v3101_v13, %v10199_v58  ;;  %v803_v58 = vld [vmem:[#allocation2 + $0x2f1] sm:$0xff] }
 0x3b1   :  { %v10218_v21 = vpop.permute.xlu1 %1292  ;;  %v4330_v34 = vld [vmem:[#allocation6 + $0xf0] ss:$2 sm:$0xff]  ;;  %v4394_v15 = vld [vmem:[#allocation6 + $0xf1] ss:$2 sm:$0xff] }
 0x3b2   :  { %v10216_v8 = vpop.permute.xlu0 %1038  ;;  %v4442_v26 = vmax.f32 %v4330_v34, %v4394_v15  ;;  %v866_v34 = vld [vmem:[#allocation2 + $0x2ea] sm:$0xff]  ;;  %v3037_v4 = vsel %vm2988_vm2, %v2972_v46, %v10218_v21 }
 0x3b3   :  { %2836 = vrot.lane.b32.xlu1 %v864_v27, %s7775_s24 }
 0x3b4   :  { %2582 = vrot.lane.b32.xlu0 %v801_v14, %s7774_s0  ;;  %v4466_v2 = vmax.f32 %v4441_v12, %v4442_v26 }
 0x3b5   :  { %v2313_v31 = vpop.permute.xlu1 %2312 }
 0x3b6   :  { %v2059_v10 = vpop.permute.xlu0 %2058  ;;  %4524 = vst.msk [vmem:[#allocation3 + $0x81] sm:$0xff] %vm2988_vm2, %v4466_v2  ;;  %v3295_v22 = vsel %vm3248_vm7, %v3230_v3, %v2313_v31 }
 0x3b7   :  { %1818 = vrot.lane.b32.xlu1 %v801_v14, %s7771_s2  ;;  %v3231_v45 = vsel %vm3183_vm6, %v3166_v18, %v2059_v10  ;;  %v867_v10 = vld [vmem:[#allocation2 + $0x2f2] sm:$0xff] }
 0x3b8   :  { %1052 = vrot.lane.b32.xlu0 %v800_v11, %s7769_s21 }
 0x3b9   :  { %v10227_v9 = vpop.permute.xlu1 %1548 }
 0x3ba   :  { %v10225_v6 = vpop.permute.xlu0 %1294  ;;  %v3102_v54 = vsel %vm3053_vm4, %v3037_v4, %v10227_v9 }
 0x3bb   :  { %2838 = vrot.lane.b32.xlu1 %v865_v38, %s7775_s24 }
 0x3bc   :  { %2072 = vrot.lane.b32.xlu0 %v864_v27, %s7772_s25 }
 0x3bd   :  { %v2569_v48 = vpop.permute.xlu1 %2568 }
 0x3be   :  { %v2315_v5 = vpop.permute.xlu0 %2314  ;;  %v3360_v32 = vsel %vm3313_vm8, %v3295_v22, %v2569_v48 }
 0x3bf   :  { %1308 = vrot.lane.b32.xlu1 %v864_v27, %s7768_s20  ;;  %v3296_v7 = vsel %vm3248_vm7, %v3231_v45, %v2315_v5 }
 0x3c0   :  { %1054 = vrot.lane.b32.xlu0 %v801_v14, %s7769_s21 }
 0x3c1   :  { %v10244_v23 = vpop.permute.xlu1 %1804 }
 0x3c2   :  { %v10242_v35 = vpop.permute.xlu0 %1550  ;;  %v7474_v57 = vpop.f32.mrb[32].mxu0  ;;  %v3167_v22 = vsel %vm3118_vm5, %v3102_v54, %v10244_v23  ;;  %v869_v54 = vld [vmem:[#allocation2 + $0x30a] sm:$0xff] }
 0x3c3   :  { %2328 = vrot.lane.b32.xlu1 %v10238_v52, %s7773_s19  ;;  %v4070_v30 = vmul.f32 %v10088_v39, %v7474_v57  ;;  %v3871_v36 = vpop.f32.mrb[33].mxu0 }
 0x3c4   :  { %2074 = vrot.lane.b32.xlu0 %v865_v38, %s7772_s25  ;;  %v4069_v28 = vmul.f32 %v10088_v39, %v3871_v36 }
 0x3c5   :  { %v2825_v60 = vpop.permute.xlu1 %2824  ;;  %v4141_v43 = vadd.f32 %v10097_v24, %v4070_v30 }
 0x3c6   :  { %v2571_v49 = vpop.permute.xlu0 %2570  ;;  %v3425_v11 = vsel %vm3378_vm9, %v3360_v32, %v2825_v60  ;;  %v4140_v29 = vadd.f32 %v10097_v24, %v4069_v28 }
 0x3c7   :  { %1564 = vrot.lane.b32.xlu1 %v10238_v52, %s7770_s22  ;;  %v4205_v55 = vmax.f32 %v4141_v43, 0.0  ;;  %7493 = vmatprep.mubr.msk.f32.mxu0 %vm3448_vm10, %v3425_v11  ;;  %v3361_v14 = vsel %vm3313_vm8, %v3296_v7, %v2571_v49  ;;  %v2973_v43 = vsel %vm124_vm0, %v9853_v44, %v10216_v8 }
 0x3c8   :  { %1310 = vrot.lane.b32.xlu0 %v865_v38, %s7768_s20  ;;  %v4204_v51 = vmax.f32 %v4140_v29, 0.0  ;;  %v3038_v59 = vsel %vm2988_vm2, %v2973_v43, %v10225_v6 }
 0x3c9   :  { %v10274_v50 = vpop.permute.xlu1 %1806  ;;  %4269 = vst.msk [vmem:[#allocation6 + $0x108] sm:$0xff] %vm2988_vm2, %v4205_v55  ;;  %v804_v55 = vld [vmem:[#allocation2 + $0x301] sm:$0xff] }
 0x3ca   :  { %v10272_v20 = vpop.permute.xlu0 %1040  ;;  %4268 = vst.msk [vmem:[#allocation6 + $0x100] sm:$0xff] %vm2988_vm2, %v4204_v51 }
 0x3cb   :  { %2584 = vrot.lane.b32.xlu1 %v802_v53, %s7774_s0 }
 0x3cc   :  { %2330 = vrot.lane.b32.xlu0 %v10268_v19, %s7773_s19 }
 0x3cd   :  { %v2827_v16 = vpop.permute.xlu1 %2826 }
 0x3ce   :  { %v2061_v0 = vpop.permute.xlu0 %2060  ;;  %v3426_v27 = vsel %vm3378_vm9, %v3361_v14, %v2827_v16 }
 0x3cf   :  { %1820 = vrot.lane.b32.xlu1 %v802_v53, %s7771_s2  ;;  %7494 = vmatmul.mubr.msk.f32.gmra.mrb[46].mxu0 %vm3448_vm10, %v3426_v27  ;;  %v3232_v25 = vsel %vm3183_vm6, %v3167_v22, %v2061_v0  ;;  %v868_v27 = vld [vmem:[#allocation2 + $0x302] sm:$0xff] }
 0x3d0   :  { %1566 = vrot.lane.b32.xlu0 %v10268_v19, %s7770_s22 }
 0x3d1   :  { %v10293_v12 = vpop.permute.xlu1 %1296  ;;  %v4332_v0 = vld [vmem:[#allocation6 + $0x100] ss:$2 sm:$0xff]  ;;  %v4396_v16 = vld [vmem:[#allocation6 + $0x101] ss:$2 sm:$0xff] }
 0x3d2   :  { %v10291_v15 = vpop.permute.xlu0 %1042 }
 0x3d3   :  { %2840 = vrot.lane.b32.xlu1 %v866_v34, %s7775_s24 }
 0x3d4   :  { %2586 = vrot.lane.b32.xlu0 %v803_v58, %s7774_s0 }
 0x3d5   :  { %v2317_v2 = vpop.permute.xlu1 %2316 }
 0x3d6   :  { %v2063_v26 = vpop.permute.xlu0 %2062  ;;  %v3297_v21 = vsel %vm3248_vm7, %v3232_v25, %v2317_v2 }
 0x3d7   :  { %1822 = vrot.lane.b32.xlu1 %v803_v58, %s7771_s2 }
 0x3d8   :  { %1056 = vrot.lane.b32.xlu0 %v802_v53, %s7769_s21  ;;  %v3103_v53 = vsel %vm3053_vm4, %v3038_v59, %v10242_v35 }
 0x3d9   :  { %v10301_v38 = vpop.permute.xlu1 %1552  ;;  %v3168_v51 = vsel %vm3118_vm5, %v3103_v53, %v10274_v50  ;;  %v805_v50 = vld [vmem:[#allocation2 + $0x309] sm:$0xff]  ;;  %v2975_v53 = vsel %vm124_vm0, %v9936_v47, %v10291_v15 }
 0x3da   :  { %v10299_v31 = vpop.permute.xlu0 %1298  ;;  %v3233_v6 = vsel %vm3183_vm6, %v3168_v51, %v2063_v26 }
 0x3db   :  { %2842 = vrot.lane.b32.xlu1 %v867_v10, %s7775_s24  ;;  %v3040_v51 = vsel %vm2988_vm2, %v2975_v53, %v10299_v31 }
 0x3dc   :  { %2076 = vrot.lane.b32.xlu0 %v866_v34, %s7772_s25 }
 0x3dd   :  { %v2573_v48 = vpop.permute.xlu1 %2572 }
 0x3de   :  { %v2319_v5 = vpop.permute.xlu0 %2318  ;;  %v3362_v36 = vsel %vm3313_vm8, %v3297_v21, %v2573_v48 }
 0x3df   :  { %1312 = vrot.lane.b32.xlu1 %v866_v34, %s7768_s20  ;;  %v3298_v35 = vsel %vm3248_vm7, %v3233_v6, %v2319_v5 }
 0x3e0   :  { %1058 = vrot.lane.b32.xlu0 %v803_v58, %s7769_s21 }
 0x3e1   :  { %v10318_v57 = vpop.permute.xlu1 %1808 }
 0x3e2   :  { %v10316_v3 = vpop.permute.xlu0 %1554  ;;  %v7477_v17 = vpop.f32.mrb[34].mxu0 }
 0x3e3   :  { %2332 = vrot.lane.b32.xlu1 %v10312_v40, %s7773_s19  ;;  %v4072_v30 = vmul.f32 %v10088_v39, %v7477_v17  ;;  %v3881_v9 = vpop.f32.mrb[35].mxu0 }
 0x3e4   :  { %2078 = vrot.lane.b32.xlu0 %v867_v10, %s7772_s25  ;;  %v4071_v32 = vmul.f32 %v10088_v39, %v3881_v9 }
 0x3e5   :  { %v2829_v49 = vpop.permute.xlu1 %2828  ;;  %v4143_v23 = vadd.f32 %v10097_v24, %v4072_v30  ;;  %v2974_v30 = vsel %vm124_vm0, %v9902_v41, %v10272_v20 }
 0x3e6   :  { %v2575_v28 = vpop.permute.xlu0 %2574  ;;  %v3427_v60 = vsel %vm3378_vm9, %v3362_v36, %v2829_v49  ;;  %v4142_v11 = vadd.f32 %v10097_v24, %v4071_v32  ;;  %v3039_v9 = vsel %vm2988_vm2, %v2974_v30, %v10293_v12  ;;  %v10387_v36 = vld [vmem:[#allocation2 + $0x318] sm:$0xff] }
 0x3e7   :  { %1568 = vrot.lane.b32.xlu1 %v10312_v40, %s7770_s22  ;;  %v4207_v29 = vmax.f32 %v4143_v23, 0.0  ;;  %7496 = vmatprep.mubr.msk.f32.mxu0 %vm3448_vm10, %v3427_v60  ;;  %v3363_v18 = vsel %vm3313_vm8, %v3298_v35, %v2575_v28  ;;  %v3104_v32 = vsel %vm3053_vm4, %v3039_v9, %v10301_v38  ;;  %v10417_v35 = vld [vmem:[#allocation2 + $0x320] sm:$0xff] }
 0x3e8   :  { %1314 = vrot.lane.b32.xlu0 %v867_v10, %s7768_s20  ;;  %v4206_v44 = vmax.f32 %v4142_v11, 0.0  ;;  %v4443_v10 = vmax.f32 %v4332_v0, %v4396_v16  ;;  %v3169_v23 = vsel %vm3118_vm5, %v3104_v32, %v10318_v57  ;;  %v744_v32 = vld [vmem:[#allocation2 + $0x330] sm:$0xff] }
 0x3e9   :  { %v10348_v13 = vpop.permute.xlu1 %1810  ;;  %4271 = vst.msk [vmem:[#allocation6 + $0x118] sm:$0xff] %vm2988_vm2, %v4207_v29 }
 0x3ea   :  { %v10346_v8 = vpop.permute.xlu0 %1044  ;;  %4270 = vst.msk [vmem:[#allocation6 + $0x110] sm:$0xff] %vm2988_vm2, %v4206_v44 }
 0x3eb   :  { %2588 = vrot.lane.b32.xlu1 %v804_v55, %s7774_s0  ;;  %v2976_v30 = vsel %vm124_vm0, %v9984_v33, %v10346_v8 }
 0x3ec   :  { %2334 = vrot.lane.b32.xlu0 %v10342_v37, %s7773_s19 }
 0x3ed   :  { %v2831_v7 = vpop.permute.xlu1 %2830 }
 0x3ee   :  { %v2065_v45 = vpop.permute.xlu0 %2064  ;;  %v3428_v14 = vsel %vm3378_vm9, %v3363_v18, %v2831_v7  ;;  %v806_v18 = vld [vmem:[#allocation2 + $0x319] sm:$0xff] }
 0x3ef   :  { %1824 = vrot.lane.b32.xlu1 %v804_v55, %s7771_s2  ;;  %7497 = vmatmul.mubr.msk.f32.gmra.mrb[48].mxu0 %vm3448_vm10, %v3428_v14  ;;  %v3234_v41 = vsel %vm3183_vm6, %v3169_v23, %v2065_v45  ;;  %v3105_v45 = vsel %vm3053_vm4, %v3040_v51, %v10316_v3  ;;  %v745_v51 = vld [vmem:[#allocation2 + $0x338] sm:$0xff] }
 0x3f0   :  { %1570 = vrot.lane.b32.xlu0 %v10342_v37, %s7770_s22  ;;  %v3170_v14 = vsel %vm3118_vm5, %v3105_v45, %v10348_v13  ;;  %v807_v13 = vld [vmem:[#allocation2 + $0x321] sm:$0xff] }
 0x3f1   :  { %v10367_v34 = vpop.permute.xlu1 %1300  ;;  %v4334_v26 = vld [vmem:[#allocation6 + $0x110] ss:$2 sm:$0xff]  ;;  %v4398_v2 = vld [vmem:[#allocation6 + $0x111] ss:$2 sm:$0xff] }
 0x3f2   :  { %v10365_v58 = vpop.permute.xlu0 %1046  ;;  %v4444_v5 = vmax.f32 %v4334_v26, %v4398_v2  ;;  %v870_v26 = vld [vmem:[#allocation2 + $0x31a] sm:$0xff]  ;;  %v3041_v9 = vsel %vm2988_vm2, %v2976_v30, %v10367_v34 }
 0x3f3   :  { %2844 = vrot.lane.b32.xlu1 %v868_v27, %s7775_s24 }
 0x3f4   :  { %2590 = vrot.lane.b32.xlu0 %v805_v50, %s7774_s0  ;;  %v4467_v48 = vmax.f32 %v4443_v10, %v4444_v5 }
 0x3f5   :  { %v2321_v4 = vpop.permute.xlu1 %2320 }
 0x3f6   :  { %v2067_v46 = vpop.permute.xlu0 %2066  ;;  %4525 = vst.msk [vmem:[#allocation3 + $0xb1] sm:$0xff] %vm2988_vm2, %v4467_v48  ;;  %v3299_v12 = vsel %vm3248_vm7, %v3234_v41, %v2321_v4 }
 0x3f7   :  { %1826 = vrot.lane.b32.xlu1 %v805_v50, %s7771_s2  ;;  %v3235_v31 = vsel %vm3183_vm6, %v3170_v14, %v2067_v46  ;;  %v871_v46 = vld [vmem:[#allocation2 + $0x322] sm:$0xff] }
 0x3f8   :  { %1060 = vrot.lane.b32.xlu0 %v804_v55, %s7769_s21 }
 0x3f9   :  { %v10376_v25 = vpop.permute.xlu1 %1556 }
 0x3fa   :  { %v10374_v22 = vpop.permute.xlu0 %1302  ;;  %v3106_v23 = vsel %vm3053_vm4, %v3041_v9, %v10376_v25 }
 0x3fb   :  { %2846 = vrot.lane.b32.xlu1 %v869_v54, %s7775_s24 }
 0x3fc   :  { %2080 = vrot.lane.b32.xlu0 %v868_v27, %s7772_s25 }
 0x3fd   :  { %v2577_v21 = vpop.permute.xlu1 %2576 }
 0x3fe   :  { %v2323_v17 = vpop.permute.xlu0 %2322  ;;  %v3364_v43 = vsel %vm3313_vm8, %v3299_v12, %v2577_v21 }
 0x3ff   :  { %1316 = vrot.lane.b32.xlu1 %v868_v27, %s7768_s20  ;;  %v3300_v3 = vsel %vm3248_vm7, %v3235_v31, %v2323_v17 }
 0x400   :  { %1062 = vrot.lane.b32.xlu0 %v805_v50, %s7769_s21 }
 0x401   :  { %v10393_v49 = vpop.permute.xlu1 %1812 }
 0x402   :  { %v10391_v28 = vpop.permute.xlu0 %1558  ;;  %v7480_v20 = vpop.f32.mrb[36].mxu0  ;;  %v3171_v12 = vsel %vm3118_vm5, %v3106_v23, %v10393_v49 }
 0x403   :  { %2336 = vrot.lane.b32.xlu1 %v10387_v36, %s7773_s19  ;;  %v4074_v60 = vmul.f32 %v10088_v39, %v7480_v20  ;;  %v3891_v38 = vpop.f32.mrb[37].mxu0 }
 0x404   :  { %2082 = vrot.lane.b32.xlu0 %v869_v54, %s7772_s25  ;;  %v4073_v11 = vmul.f32 %v10088_v39, %v3891_v38 }
 0x405   :  { %v2833_v29 = vpop.permute.xlu1 %2832  ;;  %v4145_v57 = vadd.f32 %v10097_v24, %v4074_v60 }
 0x406   :  { %v2579_v59 = vpop.permute.xlu0 %2578  ;;  %v3429_v55 = vsel %vm3378_vm9, %v3364_v43, %v2833_v29  ;;  %v4144_v44 = vadd.f32 %v10097_v24, %v4073_v11 }
 0x407   :  { %1572 = vrot.lane.b32.xlu1 %v10387_v36, %s7770_s22  ;;  %v4209_v6 = vmax.f32 %v4145_v57, 0.0  ;;  %7499 = vmatprep.mubr.msk.f32.mxu0 %vm3448_vm10, %v3429_v55  ;;  %v3365_v50 = vsel %vm3313_vm8, %v3300_v3, %v2579_v59  ;;  %v2977_v57 = vsel %vm124_vm0, %v10018_v62, %v10365_v58 }
 0x408   :  { %1318 = vrot.lane.b32.xlu0 %v869_v54, %s7768_s20  ;;  %v4208_v47 = vmax.f32 %v4144_v44, 0.0  ;;  %v3042_v53 = vsel %vm2988_vm2, %v2977_v57, %v10374_v22 }
 0x409   :  { %v10423_v7 = vpop.permute.xlu1 %1814  ;;  %4273 = vst.msk [vmem:[#allocation6 + $0x128] sm:$0xff] %vm2988_vm2, %v4209_v6  ;;  %v808_v6 = vld [vmem:[#allocation2 + $0x331] sm:$0xff] }
 0x40a   :  { %v10421_v15 = vpop.permute.xlu0 %1048  ;;  %4272 = vst.msk [vmem:[#allocation6 + $0x120] sm:$0xff] %vm2988_vm2, %v4208_v47 }
 0x40b   :  { %2592 = vrot.lane.b32.xlu1 %v806_v18, %s7774_s0 }
 0x40c   :  { %2338 = vrot.lane.b32.xlu0 %v10417_v35, %s7773_s19 }
 0x40d   :  { %v2835_v16 = vpop.permute.xlu1 %2834 }
 0x40e   :  { %v2069_v0 = vpop.permute.xlu0 %2068  ;;  %v3430_v27 = vsel %vm3378_vm9, %v3365_v50, %v2835_v16 }
 0x40f   :  { %1828 = vrot.lane.b32.xlu1 %v806_v18, %s7771_s2  ;;  %7500 = vmatmul.mubr.msk.f32.gmra.mrb[50].mxu0 %vm3448_vm10, %v3430_v27  ;;  %v3236_v33 = vsel %vm3183_vm6, %v3171_v12, %v2069_v0  ;;  %v872_v27 = vld [vmem:[#allocation2 + $0x332] sm:$0xff] }
 0x410   :  { %1574 = vrot.lane.b32.xlu0 %v10417_v35, %s7770_s22 }
 0x411   :  { %v10442_v10 = vpop.permute.xlu1 %1304  ;;  %v4336_v0 = vld [vmem:[#allocation6 + $0x120] ss:$2 sm:$0xff]  ;;  %v4400_v16 = vld [vmem:[#allocation6 + $0x121] ss:$2 sm:$0xff] }
 0x412   :  { %v10440_v2 = vpop.permute.xlu0 %1050 }
 0x413   :  { %2848 = vrot.lane.b32.xlu1 %v870_v26, %s7775_s24 }
 0x414   :  { %2594 = vrot.lane.b32.xlu0 %v807_v13, %s7774_s0 }
 0x415   :  { %v2325_v48 = vpop.permute.xlu1 %2324 }
 0x416   :  { %v2071_v5 = vpop.permute.xlu0 %2070  ;;  %v3301_v34 = vsel %vm3248_vm7, %v3236_v33, %v2325_v48  ;;  %v746_v33 = vld [vmem:[#allocation2 + $0x348] sm:$0xff] }
 0x417   :  { %1830 = vrot.lane.b32.xlu1 %v807_v13, %s7771_s2 }
 0x418   :  { %1064 = vrot.lane.b32.xlu0 %v806_v18, %s7769_s21  ;;  %v3107_v18 = vsel %vm3053_vm4, %v3042_v53, %v10391_v28 }
 0x419   :  { %v10450_v54 = vpop.permute.xlu1 %1560  ;;  %v3172_v58 = vsel %vm3118_vm5, %v3107_v18, %v10423_v7  ;;  %v809_v7 = vld [vmem:[#allocation2 + $0x339] sm:$0xff] }
 0x41a   :  { %v10448_v4 = vpop.permute.xlu0 %1306  ;;  %v3237_v22 = vsel %vm3183_vm6, %v3172_v58, %v2071_v5 }
 0x41b   :  { %2850 = vrot.lane.b32.xlu1 %v871_v46, %s7775_s24 }
 0x41c   :  { %2084 = vrot.lane.b32.xlu0 %v870_v26, %s7772_s25 }
 0x41d   :  { %v2581_v21 = vpop.permute.xlu1 %2580 }
 0x41e   :  { %v2327_v17 = vpop.permute.xlu0 %2326  ;;  %v3366_v25 = vsel %vm3313_vm8, %v3301_v34, %v2581_v21 }
 0x41f   :  { %1320 = vrot.lane.b32.xlu1 %v870_v26, %s7768_s20  ;;  %v3302_v28 = vsel %vm3248_vm7, %v3237_v22, %v2327_v17  ;;  %v2979_v22 = vsel %vm124_vm0, %v10111_v42, %v10440_v2  ;;  %v4550_v2 = vld [vmem:[#allocation3 + $0x11] sm:$0xff] }
 0x420   :  { %1066 = vrot.lane.b32.xlu0 %v807_v13, %s7769_s21 }
 0x421   :  { %v10465_v20 = vpop.permute.xlu1 %1816 }
 0x422   :  { %v10463_v41 = vpop.permute.xlu0 %1562  ;;  %v7483_v8 = vpop.f32.mrb[38].mxu0 }
 0x423   :  { %2340 = vrot.lane.b32.xlu1 %v744_v32, %s7773_s19  ;;  %v4076_v60 = vmul.f32 %v10088_v39, %v7483_v8  ;;  %v3901_v38 = vpop.f32.mrb[39].mxu0  ;;  %v747_v8 = vld [vmem:[#allocation2 + $0x350] sm:$0xff] }
 0x424   :  { %2086 = vrot.lane.b32.xlu0 %v871_v46, %s7772_s25  ;;  %v4075_v43 = vmul.f32 %v10088_v39, %v3901_v38  ;;  %v2978_v38 = vsel %vm124_vm0, %v10067_v56, %v10421_v15 }
 0x425   :  { %v2837_v59 = vpop.permute.xlu1 %2836  ;;  %v4147_v49 = vadd.f32 %v10097_v24, %v4076_v60 }
 0x426   :  { %v2583_v11 = vpop.permute.xlu0 %2582  ;;  %v3431_v29 = vsel %vm3378_vm9, %v3366_v25, %v2837_v59  ;;  %v4146_v55 = vadd.f32 %v10097_v24, %v4075_v43  ;;  %v3043_v25 = vsel %vm2988_vm2, %v2978_v38, %v10442_v10  ;;  %v810_v43 = vld [vmem:[#allocation2 + $0x349] sm:$0xff]  ;;  %v5322_v38 = vld [vmem:[%s12131_s4] sm:$0xff] }
 0x427   :  { %1576 = vrot.lane.b32.xlu1 %v744_v32, %s7770_s22  ;;  %v4211_v44 = vmax.f32 %v4147_v49, 0.0  ;;  %7502 = vmatprep.mubr.msk.f32.mxu0 %vm3448_vm10, %v3431_v29  ;;  %v3367_v14 = vsel %vm3313_vm8, %v3302_v28, %v2583_v11  ;;  %v873_v32 = vld [vmem:[#allocation2 + $0x33a] sm:$0xff]  ;;  %v811_v11 = vld [vmem:[#allocation2 + $0x351] sm:$0xff]  ;;  %v3108_v59 = vsel %vm3053_vm4, %v3043_v25, %v10450_v54  ;;  %v5323_v25 = vld [vmem:[%s12131_s4 + $0x8] sm:$0xff] }
 0x428   :  { %1322 = vrot.lane.b32.xlu0 %v871_v46, %s7768_s20  ;;  %v4210_v45 = vmax.f32 %v4146_v55, 0.0  ;;  %v4445_v46 = vmax.f32 %v4336_v0, %v4400_v16  ;;  %v3173_v57 = vsel %vm3118_vm5, %v3108_v59, %v10465_v20  ;;  %v874_v54 = vld [vmem:[#allocation2 + $0x34a] sm:$0xff]  ;;  %v4565_v16 = vld [vmem:[#allocation3 + $0x2] sm:$0xff]  ;;  %v7570_v59 = vpack.c.bf16 %v5323_v25, %v5322_v38 }
 0x429   :  { %v10491_v62 = vpop.permute.xlu1 %1818  ;;  %4275 = vst.msk [vmem:[#allocation6 + $0x138] sm:$0xff] %vm2988_vm2, %v4211_v44  ;;  %v875_v44 = vld [vmem:[#allocation2 + $0x352] sm:$0xff] }
 0x42a   :  { %v10489_v47 = vpop.permute.xlu0 %1052  ;;  %4274 = vst.msk [vmem:[#allocation6 + $0x130] sm:$0xff] %vm2988_vm2, %v4210_v45  ;;  %7571 = vmatprep.subr.bf16.mxu1 %v7570_v59 }
 0x42b   :  { %2596 = vrot.lane.b32.xlu1 %v808_v6, %s7774_s0  ;;  %7573 = vmatpush3.bf16.msra.mxu1 %v7570_v59  ;;  %v10699_v59 = vld [vmem:[#allocation3 + $0x40] sm:$0xff] }
 0x42c   :  { %2342 = vrot.lane.b32.xlu0 %v745_v51, %s7773_s19 }
 0x42d   :  { %v2839_v3 = vpop.permute.xlu1 %2838 }
 0x42e   :  { %v2073_v31 = vpop.permute.xlu0 %2072  ;;  %v3432_v50 = vsel %vm3378_vm9, %v3367_v14, %v2839_v3  ;;  %v3044_v14 = vsel %vm2988_vm2, %v2979_v22, %v10448_v4  ;;  %v4549_v3 = vld [vmem:[#allocation3 + $0x1] sm:$0xff] }
 0x42f   :  { %1832 = vrot.lane.b32.xlu1 %v808_v6, %s7771_s2  ;;  %7503 = vmatmul.mubr.msk.f32.gmra.mrb[52].mxu0 %vm3448_vm10, %v3432_v50  ;;  %v3238_v56 = vsel %vm3183_vm6, %v3173_v57, %v2073_v31  ;;  %v3109_v50 = vsel %vm3053_vm4, %v3044_v14, %v10463_v41  ;;  %v10607_v57 = vld [vmem:[#allocation3 + $0x31] sm:$0xff] }
 0x430   :  { %1578 = vrot.lane.b32.xlu0 %v745_v51, %s7770_s22 }
 0x431   :  { %v10508_v26 = vpop.permute.xlu1 %1308  ;;  %v4338_v5 = vld [vmem:[#allocation6 + $0x130] ss:$2 sm:$0xff]  ;;  %v4402_v48 = vld [vmem:[#allocation6 + $0x131] ss:$2 sm:$0xff] }
 0x432   :  { %v10506_v13 = vpop.permute.xlu0 %1054  ;;  %v4446_v17 = vmax.f32 %v4338_v5, %v4402_v48 }
 0x433   :  { %2852 = vrot.lane.b32.xlu1 %v872_v27, %s7775_s24 }
 0x434   :  { %2598 = vrot.lane.b32.xlu0 %v809_v7, %s7774_s0  ;;  %v4468_v21 = vmax.f32 %v4445_v46, %v4446_v17  ;;  %v4566_v46 = vld [vmem:[#allocation3 + $0x12] sm:$0xff] }
 0x435   :  { %v2329_v9 = vpop.permute.xlu1 %2328 }
 0x436   :  { %v2075_v30 = vpop.permute.xlu0 %2074  ;;  %4526 = vst.msk [vmem:[#allocation3 + $0xc1] sm:$0xff] %vm2988_vm2, %v4468_v21  ;;  %v3303_v10 = vsel %vm3248_vm7, %v3238_v56, %v2329_v9  ;;  %v10581_v9 = vld [vmem:[#allocation3 + $0x20] sm:$0xff]  ;;  %v2980_v56 = vsel %vm124_vm0, %v10159_v61, %v10489_v47  ;;  %v5325_v61 = vld [vmem:[%s12131_s4 + $0x18] sm:$0xff] }
 0x437   :  { %2088 = vrot.lane.b32.xlu1 %v872_v27, %s7772_s25 }
 0x438   :  { %1834 = vrot.lane.b32.xlu0 %v809_v7, %s7771_s2 }
 0x439   :  { %v10517_v12 = vpop.permute.xlu1 %1564 }
 0x43a   :  { %v10515_v23 = vpop.permute.xlu0 %1310 }
 0x43b   :  { %2090 = vrot.lane.b32.xlu1 %v873_v32, %s7772_s25 }
 0x43c   :  { %2854 = vrot.lane.b32.xlu0 %v873_v32, %s7775_s24 }
 0x43d   :  { %v2585_v60 = vpop.permute.xlu1 %2584 }
 0x43e   :  { %v2331_v34 = vpop.permute.xlu0 %2330  ;;  %v3368_v51 = vsel %vm3313_vm8, %v3303_v10, %v2585_v60  ;;  %v3045_v10 = vsel %vm2988_vm2, %v2980_v56, %v10508_v26  ;;  %v5330_v56 = vld [vmem:[%s12131_s4 + $0x40] sm:$0xff] }
 0x43f   :  { %2346 = vrot.lane.b32.xlu1 %v747_v8, %s7773_s19  ;;  %v10588_v8 = vld [vmem:[#allocation3 + $0x21] sm:$0xff]  ;;  %v3110_v47 = vsel %vm3053_vm4, %v3045_v10, %v10517_v12 }
 0x440   :  { %2344 = vrot.lane.b32.xlu0 %v746_v33, %s7773_s19 }
 0x441   :  { %v10532_v29 = vpop.permute.xlu1 %1820 }
 0x442   :  { %v10530_v49 = vpop.permute.xlu0 %1566  ;;  %v7486_v15 = vpop.f32.mrb[40].mxu0 }
 0x443   :  { %2602 = vrot.lane.b32.xlu1 %v811_v11, %s7774_s0  ;;  %v4078_v55 = vmul.f32 %v10088_v39, %v7486_v15  ;;  %v3911_v53 = vpop.f32.mrb[41].mxu0  ;;  %v10612_v15 = vld [vmem:[#allocation3 + $0x22] sm:$0xff] }
 0x444   :  { %2600 = vrot.lane.b32.xlu0 %v810_v43, %s7774_s0  ;;  %v4077_v6 = vmul.f32 %v10088_v39, %v3911_v53 }
 0x445   :  { %v2841_v20 = vpop.permute.xlu1 %2840  ;;  %v4149_v45 = vadd.f32 %v10097_v24, %v4078_v55  ;;  %v5324_v55 = vld [vmem:[%s12131_s4 + $0x10] sm:$0xff] }
 0x446   :  { %v2587_v18 = vpop.permute.xlu0 %2586  ;;  %v3433_v58 = vsel %vm3378_vm9, %v3368_v51, %v2841_v20  ;;  %v4148_v28 = vadd.f32 %v10097_v24, %v4077_v6  ;;  %v3174_v24 = vsel %vm3118_vm5, %v3109_v50, %v10491_v62  ;;  %v7574_v26 = vpack.c.bf16 %v5325_v61, %v5324_v55 }
 0x447   :  { %2858 = vrot.lane.b32.xlu1 %v875_v44, %s7775_s24  ;;  %v4213_v31 = vmax.f32 %v4149_v45, 0.0  ;;  %7505 = vmatprep.mubr.msk.f32.mxu0 %vm3448_vm10, %v3433_v58  ;;  %v3239_v4 = vsel %vm3183_vm6, %v3174_v24, %v2075_v30  ;;  %v10577_v30 = vld [vmem:[#allocation3 + $0x10] sm:$0xff]  ;;  %v3175_v44 = vsel %vm3118_vm5, %v3110_v47, %v10532_v29  ;;  %v5326_v29 = vld [vmem:[%s12131_s4 + $0x20] sm:$0xff]  ;;  %v5327_v45 = vld [vmem:[%s12131_s4 + $0x28] sm:$0xff] }
 0x448   :  { %2856 = vrot.lane.b32.xlu0 %v874_v54, %s7775_s24  ;;  %v4212_v7 = vmax.f32 %v4148_v28, 0.0  ;;  %v3304_v41 = vsel %vm3248_vm7, %v3239_v4, %v2331_v34  ;;  %7575 = vmatprep.subr.bf16.mxu1 %v7574_v26  ;;  %v4568_v24 = vld [vmem:[#allocation3 + $0x32] sm:$0xff] }
 0x449   :  { %v10558_v42 = vpop.permute.xlu1 %1822  ;;  %4277 = vst.msk [vmem:[#allocation6 + $0x148] sm:$0xff] %vm2988_vm2, %v4213_v31  ;;  %v3369_v27 = vsel %vm3313_vm8, %v3304_v41, %v2587_v18  ;;  %7577 = vmatpush3.bf16.msra.mxu1 %v7574_v26  ;;  %v7578_v31 = vpack.c.bf16 %v5327_v45, %v5326_v29  ;;  %v10666_v41 = vld [vmem:[#allocation3 + $0x30] sm:$0xff] }
 0x44a   :  { %v10556_v0 = vpop.permute.xlu0 %1056  ;;  %4276 = vst.msk [vmem:[#allocation6 + $0x140] sm:$0xff] %vm2988_vm2, %v4212_v7  ;;  %v4554_v45 = vld [vmem:[#allocation3 + $0x51] sm:$0xff] }
 0x44b   :  { %4696 = vrot.lane.b32.xlu1 %v4550_v2, %s7768_s20  ;;  %7579 = vmatprep.subr.bf16.mxu1 %v7578_v31 }
 0x44c   :  { %4694 = vrot.lane.b32.xlu0 %v4549_v3, %s7768_s20  ;;  %v10657_v3 = vld [vmem:[%s12130_s3] ss:$0 sm:$0xff] }
 0x44d   :  { %v2843_v48 = vpop.permute.xlu1 %2842  ;;  %7581 = vmatpush3.bf16.msra.mxu1 %v7578_v31 }
 0x44e   :  { %v2077_v5 = vpop.permute.xlu0 %2076  ;;  %v3434_v62 = vsel %vm3378_vm9, %v3369_v27, %v2843_v48 }
 0x44f   :  { %7506 = vmatmul.mubr.msk.f32.gmra.mrb[54].mxu0 %vm3448_vm10, %v3434_v62  ;;  %4760 = vrot.lane.b32.xlu1 %v4566_v46, %s7771_s2  ;;  %v3240_v51 = vsel %vm3183_vm6, %v3175_v44, %v2077_v5 }
 0x450   :  { %4758 = vrot.lane.b32.xlu0 %v4565_v16, %s7771_s2 }
 0x451   :  { %v10575_v21 = vpop.permute.xlu1 %1312 }
 0x452   :  { %v10573_v17 = vpop.permute.xlu0 %1058 }
 0x453   :  { %4824 = vrot.lane.b32.xlu1 %v10581_v9, %s7773_s19 }
 0x454   :  { %4822 = vrot.lane.b32.xlu0 %v10577_v30, %s7773_s19 }
 0x455   :  { %v2333_v33 = vpop.permute.xlu1 %2332 }
 0x456   :  { %v10585_v32 = vpop.permute.xlu0 %2078  ;;  %v3305_v18 = vsel %vm3248_vm7, %v3240_v51, %v2333_v33 }
 0x457   :  { %4698 = vrot.lane.b32.xlu1 %v10588_v8, %s7768_s20 }
 0x458   :  { %4886 = vrot.lane.b32.xlu0 %v4550_v2, %s7775_s24  ;;  %v2981_v2 = vsel %vm124_vm0, %v10193_v63, %v10506_v13  ;;  %v5328_v63 = vld [vmem:[%s12131_s4 + $0x30] sm:$0xff]  ;;  %v5329_v13 = vld [vmem:[%s12131_s4 + $0x38] sm:$0xff]  ;;  %s7779_s4 = smov 64  }
 0x459   :  { %v10594_v60 = vpop.permute.xlu1 %1568  ;;  %v3046_v16 = vsel %vm2988_vm2, %v2981_v2, %v10515_v23 }
 0x45a   :  { %v10592_v34 = vpop.permute.xlu0 %1314  ;;  %v3111_v5 = vsel %vm3053_vm4, %v3046_v16, %v10530_v49 }
 0x45b   :  { %4950 = vrot.lane.b32.xlu1 %v4566_v46, %s7776_s29  ;;  %v7582_v46 = vpack.c.bf16 %v5329_v13, %v5328_v63  ;;  %v3176_v33 = vsel %vm3118_vm5, %v3111_v5, %v10558_v42  ;;  %v4570_v13 = vld [vmem:[#allocation3 + $0x52] sm:$0xff]  ;;  %v2983_v5 = vsel %vm124_vm0, %v10268_v19, %v10573_v17 }
 0x45c   :  { %4888 = vrot.lane.b32.xlu0 %v10588_v8, %s7775_s24  ;;  %v3241_v38 = vsel %vm3183_vm6, %v3176_v33, %v10585_v32  ;;  %v3048_v33 = vsel %vm2988_vm2, %v2983_v5, %v10592_v34 }
 0x45d   :  { %v2589_v11 = vpop.permute.xlu1 %2588  ;;  %7583 = vmatprep.subr.bf16.mxu1 %v7582_v46 }
 0x45e   :  { %v10605_v43 = vpop.permute.xlu0 %2334  ;;  %v3370_v58 = vsel %vm3313_vm8, %v3305_v18, %v2589_v11  ;;  %7585 = vmatpush3.bf16.msra.mxu1 %v7582_v46  ;;  %v10756_v46 = vld [vmem:[#allocation3 + $0x50] sm:$0xff] }
 0x45f   :  { %4762 = vrot.lane.b32.xlu1 %v10612_v15, %s7771_s2  ;;  %v3306_v49 = vsel %vm3248_vm7, %v3241_v38, %v10605_v43  ;;  %v4340_v43 = vld [vmem:[#allocation6 + $0x140] ss:$2 sm:$0xff]  ;;  %7536 = vmatprep.subr.mxu1 %v5330_v56 }
 0x460   :  { %4700 = vrot.lane.b32.xlu0 %v10607_v57, %s7768_s20 }
 0x461   :  { %v10630_v54 = vpop.permute.xlu1 %1824 }
 0x462   :  { %v10628_v53 = vpop.permute.xlu0 %1570  ;;  %v7489_v6 = vpop.f32.mrb[42].mxu0  ;;  %7537 = vmatpush3.msra.mxu1 %v5330_v56 }
 0x463   :  { %v4080_v20 = vmul.f32 %v10088_v39, %v7489_v6  ;;  %5014 = vrot.lane.b32.xlu1 %v10581_v9, %s7777_s1  ;;  %v3921_v12 = vpop.f32.mrb[43].mxu0  ;;  %v10651_v39 = vld [vmem:[%s12154_s27] ss:$0 sm:$0xff] }
 0x464   :  { %4952 = vrot.lane.b32.xlu0 %v10612_v15, %s7776_s29  ;;  %v4079_v22 = vmul.f32 %v10651_v39, %v3921_v12 }
 0x465   :  { %v2845_v14 = vpop.permute.xlu1 %2844  ;;  %v4151_v50 = vadd.f32 %v10657_v3, %v4080_v20  ;;  %v4600_v20 = vld [vmem:[#allocation3 + $0x41] sm:$0xff] }
 0x466   :  { %v2591_v28 = vpop.permute.xlu0 %2590  ;;  %v3435_v7 = vsel %vm3378_vm9, %v3370_v58, %v2845_v14  ;;  %v4150_v4 = vadd.f32 %v10657_v3, %v4079_v22  ;;  %v2982_v58 = vsel %vm124_vm0, %v10238_v52, %v10556_v0  ;;  %v4569_v22 = vld [vmem:[#allocation3 + $0x42] sm:$0xff] }
 0x467   :  { %7508 = vmatprep.mubr.msk.f32.mxu0 %vm3448_vm10, %v3435_v7  ;;  %v4215_v27 = vmax.f32 %v4151_v50, 0.0  ;;  %4826 = vrot.lane.b32.xlu1 %v10666_v41, %s7773_s19  ;;  %v3371_v42 = vsel %vm3313_vm8, %v3306_v49, %v2591_v28  ;;  %v3047_v28 = vsel %vm2988_vm2, %v2982_v58, %v10575_v21  ;;  %v3113_v49 = vsel %vm3053_vm4, %v3048_v33, %v10628_v53 }
 0x468   :  { %4764 = vrot.lane.b32.xlu0 %v4568_v24, %s7771_s2  ;;  %v4214_v48 = vmax.f32 %v4150_v4, 0.0  ;;  %v3112_v14 = vsel %vm3053_vm4, %v3047_v28, %v10594_v60 }
 0x469   :  { %v10683_v23 = vpop.permute.xlu1 %1826  ;;  %4279 = vst.msk [vmem:[#allocation6 + $0x158] sm:$0xff] %vm2988_vm2, %v4215_v27  ;;  %v3177_v7 = vsel %vm3118_vm5, %v3112_v14, %v10630_v54 }
 0x46a   :  { %v10681_v62 = vpop.permute.xlu0 %1060  ;;  %4278 = vst.msk [vmem:[#allocation6 + $0x150] sm:$0xff] %vm2988_vm2, %v4214_v48 }
 0x46b   :  { %5078 = vrot.lane.b32.xlu1 %v10588_v8, %s7778_s23  ;;  %v4404_v8 = vld [vmem:[#allocation6 + $0x141] ss:$2 sm:$0xff] }
 0x46c   :  { %5016 = vrot.lane.b32.xlu0 %v10666_v41, %s7777_s1  ;;  %v4447_v26 = vmax.f32 %v4340_v43, %v4404_v8 }
 0x46d   :  { %v2847_v11 = vpop.permute.xlu1 %2846 }
 0x46e   :  { %v2081_v25 = vpop.permute.xlu0 %2080  ;;  %v3436_v32 = vsel %vm3378_vm9, %v3371_v42, %v2847_v11 }
 0x46f   :  { %7509 = vmatmul.mubr.msk.f32.gmra.mrb[56].mxu0 %vm3448_vm10, %v3436_v32  ;;  %4890 = vrot.lane.b32.xlu1 %v10607_v57, %s7775_s24  ;;  %v3242_v52 = vsel %vm3183_vm6, %v3177_v7, %v2081_v25  ;;  %v3178_v25 = vsel %vm3118_vm5, %v3113_v49, %v10683_v23  ;;  %v10780_v23 = vld [vmem:[#allocation3 + $0x60] sm:$0xff] }
 0x470   :  { %4828 = vrot.lane.b32.xlu0 %v10699_v59, %s7773_s19 }
 0x471   :  { %v10711_v55 = vpop.permute.xlu1 %1316  ;;  %v4342_v61 = vld [vmem:[#allocation6 + $0x150] ss:$2 sm:$0xff]  ;;  %v4406_v47 = vld [vmem:[#allocation6 + $0x151] ss:$2 sm:$0xff] }
 0x472   :  { %v10709_v10 = vpop.permute.xlu0 %1062  ;;  %v4448_v44 = vmax.f32 %v4342_v61, %v4406_v47 }
 0x473   :  { %5142 = vrot.lane.b32.xlu1 %v10612_v15, %s7779_s4 }
 0x474   :  { %5080 = vrot.lane.b32.xlu0 %v10607_v57, %s7778_s23  ;;  %v4469_v51 = vmax.f32 %v4447_v26, %v4448_v44  ;;  %v4602_v44 = vld [vmem:[#allocation3 + $0x61] sm:$0xff] }
 0x475   :  { %v2337_v18 = vpop.permute.xlu1 %2336 }
 0x476   :  { %v2083_v6 = vpop.permute.xlu0 %2082  ;;  %4527 = vst.msk [vmem:[#allocation3 + $0xd1] sm:$0xff] %vm2988_vm2, %v4469_v51 }
 0x477   :  { %4892 = vrot.lane.b32.xlu1 %v4600_v20, %s7775_s24  ;;  %v3243_v11 = vsel %vm3183_vm6, %v3178_v25, %v2083_v6 }
 0x478   :  { %4702 = vrot.lane.b32.xlu0 %v4600_v20, %s7768_s20 }
 0x479   :  { %v10722_v29 = vpop.permute.xlu1 %1572 }
 0x47a   :  { %v10720_v12 = vpop.permute.xlu0 %1318 }
 0x47b   :  { %5144 = vrot.lane.b32.xlu1 %v4568_v24, %s7779_s4 }
 0x47c   :  { %4954 = vrot.lane.b32.xlu0 %v4568_v24, %s7776_s29  ;;  %v3307_v24 = vsel %vm3248_vm7, %v3242_v52, %v2337_v18 }
 0x47d   :  { %v2593_v15 = vpop.permute.xlu1 %2592 }
 0x47e   :  { %v2339_v57 = vpop.permute.xlu0 %2338  ;;  %v3372_v2 = vsel %vm3313_vm8, %v3307_v24, %v2593_v15  ;;  %v2984_v15 = vsel %vm124_vm0, %v10312_v40, %v10681_v62 }
 0x47f   :  { %4766 = vrot.lane.b32.xlu1 %v4569_v22, %s7771_s2  ;;  %v3308_v34 = vsel %vm3248_vm7, %v3243_v11, %v2339_v57  ;;  %v4556_v57 = vld [vmem:[#allocation3 + $0x71] sm:$0xff]  ;;  %v3049_v58 = vsel %vm2988_vm2, %v2984_v15, %v10711_v55 }
 0x480   :  { %4704 = vrot.lane.b32.xlu0 %v4554_v45, %s7768_s20 }
 0x481   :  { %v10737_v50 = vpop.permute.xlu1 %1828 }
 0x482   :  { %v10735_v31 = vpop.permute.xlu0 %1574  ;;  %v7492_v0 = vpop.f32.mrb[44].mxu0 }
 0x483   :  { %v4082_v21 = vmul.f32 %v10651_v39, %v7492_v0  ;;  %5018 = vrot.lane.b32.xlu1 %v10699_v59, %s7777_s1  ;;  %v3931_v60 = vpop.f32.mrb[45].mxu0 }
 0x484   :  { %4956 = vrot.lane.b32.xlu0 %v4569_v22, %s7776_s29  ;;  %v4081_v4 = vmul.f32 %v10651_v39, %v3931_v60 }
 0x485   :  { %v2849_v27 = vpop.permute.xlu1 %2848  ;;  %v4153_v54 = vadd.f32 %v10657_v3, %v4082_v21 }
 0x486   :  { %v2595_v16 = vpop.permute.xlu0 %2594  ;;  %v3437_v63 = vsel %vm3378_vm9, %v3372_v2, %v2849_v27  ;;  %v4152_v48 = vadd.f32 %v10657_v3, %v4081_v4  ;;  %v10827_v4 = vld [vmem:[#allocation3 + $0x72] sm:$0xff] }
 0x487   :  { %7511 = vmatprep.mubr.msk.f32.mxu0 %vm3448_vm10, %v3437_v63  ;;  %v4217_v38 = vmax.f32 %v4153_v54, 0.0  ;;  %4830 = vrot.lane.b32.xlu1 %v10756_v46, %s7773_s19  ;;  %v3373_v53 = vsel %vm3313_vm8, %v3308_v34, %v2595_v16  ;;  %v2985_v16 = vsel %vm124_vm0, %v10342_v37, %v10709_v10  ;;  %v10834_v54 = vld [vmem:[#allocation3 + $0x70] sm:$0xff] }
 0x488   :  { %4768 = vrot.lane.b32.xlu0 %v4570_v13, %s7771_s2  ;;  %v4216_v42 = vmax.f32 %v4152_v48, 0.0  ;;  %v3050_v63 = vsel %vm2988_vm2, %v2985_v16, %v10720_v12  ;;  %v4620_v16 = vld [vmem:[#allocation3 + $0x82] sm:$0xff] }
 0x489   :  { %v10767_v17 = vpop.permute.xlu1 %1830  ;;  %4281 = vst.msk [vmem:[#allocation6 + $0x168] sm:$0xff] %vm2988_vm2, %v4217_v38  ;;  %v3115_v5 = vsel %vm3053_vm4, %v3050_v63, %v10735_v31 }
 0x48a   :  { %v10765_v19 = vpop.permute.xlu0 %1064  ;;  %4280 = vst.msk [vmem:[#allocation6 + $0x160] sm:$0xff] %vm2988_vm2, %v4216_v42  ;;  %v3180_v33 = vsel %vm3118_vm5, %v3115_v5, %v10767_v17  ;;  %v4588_v17 = vld [vmem:[#allocation3 + $0x80] sm:$0xff] }
 0x48b   :  { %5082 = vrot.lane.b32.xlu1 %v4600_v20, %s7778_s23 }
 0x48c   :  { %5020 = vrot.lane.b32.xlu0 %v10756_v46, %s7777_s1 }
 0x48d   :  { %v2851_v56 = vpop.permute.xlu1 %2850 }
 0x48e   :  { %v2085_v32 = vpop.permute.xlu0 %2084  ;;  %v3438_v43 = vsel %vm3378_vm9, %v3373_v53, %v2851_v56 }
 0x48f   :  { %7512 = vmatmul.mubr.msk.f32.gmra.mrb[58].mxu0 %vm3448_vm10, %v3438_v43  ;;  %4894 = vrot.lane.b32.xlu1 %v4554_v45, %s7775_s24 }
 0x490   :  { %4832 = vrot.lane.b32.xlu0 %v10780_v23, %s7773_s19 }
 0x491   :  { %v10788_v61 = vpop.permute.xlu1 %1320  ;;  %v4344_v11 = vld [vmem:[#allocation6 + $0x160] ss:$2 sm:$0xff]  ;;  %v4408_v34 = vld [vmem:[#allocation6 + $0x161] ss:$2 sm:$0xff] }
 0x492   :  { %v10786_v8 = vpop.permute.xlu0 %1066 }
 0x493   :  { %5146 = vrot.lane.b32.xlu1 %v4569_v22, %s7779_s4  ;;  %v3114_v22 = vsel %vm3053_vm4, %v3049_v58, %v10722_v29  ;;  %v4557_v58 = vld [vmem:[#allocation3 + $0xa1] sm:$0xff] }
 0x494   :  { %5084 = vrot.lane.b32.xlu0 %v4554_v45, %s7778_s23  ;;  %v10803_v45 = vld [vmem:[#allocation3 + $0x62] sm:$0xff]  ;;  %v3179_v7 = vsel %vm3118_vm5, %v3114_v22, %v10737_v50 }
 0x495   :  { %v2341_v26 = vpop.permute.xlu1 %2340  ;;  %v3244_v40 = vsel %vm3183_vm6, %v3179_v7, %v2085_v32  ;;  %v4604_v7 = vld [vmem:[#allocation3 + $0x81] sm:$0xff] }
 0x496   :  { %v2087_v47 = vpop.permute.xlu0 %2086  ;;  %v3309_v55 = vsel %vm3248_vm7, %v3244_v40, %v2341_v26  ;;  %v2986_v26 = vsel %vm124_vm0, %v10387_v36, %v10765_v19 }
 0x497   :  { %4896 = vrot.lane.b32.xlu1 %v4602_v44, %s7775_s24  ;;  %v3245_v38 = vsel %vm3183_vm6, %v3180_v33, %v2087_v47  ;;  %v4449_v47 = vmax.f32 %v4344_v11, %v4408_v34  ;;  %v10921_v34 = vld [vmem:[#allocation3 + $0xc0] sm:$0xff] }
 0x498   :  { %4706 = vrot.lane.b32.xlu0 %v4602_v44, %s7768_s20 }
 0x499   :  { %v10796_v6 = vpop.permute.xlu1 %1576 }
 0x49a   :  { %v10794_v51 = vpop.permute.xlu0 %1322 }
 0x49b   :  { %5148 = vrot.lane.b32.xlu1 %v4570_v13, %s7779_s4 }
 0x49c   :  { %4958 = vrot.lane.b32.xlu0 %v4570_v13, %s7776_s29 }
 0x49d   :  { %v2597_v20 = vpop.permute.xlu1 %2596 }
 0x49e   :  { %v2343_v18 = vpop.permute.xlu0 %2342  ;;  %v3374_v0 = vsel %vm3313_vm8, %v3309_v55, %v2597_v20  ;;  %v3051_v20 = vsel %vm2988_vm2, %v2986_v26, %v10788_v61  ;;  %v4606_v26 = vld [vmem:[#allocation3 + $0xc1] sm:$0xff] }
 0x49f   :  { %4770 = vrot.lane.b32.xlu1 %v10803_v45, %s7771_s2  ;;  %v3310_v12 = vsel %vm3248_vm7, %v3245_v38, %v2343_v18  ;;  %v3116_v36 = vsel %vm3053_vm4, %v3051_v20, %v10796_v6  ;;  %v10908_v38 = vld [vmem:[#allocation3 + $0xb0] sm:$0xff] }
 0x4a0   :  { %4708 = vrot.lane.b32.xlu0 %v4556_v57, %s7768_s20  ;;  %v4669_v20 = vld [vmem:[#allocation3 + $0x92] sm:$0xff] }
 0x4a1   :  { %v10812_v14 = vpop.permute.xlu1 %1832 }
 0x4a2   :  { %v1579_v28 = vpop.permute.xlu0 %1578  ;;  %v7495_v62 = vpop.f32.mrb[46].mxu0 }
 0x4a3   :  { %v4084_v52 = vmul.f32 %v10651_v39, %v7495_v62  ;;  %5022 = vrot.lane.b32.xlu1 %v10780_v23, %s7777_s1  ;;  %v3941_v29 = vpop.f32.mrb[47].mxu0 }
 0x4a4   :  { %4960 = vrot.lane.b32.xlu0 %v10803_v45, %s7776_s29  ;;  %v4083_v24 = vmul.f32 %v10651_v39, %v3941_v29 }
 0x4a5   :  { %v2853_v50 = vpop.permute.xlu1 %2852  ;;  %v4155_v60 = vadd.f32 %v10657_v3, %v4084_v52 }
 0x4a6   :  { %v2599_v21 = vpop.permute.xlu0 %2598  ;;  %v3439_v2 = vsel %vm3378_vm9, %v3374_v0, %v2853_v50  ;;  %v4154_v27 = vadd.f32 %v10657_v3, %v4083_v24  ;;  %v4558_v50 = vld [vmem:[#allocation3 + $0xb1] sm:$0xff] }
 0x4a7   :  { %7514 = vmatprep.mubr.msk.f32.mxu0 %vm3448_vm10, %v3439_v2  ;;  %v4219_v13 = vmax.f32 %v4155_v60, 0.0  ;;  %4834 = vrot.lane.b32.xlu1 %v10834_v54, %s7773_s19  ;;  %v3375_v31 = vsel %vm3313_vm8, %v3310_v12, %v2599_v21  ;;  %v4573_v21 = vld [vmem:[#allocation3 + $0xa2] sm:$0xff] }
 0x4a8   :  { %4772 = vrot.lane.b32.xlu0 %v10827_v4, %s7771_s2  ;;  %v4218_v37 = vmax.f32 %v4154_v27, 0.0 }
 0x4a9   :  { %v2089_v48 = vpop.permute.xlu1 %2088  ;;  %4283 = vst.msk [vmem:[#allocation6 + $0x178] sm:$0xff] %vm2988_vm2, %v4219_v13 }
 0x4aa   :  { %v1835_v10 = vpop.permute.xlu0 %1834  ;;  %4282 = vst.msk [vmem:[#allocation6 + $0x170] sm:$0xff] %vm2988_vm2, %v4218_v37 }
 0x4ab   :  { %5086 = vrot.lane.b32.xlu1 %v4602_v44, %s7778_s23  ;;  %v2987_v44 = vsel %vm124_vm0, %v10417_v35, %v10786_v8  ;;  %vm5331_vm0 = vcmask 588800  }
 0x4ac   :  { %5024 = vrot.lane.b32.xlu0 %v10834_v54, %s7777_s1  ;;  %v3052_v15 = vsel %vm2988_vm2, %v2987_v44, %v10794_v51  ;;  %v4533_v44 = vld [vmem:[#allocation3] sm:$0xff] }
 0x4ad   :  { %v2091_v42 = vpop.permute.xlu1 %2090  ;;  %v3117_v19 = vsel %vm3053_vm4, %v3052_v15, %v1579_v28  ;;  %vm6051_vm4 = vcmask 785408  }
 0x4ae   :  { %v2855_v49 = vpop.permute.xlu0 %2854  ;;  %v3182_v61 = vsel %vm3118_vm5, %v3117_v19, %v1835_v10 }
 0x4af   :  { %v3440_v25 = vsel %vm3378_vm9, %v3375_v31, %v2855_v49  ;;  %4898 = vrot.lane.b32.xlu1 %v4556_v57, %s7775_s24  ;;  %v4637_v31 = vld [vmem:[#allocation3 + $0x90] sm:$0xff] }
 0x4b0   :  { %7515 = vmatmul.mubr.msk.f32.gmra.mrb[60].mxu0 %vm3448_vm10, %v3440_v25  ;;  %4836 = vrot.lane.b32.xlu0 %v4588_v17, %s7773_s19 }
 0x4b1   :  { %v2347_v32 = vpop.permute.xlu1 %2346  ;;  %v4346_v56 = vld [vmem:[#allocation6 + $0x170] ss:$2 sm:$0xff]  ;;  %v4410_v43 = vld [vmem:[#allocation6 + $0x171] ss:$2 sm:$0xff] }
 0x4b2   :  { %v2345_v53 = vpop.permute.xlu0 %2344  ;;  %v4450_v18 = vmax.f32 %v4346_v56, %v4410_v43 }
 0x4b3   :  { %5150 = vrot.lane.b32.xlu1 %v10803_v45, %s7779_s4  ;;  %v3247_v45 = vsel %vm3183_vm6, %v3182_v61, %v2091_v42 }
 0x4b4   :  { %5088 = vrot.lane.b32.xlu0 %v4556_v57, %s7778_s23  ;;  %v4470_v22 = vmax.f32 %v4449_v47, %v4450_v18  ;;  %v3181_v57 = vsel %vm3118_vm5, %v3116_v36, %v10812_v14  ;;  %v3312_v28 = vsel %vm3248_vm7, %v3247_v45, %v2347_v32 }
 0x4b5   :  { %v2603_v8 = vpop.permute.xlu1 %2602  ;;  %v3246_v51 = vsel %vm3183_vm6, %v3181_v57, %v2089_v48  ;;  %v4574_v48 = vld [vmem:[#allocation3 + $0xb2] sm:$0xff]  ;;  %vm6060_vm6 = vcmask 916480  }
 0x4b6   :  { %v2601_v35 = vpop.permute.xlu0 %2600  ;;  %4528 = vst.msk [vmem:[#allocation3 + $0xe1] sm:$0xff] %vm2988_vm2, %v4470_v22  ;;  %v3311_v6 = vsel %vm3248_vm7, %v3246_v51, %v2345_v53  ;;  %v3377_v14 = vsel %vm3313_vm8, %v3312_v28, %v2603_v8  ;;  %v4653_v53 = vld [vmem:[#allocation3 + $0x91] sm:$0xff]  ;;  %v4575_v8 = vld [vmem:[#allocation3 + $0xc2] sm:$0xff] }
 0x4b7   :  { %4900 = vrot.lane.b32.xlu1 %v4604_v7, %s7775_s24  ;;  %v3376_v40 = vsel %vm3313_vm8, %v3311_v6, %v2601_v35  ;;  %v10941_v22 = vld [vmem:[#allocation3 + $0xd1] sm:$0xff]  ;;  %vm6720_vm8 = vcmask 1041409  }
 0x4b8   :  { %4710 = vrot.lane.b32.xlu0 %v4557_v58, %s7768_s20 }
 0x4b9   :  { %v2859_v55 = vpop.permute.xlu1 %2858 }
 0x4ba   :  { %v2857_v62 = vpop.permute.xlu0 %2856  ;;  %v3442_v29 = vsel %vm3378_vm9, %v3377_v14, %v2859_v55 }
 0x4bb   :  { %v3441_v52 = vsel %vm3378_vm9, %v3376_v40, %v2857_v62  ;;  %5152 = vrot.lane.b32.xlu1 %v10827_v4, %s7779_s4 }
 0x4bc   :  { %7517 = vmatprep.mubr.msk.f32.mxu0 %vm3448_vm10, %v3441_v52  ;;  %4962 = vrot.lane.b32.xlu0 %v10827_v4, %s7776_s29 }
 0x4bd   :  { %7518 = vmatmul.mubr.msk.f32.gmra.mrb[62].mxu0 %vm3448_vm10, %v3442_v29  ;;  %v10894_v24 = vpop.permute.xlu1 %4696 }
 0x4be   :  { %v4695_v0 = vpop.permute.xlu0 %4694 }
 0x4bf   :  { %4774 = vrot.lane.b32.xlu1 %v4573_v21, %s7771_s2  ;;  %v5190_v58 = vsel %vm2988_vm2, %v4533_v44, %v4695_v0  ;;  %v4576_v21 = vld [vmem:[#allocation3 + $0xd2] sm:$0xff] }
 0x4c0   :  { %4712 = vrot.lane.b32.xlu0 %v4558_v50, %s7768_s20 }
 0x4c1   :  { %v10898_v2 = vpop.permute.xlu1 %4760 }
 0x4c2   :  { %v4759_v60 = vpop.permute.xlu0 %4758  ;;  %v7498_v27 = vpop.f32.mrb[48].mxu0 }
 0x4c3   :  { %v4086_v4 = vmul.f32 %v10651_v39, %v7498_v27  ;;  %5026 = vrot.lane.b32.xlu1 %v4588_v17, %s7777_s1  ;;  %v3951_v63 = vpop.f32.mrb[49].mxu0  ;;  %v5206_v35 = vsel %vm3118_vm5, %v5190_v58, %v4759_v60  ;;  %v5191_v27 = vsel %vm2988_vm2, %v10577_v30, %v10894_v24 }
 0x4c4   :  { %4964 = vrot.lane.b32.xlu0 %v4620_v16, %s7776_s29  ;;  %v4085_v13 = vmul.f32 %v10651_v39, %v3951_v63  ;;  %v5207_v63 = vsel %vm3118_vm5, %v5191_v27, %v10898_v2 }
 0x4c5   :  { %v4157_v37 = vadd.f32 %v10657_v3, %v4086_v4  ;;  %v10905_v10 = vpop.permute.xlu1 %4824 }
 0x4c6   :  { %v4823_v5 = vpop.permute.xlu0 %4822  ;;  %v4156_v33 = vadd.f32 %v10657_v3, %v4085_v13 }
 0x4c7   :  { %v4221_v12 = vmax.f32 %v4157_v37, 0.0  ;;  %4838 = vrot.lane.b32.xlu1 %v10908_v38, %s7773_s19  ;;  %v5222_v61 = vsel %vm3248_vm7, %v5206_v35, %v4823_v5  ;;  %v5223_v37 = vsel %vm3248_vm7, %v5207_v63, %v10905_v10 }
 0x4c8   :  { %4776 = vrot.lane.b32.xlu0 %v4574_v48, %s7771_s2  ;;  %v4220_v49 = vmax.f32 %v4156_v33, 0.0 }
 0x4c9   :  { %4285 = vst.msk [vmem:[#allocation6 + $0x188] sm:$0xff] %vm2988_vm2, %v4221_v12  ;;  %v10914_v25 = vpop.permute.xlu1 %4698 }
 0x4ca   :  { %v4887_v42 = vpop.permute.xlu0 %4886  ;;  %4284 = vst.msk [vmem:[#allocation6 + $0x180] sm:$0xff] %vm2988_vm2, %v4220_v49 }
 0x4cb   :  { %5090 = vrot.lane.b32.xlu1 %v4604_v7, %s7778_s23  ;;  %v5238_v45 = vsel %vm3378_vm9, %v5222_v61, %v4887_v42 }
 0x4cc   :  { %5028 = vrot.lane.b32.xlu0 %v4637_v31, %s7777_s1  ;;  %v10991_v31 = vld [vmem:[#allocation3 + $0xe0] sm:$0xff] }
 0x4cd   :  { %v4951_v11 = vpop.permute.xlu1 %4950 }
 0x4ce   :  { %v10919_v17 = vpop.permute.xlu0 %4888  ;;  %v5255_v6 = vsel %vm5254_vm12, %v5238_v45, %v4951_v11 }
 0x4cf   :  { %4902 = vrot.lane.b32.xlu1 %v4558_v50, %s7775_s24  ;;  %v5239_v30 = vsel %vm3378_vm9, %v5223_v37, %v10919_v17 }
 0x4d0   :  { %4840 = vrot.lane.b32.xlu0 %v10921_v34, %s7773_s19 }
 0x4d1   :  { %v10928_v56 = vpop.permute.xlu1 %4762  ;;  %v4348_v42 = vld [vmem:[#allocation6 + $0x180] ss:$2 sm:$0xff]  ;;  %v4412_v17 = vld [vmem:[#allocation6 + $0x181] ss:$2 sm:$0xff] }
 0x4d2   :  { %v10926_v32 = vpop.permute.xlu0 %4700 }
 0x4d3   :  { %5154 = vrot.lane.b32.xlu1 %v4620_v16, %s7779_s4  ;;  %v10964_v16 = vld [vmem:[#allocation3 + $0xd0] sm:$0xff] }
 0x4d4   :  { %5092 = vrot.lane.b32.xlu0 %v4653_v53, %s7778_s23 }
 0x4d5   :  { %v5015_v47 = vpop.permute.xlu1 %5014 }
 0x4d6   :  { %v4953_v43 = vpop.permute.xlu0 %4952  ;;  %v5272_v14 = vsel %vm5271_vm13, %v5255_v6, %v5015_v47  ;;  %v5192_v6 = vsel %vm2988_vm2, %v10581_v9, %v10914_v25 }
 0x4d7   :  { %4904 = vrot.lane.b32.xlu1 %v4606_v26, %s7775_s24  ;;  %v5256_v24 = vsel %vm5254_vm12, %v5239_v30, %v4953_v43 }
 0x4d8   :  { %4714 = vrot.lane.b32.xlu0 %v4606_v26, %s7768_s20 }
 0x4d9   :  { %v10936_v15 = vpop.permute.xlu1 %4826 }
 0x4da   :  { %v10934_v18 = vpop.permute.xlu0 %4764 }
 0x4db   :  { %5156 = vrot.lane.b32.xlu1 %v4669_v20, %s7779_s4 }
 0x4dc   :  { %4966 = vrot.lane.b32.xlu0 %v4574_v48, %s7776_s29 }
 0x4dd   :  { %v5079_v19 = vpop.permute.xlu1 %5078 }
 0x4de   :  { %v5017_v36 = vpop.permute.xlu0 %5016  ;;  %v5289_v52 = vsel %vm5288_vm14, %v5272_v14, %v5079_v19  ;;  %v4608_v19 = vld [vmem:[#allocation3 + $0xe1] sm:$0xff] }
 0x4df   :  { %4778 = vrot.lane.b32.xlu1 %v4575_v8, %s7771_s2  ;;  %v5273_v2 = vsel %vm5271_vm13, %v5256_v24, %v5017_v36 }
 0x4e0   :  { %4716 = vrot.lane.b32.xlu0 %v10941_v22, %s7768_s20 }
 0x4e1   :  { %v10950_v51 = vpop.permute.xlu1 %4890 }
 0x4e2   :  { %v10947_v57 = vpop.permute.xlu0 %4828  ;;  %v7501_v7 = vpop.f32.mrb[50].mxu0 }
 0x4e3   :  { %v4088_v28 = vmul.f32 %v10651_v39, %v7501_v7  ;;  %5030 = vrot.lane.b32.xlu1 %v10921_v34, %s7777_s1  ;;  %v3961_v40 = vpop.f32.mrb[51].mxu0  ;;  %v4577_v7 = vld [vmem:[#allocation3 + $0xe2] sm:$0xff] }
 0x4e4   :  { %4968 = vrot.lane.b32.xlu0 %v4575_v8, %s7776_s29  ;;  %v4087_v62 = vmul.f32 %v10651_v39, %v3961_v40 }
 0x4e5   :  { %v4159_v29 = vadd.f32 %v10657_v3, %v4088_v28  ;;  %v5143_v0 = vpop.permute.xlu1 %5142  ;;  %v5208_v28 = vsel %vm3118_vm5, %v5192_v6, %v10928_v56 }
 0x4e6   :  { %v5081_v55 = vpop.permute.xlu0 %5080  ;;  %v4158_v50 = vadd.f32 %v10657_v3, %v4087_v62  ;;  %v5306_v60 = vsel %vm5305_vm15, %v5289_v52, %v5143_v0  ;;  %v5224_v14 = vsel %vm3248_vm7, %v5208_v28, %v10936_v15 }
 0x4e7   :  { %v4223_v4 = vmax.f32 %v4159_v29, 0.0  ;;  %7538 = vmatprep.mubr.msk.f32.mxu1 %vm5331_vm0, %v5306_v60  ;;  %4842 = vrot.lane.b32.xlu1 %v10964_v16, %s7773_s19  ;;  %v5290_v10 = vsel %vm5288_vm14, %v5273_v2, %v5081_v55  ;;  %v5240_v55 = vsel %vm3378_vm9, %v5224_v14, %v10950_v51 }
 0x4e8   :  { %4780 = vrot.lane.b32.xlu0 %v4576_v21, %s7771_s2  ;;  %v4222_v13 = vmax.f32 %v4158_v50, 0.0 }
 0x4e9   :  { %4287 = vst.msk [vmem:[#allocation6 + $0x198] sm:$0xff] %vm2988_vm2, %v4223_v4  ;;  %v10980_v48 = vpop.permute.xlu1 %4892 }
 0x4ea   :  { %v10975_v5 = vpop.permute.xlu0 %4702  ;;  %4286 = vst.msk [vmem:[#allocation6 + $0x190] sm:$0xff] %vm2988_vm2, %v4222_v13  ;;  %v5193_v13 = vsel %vm2988_vm2, %v10666_v41, %v10926_v32 }
 0x4eb   :  { %5094 = vrot.lane.b32.xlu1 %v4606_v26, %s7778_s23  ;;  %v4451_v26 = vmax.f32 %v4348_v42, %v4412_v17  ;;  %v5209_v30 = vsel %vm3118_vm5, %v5193_v13, %v10934_v18 }
 0x4ec   :  { %5032 = vrot.lane.b32.xlu0 %v10964_v16, %s7777_s1 }
 0x4ed   :  { %v5145_v12 = vpop.permute.xlu1 %5144 }
 0x4ee   :  { %v4955_v33 = vpop.permute.xlu0 %4954  ;;  %v5307_v49 = vsel %vm5305_vm15, %v5290_v10, %v5145_v12 }
 0x4ef   :  { %7539 = vmatmul.mubr.msk.f32.vlgmr.msra.gmra.mrb[0].mxu1 %vm5331_vm0, %v5307_v49  ;;  %4906 = vrot.lane.b32.xlu1 %v10941_v22, %s7775_s24  ;;  %v5257_v29 = vsel %vm5254_vm12, %v5240_v55, %v4955_v33  ;;  %v5225_v33 = vsel %vm3248_vm7, %v5209_v30, %v10947_v57 }
 0x4f0   :  { %4844 = vrot.lane.b32.xlu0 %v10991_v31, %s7773_s19  ;;  %v5241_v41 = vsel %vm3378_vm9, %v5225_v33, %v10980_v48 }
 0x4f1   :  { %v4350_v53 = vld [vmem:[#allocation6 + $0x190] ss:$2 sm:$0xff]  ;;  %v4414_v43 = vld [vmem:[#allocation6 + $0x191] ss:$2 sm:$0xff]  ;;  %v11001_v47 = vpop.permute.xlu1 %4766 }
 0x4f2   :  { %v10999_v11 = vpop.permute.xlu0 %4704  ;;  %v4452_v44 = vmax.f32 %v4350_v53, %v4414_v43 }
 0x4f3   :  { %5158 = vrot.lane.b32.xlu1 %v4575_v8, %s7779_s4 }
 0x4f4   :  { %5096 = vrot.lane.b32.xlu0 %v10941_v22, %s7778_s23  ;;  %v4471_v20 = vmax.f32 %v4451_v26, %v4452_v44 }
 0x4f5   :  { %v5019_v36 = vpop.permute.xlu1 %5018 }
 0x4f6   :  { %v4957_v58 = vpop.permute.xlu0 %4956  ;;  %4529 = vst.msk [vmem:[#allocation3 + $0xf1] sm:$0xff] %vm2988_vm2, %v4471_v20  ;;  %v5274_v56 = vsel %vm5271_vm13, %v5257_v29, %v5019_v36  ;;  %v5194_v36 = vsel %vm2988_vm2, %v10699_v59, %v10975_v5 }
 0x4f7   :  { %4908 = vrot.lane.b32.xlu1 %v4608_v19, %s7775_s24  ;;  %v5258_v32 = vsel %vm5254_vm12, %v5241_v41, %v4957_v58 }
 0x4f8   :  { %4718 = vrot.lane.b32.xlu0 %v4608_v19, %s7768_s20 }
 0x4f9   :  { %v11011_v61 = vpop.permute.xlu1 %4830 }
 0x4fa   :  { %v11009_v35 = vpop.permute.xlu0 %4768 }
 0x4fb   :  { %5160 = vrot.lane.b32.xlu1 %v4576_v21, %s7779_s4 }
 0x4fc   :  { %4970 = vrot.lane.b32.xlu0 %v4576_v21, %s7776_s29 }
 0x4fd   :  { %v5083_v8 = vpop.permute.xlu1 %5082  ;;  %v11015_v45 = vld [vmem:[#allocation3 + $0xf1] sm:$0xff] }
 0x4fe   :  { %v5021_v22 = vpop.permute.xlu0 %5020  ;;  %v5291_v21 = vsel %vm5288_vm14, %v5274_v56, %v5083_v8  ;;  %v11040_v60 = vld [vmem:[#allocation3 + $0xf2] sm:$0xff] }
 0x4ff   :  { %4782 = vrot.lane.b32.xlu1 %v4577_v7, %s7771_s2  ;;  %v11044_v63 = vld [vmem:[#allocation3 + $0xf0] sm:$0xff]  ;;  %v5275_v18 = vsel %vm5271_vm13, %v5258_v32, %v5021_v22 }
 0x500   :  { %4720 = vrot.lane.b32.xlu0 %v11015_v45, %s7768_s20 }
 0x501   :  { %v4895_v62 = vpop.permute.xlu1 %4894 }
 0x502   :  { %v11025_v40 = vpop.permute.xlu0 %4832  ;;  %v7504_v52 = vpop.f32.mrb[52].mxu0 }
 0x503   :  { %v4090_v9 = vmul.f32 %v10651_v39, %v7504_v52  ;;  %5034 = vrot.lane.b32.xlu1 %v10991_v31, %s7777_s1  ;;  %v3971_v25 = vpop.f32.mrb[53].mxu0 }
 0x504   :  { %4972 = vrot.lane.b32.xlu0 %v4577_v7, %s7776_s29  ;;  %v4089_v0 = vmul.f32 %v10651_v39, %v3971_v25 }
 0x505   :  { %v4161_v51 = vadd.f32 %v10657_v3, %v4090_v9  ;;  %v5147_v50 = vpop.permute.xlu1 %5146 }
 0x506   :  { %v5085_v15 = vpop.permute.xlu0 %5084  ;;  %v4160_v27 = vadd.f32 %v10657_v3, %v4089_v0  ;;  %v5308_v4 = vsel %vm5305_vm15, %v5291_v21, %v5147_v50  ;;  %v5195_v0 = vsel %vm2988_vm2, %v10756_v46, %v10999_v11 }
 0x507   :  { %v4225_v37 = vmax.f32 %v4161_v51, 0.0  ;;  %7541 = vmatprep.mubr.msk.f32.mxu1 %vm5331_vm0, %v5308_v4  ;;  %4846 = vrot.lane.b32.xlu1 %v11044_v63, %s7773_s19  ;;  %v5292_v57 = vsel %vm5288_vm14, %v5275_v18, %v5085_v15  ;;  %v5211_v21 = vsel %vm3118_vm5, %v5195_v0, %v11009_v35 }
 0x508   :  { %4784 = vrot.lane.b32.xlu0 %v11040_v60, %s7771_s2  ;;  %v4224_v24 = vmax.f32 %v4160_v27, 0.0  ;;  %v5227_v50 = vsel %vm3248_vm7, %v5211_v21, %v11025_v40 }
 0x509   :  { %4289 = vst.msk [vmem:[#allocation6 + $0x1a8] sm:$0xff] %vm2988_vm2, %v4225_v37  ;;  %v4897_v10 = vpop.permute.xlu1 %4896 }
 0x50a   :  { %v11056_v2 = vpop.permute.xlu0 %4706  ;;  %4288 = vst.msk [vmem:[#allocation6 + $0x1a0] sm:$0xff] %vm2988_vm2, %v4224_v24  ;;  %v5243_v4 = vsel %vm3378_vm9, %v5227_v50, %v4897_v10 }
 0x50b   :  { %5098 = vrot.lane.b32.xlu1 %v4608_v19, %s7778_s23  ;;  %v5210_v19 = vsel %vm3118_vm5, %v5194_v36, %v11001_v47 }
 0x50c   :  { %5036 = vrot.lane.b32.xlu0 %v11044_v63, %s7777_s1  ;;  %v5226_v8 = vsel %vm3248_vm7, %v5210_v19, %v11011_v61 }
 0x50d   :  { %v5149_v49 = vpop.permute.xlu1 %5148  ;;  %v5242_v28 = vsel %vm3378_vm9, %v5226_v8, %v4895_v62  ;;  %v5196_v8 = vsel %vm2988_vm2, %v10780_v23, %v11056_v2 }
 0x50e   :  { %v4959_v12 = vpop.permute.xlu0 %4958  ;;  %v5309_v42 = vsel %vm5305_vm15, %v5292_v57, %v5149_v49 }
 0x50f   :  { %7542 = vmatmul.mubr.msk.f32.gmra.mrb[2].mxu1 %vm5331_vm0, %v5309_v42  ;;  %4910 = vrot.lane.b32.xlu1 %v11015_v45, %s7775_s24  ;;  %v5259_v52 = vsel %vm5254_vm12, %v5242_v28, %v4959_v12 }
 0x511   :  { %v11076_v17 = vpop.permute.xlu1 %4770  ;;  %v4352_v30 = vld [vmem:[#allocation6 + $0x1a0] ss:$2 sm:$0xff]  ;;  %v4416_v24 = vld [vmem:[#allocation6 + $0x1a1] ss:$2 sm:$0xff] }
 0x512   :  { %v11074_v48 = vpop.permute.xlu0 %4708  ;;  %v4453_v18 = vmax.f32 %v4352_v30, %v4416_v24 }
 0x513   :  { %5162 = vrot.lane.b32.xlu1 %v4577_v7, %s7779_s4 }
 0x515   :  { %v5023_v43 = vpop.permute.xlu1 %5022 }
 0x516   :  { %v4961_v53 = vpop.permute.xlu0 %4960  ;;  %v5276_v59 = vsel %vm5271_vm13, %v5259_v52, %v5023_v43 }
 0x517   :  { %v5260_v46 = vsel %vm5254_vm12, %v5243_v4, %v4961_v53 }
 0x519   :  { %v11081_v44 = vpop.permute.xlu1 %4834 }
 0x51a   :  { %v11079_v26 = vpop.permute.xlu0 %4772 }
 0x51d   :  { %v5087_v58 = vpop.permute.xlu1 %5086 }
 0x51e   :  { %v5025_v20 = vpop.permute.xlu0 %5024  ;;  %v5293_v9 = vsel %vm5288_vm14, %v5276_v59, %v5087_v58 }
 0x51f   :  { %v5277_v11 = vsel %vm5271_vm13, %v5260_v46, %v5025_v20 }
 0x521   :  { %v4899_v7 = vpop.permute.xlu1 %4898 }
 0x522   :  { %v11088_v22 = vpop.permute.xlu0 %4836  ;;  %v7507_v6 = vpop.f32.mrb[54].mxu0 }
 0x523   :  { %v4092_v14 = vmul.f32 %v10651_v39, %v7507_v6  ;;  %v3981_v55 = vpop.f32.mrb[55].mxu0  ;;  %v5212_v6 = vsel %vm3118_vm5, %v5196_v8, %v11076_v17 }
 0x524   :  { %v4091_v29 = vmul.f32 %v10651_v39, %v3981_v55 }
 0x525   :  { %v4163_v5 = vadd.f32 %v10657_v3, %v4092_v14  ;;  %v5151_v25 = vpop.permute.xlu1 %5150  ;;  %v5228_v14 = vsel %vm3248_vm7, %v5212_v6, %v11081_v44  ;;  %v11249_v6 = vld [vmem:[%s12130_s3] ss:$0 sm:$0xff] }
 0x526   :  { %v5089_v47 = vpop.permute.xlu0 %5088  ;;  %v4162_v61 = vadd.f32 %v10657_v3, %v4091_v29  ;;  %v5310_v62 = vsel %vm5305_vm15, %v5293_v9, %v5151_v25  ;;  %v5244_v29 = vsel %vm3378_vm9, %v5228_v14, %v4899_v7 }
 0x527   :  { %v4227_v56 = vmax.f32 %v4163_v5, 0.0  ;;  %7544 = vmatprep.mubr.msk.f32.mxu1 %vm5331_vm0, %v5310_v62  ;;  %v5294_v35 = vsel %vm5288_vm14, %v5277_v11, %v5089_v47 }
 0x528   :  { %v4226_v15 = vmax.f32 %v4162_v61, 0.0 }
 0x529   :  { %4291 = vst.msk [vmem:[#allocation6 + $0x1b8] sm:$0xff] %vm2988_vm2, %v4227_v56  ;;  %v11113_v27 = vpop.permute.xlu1 %4900  ;;  %v5197_v56 = vsel %vm2988_vm2, %v10834_v54, %v11074_v48 }
 0x52a   :  { %v11108_v51 = vpop.permute.xlu0 %4710  ;;  %4290 = vst.msk [vmem:[#allocation6 + $0x1b0] sm:$0xff] %vm2988_vm2, %v4226_v15 }
 0x52d   :  { %v5153_v37 = vpop.permute.xlu1 %5152 }
 0x52e   :  { %v4963_v13 = vpop.permute.xlu0 %4962  ;;  %v5311_v33 = vsel %vm5305_vm15, %v5294_v35, %v5153_v37  ;;  %v4541_v35 = vld [vmem:[#allocation3 + $0xa0] sm:$0xff] }
 0x52f   :  { %7545 = vmatmul.mubr.msk.f32.gmra.mrb[4].mxu1 %vm5331_vm0, %v5311_v33  ;;  %v5261_v17 = vsel %vm5254_vm12, %v5244_v29, %v4963_v13  ;;  %v5198_v24 = vsel %vm2988_vm2, %v4541_v35, %v11108_v51 }
 0x531   :  { %v4354_v40 = vld [vmem:[#allocation6 + $0x1b0] ss:$2 sm:$0xff]  ;;  %v4418_v41 = vld [vmem:[#allocation6 + $0x1b1] ss:$2 sm:$0xff]  ;;  %v11123_v12 = vpop.permute.xlu1 %4774 }
 0x532   :  { %v11121_v32 = vpop.permute.xlu0 %4712  ;;  %v4454_v10 = vmax.f32 %v4354_v40, %v4418_v41  ;;  %v5214_v40 = vsel %vm3118_vm5, %v5198_v24, %v11123_v12 }
 0x534   :  { %v4472_v57 = vmax.f32 %v4453_v18, %v4454_v10 }
 0x535   :  { %v5027_v42 = vpop.permute.xlu1 %5026 }
 0x536   :  { %v4965_v49 = vpop.permute.xlu0 %4964  ;;  %4530 = vst.msk [vmem:[#allocation3 + $0x101] sm:$0xff] %vm2988_vm2, %v4472_v57  ;;  %v5278_v44 = vsel %vm5271_vm13, %v5261_v17, %v5027_v42  ;;  %v11238_v42 = vld [vmem:[%s12154_s27] ss:$0 sm:$0xff]  ;;  %v5199_v17 = vsel %vm2988_vm2, %v10908_v38, %v11121_v32 }
 0x539   :  { %v11128_v43 = vpop.permute.xlu1 %4838 }
 0x53a   :  { %v11126_v53 = vpop.permute.xlu0 %4776  ;;  %v5230_v18 = vsel %vm3248_vm7, %v5214_v40, %v11128_v43 }
 0x53d   :  { %v11130_v58 = vld [vmem:[#allocation3 + $0x101] sm:$0xff]  ;;  %v5091_v19 = vpop.permute.xlu1 %5090 }
 0x53e   :  { %v5029_v20 = vpop.permute.xlu0 %5028  ;;  %v11132_v36 = vld [vmem:[#allocation3 + $0x100] sm:$0xff]  ;;  %4912 = vrot.lane.b32.xlu1 %v11130_v58, %s7775_s24  ;;  %v5295_v61 = vsel %vm5288_vm14, %v5278_v44, %v5091_v19  ;;  %v5215_v44 = vsel %vm3118_vm5, %v5199_v17, %v11126_v53 }
 0x53f   :  { %4848 = vrot.lane.b32.xlu0 %v11132_v36, %s7773_s19  ;;  %v11159_v9 = vld [vmem:[#allocation3 + $0x102] sm:$0xff] }
 0x541   :  { %v11147_v55 = vpop.permute.xlu1 %4902 }
 0x542   :  { %v11143_v28 = vpop.permute.xlu0 %4840  ;;  %5164 = vrot.lane.b32.xlu1 %v11040_v60, %s7779_s4  ;;  %v7510_v52 = vpop.f32.mrb[56].mxu0 }
 0x543   :  { %5100 = vrot.lane.b32.xlu0 %v11015_v45, %s7778_s23  ;;  %v4094_v23 = vmul.f32 %v10651_v39, %v7510_v52  ;;  %v3991_v2 = vpop.f32.mrb[57].mxu0 }
 0x544   :  { %v4093_v59 = vmul.f32 %v10651_v39, %v3991_v2 }
 0x545   :  { %v4165_v5 = vadd.f32 %v10657_v3, %v4094_v23  ;;  %v5155_v25 = vpop.permute.xlu1 %5154 }
 0x546   :  { %v5093_v47 = vpop.permute.xlu0 %5092  ;;  %v4164_v45 = vadd.f32 %v10657_v3, %v4093_v59  ;;  %4786 = vrot.lane.b32.xlu1 %v11159_v9, %s7771_s2  ;;  %v5312_v39 = vsel %vm5305_vm15, %v5295_v61, %v5155_v25  ;;  %v5213_v3 = vsel %vm3118_vm5, %v5197_v56, %v11079_v26 }
 0x547   :  { %4722 = vrot.lane.b32.xlu0 %v11130_v58, %s7768_s20  ;;  %v4229_v7 = vmax.f32 %v4165_v5, 0.0  ;;  %7547 = vmatprep.mubr.msk.f32.mxu1 %vm5331_vm0, %v5312_v39  ;;  %v5229_v15 = vsel %vm3248_vm7, %v5213_v3, %v11088_v22  ;;  %v5231_v5 = vsel %vm3248_vm7, %v5215_v44, %v11143_v28 }
 0x548   :  { %v4228_v62 = vmax.f32 %v4164_v45, 0.0  ;;  %v5245_v54 = vsel %vm3378_vm9, %v5229_v15, %v11113_v27 }
 0x549   :  { %4293 = vst.msk [vmem:[#allocation6 + $0x1c8] sm:$0xff] %vm2988_vm2, %v4229_v7  ;;  %v11180_v21 = vpop.permute.xlu1 %4904  ;;  %v5262_v48 = vsel %vm5254_vm12, %v5245_v54, %v4965_v49  ;;  %v5246_v49 = vsel %vm3378_vm9, %v5230_v18, %v11147_v55 }
 0x54a   :  { %v11175_v0 = vpop.permute.xlu0 %4714  ;;  %4292 = vst.msk [vmem:[#allocation6 + $0x1c0] sm:$0xff] %vm2988_vm2, %v4228_v62  ;;  %5038 = vrot.lane.b32.xlu1 %v11132_v36, %s7777_s1  ;;  %v5279_v26 = vsel %vm5271_vm13, %v5262_v48, %v5029_v20  ;;  %v5247_v61 = vsel %vm3378_vm9, %v5231_v5, %v11180_v21 }
 0x54b   :  { %4974 = vrot.lane.b32.xlu0 %v11040_v60, %s7776_s29  ;;  %v5296_v22 = vsel %vm5288_vm14, %v5279_v26, %v5093_v47 }
 0x54d   :  { %v5157_v4 = vpop.permute.xlu1 %5156 }
 0x54e   :  { %v4967_v50 = vpop.permute.xlu0 %4966  ;;  %v5313_v46 = vsel %vm5305_vm15, %v5296_v22, %v5157_v4 }
 0x54f   :  { %7548 = vmatmul.mubr.msk.f32.gmra.mrb[6].mxu1 %vm5331_vm0, %v5313_v46  ;;  %v5263_v19 = vsel %vm5254_vm12, %v5246_v49, %v4967_v50 }
 0x551   :  { %v11207_v27 = vpop.permute.xlu1 %4778  ;;  %v4356_v7 = vld [vmem:[#allocation6 + $0x1c0] ss:$2 sm:$0xff]  ;;  %v4420_v39 = vld [vmem:[#allocation6 + $0x1c1] ss:$2 sm:$0xff] }
 0x552   :  { %v11205_v60 = vpop.permute.xlu0 %4716  ;;  %v4455_v3 = vmax.f32 %v4356_v7, %v4420_v39  ;;  %v4645_v39 = vld [vmem:[#allocation3 + $0x130] sm:$0xff] }
 0x555   :  { %v5031_v13 = vpop.permute.xlu1 %5030 }
 0x556   :  { %v4969_v11 = vpop.permute.xlu0 %4968  ;;  %v5280_v8 = vsel %vm5271_vm13, %v5263_v19, %v5031_v13 }
 0x557   :  { %v5264_v38 = vsel %vm5254_vm12, %v5247_v61, %v4969_v11  ;;  %v5200_v11 = vsel %vm2988_vm2, %v10921_v34, %v11175_v0 }
 0x558   :  { %v5216_v13 = vsel %vm3118_vm5, %v5200_v11, %v11207_v27  ;;  %v4677_v11 = vld [vmem:[#allocation3 + $0x132] sm:$0xff] }
 0x559   :  { %v4843_v30 = vpop.permute.xlu1 %4842 }
 0x55a   :  { %v11225_v37 = vpop.permute.xlu0 %4780  ;;  %v5232_v24 = vsel %vm3248_vm7, %v5216_v13, %v4843_v30 }
 0x55d   :  { %v5095_v33 = vpop.permute.xlu1 %5094 }
 0x55e   :  { %v5033_v41 = vpop.permute.xlu0 %5032  ;;  %v5297_v55 = vsel %vm5288_vm14, %v5280_v8, %v5095_v33 }
 0x55f   :  { %v5281_v32 = vsel %vm5271_vm13, %v5264_v38, %v5033_v41 }
 0x561   :  { %v4907_v10 = vpop.permute.xlu1 %4906 }
 0x562   :  { %v7513_v57 = vpop.f32.mrb[58].mxu0  ;;  %v11244_v43 = vpop.permute.xlu0 %4844  ;;  %v5248_v41 = vsel %vm3378_vm9, %v5232_v24, %v4907_v10  ;;  %v11369_v24 = vld [vmem:[%s12133_s6] ss:$0 sm:$0xff]  ;;  %s7781_s6 = smov 96  }
 0x563   :  { %v4096_v51 = vmul.f32 %v11238_v42, %v7513_v57  ;;  %v4001_v20 = vpop.f32.mrb[59].mxu0 }
 0x564   :  { %v4095_v12 = vmul.f32 %v11238_v42, %v4001_v20 }
 0x565   :  { %v4167_v14 = vadd.f32 %v11249_v6, %v4096_v51  ;;  %v5159_v29 = vpop.permute.xlu1 %5158 }
 0x566   :  { %v4166_v52 = vadd.f32 %v11249_v6, %v4095_v12  ;;  %v5314_v2 = vsel %vm5305_vm15, %v5297_v55, %v5159_v29  ;;  %v5097_v45 = vpop.permute.xlu0 %5096 }
 0x567   :  { %v4231_v23 = vmax.f32 %v4167_v14, 0.0  ;;  %7550 = vmatprep.mubr.msk.f32.mxu1 %vm5331_vm0, %v5314_v2  ;;  %v5298_v25 = vsel %vm5288_vm14, %v5281_v32, %v5097_v45 }
 0x568   :  { %v4230_v59 = vmax.f32 %v4166_v52, 0.0 }
 0x569   :  { %4295 = vst.msk [vmem:[#allocation6 + $0x1d8] sm:$0xff] %vm2988_vm2, %v4231_v23  ;;  %v11265_v47 = vpop.permute.xlu1 %4908 }
 0x56a   :  { %4294 = vst.msk [vmem:[#allocation6 + $0x1d0] sm:$0xff] %vm2988_vm2, %v4230_v59  ;;  %v11279_v50 = vpop.permute.xlu0 %4718 }
 0x56d   :  { %v5161_v53 = vpop.permute.xlu1 %5160 }
 0x56e   :  { %v5315_v56 = vsel %vm5305_vm15, %v5298_v25, %v5161_v53  ;;  %v4971_v35 = vpop.permute.xlu0 %4970 }
 0x56f   :  { %7551 = vmatmul.mubr.msk.f32.gmra.mrb[8].mxu1 %vm5331_vm0, %v5315_v56  ;;  %v5265_v0 = vsel %vm5254_vm12, %v5248_v41, %v4971_v35  ;;  %v5201_v56 = vsel %vm2988_vm2, %v10964_v16, %v11205_v60 }
 0x571   :  { %v4358_v28 = vld [vmem:[#allocation6 + $0x1d0] ss:$2 sm:$0xff]  ;;  %v4422_v62 = vld [vmem:[#allocation6 + $0x1d1] ss:$2 sm:$0xff]  ;;  %v11274_v54 = vpop.permute.xlu1 %4782 }
 0x572   :  { %v4456_v15 = vmax.f32 %v4358_v28, %v4422_v62  ;;  %v5217_v28 = vsel %vm3118_vm5, %v5201_v56, %v11225_v37 }
 0x574   :  { %v4473_v21 = vmax.f32 %v4455_v3, %v4456_v15  ;;  %v4661_v15 = vld [vmem:[#allocation3 + $0x131] sm:$0xff] }
 0x575   :  { %v5035_v48 = vpop.permute.xlu1 %5034 }
 0x576   :  { %4531 = vst.msk [vmem:[#allocation3 + $0x111] sm:$0xff] %vm2988_vm2, %v4473_v21  ;;  %v5282_v30 = vsel %vm5271_vm13, %v5265_v0, %v5035_v48  ;;  %v5233_v21 = vsel %vm3248_vm7, %v5217_v28, %v11244_v43  ;;  %v11364_v43 = vld [vmem:[%s12132_s5] ss:$0 sm:$0xff]  ;;  %s7780_s5 = smov 80  }
 0x577   :  { %v5249_v48 = vsel %vm3378_vm9, %v5233_v21, %v11265_v47  ;;  %v5202_v21 = vsel %vm2988_vm2, %v10991_v31, %v11279_v50 }
 0x579   :  { %v11277_v26 = vpop.permute.xlu1 %4846 }
 0x57d   :  { %v11281_v22 = vld [vmem:[#allocation3 + $0x110] sm:$0xff]  ;;  %v5099_v46 = vpop.permute.xlu1 %5098 }
 0x57e   :  { %v11283_v4 = vld [vmem:[#allocation3 + $0x111] sm:$0xff]  ;;  %4850 = vrot.lane.b32.xlu1 %v11281_v22, %s7773_s19 }
 0x57f   :  { %4724 = vrot.lane.b32.xlu0 %v11283_v4, %s7768_s20  ;;  %v4580_v49 = vld [vmem:[#allocation3 + $0x112] sm:$0xff] }
 0x581   :  { %v11295_v33 = vpop.permute.xlu1 %4910 }
 0x582   :  { %5102 = vrot.lane.b32.xlu1 %v11130_v58, %s7778_s23  ;;  %v5299_v58 = vsel %vm5288_vm14, %v5282_v30, %v5099_v46 }
 0x583   :  { %4976 = vrot.lane.b32.xlu0 %v11159_v9, %s7776_s29  ;;  %v7516_v40 = vpop.f32.mrb[60].mxu0 }
 0x584   :  { %v4098_v18 = vmul.f32 %v11238_v42, %v7516_v40  ;;  %v4011_v34 = vpop.f32.mrb[61].mxu0 }
 0x585   :  { %v4097_v27 = vmul.f32 %v11238_v42, %v4011_v34  ;;  %v5163_v20 = vpop.permute.xlu1 %5162  ;;  %v5721_v34 = vld [vmem:[#allocation4 + $0x1] sm:$0xf] }
 0x586   :  { %v4169_v57 = vadd.f32 %v11249_v6, %v4098_v18  ;;  %4914 = vrot.lane.b32.xlu1 %v11283_v4, %s7775_s24  ;;  %v5316_v19 = vsel %vm5305_vm15, %v5299_v58, %v5163_v20 }
 0x587   :  { %v4168_v51 = vadd.f32 %v11249_v6, %v4097_v27  ;;  %4788 = vrot.lane.b32.xlu0 %v4580_v49, %s7771_s2  ;;  %7553 = vmatprep.mubr.msk.f32.mxu1 %vm5331_vm0, %v5316_v19 }
 0x588   :  { %v4233_v10 = vmax.f32 %v4169_v57, 0.0 }
 0x589   :  { %v4232_v12 = vmax.f32 %v4168_v51, 0.0 }
 0x58a   :  { %4297 = vst.msk [vmem:[#allocation6 + $0x1e8] sm:$0xff] %vm2988_vm2, %v4233_v10  ;;  %5166 = vrot.lane.b32.xlu1 %v11159_v9, %s7779_s4  ;;  %v11327_v9 = vpop.permute.xlu0 %4720 }
 0x58b   :  { %4296 = vst.msk [vmem:[#allocation6 + $0x1e0] sm:$0xff] %vm2988_vm2, %v4232_v12  ;;  %5040 = vrot.lane.b32.xlu0 %v11281_v22, %s7777_s1 }
 0x58e   :  { %4978 = vrot.lane.b32.xlu1 %v4580_v49, %s7776_s29  ;;  %v4973_v32 = vpop.permute.xlu0 %4972 }
 0x58f   :  { %v5266_v60 = vsel %vm5254_vm12, %v5249_v48, %v4973_v32 }
 0x590   :  { %v7519_v8 = vpop.f32.mrb[62].mxu0 }
 0x591   :  { %v4100_v14 = vmul.f32 %v11238_v42, %v7519_v8  ;;  %v4021_v55 = vpop.f32.mrb[63].mxu0 }
 0x592   :  { %v4099_v52 = vmul.f32 %v11238_v42, %v4021_v55  ;;  %v4360_v59 = vld [vmem:[#allocation6 + $0x1e0] ss:$2 sm:$0xff]  ;;  %v4424_v44 = vld [vmem:[#allocation6 + $0x1e1] ss:$2 sm:$0xff]  ;;  %v11330_v25 = vpop.permute.xlu0 %4784 }
 0x593   :  { %v4171_v29 = vadd.f32 %v11249_v6, %v4100_v14  ;;  %v4457_v45 = vmax.f32 %v4360_v59, %v4424_v44 }
 0x594   :  { %v4170_v23 = vadd.f32 %v11249_v6, %v4099_v52 }
 0x595   :  { %v4235_v2 = vmax.f32 %v4171_v29, 0.0 }
 0x596   :  { %v4234_v17 = vmax.f32 %v4170_v23, 0.0  ;;  %v5037_v7 = vpop.permute.xlu0 %5036 }
 0x597   :  { %4299 = vst.msk [vmem:[#allocation6 + $0x1f8] sm:$0xff] %vm2988_vm2, %v4235_v2  ;;  %v5283_v37 = vsel %vm5271_vm13, %v5266_v60, %v5037_v7 }
 0x598   :  { %4298 = vst.msk [vmem:[#allocation6 + $0x1f0] sm:$0xff] %vm2988_vm2, %v4234_v17 }
 0x59f   :  { %v4362_v5 = vld [vmem:[#allocation6 + $0x1f0] ss:$2 sm:$0xff]  ;;  %v4426_v61 = vld [vmem:[#allocation6 + $0x1f1] ss:$2 sm:$0xff] }
 0x5a0   :  { %v4458_v38 = vmax.f32 %v4362_v5, %v4426_v61 }
 0x5a2   :  { %v4474_v42 = vmax.f32 %v4457_v45, %v4458_v38 }
 0x5a4   :  { %4532 = vst.msk [vmem:[#allocation3 + $0x121] sm:$0xff] %vm2988_vm2, %v4474_v42 }
 0x5ab   :  { %v4628_v6 = vld [vmem:[#allocation3 + $0x122] sm:$0xff] }
 0x5ac   :  { %v4596_v53 = vld [vmem:[#allocation3 + $0x120] sm:$0xff]  ;;  %4980 = vrot.lane.b32.xlu1 %v4628_v6, %s7776_s29 }
 0x5ad   :  { %4852 = vrot.lane.b32.xlu0 %v4596_v53, %s7773_s19  ;;  %v4612_v16 = vld [vmem:[#allocation3 + $0x121] sm:$0xff] }
 0x5b0   :  { %5044 = vrot.lane.b32.xlu1 %v4645_v39, %s7777_s1  ;;  %v11342_v62 = vpop.permute.xlu1 %4912 }
 0x5b1   :  { %5104 = vrot.lane.b32.xlu0 %v11283_v4, %s7778_s23  ;;  %v11344_v3 = vpop.permute.xlu0 %4848 }
 0x5b4   :  { %5108 = vrot.lane.b32.xlu1 %v4661_v15, %s7778_s23  ;;  %v5165_v4 = vpop.permute.xlu1 %5164 }
 0x5b5   :  { %4916 = vrot.lane.b32.xlu0 %v4612_v16, %s7775_s24  ;;  %v5101_v46 = vpop.permute.xlu0 %5100 }
 0x5b6   :  { %v5300_v13 = vsel %vm5288_vm14, %v5283_v37, %v5101_v46 }
 0x5b7   :  { %v5317_v35 = vsel %vm5305_vm15, %v5300_v13, %v5165_v4 }
 0x5b8   :  { %7554 = vmatmul.mubr.msk.f32.gmra.mrb[10].mxu1 %vm5331_vm0, %v5317_v35  ;;  %5172 = vrot.lane.b32.xlu1 %v4677_v11, %s7779_s4  ;;  %v11387_v44 = vpop.permute.xlu1 %4786 }
 0x5b9   :  { %5168 = vrot.lane.b32.xlu0 %v4580_v49, %s7779_s4  ;;  %v5729_v49 = vld [vmem:[#allocation4 + $0x2] sm:$0xf]  ;;  %v11393_v42 = vpop.permute.xlu0 %4722 }
 0x5bc   :  { %v5039_v32 = vpop.permute.xlu1 %5038 }
 0x5bd   :  { %5042 = vrot.lane.b32.xlu0 %v4596_v53, %s7777_s1  ;;  %v4975_v60 = vpop.permute.xlu0 %4974 }
 0x5c1   :  { %5106 = vrot.lane.b32.xlu0 %v4612_v16, %s7778_s23  ;;  %v5218_v16 = vsel %vm3118_vm5, %v5202_v21, %v11274_v54 }
 0x5c2   :  { %v7540_v47 = vpop.f32.mrb[0].mxu1  ;;  %v5234_v4 = vsel %vm3248_vm7, %v5218_v16, %v11277_v26  ;;  %v5203_v16 = vsel %vm2988_vm2, %v11044_v63, %v11327_v9 }
 0x5c3   :  { %v5533_v40 = vmul.f32 %v7540_v47, %v11364_v43  ;;  %v5446_v41 = vpop.f32.mrb[1].mxu1  ;;  %v5250_v46 = vsel %vm3378_vm9, %v5234_v4, %v11295_v33  ;;  %v6100_v4 = vld [vmem:[%s12134_s7 + $0x38] sm:$0xff] }
 0x5c4   :  { %v5532_v18 = vmul.f32 %v11364_v43, %v5446_v41  ;;  %v5267_v11 = vsel %vm5254_vm12, %v5250_v46, %v4975_v60  ;;  %v6098_v60 = vld [vmem:[%s12134_s7 + $0x28] sm:$0xff]  ;;  %v5219_v46 = vsel %vm3118_vm5, %v5203_v16, %v11330_v25 }
 0x5c5   :  { %5170 = vrot.lane.b32.xlu0 %v4628_v6, %s7779_s4  ;;  %v5556_v0 = vadd.f32 %v11369_v24, %v5533_v40  ;;  %v5284_v31 = vsel %vm5271_vm13, %v5267_v11, %v5039_v32  ;;  %v5235_v9 = vsel %vm3248_vm7, %v5219_v46, %v11344_v3  ;;  %v6102_v3 = vld [vmem:[%s12134_s7 + $0x48] sm:$0xff] }
 0x5c6   :  { %v5555_v27 = vadd.f32 %v11369_v24, %v5532_v18 }
 0x5c7   :  { %v5572_v30 = vmax.f32 %v5556_v0, 0.0 }
 0x5c8   :  { %v5571_v57 = vmax.f32 %v5555_v27, 0.0 }
 0x5c9   :  { %5794 = vrot.lane.b32.xlu0 %v5721_v34, %s7771_s2  ;;  %5588 = vst.msk [vmem:[#allocation7 + $0x8] sm:$0xff] %vm3118_vm5, %v5572_v30 }
 0x5ca   :  { %5587 = vst.msk [vmem:[#allocation7] sm:$0xff] %vm3118_vm5, %v5571_v57 }
 0x5cd   :  { %5826 = vrot.lane.b32.xlu0 %v5729_v49, %s7775_s24 }
 0x5d0   :  { %v5605_v58 = vld [vmem:[#allocation7 + $0x8] ss:$2 sm:$0xf]  ;;  %v5637_v51 = vld [vmem:[#allocation7 + $0x9] ss:$2 sm:$0xf] }
 0x5d1   :  { %v5667_v20 = vmax.f32 %v5605_v58, %v5637_v51  ;;  %v5603_v10 = vld [vmem:[#allocation7] ss:$2 sm:$0xf]  ;;  %v5635_v19 = vld [vmem:[#allocation7 + $0x1] ss:$2 sm:$0xf] }
 0x5d2   :  { %v5666_v12 = vmax.f32 %v5603_v10, %v5635_v19 }
 0x5d4   :  { %v5682_v8 = vmax.f32 %v5666_v12, %v5667_v20 }
 0x5d6   :  { %5705 = vst.msk [vmem:[#allocation4 + $0x9] sm:$0xf] %vm5704_vm3, %v5682_v8 }
 0x5dd   :  { %v5722_v14 = vld [vmem:[#allocation4 + $0x9] sm:$0xf] }
 0x5de   :  { %v5737_v55 = vld [vmem:[#allocation4 + $0x8] sm:$0xf]  ;;  %5796 = vrot.lane.b32.xlu1 %v5722_v14, %s7771_s2 }
 0x5df   :  { %5858 = vrot.lane.b32.xlu0 %v5737_v55, %s7777_s1  ;;  %v5730_v52 = vld [vmem:[#allocation4 + $0xa] sm:$0xf] }
 0x5e0   :  { %v5745_v29 = vld [vmem:[#allocation4 + $0x9] sm:$0xf] }
 0x5e1   :  { %v5753_v40 = vld [vmem:[#allocation4 + $0xa] sm:$0xf] }
 0x5e2   :  { %v7543_v23 = vpop.f32.mrb[2].mxu1  ;;  %5828 = vrot.lane.b32.xlu1 %v5730_v52, %s7775_s24 }
 0x5e3   :  { %5890 = vrot.lane.b32.xlu0 %v5745_v29, %s7779_s4  ;;  %v5535_v2 = vmul.f32 %v7543_v23, %v11364_v43  ;;  %v5456_v17 = vpop.f32.mrb[3].mxu1 }
 0x5e4   :  { %v5534_v59 = vmul.f32 %v11364_v43, %v5456_v17  ;;  %v6094_v17 = vld [vmem:[%s12134_s7 + $0x8] sm:$0xff] }
 0x5e5   :  { %v5558_v5 = vadd.f32 %v11369_v24, %v5535_v2  ;;  %v6093_v2 = vld [vmem:[%s12134_s7] sm:$0xff] }
 0x5e6   :  { %v5557_v61 = vadd.f32 %v11369_v24, %v5534_v59  ;;  %v7587_v59 = vpack.c.bf16 %v6094_v17, %v6093_v2 }
 0x5e7   :  { %v5574_v45 = vmax.f32 %v5558_v5, 0.0  ;;  %v7782_v5 = vmov 0.0|0.0  }
 0x5e8   :  { %v5573_v38 = vmax.f32 %v5557_v61, 0.0  ;;  %7586 = vmatprep.subr.bf16.mxu1 %v7782_v5 }
 0x5e9   :  { %5590 = vst.msk [vmem:[#allocation7 + $0x18] sm:$0xff] %vm3118_vm5, %v5574_v45  ;;  %7588 = vmatpush1.bf16.msra.mxu1 %v7587_v59  ;;  %v6095_v45 = vld [vmem:[%s12134_s7 + $0x10] sm:$0xff]  ;;  %v6105_v59 = vld [vmem:[%s12134_s7 + $0x60] sm:$0xff] }
 0x5ea   :  { %5589 = vst.msk [vmem:[#allocation7 + $0x10] sm:$0xff] %vm3118_vm5, %v5573_v38  ;;  %7589 = vmatprep.subr.bf16.mxu1 %v7782_v5  ;;  %v6096_v38 = vld [vmem:[%s12134_s7 + $0x18] sm:$0xff] }
 0x5eb   :  { %v7590_v32 = vpack.c.bf16 %v6096_v38, %v6095_v45 }
 0x5ed   :  { %7591 = vmatpush1.bf16.msra.mxu1 %v7590_v32  ;;  %v5733_v32 = vld [vmem:[#allocation4 + $0x32] sm:$0xf] }
 0x5ee   :  { %7592 = vmatprep.subr.bf16.mxu1 %v7782_v5 }
 0x5f0   :  { %v11395_v6 = vpop.permute.xlu1 %4850  ;;  %v5609_v53 = vld [vmem:[#allocation7 + $0x18] ss:$2 sm:$0xf]  ;;  %v5641_v7 = vld [vmem:[#allocation7 + $0x19] ss:$2 sm:$0xf] }
 0x5f1   :  { %v5669_v39 = vmax.f32 %v5609_v53, %v5641_v7  ;;  %v5607_v56 = vld [vmem:[#allocation7 + $0x10] ss:$2 sm:$0xf]  ;;  %v5639_v28 = vld [vmem:[#allocation7 + $0x11] ss:$2 sm:$0xf]  ;;  %v11421_v57 = vpop.permute.xlu0 %4724 }
 0x5f2   :  { %v5668_v15 = vmax.f32 %v5607_v56, %v5639_v28 }
 0x5f4   :  { %v5103_v48 = vpop.permute.xlu1 %5102  ;;  %v5683_v37 = vmax.f32 %v5668_v15, %v5669_v39 }
 0x5f5   :  { %v5301_v50 = vsel %vm5288_vm14, %v5284_v31, %v5103_v48  ;;  %v4977_v10 = vpop.permute.xlu0 %4976  ;;  %v6097_v48 = vld [vmem:[%s12134_s7 + $0x20] sm:$0xff] }
 0x5f6   :  { %5706 = vst.msk [vmem:[#allocation4 + $0x11] sm:$0xf] %vm5704_vm3, %v5683_v37  ;;  %v6099_v37 = vld [vmem:[%s12134_s7 + $0x30] sm:$0xff]  ;;  %v7593_v63 = vpack.c.bf16 %v6098_v60, %v6097_v48 }
 0x5f7   :  { %v7596_v25 = vpack.c.bf16 %v6100_v4, %v6099_v37 }
 0x5f8   :  { %v11408_v13 = vpop.permute.xlu1 %4914  ;;  %7594 = vmatpush1.bf16.msra.mxu1 %v7593_v63 }
 0x5f9   :  { %v11428_v52 = vpop.permute.xlu0 %4788  ;;  %7595 = vmatprep.subr.bf16.mxu1 %v7782_v5 }
 0x5fc   :  { %v5167_v35 = vpop.permute.xlu1 %5166  ;;  %7597 = vmatpush1.bf16.msra.mxu1 %v7596_v25 }
 0x5fd   :  { %v5318_v54 = vsel %vm5305_vm15, %v5301_v50, %v5167_v35  ;;  %v5738_v47 = vld [vmem:[#allocation4 + $0x10] sm:$0xf]  ;;  %v5041_v61 = vpop.permute.xlu0 %5040  ;;  %7598 = vmatprep.subr.bf16.mxu1 %v7782_v5 }
 0x5fe   :  { %7556 = vmatprep.mubr.msk.f32.mxu1 %vm5331_vm0, %v5318_v54  ;;  %v5723_v26 = vld [vmem:[#allocation4 + $0x11] sm:$0xf]  ;;  %5860 = vrot.lane.b32.xlu1 %v5738_v47, %s7777_s1 }
 0x5ff   :  { %5798 = vrot.lane.b32.xlu0 %v5723_v26, %s7771_s2  ;;  %v5746_v33 = vld [vmem:[#allocation4 + $0x11] sm:$0xf] }
 0x600   :  { %v5731_v30 = vld [vmem:[#allocation4 + $0x12] sm:$0xf]  ;;  %v11446_v56 = vpop.permute.xlu1 %4978 }
 0x601   :  { %v5762_v20 = vld [vmem:[#allocation4 + $0x10] sm:$0xf] }
 0x602   :  { %v7546_v41 = vpop.f32.mrb[4].mxu1  ;;  %5892 = vrot.lane.b32.xlu1 %v5746_v33, %s7779_s4  ;;  %v5754_v15 = vld [vmem:[#allocation4 + $0x12] sm:$0xf] }
 0x603   :  { %5922 = vrot.lane.b32.xlu0 %v5753_v40, %s7780_s5  ;;  %v5537_v18 = vmul.f32 %v7546_v41, %v11364_v43  ;;  %v5466_v34 = vpop.f32.mrb[5].mxu1  ;;  %v5770_v21 = vld [vmem:[#allocation4 + $0x11] sm:$0xf]  ;;  %v6101_v41 = vld [vmem:[%s12134_s7 + $0x40] sm:$0xff] }
 0x604   :  { %v5536_v0 = vmul.f32 %v11364_v43, %v5466_v34 }
 0x605   :  { %v5560_v27 = vadd.f32 %v11369_v24, %v5537_v18  ;;  %v5251_v18 = vsel %vm3378_vm9, %v5235_v9, %v11342_v62  ;;  %v7599_v62 = vpack.c.bf16 %v6102_v3, %v6101_v41 }
 0x606   :  { %v5559_v49 = vadd.f32 %v11369_v24, %v5536_v0  ;;  %v5268_v0 = vsel %vm5254_vm12, %v5251_v18, %v4977_v10 }
 0x607   :  { %5830 = vrot.lane.b32.xlu0 %v5731_v30, %s7775_s24  ;;  %v5576_v58 = vmax.f32 %v5560_v27, 0.0  ;;  %v5725_v30 = vld [vmem:[#allocation4 + $0x31] sm:$0xf]  ;;  %7600 = vmatpush1.bf16.msra.mxu1 %v7599_v62 }
 0x608   :  { %v5575_v51 = vmax.f32 %v5559_v49, 0.0  ;;  %v5205_v49 = vsel %vm2988_vm2, %v11281_v22, %v11421_v57  ;;  %v6103_v22 = vld [vmem:[%s12134_s7 + $0x50] sm:$0xff]  ;;  %v6104_v57 = vld [vmem:[%s12134_s7 + $0x58] sm:$0xff]  ;;  %7601 = vmatprep.subr.bf16.mxu1 %v7782_v5 }
 0x609   :  { %5592 = vst.msk [vmem:[#allocation7 + $0x28] sm:$0xff] %vm3118_vm5, %v5576_v58  ;;  %v5285_v58 = vsel %vm5271_vm13, %v5268_v0, %v5041_v61  ;;  %v6106_v61 = vld [vmem:[%s12134_s7 + $0x68] sm:$0xff] }
 0x60a   :  { %5591 = vst.msk [vmem:[#allocation7 + $0x20] sm:$0xff] %vm3118_vm5, %v5575_v51 }
 0x60b   :  { %5954 = vrot.lane.b32.xlu0 %v5762_v20, %s7781_s6 }
 0x610   :  { %v5613_v19 = vld [vmem:[#allocation7 + $0x28] ss:$2 sm:$0xf]  ;;  %v5645_v12 = vld [vmem:[#allocation7 + $0x29] ss:$2 sm:$0xf] }
 0x611   :  { %v5671_v8 = vmax.f32 %v5613_v19, %v5645_v12  ;;  %v5611_v14 = vld [vmem:[#allocation7 + $0x20] ss:$2 sm:$0xf]  ;;  %v5643_v55 = vld [vmem:[#allocation7 + $0x21] ss:$2 sm:$0xf]  ;;  %v5221_v19 = vsel %vm3118_vm5, %v5205_v49, %v11428_v52 }
 0x612   :  { %v5670_v29 = vmax.f32 %v5611_v14, %v5643_v55 }
 0x614   :  { %v5684_v23 = vmax.f32 %v5670_v29, %v5671_v8  ;;  %v7602_v29 = vpack.c.bf16 %v6104_v57, %v6103_v22 }
 0x616   :  { %5707 = vst.msk [vmem:[#allocation4 + $0x19] sm:$0xf] %vm5704_vm3, %v5684_v23  ;;  %v5204_v23 = vsel %vm2988_vm2, %v11132_v36, %v11393_v42  ;;  %7603 = vmatpush1.bf16.msra.mxu1 %v7602_v29  ;;  %vm6042_vm2 = vcmask 654336  }
 0x617   :  { %v5220_v36 = vsel %vm3118_vm5, %v5204_v23, %v11387_v44  ;;  %7604 = vmatprep.subr.bf16.mxu1 %v7782_v5  ;;  %v6107_v44 = vld [vmem:[%s12134_s7 + $0x70] sm:$0xff] }
 0x61d   :  { %v5724_v7 = vld [vmem:[#allocation4 + $0x19] sm:$0xf] }
 0x61e   :  { %v5739_v39 = vld [vmem:[#allocation4 + $0x18] sm:$0xf]  ;;  %5800 = vrot.lane.b32.xlu1 %v5724_v7, %s7771_s2  ;;  %v4981_v11 = vpop.permute.xlu1 %4980  ;;  %v7605_v7 = vpack.c.bf16 %v6106_v61, %v6105_v59  ;;  %v5765_v61 = vld [vmem:[#allocation4 + $0x28] sm:$0xf] }
 0x61f   :  { %v4853_v53 = vpop.permute.xlu0 %4852  ;;  %5862 = vrot.lane.b32.xlu0 %v5739_v39, %s7777_s1  ;;  %v5732_v26 = vld [vmem:[#allocation4 + $0x1a] sm:$0xf]  ;;  %v5236_v39 = vsel %vm3248_vm7, %v5220_v36, %v11395_v6  ;;  %v5715_v36 = vld [vmem:[#allocation4 + $0x10] sm:$0xf] }
 0x620   :  { %v5747_v40 = vld [vmem:[#allocation4 + $0x19] sm:$0xf]  ;;  %v5237_v14 = vsel %vm3248_vm7, %v5221_v19, %v4853_v53  ;;  %v5252_v60 = vsel %vm3378_vm9, %v5236_v39, %v11408_v13  ;;  %7606 = vmatpush1.bf16.msra.mxu1 %v7605_v7  ;;  %vm6314_vm7 = vcmask 123904  }
 0x621   :  { %v5763_v8 = vld [vmem:[#allocation4 + $0x18] sm:$0xf]  ;;  %v5269_v4 = vsel %vm5254_vm12, %v5252_v60, %v11446_v56  ;;  %7607 = vmatprep.subr.bf16.mxu1 %v7782_v5  ;;  %v6109_v56 = vld [vmem:[%s12134_s7 + $0x80] sm:$0xff] }
 0x622   :  { %v7549_v31 = vpop.f32.mrb[6].mxu1  ;;  %5924 = vrot.lane.b32.xlu1 %v5754_v15, %s7780_s5  ;;  %v5045_v51 = vpop.permute.xlu1 %5044  ;;  %v5755_v17 = vld [vmem:[#allocation4 + $0x1a] sm:$0xf] }
 0x623   :  { %v5105_v28 = vpop.permute.xlu0 %5104  ;;  %5986 = vrot.lane.b32.xlu0 %v5770_v21, %s7783_s28  ;;  %v5539_v50 = vmul.f32 %v7549_v31, %v11364_v43  ;;  %v5476_v35 = vpop.f32.mrb[7].mxu1  ;;  %v6108_v6 = vld [vmem:[%s12134_s7 + $0x78] sm:$0xff] }
 0x624   :  { %v5538_v54 = vmul.f32 %v11364_v43, %v5476_v35  ;;  %v5302_v12 = vsel %vm5288_vm14, %v5285_v58, %v5105_v28  ;;  %v5771_v41 = vld [vmem:[#allocation4 + $0x19] sm:$0xf] }
 0x625   :  { %v5562_v33 = vadd.f32 %v11369_v24, %v5539_v50  ;;  %v7608_v50 = vpack.c.bf16 %v6108_v6, %v6107_v44 }
 0x626   :  { %v5561_v34 = vadd.f32 %v11369_v24, %v5538_v54  ;;  %5832 = vrot.lane.b32.xlu1 %v5732_v26, %s7775_s24  ;;  %v5109_v45 = vpop.permute.xlu1 %5108  ;;  %v6110_v54 = vld [vmem:[%s12134_s7 + $0x88] sm:$0xff]  ;;  %v7731_v26 = vld [vmem:[#allocation4 + $0x12] ss:$8 sps:$4 sm:$0xff]  }
 0x627   :  { %v4917_v47 = vpop.permute.xlu0 %4916  ;;  %5894 = vrot.lane.b32.xlu0 %v5747_v40, %s7779_s4  ;;  %v5578_v27 = vmax.f32 %v5562_v33, 0.0  ;;  %7609 = vmatpush1.bf16.msra.mxu1 %v7608_v50  ;;  %v7611_v25 = vpack.c.bf16 %v6110_v54, %v6109_v56 }
 0x628   :  { %v5577_v20 = vmax.f32 %v5561_v34, 0.0  ;;  %v5253_v52 = vsel %vm3378_vm9, %v5237_v14, %v4917_v47  ;;  %7610 = vmatprep.subr.bf16.mxu1 %v7782_v5 }
 0x629   :  { %5594 = vst.msk [vmem:[#allocation7 + $0x38] sm:$0xff] %vm3118_vm5, %v5578_v27  ;;  %v5270_v38 = vsel %vm5254_vm12, %v5253_v52, %v4981_v11 }
 0x62a   :  { %5593 = vst.msk [vmem:[#allocation7 + $0x30] sm:$0xff] %vm3118_vm5, %v5577_v20  ;;  %5956 = vrot.lane.b32.xlu1 %v5763_v8, %s7781_s6  ;;  %v5287_v48 = vsel %vm5271_vm13, %v5270_v38, %v5045_v51  ;;  %v5173_v46 = vpop.permute.xlu1 %5172 }
 0x62b   :  { %v5169_v10 = vpop.permute.xlu0 %5168  ;;  %5802 = vrot.lane.b32.xlu0 %v5725_v30, %s7771_s2  ;;  %v5304_v11 = vsel %vm5288_vm14, %v5287_v48, %v5109_v45  ;;  %7612 = vmatpush1.bf16.msra.mxu1 %v7611_v25 }
 0x62c   :  { %v5319_v55 = vsel %vm5305_vm15, %v5302_v12, %v5169_v10  ;;  %v5321_v47 = vsel %vm5305_vm15, %v5304_v11, %v5173_v46  ;;  %7613 = vmatprep.subr.bf16.mxu1 %v7782_v5 }
 0x62d   :  { %7557 = vmatmul.mubr.msk.f32.gmra.mrb[12].mxu1 %vm5331_vm0, %v5319_v55 }
 0x62f   :  { %v5043_v2 = vpop.permute.xlu0 %5042  ;;  %5926 = vrot.lane.b32.xlu0 %v5755_v17, %s7780_s5 }
 0x630   :  { %v5617_v42 = vld [vmem:[#allocation7 + $0x38] ss:$2 sm:$0xf]  ;;  %v5649_v53 = vld [vmem:[#allocation7 + $0x39] ss:$2 sm:$0xf]  ;;  %v5286_v31 = vsel %vm5271_vm13, %v5269_v4, %v5043_v2 }
 0x631   :  { %v5673_v28 = vmax.f32 %v5617_v42, %v5649_v53  ;;  %v5615_v15 = vld [vmem:[#allocation7 + $0x30] ss:$2 sm:$0xf]  ;;  %v5647_v21 = vld [vmem:[#allocation7 + $0x31] ss:$2 sm:$0xf] }
 0x632   :  { %v5672_v37 = vmax.f32 %v5615_v15, %v5647_v21 }
 0x633   :  { %v5107_v16 = vpop.permute.xlu0 %5106  ;;  %5834 = vrot.lane.b32.xlu0 %v5733_v32, %s7775_s24 }
 0x634   :  { %v5685_v13 = vmax.f32 %v5672_v37, %v5673_v28  ;;  %v5303_v63 = vsel %vm5288_vm14, %v5286_v31, %v5107_v16 }
 0x636   :  { %5708 = vst.msk [vmem:[#allocation4 + $0x21] sm:$0xf] %vm5704_vm3, %v5685_v13 }
 0x637   :  { %v5171_v9 = vpop.permute.xlu0 %5170 }
 0x638   :  { %v5320_v35 = vsel %vm5305_vm15, %v5303_v63, %v5171_v9 }
 0x639   :  { %7559 = vmatprep.mubr.msk.f32.mxu1 %vm5331_vm0, %v5320_v35  ;;  %v5716_v35 = vld [vmem:[#allocation4 + $0x18] sm:$0xf] }
 0x63a   :  { %7560 = vmatmul.mubr.msk.f32.gmra.mrb[14].mxu1 %vm5331_vm0, %v5321_v47 }
 0x63b   :  { %7238 = vmatprep.mubr.msk.f32.mxu1 %vm3118_vm5, %v7731_v26  ;;  %v11567_v57 = vpop.permute.xlu0 %5794 }
 0x63d   :  { %v5740_v33 = vld [vmem:[#allocation4 + $0x20] sm:$0xf] }
 0x63e   :  { %v5764_v40 = vld [vmem:[#allocation4 + $0x20] sm:$0xf]  ;;  %5864 = vrot.lane.b32.xlu1 %v5740_v33, %s7777_s1 }
 0x63f   :  { %5958 = vrot.lane.b32.xlu0 %v5764_v40, %s7781_s6  ;;  %v5748_v30 = vld [vmem:[#allocation4 + $0x21] sm:$0xf]  ;;  %v11571_v52 = vpop.permute.xlu0 %5826 }
 0x640   :  { %v5756_v29 = vld [vmem:[#allocation4 + $0x22] sm:$0xf] }
 0x641   :  { %v5772_v23 = vld [vmem:[#allocation4 + $0x21] sm:$0xf] }
 0x642   :  { %v7552_v3 = vpop.f32.mrb[8].mxu1  ;;  %5988 = vrot.lane.b32.xlu1 %v5771_v41, %s7783_s28 }
 0x643   :  { %v5541_v18 = vmul.f32 %v7552_v3, %v11364_v43  ;;  %v5486_v34 = vpop.f32.mrb[9].mxu1 }
 0x644   :  { %v5540_v0 = vmul.f32 %v11364_v43, %v5486_v34 }
 0x645   :  { %v5564_v27 = vadd.f32 %v11369_v24, %v5541_v18 }
 0x646   :  { %v5563_v49 = vadd.f32 %v11369_v24, %v5540_v0  ;;  %5896 = vrot.lane.b32.xlu1 %v5748_v30, %s7779_s4 }
 0x647   :  { %v5580_v58 = vmax.f32 %v5564_v27, 0.0  ;;  %v5717_v27 = vld [vmem:[#allocation4 + $0x30] sm:$0xf] }
 0x648   :  { %v5579_v51 = vmax.f32 %v5563_v49, 0.0 }
 0x649   :  { %5596 = vst.msk [vmem:[#allocation7 + $0x48] sm:$0xff] %vm3118_vm5, %v5580_v58 }
 0x64a   :  { %5595 = vst.msk [vmem:[#allocation7 + $0x40] sm:$0xff] %vm3118_vm5, %v5579_v51 }
 0x650   :  { %v5621_v20 = vld [vmem:[#allocation7 + $0x48] ss:$2 sm:$0xf]  ;;  %v5653_v62 = vld [vmem:[#allocation7 + $0x49] ss:$2 sm:$0xf]  ;;  %v5797_v39 = vpop.permute.xlu1 %5796 }
 0x651   :  { %v5675_v19 = vmax.f32 %v5621_v20, %v5653_v62  ;;  %v5619_v12 = vld [vmem:[#allocation7 + $0x40] ss:$2 sm:$0xf]  ;;  %v5651_v10 = vld [vmem:[#allocation7 + $0x41] ss:$2 sm:$0xf]  ;;  %v11575_v59 = vpop.permute.xlu0 %5858 }
 0x652   :  { %v5674_v8 = vmax.f32 %v5619_v12, %v5651_v10  ;;  %v5713_v12 = vld [vmem:[#allocation4] sm:$0xf] }
 0x654   :  { %v5686_v22 = vmax.f32 %v5674_v8, %v5675_v19  ;;  %v5829_v28 = vpop.permute.xlu1 %5828  ;;  %v5773_v19 = vld [vmem:[#allocation4 + $0x29] sm:$0xf]  ;;  %v6010_v8 = vsel %vm3118_vm5, %v5713_v12, %v11567_v57 }
 0x655   :  { %v11580_v45 = vpop.permute.xlu0 %5890 }
 0x656   :  { %5709 = vst.msk [vmem:[#allocation4 + $0x39] sm:$0xf] %vm5704_vm3, %v5686_v22 }
 0x65d   :  { %v5726_v14 = vld [vmem:[#allocation4 + $0x39] sm:$0xf] }
 0x65e   :  { %v5741_v55 = vld [vmem:[#allocation4 + $0x38] sm:$0xf]  ;;  %5804 = vrot.lane.b32.xlu1 %v5726_v14, %s7771_s2 }
 0x65f   :  { %5866 = vrot.lane.b32.xlu0 %v5741_v55, %s7777_s1  ;;  %v5734_v2 = vld [vmem:[#allocation4 + $0x3a] sm:$0xf] }
 0x660   :  { %v5749_v17 = vld [vmem:[#allocation4 + $0x39] sm:$0xf] }
 0x661   :  { %v5757_v10 = vld [vmem:[#allocation4 + $0x3a] sm:$0xf] }
 0x662   :  { %5928 = vrot.lane.b32.xlu1 %v5756_v29, %s7780_s5  ;;  %v6018_v29 = vsel %vm3378_vm9, %v6010_v8, %v11571_v52 }
 0x663   :  { %5990 = vrot.lane.b32.xlu0 %v5772_v23, %s7783_s28  ;;  %v5714_v23 = vld [vmem:[#allocation4 + $0x8] sm:$0xf]  ;;  %v6026_v57 = vsel %vm5271_vm13, %v6018_v29, %v11575_v59 }
 0x664   :  { %v6034_v52 = vsel %vm5305_vm15, %v6026_v57, %v11580_v45  ;;  %v7732_v45 = vld [vmem:[#allocation4 + $0x22] ss:$8 sps:$4 sm:$0xff]  }
 0x666   :  { %5836 = vrot.lane.b32.xlu1 %v5734_v2, %s7775_s24  ;;  %v6011_v2 = vsel %vm3118_vm5, %v5714_v23, %v5797_v39 }
 0x667   :  { %5898 = vrot.lane.b32.xlu0 %v5749_v17, %s7779_s4  ;;  %v6019_v17 = vsel %vm3378_vm9, %v6011_v2, %v5829_v28 }
 0x66a   :  { %5960 = vrot.lane.b32.xlu1 %v5765_v61, %s7781_s6 }
 0x670   :  { %v5861_v15 = vpop.permute.xlu1 %5860 }
 0x671   :  { %v5799_v38 = vpop.permute.xlu0 %5798 }
 0x672   :  { %v6012_v42 = vsel %vm3118_vm5, %v5715_v36, %v5799_v38  ;;  %v6027_v36 = vsel %vm5271_vm13, %v6019_v17, %v5861_v15 }
 0x674   :  { %v5893_v37 = vpop.permute.xlu1 %5892 }
 0x675   :  { %v11582_v32 = vpop.permute.xlu0 %5922 }
 0x679   :  { %v5831_v53 = vpop.permute.xlu0 %5830 }
 0x67a   :  { %v6020_v7 = vsel %vm3378_vm9, %v6012_v42, %v5831_v53  ;;  %v6035_v53 = vsel %vm5305_vm15, %v6027_v36, %v5893_v37 }
 0x67d   :  { %v11588_v44 = vpop.permute.xlu0 %5954 }
 0x68b   :  { %v7555_v21 = vpop.f32.mrb[10].mxu1 }
 0x68c   :  { %v5543_v48 = vmul.f32 %v7555_v21, %v11364_v43  ;;  %v5496_v16 = vpop.f32.mrb[11].mxu1 }
 0x68d   :  { %v5542_v60 = vmul.f32 %v11364_v43, %v5496_v16 }
 0x68e   :  { %v5566_v6 = vadd.f32 %v11369_v24, %v5543_v48 }
 0x68f   :  { %v5565_v4 = vadd.f32 %v11369_v24, %v5542_v60 }
 0x690   :  { %v5582_v46 = vmax.f32 %v5566_v6, 0.0  ;;  %v5801_v31 = vpop.permute.xlu1 %5800 }
 0x691   :  { %v5581_v11 = vmax.f32 %v5565_v4, 0.0  ;;  %v5863_v13 = vpop.permute.xlu0 %5862  ;;  %v6013_v33 = vsel %vm3118_vm5, %v5716_v35, %v5801_v31 }
 0x692   :  { %5598 = vst.msk [vmem:[#allocation7 + $0x58] sm:$0xff] %vm3118_vm5, %v5582_v46  ;;  %v11595_v63 = vsel %vm5271_vm13, %v6020_v7, %v5863_v13  ;;  %v6043_v7 = vsel %vm6042_vm2, %v6034_v52, %v11582_v32  ;;  %v5718_v46 = vld [vmem:[#allocation4 + $0x38] sm:$0xf] }
 0x693   :  { %5597 = vst.msk [vmem:[#allocation7 + $0x50] sm:$0xff] %vm3118_vm5, %v5581_v11  ;;  %v6052_v59 = vsel %vm6051_vm4, %v6043_v7, %v11588_v44 }
 0x694   :  { %v5925_v9 = vpop.permute.xlu1 %5924 }
 0x695   :  { %v5987_v50 = vpop.permute.xlu0 %5986  ;;  %v6044_v39 = vsel %vm6042_vm2, %v6035_v53, %v5925_v9 }
 0x696   :  { %v6061_v21 = vsel %vm6060_vm6, %v6052_v59, %v5987_v50 }
 0x698   :  { %v5833_v40 = vpop.permute.xlu1 %5832 }
 0x699   :  { %v5625_v56 = vld [vmem:[#allocation7 + $0x58] ss:$2 sm:$0xf]  ;;  %v5657_v54 = vld [vmem:[#allocation7 + $0x59] ss:$2 sm:$0xf]  ;;  %v11598_v41 = vpop.permute.xlu0 %5894  ;;  %v6021_v18 = vsel %vm3378_vm9, %v6013_v33, %v5833_v40 }
 0x69a   :  { %v5677_v47 = vmax.f32 %v5625_v56, %v5657_v54  ;;  %v5623_v26 = vld [vmem:[#allocation7 + $0x50] ss:$2 sm:$0xf]  ;;  %v5655_v25 = vld [vmem:[#allocation7 + $0x51] ss:$2 sm:$0xf] }
 0x69b   :  { %v5676_v3 = vmax.f32 %v5623_v26, %v5655_v25 }
 0x69c   :  { %v5957_v22 = vpop.permute.xlu1 %5956 }
 0x69d   :  { %v5687_v34 = vmax.f32 %v5676_v3, %v5677_v47  ;;  %v5803_v0 = vpop.permute.xlu0 %5802  ;;  %v6053_v28 = vsel %vm6051_vm4, %v6044_v39, %v5957_v22 }
 0x69e   :  { %v6014_v49 = vsel %vm3118_vm5, %v5717_v27, %v5803_v0 }
 0x69f   :  { %5710 = vst.msk [vmem:[#allocation4 + $0x41] sm:$0xf] %vm5704_vm3, %v5687_v34 }
 0x6a1   :  { %v11602_v30 = vpop.permute.xlu0 %5926 }
 0x6a5   :  { %v5835_v20 = vpop.permute.xlu0 %5834 }
 0x6a6   :  { %v5742_v58 = vld [vmem:[#allocation4 + $0x40] sm:$0xf]  ;;  %v6022_v62 = vsel %vm3378_vm9, %v6014_v49, %v5835_v20 }
 0x6a7   :  { %v5727_v51 = vld [vmem:[#allocation4 + $0x41] sm:$0xf]  ;;  %5868 = vrot.lane.b32.xlu1 %v5742_v58, %s7777_s1 }
 0x6a8   :  { %5806 = vrot.lane.b32.xlu0 %v5727_v51, %s7771_s2  ;;  %v5750_v14 = vld [vmem:[#allocation4 + $0x41] sm:$0xf] }
 0x6a9   :  { %v5735_v55 = vld [vmem:[#allocation4 + $0x42] sm:$0xf] }
 0x6aa   :  { %v5766_v38 = vld [vmem:[#allocation4 + $0x40] sm:$0xf] }
 0x6ab   :  { %5992 = vrot.lane.b32.xlu1 %v5773_v19, %s7783_s28  ;;  %v5774_v59 = vld [vmem:[#allocation4 + $0x41] sm:$0xf] }
 0x6ac   :  { %5930 = vrot.lane.b32.xlu0 %v5757_v10, %s7780_s5 }
 0x6af   :  { %5900 = vrot.lane.b32.xlu1 %v5750_v14, %s7779_s4 }
 0x6b0   :  { %5838 = vrot.lane.b32.xlu0 %v5735_v55, %s7775_s24  ;;  %v5865_v61 = vpop.permute.xlu1 %5864 }
 0x6b1   :  { %v6029_v42 = vsel %vm5271_vm13, %v6021_v18, %v5865_v61  ;;  %v5959_v60 = vpop.permute.xlu0 %5958 }
 0x6b4   :  { %5962 = vrot.lane.b32.xlu0 %v5766_v38, %s7781_s6  ;;  %v5989_v15 = vpop.permute.xlu1 %5988 }
 0x6b5   :  { %v6062_v48 = vsel %vm6060_vm6, %v6053_v28, %v5989_v15  ;;  %v5758_v28 = vld [vmem:[#allocation4 + $0x42] sm:$0xf] }
 0x6b6   :  { %v7230_v16 = vcombine.low %v6061_v21, %v6062_v48 }
 0x6b8   :  { %6196 = vmatmul.mubr.f32.vlgmr.msra.gmra.mrb[16].mxu1 %v7230_v16  ;;  %v5897_v37 = vpop.permute.xlu1 %5896 }
 0x6b9   :  { %7239 = vmatprep.mubr.msk.f32.mxu1 %vm3118_vm5, %v7732_v45  ;;  %v6037_v55 = vsel %vm5305_vm15, %v6029_v42, %v5897_v37 }
 0x6d0   :  { %v5805_v32 = vpop.permute.xlu1 %5804 }
 0x6d1   :  { %v5867_v6 = vpop.permute.xlu0 %5866  ;;  %v6015_v11 = vsel %vm3118_vm5, %v5718_v46, %v5805_v32  ;;  %v6323_v46 = vld [vmem:[#allocation5 + $0x1] sm:$0x3] }
 0x6d2   :  { %v11636_v4 = vsel %vm5271_vm13, %v6022_v62, %v5867_v6 }
 0x6d4   :  { %v5929_v44 = vpop.permute.xlu1 %5928 }
 0x6d5   :  { %v5991_v29 = vpop.permute.xlu0 %5990  ;;  %v6046_v17 = vsel %vm6042_vm2, %v6037_v55, %v5929_v44 }
 0x6d8   :  { %v5837_v31 = vpop.permute.xlu1 %5836 }
 0x6d9   :  { %v6023_v13 = vsel %vm3378_vm9, %v6015_v11, %v5837_v31  ;;  %v6325_v31 = vld [vmem:[#allocation5 + $0x11] sm:$0x3] }
 0x6dc   :  { %v5961_v10 = vpop.permute.xlu1 %5960 }
 0x6dd   :  { %v6055_v36 = vsel %vm6051_vm4, %v6046_v17, %v5961_v10 }
 0x700   :  { %v7558_v9 = vpop.f32.mrb[12].mxu1 }
 0x701   :  { %v5545_v50 = vmul.f32 %v7558_v9, %v11364_v43  ;;  %v5506_v35 = vpop.f32.mrb[13].mxu1  ;;  %v5769_v9 = vld [vmem:[#allocation4 + $0x58] sm:$0xf] }
 0x702   :  { %v5544_v56 = vmul.f32 %v11364_v43, %v5506_v35  ;;  %v5777_v35 = vld [vmem:[#allocation4 + $0x59] sm:$0xf] }
 0x703   :  { %v5568_v54 = vadd.f32 %v11369_v24, %v5545_v50  ;;  %v6327_v50 = vld [vmem:[#allocation5 + $0x2] sm:$0x3] }
 0x704   :  { %v5567_v47 = vadd.f32 %v11369_v24, %v5544_v56  ;;  %v6329_v56 = vld [vmem:[#allocation5 + $0x12] sm:$0x3] }
 0x705   :  { %v5584_v26 = vmax.f32 %v5568_v54, 0.0  ;;  %v5899_v54 = vpop.permute.xlu0 %5898 }
 0x706   :  { %v5583_v25 = vmax.f32 %v5567_v47, 0.0 }
 0x707   :  { %5600 = vst.msk [vmem:[#allocation7 + $0x68] sm:$0xff] %vm3118_vm5, %v5584_v26 }
 0x708   :  { %5599 = vst.msk [vmem:[#allocation7 + $0x60] sm:$0xff] %vm3118_vm5, %v5583_v25 }
 0x70d   :  { %v7561_v33 = vpop.f32.mrb[14].mxu1 }
 0x70e   :  { %v5629_v40 = vld [vmem:[#allocation7 + $0x68] ss:$2 sm:$0xf]  ;;  %v5661_v3 = vld [vmem:[#allocation7 + $0x69] ss:$2 sm:$0xf]  ;;  %v5547_v18 = vmul.f32 %v7561_v33, %v11364_v43 }
 0x70f   :  { %v5679_v34 = vmax.f32 %v5629_v40, %v5661_v3  ;;  %v5627_v0 = vld [vmem:[#allocation7 + $0x60] ss:$2 sm:$0xf]  ;;  %v5659_v27 = vld [vmem:[#allocation7 + $0x61] ss:$2 sm:$0xf] }
 0x710   :  { %v5678_v49 = vmax.f32 %v5627_v0, %v5659_v27  ;;  %v5570_v58 = vadd.f32 %v11369_v24, %v5547_v18  ;;  %v5516_v51 = vpop.f32.mrb[15].mxu1  ;;  %v11692_v40 = vld [vmem:[%s12135_s8] ss:$0 sm:$0xff] }
 0x711   :  { %v5546_v20 = vmul.f32 %v11364_v43, %v5516_v51  ;;  %v6036_v43 = vsel %vm5305_vm15, %v11595_v63, %v11598_v41  ;;  %v11697_v18 = vld [vmem:[%s12136_s9] ss:$0 sm:$0xff] }
 0x712   :  { %v5586_v62 = vmax.f32 %v5570_v58, 0.0  ;;  %v5688_v19 = vmax.f32 %v5678_v49, %v5679_v34  ;;  %v6045_v2 = vsel %vm6042_vm2, %v6036_v43, %v11602_v30 }
 0x713   :  { %v5569_v12 = vadd.f32 %v11369_v24, %v5546_v20  ;;  %v6054_v57 = vsel %vm6051_vm4, %v6045_v2, %v5959_v60 }
 0x714   :  { %5602 = vst.msk [vmem:[#allocation7 + $0x78] sm:$0xff] %vm3118_vm5, %v5586_v62  ;;  %v6063_v41 = vsel %vm6060_vm6, %v6054_v57, %v5991_v29 }
 0x715   :  { %5711 = vst.msk [vmem:[#allocation4 + $0x49] sm:$0xf] %vm5704_vm3, %v5688_v19  ;;  %v5585_v8 = vmax.f32 %v5569_v12, 0.0 }
 0x717   :  { %5601 = vst.msk [vmem:[#allocation7 + $0x70] sm:$0xff] %vm3118_vm5, %v5585_v8 }
 0x719   :  { %v5869_v22 = vpop.permute.xlu1 %5868 }
 0x71a   :  { %v11654_v14 = vsel %vm5271_vm13, %v6023_v13, %v5869_v22  ;;  %v5807_v47 = vpop.permute.xlu0 %5806 }
 0x71b   :  { %v5633_v24 = vld [vmem:[#allocation7 + $0x78] ss:$2 sm:$0xf]  ;;  %v5665_v23 = vld [vmem:[#allocation7 + $0x79] ss:$2 sm:$0xf] }
 0x71c   :  { %v5743_v61 = vld [vmem:[#allocation4 + $0x48] sm:$0xf]  ;;  %v5681_v52 = vmax.f32 %v5633_v24, %v5665_v23 }
 0x71d   :  { %v5728_v38 = vld [vmem:[#allocation4 + $0x49] sm:$0xf]  ;;  %5870 = vrot.lane.b32.xlu0 %v5743_v61, %s7777_s1  ;;  %v5993_v63 = vpop.permute.xlu1 %5992 }
 0x71e   :  { %5808 = vrot.lane.b32.xlu1 %v5728_v38, %s7771_s2  ;;  %v5631_v42 = vld [vmem:[#allocation7 + $0x70] ss:$2 sm:$0xf]  ;;  %v5663_v53 = vld [vmem:[#allocation7 + $0x71] ss:$2 sm:$0xf]  ;;  %v6064_v30 = vsel %vm6060_vm6, %v6055_v36, %v5993_v63  ;;  %v5931_v26 = vpop.permute.xlu0 %5930  ;;  %v6038_v38 = vsel %vm5305_vm15, %v11636_v4, %v5899_v54 }
 0x71f   :  { %v5680_v7 = vmax.f32 %v5631_v42, %v5663_v53  ;;  %v7232_v39 = vcombine.low %v6063_v41, %v6064_v30  ;;  %v7733_v15 = vld [vmem:[#allocation4 + $0x42] ss:$8 sps:$4 sm:$0xff]   ;;  %v6047_v36 = vsel %vm6042_vm2, %v6038_v38, %v5931_v26 }
 0x720   :  { %v5751_v48 = vld [vmem:[#allocation4 + $0x49] sm:$0xf] }
 0x721   :  { %5994 = vrot.lane.b32.xlu0 %v5774_v59, %s7783_s28  ;;  %v5689_v21 = vmax.f32 %v5680_v7, %v5681_v52  ;;  %6201 = vmatmul.mubr.f32.gmra.mrb[18].mxu1 %v7232_v39  ;;  %v5736_v16 = vld [vmem:[#allocation4 + $0x4a] sm:$0xf]  ;;  %v5901_v33 = vpop.permute.xlu1 %5900 }
 0x722   :  { %5932 = vrot.lane.b32.xlu1 %v5758_v28, %s7780_s5  ;;  %7240 = vmatprep.mubr.msk.f32.mxu1 %vm3118_vm5, %v7733_v15  ;;  %v5759_v45 = vld [vmem:[#allocation4 + $0x4a] sm:$0xf]  ;;  %v5839_v25 = vpop.permute.xlu0 %5838  ;;  %v6039_v57 = vsel %vm5305_vm15, %v11654_v14, %v5901_v33 }
 0x723   :  { %5712 = vst.msk [vmem:[#allocation4 + $0x51] sm:$0xf] %vm5704_vm3, %v5689_v21  ;;  %v5767_v60 = vld [vmem:[#allocation4 + $0x48] sm:$0xf] }
 0x724   :  { %v5775_v44 = vld [vmem:[#allocation4 + $0x49] sm:$0xf] }
 0x725   :  { %5902 = vrot.lane.b32.xlu0 %v5751_v48, %s7779_s4  ;;  %v5719_v48 = vld [vmem:[#allocation4 + $0x40] sm:$0xf] }
 0x726   :  { %5840 = vrot.lane.b32.xlu1 %v5736_v16, %s7775_s24  ;;  %v5963_v27 = vpop.permute.xlu0 %5962  ;;  %v5720_v16 = vld [vmem:[#allocation4 + $0x48] sm:$0xf] }
 0x727   :  { %v6056_v63 = vsel %vm6051_vm4, %v6047_v36, %v5963_v27 }
 0x729   :  { %5934 = vrot.lane.b32.xlu0 %v5759_v45, %s7780_s5  ;;  %v6016_v45 = vsel %vm3118_vm5, %v5719_v48, %v5807_v47 }
 0x72a   :  { %5964 = vrot.lane.b32.xlu1 %v5767_v60, %s7781_s6  ;;  %v5768_v37 = vld [vmem:[#allocation4 + $0x50] sm:$0xf] }
 0x72b   :  { %v5744_v32 = vld [vmem:[#allocation4 + $0x50] sm:$0xf] }
 0x72c   :  { %v5776_v6 = vld [vmem:[#allocation4 + $0x51] sm:$0xf] }
 0x72d   :  { %5966 = vrot.lane.b32.xlu0 %v5768_v37, %s7781_s6  ;;  %v5752_v11 = vld [vmem:[#allocation4 + $0x51] sm:$0xf]  ;;  %v6024_v37 = vsel %vm3378_vm9, %v6016_v45, %v5839_v25 }
 0x72e   :  { %5872 = vrot.lane.b32.xlu1 %v5744_v32, %s7777_s1  ;;  %v5760_v13 = vld [vmem:[#allocation4 + $0x52] sm:$0xf] }
 0x72f   :  { %v7734_v39 = vld [vmem:[#allocation4 + $0x52] ss:$8 sps:$4 sm:$0xff]  }
 0x731   :  { %5998 = vrot.lane.b32.xlu0 %v5776_v6, %s7783_s28 }
 0x732   :  { %5996 = vrot.lane.b32.xlu1 %v5775_v44, %s7783_s28 }
 0x735   :  { %6360 = vrot.lane.b32.xlu0 %v6323_v46, %s7771_s2 }
 0x736   :  { %5904 = vrot.lane.b32.xlu1 %v5752_v11, %s7779_s4 }
 0x739   :  { %6364 = vrot.lane.b32.xlu0 %v6325_v31, %s7771_s2 }
 0x73a   :  { %5936 = vrot.lane.b32.xlu1 %v5760_v13, %s7780_s5 }
 0x73d   :  { %6376 = vrot.lane.b32.xlu0 %v6327_v50, %s7775_s24 }
 0x73e   :  { %5968 = vrot.lane.b32.xlu1 %v5769_v9, %s7781_s6 }
 0x741   :  { %6380 = vrot.lane.b32.xlu0 %v6329_v56, %s7775_s24 }
 0x742   :  { %6000 = vrot.lane.b32.xlu1 %v5777_v35, %s7783_s28 }
 0x78b   :  { %v6197_v3 = vpop.f32.mrb[16].mxu1 }
 0x78c   :  { %v6223_v34 = vmul.f32 %v11692_v40, %v6197_v3  ;;  %v6199_v0 = vpop.f32.mrb[17].mxu1 }
 0x78e   :  { %v6234_v58 = vadd.f32 %v11697_v18, %v6223_v34 }
 0x78f   :  { %v5871_v20 = vpop.permute.xlu0 %5870 }
 0x790   :  { %v5809_v49 = vpop.permute.xlu1 %5808  ;;  %v6238_v51 = vmax.f32 %v6234_v58, 0.0  ;;  %v6032_v44 = vsel %vm5271_vm13, %v6024_v37, %v5871_v20 }
 0x791   :  { %v6017_v60 = vsel %vm3118_vm5, %v5720_v16, %v5809_v49 }
 0x792   :  { %v6246_v19 = vcombine.high %v6238_v51, %v6238_v51  ;;  %6254 = vst.msk [vmem:[#allocation8] sm:$0xf] %vm5704_vm3, %v6238_v51 }
 0x793   :  { %v5995_v10 = vpop.permute.xlu0 %5994 }
 0x794   :  { %v5933_v62 = vpop.permute.xlu1 %5932  ;;  %6255 = vst.msk [vmem:[#allocation8 + $0x4] sm:$0xf] %vm5704_vm3, %v6246_v19  ;;  %v6065_v53 = vsel %vm6060_vm6, %v6056_v63, %v5995_v10 }
 0x795   :  { %v6048_v52 = vsel %vm6042_vm2, %v6039_v57, %v5933_v62 }
 0x797   :  { %v5903_v2 = vpop.permute.xlu0 %5902 }
 0x798   :  { %v5841_v12 = vpop.permute.xlu1 %5840  ;;  %v6040_v11 = vsel %vm5305_vm15, %v6032_v44, %v5903_v2 }
 0x799   :  { %v6262_v8 = vld [vmem:[#allocation8] ss:$2 sm:$0x3]  ;;  %v6278_v22 = vld [vmem:[#allocation8 + $0x1] ss:$2 sm:$0x3]  ;;  %v6025_v32 = vsel %vm3378_vm9, %v6017_v60, %v5841_v12 }
 0x79a   :  { %v6293_v24 = vmax.f32 %v6262_v8, %v6278_v22 }
 0x79b   :  { %v6264_v55 = vld [vmem:[#allocation8 + $0x4] ss:$2 sm:$0x3]  ;;  %v6280_v29 = vld [vmem:[#allocation8 + $0x5] ss:$2 sm:$0x3]  ;;  %v5935_v7 = vpop.permute.xlu0 %5934 }
 0x79c   :  { %v5965_v43 = vpop.permute.xlu1 %5964  ;;  %v6294_v23 = vmax.f32 %v6264_v55, %v6280_v29  ;;  %v6049_v9 = vsel %vm6042_vm2, %v6040_v11, %v5935_v7 }
 0x79d   :  { %v6057_v41 = vsel %vm6051_vm4, %v6048_v52, %v5965_v43 }
 0x79e   :  { %v6301_v61 = vmax.f32 %v6293_v24, %v6294_v23 }
 0x79f   :  { %v5967_v15 = vpop.permute.xlu0 %5966 }
 0x7a0   :  { %v5873_v17 = vpop.permute.xlu1 %5872  ;;  %6315 = vst.msk [vmem:[#allocation5 + $0x5] sm:$0x3] %vm6314_vm7, %v6301_v61  ;;  %v6058_v35 = vsel %vm6051_vm4, %v6049_v9, %v5967_v15 }
 0x7a1   :  { %v6033_v46 = vsel %vm5271_vm13, %v6025_v32, %v5873_v17  ;;  %v6536_v32 = vld [vmem:[%s12137_s10] sm:$0xff] }
 0x7a3   :  { %v5999_v31 = vpop.permute.xlu0 %5998 }
 0x7a4   :  { %v5997_v42 = vpop.permute.xlu1 %5996  ;;  %v6067_v47 = vsel %vm6060_vm6, %v6058_v35, %v5999_v31  ;;  %v6538_v31 = vld [vmem:[%s12137_s10 + $0x10] sm:$0xff] }
 0x7a5   :  { %v6066_v30 = vsel %vm6060_vm6, %v6057_v41, %v5997_v42 }
 0x7a6   :  { %v7234_v4 = vcombine.low %v6065_v53, %v6066_v30 }
 0x7a7   :  { %v6331_v14 = vld [vmem:[#allocation5 + $0x4] sm:$0x3]  ;;  %v6339_v60 = vld [vmem:[#allocation5 + $0x6] sm:$0x3] }
 0x7a8   :  { %v5905_v59 = vpop.permute.xlu1 %5904  ;;  %6206 = vmatmul.mubr.f32.gmra.mrb[20].mxu1 %v7234_v4  ;;  %v6324_v28 = vld [vmem:[#allocation5 + $0x5] sm:$0x3]  ;;  %6392 = vrot.lane.b32.xlu0 %v6331_v14, %s7777_s1 }
 0x7a9   :  { %7241 = vmatprep.mubr.msk.f32.mxu1 %vm3118_vm5, %v7734_v39  ;;  %6362 = vrot.lane.b32.xlu1 %v6324_v28, %s7771_s2  ;;  %v6041_v13 = vsel %vm5305_vm15, %v6033_v46, %v5905_v59  ;;  %v6335_v59 = vld [vmem:[#allocation5 + $0x5] sm:$0x3] }
 0x7aa   :  { %v6328_v14 = vld [vmem:[#allocation5 + $0x6] sm:$0x3] }
 0x7ac   :  { %v5937_v21 = vpop.permute.xlu1 %5936 }
 0x7ad   :  { %v6050_v50 = vsel %vm6042_vm2, %v6041_v13, %v5937_v21  ;;  %v6539_v13 = vld [vmem:[%s12137_s10 + $0x18] sm:$0xff] }
 0x7b0   :  { %v5969_v6 = vpop.permute.xlu1 %5968 }
 0x7b1   :  { %v6059_v56 = vsel %vm6051_vm4, %v6050_v50, %v5969_v6  ;;  %v6537_v6 = vld [vmem:[%s12137_s10 + $0x8] sm:$0xff]  ;;  %v7617_v50 = vpack.c.bf16 %v6539_v13, %v6538_v31 }
 0x7b2   :  { %v7614_v44 = vpack.c.bf16 %v6537_v6, %v6536_v32  ;;  %v6321_v32 = vld [vmem:[#allocation5 + $0x10] sm:$0x3] }
 0x7b4   :  { %v6001_v54 = vpop.permute.xlu1 %6000  ;;  %7615 = vmatpush1.bf16.msra.mxu1 %v7614_v44 }
 0x7b5   :  { %v6068_v26 = vsel %vm6060_vm6, %v6059_v56, %v6001_v54  ;;  %7616 = vmatprep.subr.bf16.mxu1 %v7782_v5  ;;  %v6540_v56 = vld [vmem:[%s12137_s10 + $0x20] sm:$0xff]  ;;  %v6541_v54 = vld [vmem:[%s12137_s10 + $0x28] sm:$0xff] }
 0x7b6   :  { %v7236_v25 = vcombine.low %v6067_v47, %v6068_v26  ;;  %v7620_v47 = vpack.c.bf16 %v6541_v54, %v6540_v56  ;;  %v6320_v56 = vld [vmem:[#allocation5 + $0x4] sm:$0x3]  ;;  %v6508_v54 = vlaneseq }
 0x7b8   :  { %6211 = vmatmul.mubr.f32.gmra.mrb[22].mxu1 %v7236_v25 }
 0x7b9   :  { %7618 = vmatpush1.bf16.msra.mxu1 %v7617_v50 }
 0x7ba   :  { %7619 = vmatprep.subr.bf16.mxu1 %v7782_v5 }
 0x7bd   :  { %7621 = vmatpush1.bf16.msra.mxu1 %v7620_v47 }
 0x7be   :  { %7622 = vmatprep.subr.bf16.mxu1 %v7782_v5 }
 0x7f4   :  { %v6202_v33 = vpop.f32.mrb[18].mxu1 }
 0x7f5   :  { %v6224_v3 = vmul.f32 %v11692_v40, %v6202_v33  ;;  %v6204_v34 = vpop.f32.mrb[19].mxu1  ;;  %v6542_v33 = vld [vmem:[%s12137_s10 + $0x30] sm:$0xff] }
 0x7f7   :  { %v6235_v0 = vadd.f32 %v11697_v18, %v6224_v3  ;;  %v6543_v3 = vld [vmem:[%s12137_s10 + $0x38] sm:$0xff] }
 0x7f8   :  { %v7623_v34 = vpack.c.bf16 %v6543_v3, %v6542_v33 }
 0x7f9   :  { %v6239_v27 = vmax.f32 %v6235_v0, 0.0 }
 0x7fa   :  { %7624 = vmatpush1.bf16.msra.mxu1 %v7623_v34 }
 0x7fb   :  { %v6247_v49 = vcombine.high %v6239_v27, %v6239_v27  ;;  %6256 = vst.msk [vmem:[#allocation8 + $0x8] sm:$0xf] %vm5704_vm3, %v6239_v27  ;;  %7625 = vmatprep.subr.bf16.mxu1 %v7782_v5 }
 0x7fd   :  { %6257 = vst.msk [vmem:[#allocation8 + $0xc] sm:$0xf] %vm5704_vm3, %v6247_v49  ;;  %v6544_v49 = vld [vmem:[%s12137_s10 + $0x40] sm:$0xff] }
 0x802   :  { %v6266_v58 = vld [vmem:[#allocation8 + $0x8] ss:$2 sm:$0x3]  ;;  %v6282_v51 = vld [vmem:[#allocation8 + $0x9] ss:$2 sm:$0x3] }
 0x803   :  { %v6295_v19 = vmax.f32 %v6266_v58, %v6282_v51  ;;  %v6545_v58 = vld [vmem:[%s12137_s10 + $0x48] sm:$0xff] }
 0x804   :  { %v6268_v20 = vld [vmem:[#allocation8 + $0xc] ss:$2 sm:$0x3]  ;;  %v6284_v62 = vld [vmem:[#allocation8 + $0xd] ss:$2 sm:$0x3]  ;;  %v7626_v51 = vpack.c.bf16 %v6545_v58, %v6544_v49 }
 0x805   :  { %v6296_v12 = vmax.f32 %v6268_v20, %v6284_v62 }
 0x806   :  { %7627 = vmatpush1.bf16.msra.mxu1 %v7626_v51 }
 0x807   :  { %v6302_v10 = vmax.f32 %v6295_v19, %v6296_v12  ;;  %v6546_v19 = vld [vmem:[%s12137_s10 + $0x50] sm:$0xff]  ;;  %v6547_v12 = vld [vmem:[%s12137_s10 + $0x58] sm:$0xff]  ;;  %7628 = vmatprep.subr.bf16.mxu1 %v7782_v5 }
 0x809   :  { %6316 = vst.msk [vmem:[#allocation5 + $0x9] sm:$0x3] %vm6314_vm7, %v6302_v10  ;;  %v6345_v10 = vld [vmem:[#allocation5 + $0xc] sm:$0x3] }
 0x810   :  { %v6332_v37 = vld [vmem:[#allocation5 + $0x8] sm:$0x3]  ;;  %v6340_v27 = vld [vmem:[#allocation5 + $0xa] sm:$0x3] }
 0x811   :  { %v6344_v9 = vld [vmem:[#allocation5 + $0x8] sm:$0x3] }
 0x812   :  { %v6336_v35 = vld [vmem:[#allocation5 + $0x9] sm:$0x3] }
 0x813   :  { %v6348_v0 = vld [vmem:[#allocation5 + $0x9] sm:$0x3] }
 0x87b   :  { %v6207_v8 = vpop.f32.mrb[20].mxu1 }
 0x87c   :  { %v6225_v22 = vmul.f32 %v11692_v40, %v6207_v8  ;;  %v6209_v43 = vpop.f32.mrb[21].mxu1  ;;  %v7629_v8 = vpack.c.bf16 %v6547_v12, %v6546_v19  ;;  %v11844_v19 = vshrl.u32 %v6508_v54, 7 }
 0x87d   :  { %v6549_v43 = vld [vmem:[%s12137_s10 + $0x68] sm:$0xff] }
 0x87e   :  { %v6236_v55 = vadd.f32 %v11697_v18, %v6225_v22  ;;  %7630 = vmatpush1.bf16.msra.mxu1 %v7629_v8  ;;  %v6548_v22 = vld [vmem:[%s12137_s10 + $0x60] sm:$0xff] }
 0x87f   :  { %7631 = vmatprep.subr.bf16.mxu1 %v7782_v5 }
 0x880   :  { %v6240_v29 = vmax.f32 %v6236_v55, 0.0  ;;  %v6347_v55 = vld [vmem:[#allocation5 + $0x1c] sm:$0x3] }
 0x882   :  { %v6248_v24 = vcombine.high %v6240_v29, %v6240_v29  ;;  %6258 = vst.msk [vmem:[#allocation8 + $0x10] sm:$0xf] %vm5704_vm3, %v6240_v29  ;;  %v7632_v29 = vpack.c.bf16 %v6549_v43, %v6548_v22 }
 0x884   :  { %6259 = vst.msk [vmem:[#allocation8 + $0x14] sm:$0xf] %vm5704_vm3, %v6248_v24  ;;  %7633 = vmatpush1.bf16.msra.mxu1 %v7632_v29  ;;  %v6550_v24 = vld [vmem:[%s12137_s10 + $0x70] sm:$0xff] }
 0x885   :  { %7634 = vmatprep.subr.bf16.mxu1 %v7782_v5 }
 0x889   :  { %v6270_v23 = vld [vmem:[#allocation8 + $0x10] ss:$2 sm:$0x3]  ;;  %v6286_v2 = vld [vmem:[#allocation8 + $0x11] ss:$2 sm:$0x3] }
 0x88a   :  { %v6297_v38 = vmax.f32 %v6270_v23, %v6286_v2  ;;  %v6551_v23 = vld [vmem:[%s12137_s10 + $0x78] sm:$0xff]  ;;  %v6349_v2 = vld [vmem:[#allocation5 + $0xd] sm:$0x3] }
 0x88b   :  { %v6272_v17 = vld [vmem:[#allocation8 + $0x14] ss:$2 sm:$0x3]  ;;  %v6288_v61 = vld [vmem:[#allocation8 + $0x15] ss:$2 sm:$0x3] }
 0x88c   :  { %v6298_v57 = vmax.f32 %v6272_v17, %v6288_v61  ;;  %v6212_v36 = vpop.f32.mrb[22].mxu1  ;;  %v7635_v17 = vpack.c.bf16 %v6551_v23, %v6550_v24  ;;  %v6552_v61 = vld [vmem:[%s12137_s10 + $0x80] sm:$0xff] }
 0x88d   :  { %v6226_v52 = vmul.f32 %v11692_v40, %v6212_v36  ;;  %v6214_v63 = vpop.f32.mrb[23].mxu1 }
 0x88e   :  { %v6303_v41 = vmax.f32 %v6297_v38, %v6298_v57  ;;  %7636 = vmatpush1.bf16.msra.mxu1 %v7635_v17  ;;  %v6553_v38 = vld [vmem:[%s12137_s10 + $0x88] sm:$0xff]  ;;  %v6351_v57 = vld [vmem:[#allocation5 + $0x1d] sm:$0x3] }
 0x88f   :  { %v6237_v42 = vadd.f32 %v11697_v18, %v6226_v52  ;;  %7637 = vmatprep.subr.bf16.mxu1 %v7782_v5  ;;  %v7638_v36 = vpack.c.bf16 %v6553_v38, %v6552_v61  ;;  %v6361_v52 = vpop.permute.xlu0 %6360  ;;  %v6352_v61 = vld [vmem:[#allocation5 + $0xa] sm:$0x3] }
 0x890   :  { %6317 = vst.msk [vmem:[#allocation5 + $0x15] sm:$0x3] %vm6314_vm7, %v6303_v41 }
 0x891   :  { %v6241_v53 = vmax.f32 %v6237_v42, 0.0 }
 0x892   :  { %7639 = vmatpush1.bf16.msra.mxu1 %v7638_v36 }
 0x893   :  { %v6249_v30 = vcombine.high %v6241_v53, %v6241_v53  ;;  %6260 = vst.msk [vmem:[#allocation8 + $0x18] sm:$0xf] %vm5704_vm3, %v6241_v53  ;;  %v6365_v63 = vpop.permute.xlu0 %6364  ;;  %v6363_v53 = vpop.permute.xlu1 %6362 }
 0x894   :  { %v6469_v47 = vsel %vm3118_vm5, %v6320_v56, %v6363_v53  ;;  %v6950_v56 = vld [vmem:[%s12143_s16 + $0x100] sm:$0xff] }
 0x895   :  { %6261 = vst.msk [vmem:[#allocation8 + $0x1c] sm:$0xf] %vm5704_vm3, %v6249_v30 }
 0x897   :  { %v6333_v7 = vld [vmem:[#allocation5 + $0x14] sm:$0x3]  ;;  %v6330_v16 = vld [vmem:[#allocation5 + $0x16] sm:$0x3]  ;;  %v6377_v41 = vpop.permute.xlu0 %6376 }
 0x898   :  { %v6326_v4 = vld [vmem:[#allocation5 + $0x15] sm:$0x3]  ;;  %6396 = vrot.lane.b32.xlu0 %v6333_v7, %s7777_s1 }
 0x899   :  { %6366 = vrot.lane.b32.xlu1 %v6326_v4, %s7771_s2  ;;  %v6337_v48 = vld [vmem:[#allocation5 + $0x15] sm:$0x3] }
 0x89a   :  { %v6274_v39 = vld [vmem:[#allocation8 + $0x18] ss:$2 sm:$0x3]  ;;  %v6290_v40 = vld [vmem:[#allocation8 + $0x19] ss:$2 sm:$0x3] }
 0x89b   :  { %v6299_v15 = vmax.f32 %v6274_v39, %v6290_v40  ;;  %v6341_v46 = vld [vmem:[#allocation5 + $0x16] sm:$0x3]  ;;  %v6381_v42 = vpop.permute.xlu0 %6380  ;;  %v6322_v58 = vld [vmem:[#allocation5 + $0x14] sm:$0x3] }
 0x89c   :  { %v6276_v28 = vld [vmem:[#allocation8 + $0x1c] ss:$2 sm:$0x3]  ;;  %v6292_v18 = vld [vmem:[#allocation8 + $0x1d] ss:$2 sm:$0x3]  ;;  %6408 = vrot.lane.b32.xlu0 %v6335_v59, %s7779_s4 }
 0x89d   :  { %6378 = vrot.lane.b32.xlu1 %v6328_v14, %s7775_s24  ;;  %v6300_v21 = vmax.f32 %v6276_v28, %v6292_v18 }
 0x89f   :  { %v6304_v45 = vmax.f32 %v6299_v15, %v6300_v21  ;;  %v6393_v30 = vpop.permute.xlu0 %6392 }
 0x8a0   :  { %6412 = vrot.lane.b32.xlu0 %v6337_v48, %s7779_s4 }
 0x8a1   :  { %6382 = vrot.lane.b32.xlu1 %v6330_v16, %s7775_s24  ;;  %6318 = vst.msk [vmem:[#allocation5 + $0x19] sm:$0x3] %vm6314_vm7, %v6304_v45 }
 0x8a4   :  { %6424 = vrot.lane.b32.xlu0 %v6339_v60, %s7780_s5  ;;  %v6319_v60 = vld [vmem:[#allocation5] sm:$0x3] }
 0x8a5   :  { %6394 = vrot.lane.b32.xlu1 %v6332_v37, %s7777_s1  ;;  %v6468_v44 = vsel %vm3118_vm5, %v6319_v60, %v6361_v52 }
 0x8a8   :  { %6428 = vrot.lane.b32.xlu0 %v6341_v46, %s7780_s5  ;;  %v6334_v11 = vld [vmem:[#allocation5 + $0x18] sm:$0x3]  ;;  %v6342_v62 = vld [vmem:[#allocation5 + $0x1a] sm:$0x3]  ;;  %v6470_v46 = vsel %vm3118_vm5, %v6321_v32, %v6365_v63  ;;  %v6714_v32 = vld [vmem:[%s12140_s13 + $0x28] sm:$0xff] }
 0x8a9   :  { %6398 = vrot.lane.b32.xlu1 %v6334_v11, %s7777_s1  ;;  %v6346_v26 = vld [vmem:[#allocation5 + $0x18] sm:$0x3]  ;;  %v6472_v11 = vsel %vm3378_vm9, %v6468_v44, %v6377_v41  ;;  %v6354_v53 = vld [vmem:[#allocation5 + $0x1a] sm:$0x3] }
 0x8aa   :  { %v6338_v25 = vld [vmem:[#allocation5 + $0x19] sm:$0x3] }
 0x8ab   :  { %v6350_v20 = vld [vmem:[#allocation5 + $0x19] sm:$0x3] }
 0x8ac   :  { %6440 = vrot.lane.b32.xlu0 %v6344_v9, %s7781_s6  ;;  %v7784_v9 = vmov 1983009808  }
 0x8ad   :  { %6410 = vrot.lane.b32.xlu1 %v6336_v35, %s7779_s4  ;;  %v6506_v50 = vunpack.c.l.s4 %v7784_v9  ;;  %v6474_v35 = vsel %vm3378_vm9, %v6470_v46, %v6381_v42  ;;  %v6713_v46 = vld [vmem:[%s12140_s13 + $0x20] sm:$0xff] }
 0x8af   :  { %v6507_v49 = vunpack.c.0.s8 %v6506_v50  ;;  %v6966_v50 = vld [vmem:[%s12143_s16 + $0x180] sm:$0xff] }
 0x8b0   :  { %6444 = vrot.lane.b32.xlu0 %v6346_v26, %s7781_s6  ;;  %v6476_v26 = vsel %vm5271_vm13, %v6472_v11, %v6393_v30  ;;  %v6355_v30 = vld [vmem:[#allocation5 + $0x1e] sm:$0x3] }
 0x8b1   :  { %6414 = vrot.lane.b32.xlu1 %v6338_v25, %s7779_s4  ;;  %v11858_v52 = vsub.s32 %v6507_v49, %v11844_v19  ;;  %v6712_v11 = vld [vmem:[%s12140_s13 + $0x18] sm:$0xff]  ;;  %v6971_v49 = vld [vmem:[%s12143_s16 + $0x1a8] sm:$0xff] }
 0x8b4   :  { %6456 = vrot.lane.b32.xlu0 %v6348_v0, %s7783_s28 }
 0x8b5   :  { %6426 = vrot.lane.b32.xlu1 %v6340_v27, %s7780_s5 }
 0x8b8   :  { %6460 = vrot.lane.b32.xlu0 %v6350_v20, %s7783_s28 }
 0x8b9   :  { %6430 = vrot.lane.b32.xlu1 %v6342_v62, %s7780_s5 }
 0x8bd   :  { %6442 = vrot.lane.b32.xlu1 %v6345_v10, %s7781_s6 }
 0x8c1   :  { %6446 = vrot.lane.b32.xlu1 %v6347_v55, %s7781_s6  ;;  %v6353_v55 = vld [vmem:[#allocation5 + $0xe] sm:$0x3] }
 0x8c5   :  { %6458 = vrot.lane.b32.xlu1 %v6349_v2, %s7783_s28 }
 0x8c9   :  { %6462 = vrot.lane.b32.xlu1 %v6351_v57, %s7783_s28 }
 0x90a   :  { %v6397_v4 = vpop.permute.xlu0 %6396 }
 0x90b   :  { %v6367_v7 = vpop.permute.xlu1 %6366  ;;  %v6478_v34 = vsel %vm5271_vm13, %v6474_v35, %v6397_v4  ;;  %v6967_v35 = vld [vmem:[%s12143_s16 + $0x188] sm:$0xff] }
 0x90c   :  { %v6471_v10 = vsel %vm3118_vm5, %v6322_v58, %v6367_v7  ;;  %v7680_v54 = vpack.c.bf16 %v6967_v35, %v6966_v50 }
 0x90e   :  { %v6409_v40 = vpop.permute.xlu0 %6408  ;;  %7681 = vmatprep.subr.bf16.mxu0 %v7680_v54 }
 0x90f   :  { %v6379_v39 = vpop.permute.xlu1 %6378  ;;  %v6480_v33 = vsel %vm5305_vm15, %v6476_v26, %v6409_v40  ;;  %v6968_v26 = vld [vmem:[%s12143_s16 + $0x190] sm:$0xff] }
 0x910   :  { %v6473_v25 = vsel %vm3378_vm9, %v6469_v47, %v6379_v39  ;;  %v6951_v47 = vld [vmem:[%s12143_s16 + $0x108] sm:$0xff] }
 0x912   :  { %v6413_v14 = vpop.permute.xlu0 %6412 }
 0x913   :  { %v6383_v59 = vpop.permute.xlu1 %6382  ;;  %v6482_v51 = vsel %vm5305_vm15, %v6478_v34, %v6413_v14  ;;  %v6952_v34 = vld [vmem:[%s12143_s16 + $0x110] sm:$0xff] }
 0x914   :  { %v6475_v29 = vsel %vm3378_vm9, %v6471_v10, %v6383_v59  ;;  %v6973_v10 = vld [vmem:[%s12143_s16 + $0x1b8] sm:$0xff] }
 0x916   :  { %v6425_v18 = vpop.permute.xlu0 %6424 }
 0x917   :  { %v6395_v28 = vpop.permute.xlu1 %6394  ;;  %v6484_v27 = vsel %vm6042_vm2, %v6480_v33, %v6425_v18  ;;  %v7682_v33 = vpack.c.bf16 %v6951_v47, %v6950_v56 }
 0x918   :  { %v6477_v0 = vsel %vm5271_vm13, %v6473_v25, %v6395_v28  ;;  %v6969_v25 = vld [vmem:[%s12143_s16 + $0x198] sm:$0xff] }
 0x919   :  { %7683 = vmatpush3.bf16.msra.mxu0 %v7682_v33 }
 0x91a   :  { %v6429_v5 = vpop.permute.xlu0 %6428 }
 0x91b   :  { %v6399_v15 = vpop.permute.xlu1 %6398  ;;  %v6486_v8 = vsel %vm6042_vm2, %v6482_v51, %v6429_v5 }
 0x91c   :  { %v6479_v17 = vsel %vm5271_vm13, %v6475_v29, %v6399_v15  ;;  %v6974_v29 = vld [vmem:[%s12143_s16 + $0x1c0] sm:$0xff] }
 0x91e   :  { %v6441_v48 = vpop.permute.xlu0 %6440 }
 0x91f   :  { %v6411_v21 = vpop.permute.xlu1 %6410  ;;  %v6488_v62 = vsel %vm6051_vm4, %v6484_v27, %v6441_v48  ;;  %v6970_v27 = vld [vmem:[%s12143_s16 + $0x1a0] sm:$0xff] }
 0x920   :  { %v6481_v20 = vsel %vm5305_vm15, %v6477_v0, %v6411_v21  ;;  %v6953_v0 = vld [vmem:[%s12143_s16 + $0x118] sm:$0xff]  ;;  %v7688_v51 = vpack.c.bf16 %v6971_v49, %v6970_v27 }
 0x921   :  { %v7686_v58 = vpack.c.bf16 %v6953_v0, %v6952_v34  ;;  %v6711_v34 = vld [vmem:[%s12140_s13 + $0x10] sm:$0xff] }
 0x922   :  { %v6445_v37 = vpop.permute.xlu0 %6444  ;;  %v6715_v0 = vld [vmem:[%s12140_s13 + $0x30] sm:$0xff] }
 0x923   :  { %v6415_v16 = vpop.permute.xlu1 %6414  ;;  %v6490_v24 = vsel %vm6051_vm4, %v6486_v8, %v6445_v37  ;;  %v6710_v37 = vld [vmem:[%s12140_s13 + $0x8] sm:$0xff] }
 0x924   :  { %v6483_v36 = vsel %vm5305_vm15, %v6479_v17, %v6415_v16  ;;  %v7640_v44 = vpack.c.bf16 %v6714_v32, %v6710_v37  ;;  %v6958_v17 = vld [vmem:[%s12143_s16 + $0x140] sm:$0xff] }
 0x926   :  { %v6457_v31 = vpop.permute.xlu0 %6456  ;;  %7641 = vmatprep.subr.bf16.mxu1 %v7640_v44 }
 0x927   :  { %v6427_v45 = vpop.permute.xlu1 %6426  ;;  %v6492_v43 = vsel %vm6060_vm6, %v6488_v62, %v6457_v31  ;;  %v6716_v31 = vld [vmem:[%s12140_s13 + $0x38] sm:$0xff]  ;;  %v6955_v62 = vld [vmem:[%s12143_s16 + $0x128] sm:$0xff] }
 0x928   :  { %v6485_v22 = vsel %vm6042_vm2, %v6481_v20, %v6427_v45  ;;  %v6504_v63 = vcombine.low %v6492_v43, %v6352_v61  ;;  %v7644_v9 = vpack.c.bf16 %v6716_v31, %v6712_v11  ;;  %v6954_v20 = vld [vmem:[%s12143_s16 + $0x120] sm:$0xff]  ;;  %v6956_v43 = vld [vmem:[%s12143_s16 + $0x130] sm:$0xff]  ;;  %v6959_v61 = vld [vmem:[%s12143_s16 + $0x148] sm:$0xff] }
 0x929   :  { %v7690_v8 = vpack.c.bf16 %v6955_v62, %v6954_v20 }
 0x92a   :  { %v6461_v12 = vpop.permute.xlu0 %6460  ;;  %v6511_v14 = vrot.slane %v6504_v63, %v11858_v52 }
 0x92b   :  { %v6431_v6 = vpop.permute.xlu1 %6430  ;;  %v6494_v38 = vsel %vm6060_vm6, %v6490_v24, %v6461_v12  ;;  %v6972_v12 = vld [vmem:[%s12143_s16 + $0x1b0] sm:$0xff]  ;;  %v6975_v24 = vld [vmem:[%s12143_s16 + $0x1c8] sm:$0xff] }
 0x92c   :  { %v6487_v42 = vsel %vm6042_vm2, %v6483_v36, %v6431_v6  ;;  %v6520_v7 = vcombine.low %v6494_v38, %v6354_v53  ;;  %v6709_v6 = vld [vmem:[%s12140_s13] sm:$0xff]  ;;  %v6976_v38 = vld [vmem:[%s12143_s16 + $0x1d0] sm:$0xff]  ;;  %v7698_v36 = vpack.c.bf16 %v6959_v61, %v6958_v17  ;;  %v6921_v17 = vld [vmem:[%s12143_s16 + $0x18] sm:$0xff] }
 0x92d   :  { %v6978_v53 = vld [vmem:[%s12143_s16 + $0x1e0] sm:$0xff] }
 0x92e   :  { %v6527_v18 = vrot.slane %v6520_v7, %v11858_v52  ;;  %v6938_v61 = vld [vmem:[%s12143_s16 + $0xa0] sm:$0xff] }
 0x92f   :  { %v6443_v13 = vpop.permute.xlu1 %6442 }
 0x930   :  { %v6489_v23 = vsel %vm6051_vm4, %v6485_v22, %v6443_v13  ;;  %v7642_v13 = vpack.c.bf16 %v6713_v46, %v6709_v6  ;;  %v7692_v22 = vpack.c.bf16 %v6973_v10, %v6972_v12  ;;  %v7646_v12 = vpack.c.bf16 %v6715_v0, %v6711_v34 }
 0x931   :  { %v6882_v34 = vsub.s32 3, %v11844_v19 }
 0x933   :  { %v6447_v3 = vpop.permute.xlu1 %6446 }
 0x934   :  { %v6491_v4 = vsel %vm6051_vm4, %v6487_v42, %v6447_v3  ;;  %v7684_v3 = vpack.c.bf16 %v6969_v25, %v6968_v26  ;;  %v6961_v42 = vld [vmem:[%s12143_s16 + $0x158] sm:$0xff] }
 0x936   :  { %7685 = vmatprep.subr.bf16.mxu0 %v7684_v3 }
 0x937   :  { %v6459_v2 = vpop.permute.xlu1 %6458  ;;  %7687 = vmatpush3.bf16.msra.mxu0 %v7686_v58  ;;  %v6934_v58 = vld [vmem:[%s12143_s16 + $0x80] sm:$0xff] }
 0x938   :  { %v6493_v57 = vsel %vm6060_vm6, %v6489_v23, %v6459_v2  ;;  %7689 = vmatprep.subr.bf16.mxu0 %v7688_v51  ;;  %v7696_v2 = vpack.c.bf16 %v6975_v24, %v6974_v29  ;;  %v6935_v51 = vld [vmem:[%s12143_s16 + $0x88] sm:$0xff]  ;;  %v6937_v29 = vld [vmem:[%s12143_s16 + $0x98] sm:$0xff] }
 0x939   :  { %v6512_v41 = vcombine.low %v6493_v57, %v6353_v55  ;;  %v6957_v55 = vld [vmem:[%s12143_s16 + $0x138] sm:$0xff]  ;;  %v7648_v10 = vpack.c.bf16 %v6935_v51, %v6934_v58 }
 0x93a   :  { %v7694_v23 = vpack.c.bf16 %v6957_v55, %v6956_v43  ;;  %v6977_v57 = vld [vmem:[%s12143_s16 + $0x1d8] sm:$0xff]  ;;  %v6936_v55 = vld [vmem:[%s12143_s16 + $0x90] sm:$0xff] }
 0x93b   :  { %v6519_v39 = vrot.slane %v6512_v41, %v11858_v52  ;;  %v6463_v40 = vpop.permute.xlu1 %6462  ;;  %7691 = vmatpush3.bf16.msra.mxu0 %v7690_v8  ;;  %v7700_v63 = vpack.c.bf16 %v6977_v57, %v6976_v38  ;;  %v6960_v41 = vld [vmem:[%s12143_s16 + $0x150] sm:$0xff]  ;;  %v6918_v8 = vld [vmem:[%s12143_s16] sm:$0xff]  ;;  %v6939_v38 = vld [vmem:[%s12143_s16 + $0xa8] sm:$0xff] }
 0x93c   :  { %v6495_v59 = vsel %vm6060_vm6, %v6491_v4, %v6463_v40  ;;  %7693 = vmatprep.subr.bf16.mxu0 %v7692_v22  ;;  %v7702_v7 = vpack.c.bf16 %v6961_v42, %v6960_v41  ;;  %v6963_v40 = vld [vmem:[%s12143_s16 + $0x168] sm:$0xff]  ;;  %v7656_v57 = vpack.c.bf16 %v6939_v38, %v6938_v61  ;;  %v6940_v41 = vld [vmem:[%s12143_s16 + $0xb0] sm:$0xff]  ;;  %v6941_v42 = vld [vmem:[%s12143_s16 + $0xb8] sm:$0xff] }
 0x93d   :  { %v6528_v28 = vcombine.low %v6495_v59, %v6355_v30  ;;  %v6554_v15 = vcombine.low %v6511_v14, %v6519_v39  ;;  %v6979_v30 = vld [vmem:[%s12143_s16 + $0x1e8] sm:$0xff]  ;;  %v6962_v39 = vld [vmem:[%s12143_s16 + $0x160] sm:$0xff]  ;;  %v6980_v59 = vld [vmem:[%s12143_s16 + $0x1f0] sm:$0xff] }
 0x93e   :  { %v7704_v4 = vpack.c.bf16 %v6979_v30, %v6978_v53  ;;  %v6981_v14 = vld [vmem:[%s12143_s16 + $0x1f8] sm:$0xff]  ;;  %v6919_v22 = vld [vmem:[%s12143_s16 + $0x8] sm:$0xff]  ;;  %v7660_v30 = vpack.c.bf16 %v6941_v42, %v6940_v41 }
 0x93f   :  { %v6535_v5 = vrot.slane %v6528_v28, %v11858_v52  ;;  %v6562_v48 = vrot.slane %v6554_v15, %v11858_v52  ;;  %7695 = vmatpush3.bf16.msra.mxu0 %v7694_v23  ;;  %v7706_v28 = vpack.c.bf16 %v6963_v40, %v6962_v39  ;;  %v6964_v15 = vld [vmem:[%s12143_s16 + $0x170] sm:$0xff]  ;;  %v7650_v24 = vpack.c.bf16 %v6919_v22, %v6918_v8  ;;  %v6942_v39 = vld [vmem:[%s12143_s16 + $0xc0] sm:$0xff]  ;;  %v6943_v40 = vld [vmem:[%s12143_s16 + $0xc8] sm:$0xff] }
 0x940   :  { %7697 = vmatprep.subr.bf16.mxu0 %v7696_v2  ;;  %v7652_v23 = vpack.c.bf16 %v6937_v29, %v6936_v55  ;;  %v6920_v2 = vld [vmem:[%s12143_s16 + $0x10] sm:$0xff] }
 0x941   :  { %v6555_v21 = vcombine.low %v6527_v18, %v6535_v5  ;;  %v7708_v18 = vpack.c.bf16 %v6981_v14, %v6980_v59  ;;  %v6965_v5 = vld [vmem:[%s12143_s16 + $0x178] sm:$0xff]  ;;  %v7664_v14 = vpack.c.bf16 %v6943_v40, %v6942_v39 }
 0x943   :  { %v6569_v16 = vrot.slane %v6555_v21, %v11858_v52  ;;  %7699 = vmatpush3.bf16.msra.mxu0 %v7698_v36  ;;  %v7710_v21 = vpack.c.bf16 %v6965_v5, %v6964_v15  ;;  %v6922_v36 = vld [vmem:[%s12143_s16 + $0x20] sm:$0xff]  ;;  %v6944_v15 = vld [vmem:[%s12143_s16 + $0xd0] sm:$0xff]  ;;  %v6945_v5 = vld [vmem:[%s12143_s16 + $0xd8] sm:$0xff] }
 0x944   :  { %7701 = vmatprep.subr.bf16.mxu0 %v7700_v63  ;;  %v6923_v63 = vld [vmem:[%s12143_s16 + $0x28] sm:$0xff] }
 0x945   :  { %v6570_v45 = vcombine.low %v6562_v48, %v6569_v16  ;;  %v6571_v60 = vcombine.high %v6562_v48, %v6569_v16  ;;  %v7245_v48 = vld [vmem:[%s12138_s11] ss:$0 sm:$0xff]  ;;  %v7658_v53 = vpack.c.bf16 %v6923_v63, %v6922_v36 }
 0x947   :  { %7244 = vmatprep.mubr.msk.f32.mxu1 %vm3118_vm5, %v6571_v60  ;;  %7703 = vmatpush3.bf16.msra.mxu0 %v7702_v7  ;;  %v6924_v7 = vld [vmem:[%s12143_s16 + $0x30] sm:$0xff] }
 0x948   :  { %6640 = vmatmul.mubr.f32.vlgmr.msra.gmra.mrb[24].mxu1 %v6570_v45  ;;  %7705 = vmatprep.subr.bf16.mxu0 %v7704_v4  ;;  %v7246_v45 = vld [vmem:[%s12139_s12] ss:$0 sm:$0xff]  ;;  %v6925_v4 = vld [vmem:[%s12143_s16 + $0x38] sm:$0xff] }
 0x949   :  { %6788 = vmatprep.mubr.f32.mxu1 %v7767_v1  ;;  %7643 = vmatpush1.bf16.msra.mxu1 %v7642_v13  ;;  %v7662_v59 = vpack.c.bf16 %v6925_v4, %v6924_v7 }
 0x94a   :  { %7645 = vmatprep.subr.bf16.mxu1 %v7644_v9 }
 0x94b   :  { %7707 = vmatpush3.bf16.msra.mxu0 %v7706_v28  ;;  %v6926_v28 = vld [vmem:[%s12143_s16 + $0x40] sm:$0xff] }
 0x94c   :  { %7709 = vmatprep.subr.bf16.mxu0 %v7708_v18  ;;  %v6927_v18 = vld [vmem:[%s12143_s16 + $0x48] sm:$0xff] }
 0x94f   :  { %7711 = vmatpush3.bf16.msra.mxu0 %v7710_v21  ;;  %v7666_v21 = vpack.c.bf16 %v6927_v18, %v6926_v28 }
 0xa1b   :  { %v6641_v16 = vpop.f32.mrb[24].mxu1 }
 0xa1c   :  { %v6652_v60 = vmul.f32 %v7245_v48, %v6641_v16  ;;  %v6643_v37 = vpop.f32.mrb[25].mxu1  ;;  %v7668_v48 = vpack.c.bf16 %v6945_v5, %v6944_v15  ;;  %v6928_v16 = vld [vmem:[%s12143_s16 + $0x50] sm:$0xff] }
 0xa1d   :  { %v6947_v37 = vld [vmem:[%s12143_s16 + $0xe8] sm:$0xff] }
 0xa1e   :  { %v6660_v32 = vadd.f32 %v7246_v45, %v6652_v60  ;;  %v6929_v45 = vld [vmem:[%s12143_s16 + $0x58] sm:$0xff]  ;;  %v6946_v60 = vld [vmem:[%s12143_s16 + $0xe0] sm:$0xff] }
 0xa20   :  { %v6661_v6 = vmax.f32 %v6660_v32, 0.0  ;;  %v7670_v32 = vpack.c.bf16 %v6929_v45, %v6928_v16 }
 0xa22   :  { %v6663_v44 = vcombine.high %v6661_v6, %v6661_v6  ;;  %v6670_v46 = vrot.slane %v6661_v6, %v11858_v52  ;;  %v7672_v6 = vpack.c.bf16 %v6947_v37, %v6946_v60 }
 0xa24   :  { %v6677_v11 = vrot.slane %v6663_v44, %v11858_v52  ;;  %v6678_v31 = vcombine.high %v6670_v46, %v6670_v46  ;;  %6684 = vst.msk [vmem:[#allocation9] sm:$0x3] %vm6314_vm7, %v6670_v46  ;;  %v6930_v44 = vld [vmem:[%s12143_s16 + $0x60] sm:$0xff]  ;;  %v6931_v46 = vld [vmem:[%s12143_s16 + $0x68] sm:$0xff] }
 0xa26   :  { %v6679_v13 = vcombine.high %v6677_v11, %v6677_v11  ;;  %6685 = vst.msk [vmem:[#allocation9 + $0x2] sm:$0x3] %vm6314_vm7, %v6678_v31  ;;  %6686 = vst.msk [vmem:[#allocation9 + $0x4] sm:$0x3] %vm6314_vm7, %v6677_v11  ;;  %v7674_v11 = vpack.c.bf16 %v6931_v46, %v6930_v44  ;;  %v6948_v31 = vld [vmem:[%s12143_s16 + $0xf0] sm:$0xff] }
 0xa28   :  { %6687 = vst.msk [vmem:[#allocation9 + $0x6] sm:$0x3] %vm6314_vm7, %v6679_v13  ;;  %v6949_v13 = vld [vmem:[%s12143_s16 + $0xf8] sm:$0xff] }
 0xa2b   :  { %v6688_v9 = vld [vmem:[#allocation9] ss:$2 sm:$0x1]  ;;  %v6696_v56 = vld [vmem:[#allocation9 + $0x1] ss:$2 sm:$0x1] }
 0xa2c   :  { %v6703_v27 = vmax.f32 %v6688_v9, %v6696_v56  ;;  %v7676_v9 = vpack.c.bf16 %v6949_v13, %v6948_v31 }
 0xa2d   :  { %v6690_v50 = vld [vmem:[#allocation9 + $0x2] ss:$2 sm:$0x1]  ;;  %v6692_v35 = vld [vmem:[#allocation9 + $0x4] ss:$2 sm:$0x1] }
 0xa2e   :  { %v6698_v54 = vld [vmem:[#allocation9 + $0x3] ss:$2 sm:$0x1]  ;;  %v6700_v47 = vld [vmem:[#allocation9 + $0x5] ss:$2 sm:$0x1] }
 0xa2f   :  { %v6694_v26 = vld [vmem:[#allocation9 + $0x6] ss:$2 sm:$0x1]  ;;  %v6702_v25 = vld [vmem:[#allocation9 + $0x7] ss:$2 sm:$0x1]  ;;  %v6704_v33 = vmax.f32 %v6690_v50, %v6698_v54  ;;  %v6705_v52 = vmax.f32 %v6692_v35, %v6700_v47 }
 0xa30   :  { %v6706_v3 = vmax.f32 %v6694_v26, %v6702_v25  ;;  %v6932_v50 = vld [vmem:[%s12143_s16 + $0x70] sm:$0xff]  ;;  %v6933_v35 = vld [vmem:[%s12143_s16 + $0x78] sm:$0xff]  ;;  %v6870_v54 = vsub.s32 0, %v11844_v19  ;;  %v6866_v47 = vld [vmem:[%s12141_s14] sm:$0xf]  ;;  %v6874_v26 = vsub.s32 1, %v11844_v19 }
 0xa31   :  { %v6707_v20 = vmax.f32 %v6703_v27, %v6704_v33  ;;  %v7678_v56 = vpack.c.bf16 %v6933_v35, %v6932_v50  ;;  %v6892_v33 = vld [vmem:[%s12142_s15] sm:$0xf]  ;;  %s7785_s16 = smov [#allocation10]  }
 0xa32   :  { %v6708_v49 = vmax.f32 %v6705_v52, %v6706_v3  ;;  %v6871_v25 = vrot.slane %v6866_v47, %v6870_v54  ;;  %v6878_v52 = vsub.s32 2, %v11844_v19  ;;  %v6875_v3 = vrot.slane %v6866_v47, %v6874_v26  ;;  %s7137_s8 = sshll.u32 %s7785_s16, 4  ;;  %s7138_s8 = int_to_ptr.vmem [resolvable:$true] %s7137_s8 }
 0xa33   :  { %v6901_v27 = vrot.slane %v6892_v33, %v6874_v26  ;;  %v6897_v58 = vrot.slane %v6892_v33, %v6870_v54  ;;  %v6909_v22 = vrot.slane %v6892_v33, %v6882_v34  ;;  %s7743_s9 = scalar_lea.vmem %s7138_s8, 32  ;;  %p7748_p1 = scmp.lt.s32.totalorder %s7138_s8, %s7138_s8 }
 0xa34   :  { %v6719_v62 = vrot.slane %v6708_v49, 7  ;;  %v6905_v29 = vrot.slane %v6892_v33, %v6878_v52  ;;  %p7744_p0 = scmp.ne.s32.totalorder %s7138_s8, %s7743_s9  ;;  %p7749_p2 = scmp.lt.s32.totalorder %s7743_s9, %s7743_s9 }
 0xa36   :  { %v6721_v43 = vsel %vm6720_vm8, %v6719_v62, %v6707_v20  ;;  %v6879_v20 = vrot.slane %v6866_v47, %v6878_v52  ;;  %p7750_p3 = por %p7749_p2, %p7748_p1 }
 0xa37   :  { %7247 = vmatmul.mubr.msk.f32.vlgmr.msra.gmra.mrb[26].mxu1 %vm3118_vm5, %v6721_v43 }
 0xa38   :  { %7647 = vmatpush1.bf16.msra.mxu1 %v7646_v12  ;;  %6859 = vmatprep.mubr.f32.mxu1 %v7767_v1  ;;  %v7654_v1 = vpack.c.bf16 %v6921_v17, %v6920_v2  ;;  %v6883_v12 = vrot.slane %v6866_v47, %v6882_v34  ;;  %p7751_p4 = pnand %p7750_p3, %p7744_p0 }
 0xa39   :  { %7649 = vmatprep.subr.bf16.mxu1 %v7648_v10 }
 0xa3b   :  { %7248 = vmatmul.mubr.msk.f32.vlgmr.msra.gmra.mrb[28].mxu1 %vm3118_vm5, %v6721_v43  ;;  %vm7129_vm5 = vcmask 74752  }
 0xa3c   :  { %7651 = vmatpush3.bf16.msra.mxu1 %v7650_v24 }
 0xa3d   :  { %7653 = vmatprep.subr.bf16.mxu1 %v7652_v23 }
 0xa40   :  { %7655 = vmatpush3.bf16.msra.mxu1 %v7654_v1  ;;  %v7249_v1 = vld [vmem:[%s12144_s17] ss:$0 sm:$0xff] }
 0xa41   :  { %7657 = vmatprep.subr.bf16.mxu1 %v7656_v57 }
 0xa44   :  { %7659 = vmatpush3.bf16.msra.mxu1 %v7658_v53 }
 0xa45   :  { %7661 = vmatprep.subr.bf16.mxu1 %v7660_v30 }
 0xa48   :  { %7663 = vmatpush3.bf16.msra.mxu1 %v7662_v59 }
 0xa49   :  { %7665 = vmatprep.subr.bf16.mxu1 %v7664_v14 }
 0xa4c   :  { %7667 = vmatpush3.bf16.msra.mxu1 %v7666_v21 }
 0xa4d   :  { %7669 = vmatprep.subr.bf16.mxu1 %v7668_v48 }
 0xa50   :  { %7671 = vmatpush3.bf16.msra.mxu1 %v7670_v32 }
 0xa51   :  { %7673 = vmatprep.subr.bf16.mxu1 %v7672_v6 }
 0xa54   :  { %7675 = vmatpush3.bf16.msra.mxu1 %v7674_v11 }
 0xa55   :  { %7677 = vmatprep.subr.bf16.mxu1 %v7676_v9 }
 0xa58   :  { %7679 = vmatpush3.bf16.msra.mxu1 %v7678_v56 }
 0xb0a   :  { %v6790_v0 = vpop.f32.mrb[26].mxu1 }
 0xb0b   :  { %v6888_v49 = vmul.f32 %v6871_v25, %v6790_v0  ;;  %v6792_v51 = vpop.f32.mrb[27].mxu1 }
 0xb0c   :  { %v6889_v62 = vmul.f32 %v6875_v3, %v6792_v51 }
 0xb0d   :  { %v6914_v43 = vadd.f32 %v6897_v58, %v6888_v49 }
 0xb0e   :  { %v6915_v10 = vadd.f32 %v6901_v27, %v6889_v62  ;;  %v6861_v8 = vpop.f32.mrb[28].mxu1 }
 0xb0f   :  { %v6890_v55 = vmul.f32 %v6879_v20, %v6861_v8  ;;  %v6863_v24 = vpop.f32.mrb[29].mxu1 }
 0xb10   :  { %v6891_v23 = vmul.f32 %v6883_v12, %v6863_v24  ;;  %7053 = vmatprep.mubr.f32.mxu1 %v6915_v10 }
 0xb11   :  { %7054 = vmatmul.mubr.f32.vlgmr.msra.gmra.mrb[30].mxu1 %v6914_v43  ;;  %v6916_v19 = vadd.f32 %v6905_v29, %v6890_v55 }
 0xb12   :  { %v6917_v2 = vadd.f32 %v6909_v22, %v6891_v23 }
 0xb14   :  { %7123 = vmatprep.mubr.f32.mxu0 %v6917_v2 }
 0xb15   :  { %7124 = vmatmul.mubr.f32.vlgmr.msra.gmra.mrb[64].mxu0 %v6916_v19 }
 0xbe4   :  { %v7376_v17 = vpop.f32.mrb[30].mxu1 }
 0xbe5   :  { %v7377_v61 = vpop.f32.mrb[31].mxu1 }
 0xbe6   :  { %v7378_v38 = vadd.f32 %v7377_v61, %v7376_v17 }
 0xbe8   :  { %v7411_v57 = vpop.f32.mrb[64].mxu0  ;;  %v7056_v63 = vadd.f32 %v7378_v38, %v7249_v1 }
 0xbe9   :  { %v7412_v36 = vpop.f32.mrb[65].mxu0 }
 0xbea   :  { %v7413_v41 = vadd.f32 %v7412_v36, %v7411_v57 }
 0xbec   :  { %v7126_v42 = vadd.f32 %v7413_v41, %v7056_v63 }
 0xbee   :  { %7130 = vst.msk [vmem:[#allocation10] sm:$0x3] %vm7129_vm5, %v7126_v42 }
 0xbef   :  { %7754 = shalt.err (!%p7751_p4)
}
 0xbf0   :  { %s7755_s17 = scalar_lea.hbm %s12145_s18, 32 }
 0xbf1   :  { %p7756_p5 = scmp.ne.s32.totalorder %s12145_s18, %s7755_s17  ;;  %p7759_p6 = scmp.lt.u32.totalorder %s7755_s17, %s12145_s18 }
 0xbf3   :  { %p7761_p7 = pnand %p7759_p6, %p7756_p5 }
 0xbf5   :  { %7764 = shalt.err (!%p7761_p7)
}
 0xbf6   :  { %7140 = dma.vmem_to_hbm [thread:$0]  %s7138_s8, 32, %s12145_s18, [#allocation11]  }
 0xbf7   :  { %7765 = dma.done.wait [#allocation11], 32  }
 0xbf8   :  { %7766 = vsyncadd [#allocation11], 4294967264 }
 0xbf9   :  { %7144 = vsyncpa [#allocation11], 1 }

</bundles_post_ra>
